<compile_context>
chip_gen: v7x
topology: tpu7x:2x2x1
jax: 0.10.0
libtpu: 0.0.40
codegen_flags: <defaults>
</compile_context>

<pallas_src>
import math
import numpy as np
import jax
import jax.numpy as jnp
from jax import lax
from jax.experimental import pallas as pl
from jax.experimental.pallas import tpu as pltpu

# ----------------------------- small config ---------------------------------
B = 2
IN_CHANS = 3            # module asserts in_chans == 3
T = 16                  # tubelet size 2 -> 8 temporal patches (matches the
                        # hard-coded pos_embed.reshape(8, -1, D) in prepare_tokens)
H = W = 32              # -> h_new = w_new = 2 spatial patches
PATCH_T, PATCH_S = 2, 16
EMBED_DIM = 64
DEPTH = 2
NUM_HEADS = 4
MLP_RATIO = 4
LN_EPS = 1e-6

TP = T // PATCH_T                                   # 8
HP = H // PATCH_S                                   # 2
WP = W // PATCH_S                                   # 2
N_TOKENS = TP * HP * WP                             # 32
PATCH_DIM = IN_CHANS * PATCH_T * PATCH_S * PATCH_S  # 1536
HEAD_DIM = EMBED_DIM // NUM_HEADS                   # 16
MLP_HIDDEN = EMBED_DIM * MLP_RATIO                  # 256
# pos_embed built for img_size [3,16,224,224] -> patches_layout (8,14,14)
POS_T, POS_H, POS_W = 8, 14, 14


# --------------------- PyTorch-matching bicubic (setup-time, host) ----------
def _cubic_w(t, A=-0.75):
    w0 = ((A * (t + 1) - 5 * A) * (t + 1) + 8 * A) * (t + 1) - 4 * A
    w1 = ((A + 2) * t - (A + 3)) * t * t + 1
    s = 1 - t
    w2 = ((A + 2) * s - (A + 3)) * s * s + 1
    w3 = 1.0 - w0 - w1 - w2
    return (w0, w1, w2, w3)


def _resize_matrix(in_size, out_size):
    # 1-D bicubic resize matrix, PyTorch semantics: align_corners=False,
    # A=-0.75, no antialias, clamped border indices.
    if in_size == out_size:
        return np.eye(in_size, dtype=np.float64)
    M = np.zeros((out_size, in_size), dtype=np.float64)
    scale = in_size / out_size
    for i in range(out_size):
        real = (i + 0.5) * scale - 0.5
        idx = int(np.floor(real))
        t = real - idx
        for off, w in zip(range(-1, 3), _cubic_w(t)):
            j = min(max(idx + off, 0), in_size - 1)
            M[i, j] += w
    return M


def interpolate_pos_embed(pos_embed_np, h_new, w_new):
    # Reproduces prepare_tokens' interpolate_pos_embed_online.  Runs ONCE per
    # resolution on the host (never inside the jitted forward).
    # TODO(synk): if the reference path uses antialias=True for downscale, the
    # resize matrix here must be regenerated with antialias weights.
    D = pos_embed_np.shape[-1]
    p = np.asarray(pos_embed_np, dtype=np.float64).reshape(POS_T, POS_H, POS_W, D)
    Mh = _resize_matrix(POS_H, h_new)
    Mw = _resize_matrix(POS_W, w_new)
    out = np.einsum("ip,jq,fpqd->fijd", Mh, Mw, p)
    return jnp.asarray(out.reshape(POS_T * h_new * w_new, D), dtype=jnp.float32)


# ----------------------------- in-kernel helpers -----------------------------
def _layernorm(x, w, b):
    mu = jnp.mean(x, axis=-1, keepdims=True)
    var = jnp.mean(jnp.square(x - mu), axis=-1, keepdims=True)
    return (x - mu) * lax.rsqrt(var + LN_EPS) * w + b


def _gelu_exact(x):
    # nn.GELU() default = exact erf GELU.  erf via Abramowitz & Stegun 7.1.26
    # (|err| < 1.5e-7); the divide uses the EUP reciprocal so the VALU slot
    # (the saturating resource here) is not charged for it.
    a1, a2, a3, a4, a5 = 0.254829592, -0.284496736, 1.421413741, -1.453152027, 1.061405429
    p = 0.3275911
    z = x * 0.7071067811865476
    az = jnp.abs(z)
    t = pl.reciprocal(1.0 + p * az, approx=True)
    poly = ((((a5 * t + a4) * t + a3) * t + a2) * t + a1) * t
    erf_abs = 1.0 - poly * jnp.exp(-az * az)
    erf = jnp.where(z >= 0.0, erf_abs, -erf_abs)
    return 0.5 * x * (1.0 + erf)


# ------------------------------ fused Pallas kernel --------------------------
def _make_fused_vit_kernel(fold):
    """fold = samples processed per grid step (1 on 2-TC v7x, B on v5e/v6e)."""
    R = fold * N_TOKENS          # rows of the residual stream in this step
    G = fold * NUM_HEADS         # attention batch (head-major, then sample)
    dn_qk = (((2,), (2,)), ((0,), (0,)))   # (G,N,HD)@(G,N,HD) -> (G,N,N)
    dn_pv = (((2,), (1,)), ((0,), (0,)))   # (G,N,N) @(G,N,HD) -> (G,N,HD)

    def split_heads(m):          # (R, D) -> (G, N, HD); lane slices + major stack
        parts = [m[:, h * HEAD_DIM:(h + 1) * HEAD_DIM] for h in range(NUM_HEADS)]
        s = jnp.stack(parts, axis=0)                    # (NH, fold*N, HD)
        return s.reshape(G, N_TOKENS, HEAD_DIM)         # split fold off the sublane dim

    def merge_heads(o):          # (G, N, HD) -> (R, D); inverse of split_heads
        o = o.reshape(NUM_HEADS, R, HEAD_DIM)
        return jnp.concatenate([o[h] for h in range(NUM_HEADS)], axis=-1)

    def kernel(patches_ref, posb_ref, patch_w_ref,
               ln1w_ref, ln1b_ref, wqkv_ref, bqkv_ref, wproj_ref, bproj_ref,
               ln2w_ref, ln2b_ref, wfc1_ref, bfc1_ref, wfc2_ref, bfc2_ref,
               normw_ref, normb_ref, o_ref):
        # ---- patch embed: Conv3d(kernel=stride=(2,16,16)) folded into one bf16
        # GEMM; the conv bias is pre-folded into posb (pos embed) at setup.
        x = (jnp.dot(patches_ref[...], patch_w_ref[...],
                     preferred_element_type=jnp.float32)
             + posb_ref[...])                                     # (R, D) f32 residual

        for d in range(DEPTH):                    # static unroll over blocks
            # --------------- attention branch ---------------
            xn = _layernorm(x, ln1w_ref[d], ln1b_ref[d]).astype(jnp.bfloat16)
            # single lane-dense fused QKV GEMM; 1/sqrt(HD) pre-folded into Wq/bq
            qkv = (jnp.dot(xn, wqkv_ref[d], preferred_element_type=jnp.float32)
                   + bqkv_ref[d]).astype(jnp.bfloat16)            # (R, 3D)
            q = split_heads(qkv[:, 0:EMBED_DIM])
            k = split_heads(qkv[:, EMBED_DIM:2 * EMBED_DIM])
            v = split_heads(qkv[:, 2 * EMBED_DIM:3 * EMBED_DIM])
            s = lax.dot_general(q, k, dn_qk, preferred_element_type=jnp.float32)
            s = s - jnp.max(s, axis=-1, keepdims=True)
            e = jnp.exp(s)
            pattn = e * pl.reciprocal(jnp.sum(e, axis=-1, keepdims=True), approx=True)
            o = lax.dot_general(pattn.astype(jnp.bfloat16), v, dn_pv,
                                preferred_element_type=jnp.float32)   # (G, N, HD)
            # lane-concat head outputs -> one 64-deep dense projection GEMM
            oc = merge_heads(o.astype(jnp.bfloat16))                  # (R, D)
            x = x + (jnp.dot(oc, wproj_ref[d], preferred_element_type=jnp.float32)
                     + bproj_ref[d])
            # --------------- MLP branch ---------------
            xn2 = _layernorm(x, ln2w_ref[d], ln2b_ref[d]).astype(jnp.bfloat16)
            h1 = _gelu_exact(jnp.dot(xn2, wfc1_ref[d],
                                     preferred_element_type=jnp.float32) + bfc1_ref[d])
            x = x + (jnp.dot(h1.astype(jnp.bfloat16), wfc2_ref[d],
                             preferred_element_type=jnp.float32) + bfc2_ref[d])

        o_ref[...] = _layernorm(x, normw_ref[...], normb_ref[...])

    return kernel


# --------------------------- pallas_call wrapper -----------------------------
def _const_spec(arr):
    zeros = (0,) * arr.ndim
    return pl.BlockSpec(arr.shape, lambda b, _z=zeros: _z)   # same block every step


def _samples_per_grid_step():
    # v7x has 2 TensorCores per chip -> keep grid=(B,) "parallel" (one sample
    # per TC).  Single-TC v5e/v6e -> fold the whole batch into one grid step.
    try:
        kind = jax.devices()[0].device_kind.lower()
    except Exception:
        kind = ""
    if "v7" in kind and B % 2 == 0:
        return 1
    return B


def patchify(x):
    # (B, C, T, H, W) -> (B*N, C*pt*ps*ps); token order (t, h, w),
    # feature order (c, kt, kh, kw) matching Conv3d weight flattening.
    Bx = x.shape[0]
    x = x.reshape(Bx, IN_CHANS, TP, PATCH_T, HP, PATCH_S, WP, PATCH_S)
    x = x.transpose(0, 2, 4, 6, 1, 3, 5, 7)
    return x.reshape(Bx * N_TOKENS, PATCH_DIM).astype(jnp.bfloat16)


def build_vit_forward(fold):
    assert B % fold == 0
    R = fold * N_TOKENS
    grid = (B // fold,)
    kernel = _make_fused_vit_kernel(fold)

    def forward(params, x, posb):
        patches = patchify(x)                                     # (B*N, PATCH_DIM)
        consts = [posb, params["patch_w"],
                  params["ln1_w"], params["ln1_b"], params["wqkv"], params["bqkv"],
                  params["wproj"], params["bproj"], params["ln2_w"], params["ln2_b"],
                  params["wfc1"], params["bfc1"], params["wfc2"], params["bfc2"],
                  params["norm_w"], params["norm_b"]]
        out = pl.pallas_call(
            kernel,
            out_shape=jax.ShapeDtypeStruct((B * N_TOKENS, EMBED_DIM), jnp.float32),
            grid=grid,
            in_specs=([pl.BlockSpec((R, PATCH_DIM), lambda b: (b, 0))]
                      + [_const_spec(a) for a in consts]),
            out_specs=pl.BlockSpec((R, EMBED_DIM), lambda b: (b, 0)),
            compiler_params=pltpu.CompilerParams(dimension_semantics=("parallel",)),
        )(patches, *consts)
        return out.reshape(B, N_TOKENS, EMBED_DIM)

    return forward


# -------------------------------- params -------------------------------------
def init_params(key):
    keys = iter(jax.random.split(key, 16))

    def nrm(shape, std=0.02):
        return std * jax.random.normal(next(keys), shape, jnp.float32)

    # Fused qkv as (DEPTH, D, 3D) = concat([Wq^T, Wk^T, Wv^T], -1); attention
    # scale 1/sqrt(HD)=0.25 (power of two, exact in bf16) folded into the q part.
    scale = 1.0 / math.sqrt(HEAD_DIM)
    qscale = jnp.concatenate([jnp.full((EMBED_DIM,), scale, jnp.float32),
                              jnp.ones((2 * EMBED_DIM,), jnp.float32)])
    wqkv = nrm((DEPTH, EMBED_DIM, 3 * EMBED_DIM)) * qscale
    bqkv = nrm((DEPTH, 1, 3 * EMBED_DIM), std=0.01) * qscale

    return {
        "patch_w": nrm((PATCH_DIM, EMBED_DIM)).astype(jnp.bfloat16),  # flat Conv3d weight^T
        "patch_b": nrm((1, EMBED_DIM), std=0.01),   # folded into posb at setup
        "pos_embed": nrm((POS_T * POS_H * POS_W, EMBED_DIM)),
        "ln1_w": jnp.ones((DEPTH, 1, EMBED_DIM), jnp.float32),
        "ln1_b": jnp.zeros((DEPTH, 1, EMBED_DIM), jnp.float32),
        "ln2_w": jnp.ones((DEPTH, 1, EMBED_DIM), jnp.float32),
        "ln2_b": jnp.zeros((DEPTH, 1, EMBED_DIM), jnp.float32),
        "wqkv": wqkv.astype(jnp.bfloat16),
        "bqkv": bqkv,
        "wproj": nrm((DEPTH, EMBED_DIM, EMBED_DIM)).astype(jnp.bfloat16),  # proj.weight^T
        "bproj": nrm((DEPTH, 1, EMBED_DIM), std=0.01),
        "wfc1": nrm((DEPTH, EMBED_DIM, MLP_HIDDEN)).astype(jnp.bfloat16),
        "bfc1": nrm((DEPTH, 1, MLP_HIDDEN), std=0.01),
        "wfc2": nrm((DEPTH, MLP_HIDDEN, EMBED_DIM)).astype(jnp.bfloat16),
        "bfc2": nrm((DEPTH, 1, EMBED_DIM), std=0.01),
        "norm_w": jnp.ones((1, EMBED_DIM), jnp.float32),
        "norm_b": jnp.zeros((1, EMBED_DIM), jnp.float32),
    }


# -------------------------------- glue ---------------------------------------
if __name__ == "__main__":
    key = jax.random.PRNGKey(0)
    kp, kx = jax.random.split(key)
    params = init_params(kp)
    x = jax.random.normal(kx, (B, IN_CHANS, T, H, W), jnp.float32)

    fold = _samples_per_grid_step()
    # pos-embed bicubic interpolation: once per resolution, on the host, and
    # the Conv3d bias is folded in here; tiled to the per-step row count.
    pos = interpolate_pos_embed(np.asarray(params["pos_embed"]), HP, WP)   # (N, D)
    posb = jnp.tile(pos + params["patch_b"], (fold, 1))                    # (fold*N, D)

    fwd = jax.jit(build_vit_forward(fold))
    out = jax.block_until_ready(fwd(params, x, posb))
    assert out.shape == (B, N_TOKENS, EMBED_DIM)
    assert out.dtype == jnp.float32
    assert bool(jnp.all(jnp.isfinite(out)))
    print("KERNEL_OK")
</pallas_src>

<mosaic_0001>
module attributes {stable_mosaic.version = 11 : i64} {
  func.func @kernel(%arg0: i32, %arg1: memref<64x1536xbf16, #tpu.memory_space<vmem>>, %arg2: memref<64x64xf32, #tpu.memory_space<vmem>>, %arg3: memref<1536x64xbf16, #tpu.memory_space<vmem>>, %arg4: memref<2x1x64xf32, #tpu.memory_space<vmem>>, %arg5: memref<2x1x64xf32, #tpu.memory_space<vmem>>, %arg6: memref<2x64x192xbf16, #tpu.memory_space<vmem>>, %arg7: memref<2x1x192xf32, #tpu.memory_space<vmem>>, %arg8: memref<2x64x64xbf16, #tpu.memory_space<vmem>>, %arg9: memref<2x1x64xf32, #tpu.memory_space<vmem>>, %arg10: memref<2x1x64xf32, #tpu.memory_space<vmem>>, %arg11: memref<2x1x64xf32, #tpu.memory_space<vmem>>, %arg12: memref<2x64x256xbf16, #tpu.memory_space<vmem>>, %arg13: memref<2x1x256xf32, #tpu.memory_space<vmem>>, %arg14: memref<2x256x64xbf16, #tpu.memory_space<vmem>>, %arg15: memref<2x1x64xf32, #tpu.memory_space<vmem>>, %arg16: memref<1x64xf32, #tpu.memory_space<vmem>>, %arg17: memref<1x64xf32, #tpu.memory_space<vmem>>, %arg18: memref<64x64xf32, #tpu.memory_space<vmem>>) attributes {dimension_semantics = [#tpu.dimension_semantics<parallel>], iteration_bounds = array<i64: 1>, scalar_prefetch = 0 : i64, scratch_operands = 0 : i64, tpu.core_type = #tpu.core_type<tc>, window_params = [{transform_indices = @transform_0, window_bounds = array<i64: 64, 1536>}, {pipeline_mode = #tpu.pipeline_mode<synchronous>, transform_indices = @transform_1, window_bounds = array<i64: 64, 64>}, {pipeline_mode = #tpu.pipeline_mode<synchronous>, transform_indices = @transform_2, window_bounds = array<i64: 1536, 64>}, {pipeline_mode = #tpu.pipeline_mode<synchronous>, transform_indices = @transform_3, window_bounds = array<i64: 2, 1, 64>}, {pipeline_mode = #tpu.pipeline_mode<synchronous>, transform_indices = @transform_4, window_bounds = array<i64: 2, 1, 64>}, {pipeline_mode = #tpu.pipeline_mode<synchronous>, transform_indices = @transform_5, window_bounds = array<i64: 2, 64, 192>}, {pipeline_mode = #tpu.pipeline_mode<synchronous>, transform_indices = @transform_6, window_bounds = array<i64: 2, 1, 192>}, {pipeline_mode = #tpu.pipeline_mode<synchronous>, transform_indices = @transform_7, window_bounds = array<i64: 2, 64, 64>}, {pipeline_mode = #tpu.pipeline_mode<synchronous>, transform_indices = @transform_8, window_bounds = array<i64: 2, 1, 64>}, {pipeline_mode = #tpu.pipeline_mode<synchronous>, transform_indices = @transform_9, window_bounds = array<i64: 2, 1, 64>}, {pipeline_mode = #tpu.pipeline_mode<synchronous>, transform_indices = @transform_10, window_bounds = array<i64: 2, 1, 64>}, {pipeline_mode = #tpu.pipeline_mode<synchronous>, transform_indices = @transform_11, window_bounds = array<i64: 2, 64, 256>}, {pipeline_mode = #tpu.pipeline_mode<synchronous>, transform_indices = @transform_12, window_bounds = array<i64: 2, 1, 256>}, {pipeline_mode = #tpu.pipeline_mode<synchronous>, transform_indices = @transform_13, window_bounds = array<i64: 2, 256, 64>}, {pipeline_mode = #tpu.pipeline_mode<synchronous>, transform_indices = @transform_14, window_bounds = array<i64: 2, 1, 64>}, {pipeline_mode = #tpu.pipeline_mode<synchronous>, transform_indices = @transform_15, window_bounds = array<i64: 1, 64>}, {pipeline_mode = #tpu.pipeline_mode<synchronous>, transform_indices = @transform_16, window_bounds = array<i64: 1, 64>}, {transform_indices = @transform_17, window_bounds = array<i64: 64, 64>}]} {
    %c0 = arith.constant 0 : index
    %c0_0 = arith.constant 0 : index
    %0 = vector.load %arg1[%c0, %c0_0] : memref<64x1536xbf16, #tpu.memory_space<vmem>>, vector<64x1536xbf16>
    %c0_1 = arith.constant 0 : index
    %c0_2 = arith.constant 0 : index
    %1 = vector.load %arg3[%c0_1, %c0_2] : memref<1536x64xbf16, #tpu.memory_space<vmem>>, vector<1536x64xbf16>
    %cst = arith.constant dense<0.000000e+00> : vector<64x64xf32>
    %2 = tpu.matmul %0, %1, %cst {dimension_numbers = #tpu.dot_dimension_numbers<[1], [0], [0], [1], [0, 0, 1, 1], [], []>} : vector<64x1536xbf16>, vector<1536x64xbf16>, vector<64x64xf32> -> vector<64x64xf32>
    %c0_3 = arith.constant 0 : index
    %c0_4 = arith.constant 0 : index
    %3 = vector.load %arg2[%c0_3, %c0_4] : memref<64x64xf32, #tpu.memory_space<vmem>>, vector<64x64xf32>
    %4 = arith.addf %2, %3 : vector<64x64xf32>
    %c0_5 = arith.constant 0 : index
    %c0_6 = arith.constant 0 : index
    %c0_7 = arith.constant 0 : index
    %5 = vector.load %arg4[%c0_5, %c0_6, %c0_7] : memref<2x1x64xf32, #tpu.memory_space<vmem>>, vector<1x1x64xf32>
    %6 = vector.shape_cast %5 : vector<1x1x64xf32> to vector<1x64xf32>
    %c0_8 = arith.constant 0 : index
    %c0_9 = arith.constant 0 : index
    %c0_10 = arith.constant 0 : index
    %7 = vector.load %arg5[%c0_8, %c0_9, %c0_10] : memref<2x1x64xf32, #tpu.memory_space<vmem>>, vector<1x1x64xf32>
    %8 = vector.shape_cast %7 : vector<1x1x64xf32> to vector<1x64xf32>
    %cst_11 = arith.constant dense<0.000000e+00> : vector<64xf32>
    %9 = vector.multi_reduction <add>, %4, %cst_11 [1] : vector<64x64xf32> to vector<64xf32>
    %10 = vector.shape_cast %9 : vector<64xf32> to vector<64x1xf32>
    %cst_12 = arith.constant 6.400000e+01 : f32
    %11 = vector.broadcast %cst_12 : f32 to vector<64x1xf32>
    %12 = arith.divf %10, %11 : vector<64x1xf32>
    %13 = vector.broadcast %12 : vector<64x1xf32> to vector<64x64xf32>
    %14 = arith.subf %4, %13 : vector<64x64xf32>
    %15 = arith.mulf %14, %14 : vector<64x64xf32>
    %cst_13 = arith.constant dense<0.000000e+00> : vector<64xf32>
    %16 = vector.multi_reduction <add>, %15, %cst_13 [1] : vector<64x64xf32> to vector<64xf32>
    %17 = vector.shape_cast %16 : vector<64xf32> to vector<64x1xf32>
    %cst_14 = arith.constant 6.400000e+01 : f32
    %18 = vector.broadcast %cst_14 : f32 to vector<64x1xf32>
    %19 = arith.divf %17, %18 : vector<64x1xf32>
    %20 = vector.broadcast %12 : vector<64x1xf32> to vector<64x64xf32>
    %21 = arith.subf %4, %20 : vector<64x64xf32>
    %cst_15 = arith.constant 9.99999997E-7 : f32
    %22 = vector.broadcast %cst_15 : f32 to vector<64x1xf32>
    %23 = arith.addf %19, %22 : vector<64x1xf32>
    %24 = math.rsqrt %23 : vector<64x1xf32>
    %25 = vector.broadcast %24 : vector<64x1xf32> to vector<64x64xf32>
    %26 = arith.mulf %21, %25 : vector<64x64xf32>
    %27 = vector.broadcast %6 : vector<1x64xf32> to vector<64x64xf32>
    %28 = arith.mulf %26, %27 : vector<64x64xf32>
    %29 = vector.broadcast %8 : vector<1x64xf32> to vector<64x64xf32>
    %30 = arith.addf %28, %29 : vector<64x64xf32>
    %31 = arith.truncf %30 : vector<64x64xf32> to vector<64x64xbf16>
    %c0_16 = arith.constant 0 : index
    %c0_17 = arith.constant 0 : index
    %c0_18 = arith.constant 0 : index
    %32 = vector.load %arg6[%c0_16, %c0_17, %c0_18] : memref<2x64x192xbf16, #tpu.memory_space<vmem>>, vector<1x64x192xbf16>
    %33 = vector.shape_cast %32 : vector<1x64x192xbf16> to vector<64x192xbf16>
    %cst_19 = arith.constant dense<0.000000e+00> : vector<64x192xf32>
    %34 = tpu.matmul %31, %33, %cst_19 {dimension_numbers = #tpu.dot_dimension_numbers<[1], [0], [0], [1], [0, 0, 1, 1], [], []>} : vector<64x64xbf16>, vector<64x192xbf16>, vector<64x192xf32> -> vector<64x192xf32>
    %c0_20 = arith.constant 0 : index
    %c0_21 = arith.constant 0 : index
    %c0_22 = arith.constant 0 : index
    %35 = vector.load %arg7[%c0_20, %c0_21, %c0_22] : memref<2x1x192xf32, #tpu.memory_space<vmem>>, vector<1x1x192xf32>
    %36 = vector.shape_cast %35 : vector<1x1x192xf32> to vector<1x192xf32>
    %37 = vector.broadcast %36 : vector<1x192xf32> to vector<64x192xf32>
    %38 = arith.addf %34, %37 : vector<64x192xf32>
    %39 = arith.truncf %38 : vector<64x192xf32> to vector<64x192xbf16>
    %40 = vector.extract_strided_slice %39 {offsets = [0, 0], sizes = [64, 64], strides = [1, 1]} : vector<64x192xbf16> to vector<64x64xbf16>
    %41 = vector.extract_strided_slice %40 {offsets = [0, 0], sizes = [64, 16], strides = [1, 1]} : vector<64x64xbf16> to vector<64x16xbf16>
    %42 = vector.extract_strided_slice %40 {offsets = [0, 16], sizes = [64, 16], strides = [1, 1]} : vector<64x64xbf16> to vector<64x16xbf16>
    %43 = vector.extract_strided_slice %40 {offsets = [0, 32], sizes = [64, 16], strides = [1, 1]} : vector<64x64xbf16> to vector<64x16xbf16>
    %44 = vector.extract_strided_slice %40 {offsets = [0, 48], sizes = [64, 16], strides = [1, 1]} : vector<64x64xbf16> to vector<64x16xbf16>
    %45 = vector.shape_cast %41 : vector<64x16xbf16> to vector<1x64x16xbf16>
    %46 = vector.shape_cast %42 : vector<64x16xbf16> to vector<1x64x16xbf16>
    %47 = vector.shape_cast %43 : vector<64x16xbf16> to vector<1x64x16xbf16>
    %48 = vector.shape_cast %44 : vector<64x16xbf16> to vector<1x64x16xbf16>
    %49 = tpu.concatenate %45, %46, %47, %48 in 0 : vector<1x64x16xbf16>, vector<1x64x16xbf16>, vector<1x64x16xbf16>, vector<1x64x16xbf16> -> vector<4x64x16xbf16>
    %50 = vector.shape_cast %49 : vector<4x64x16xbf16> to vector<8x32x16xbf16>
    %51 = vector.extract_strided_slice %39 {offsets = [0, 64], sizes = [64, 64], strides = [1, 1]} : vector<64x192xbf16> to vector<64x64xbf16>
    %52 = vector.extract_strided_slice %51 {offsets = [0, 0], sizes = [64, 16], strides = [1, 1]} : vector<64x64xbf16> to vector<64x16xbf16>
    %53 = vector.extract_strided_slice %51 {offsets = [0, 16], sizes = [64, 16], strides = [1, 1]} : vector<64x64xbf16> to vector<64x16xbf16>
    %54 = vector.extract_strided_slice %51 {offsets = [0, 32], sizes = [64, 16], strides = [1, 1]} : vector<64x64xbf16> to vector<64x16xbf16>
    %55 = vector.extract_strided_slice %51 {offsets = [0, 48], sizes = [64, 16], strides = [1, 1]} : vector<64x64xbf16> to vector<64x16xbf16>
    %56 = vector.shape_cast %52 : vector<64x16xbf16> to vector<1x64x16xbf16>
    %57 = vector.shape_cast %53 : vector<64x16xbf16> to vector<1x64x16xbf16>
    %58 = vector.shape_cast %54 : vector<64x16xbf16> to vector<1x64x16xbf16>
    %59 = vector.shape_cast %55 : vector<64x16xbf16> to vector<1x64x16xbf16>
    %60 = tpu.concatenate %56, %57, %58, %59 in 0 : vector<1x64x16xbf16>, vector<1x64x16xbf16>, vector<1x64x16xbf16>, vector<1x64x16xbf16> -> vector<4x64x16xbf16>
    %61 = vector.shape_cast %60 : vector<4x64x16xbf16> to vector<8x32x16xbf16>
    %62 = vector.extract_strided_slice %39 {offsets = [0, 128], sizes = [64, 64], strides = [1, 1]} : vector<64x192xbf16> to vector<64x64xbf16>
    %63 = vector.extract_strided_slice %62 {offsets = [0, 0], sizes = [64, 16], strides = [1, 1]} : vector<64x64xbf16> to vector<64x16xbf16>
    %64 = vector.extract_strided_slice %62 {offsets = [0, 16], sizes = [64, 16], strides = [1, 1]} : vector<64x64xbf16> to vector<64x16xbf16>
    %65 = vector.extract_strided_slice %62 {offsets = [0, 32], sizes = [64, 16], strides = [1, 1]} : vector<64x64xbf16> to vector<64x16xbf16>
    %66 = vector.extract_strided_slice %62 {offsets = [0, 48], sizes = [64, 16], strides = [1, 1]} : vector<64x64xbf16> to vector<64x16xbf16>
    %67 = vector.shape_cast %63 : vector<64x16xbf16> to vector<1x64x16xbf16>
    %68 = vector.shape_cast %64 : vector<64x16xbf16> to vector<1x64x16xbf16>
    %69 = vector.shape_cast %65 : vector<64x16xbf16> to vector<1x64x16xbf16>
    %70 = vector.shape_cast %66 : vector<64x16xbf16> to vector<1x64x16xbf16>
    %71 = tpu.concatenate %67, %68, %69, %70 in 0 : vector<1x64x16xbf16>, vector<1x64x16xbf16>, vector<1x64x16xbf16>, vector<1x64x16xbf16> -> vector<4x64x16xbf16>
    %72 = vector.shape_cast %71 : vector<4x64x16xbf16> to vector<8x32x16xbf16>
    %cst_23 = arith.constant dense<0.000000e+00> : vector<8x32x32xf32>
    %73 = tpu.matmul %50, %61, %cst_23 {dimension_numbers = #tpu.dot_dimension_numbers<[2], [2], [1], [1], [0, 0, 0, 1, 1, 1], [0], [0]>} : vector<8x32x16xbf16>, vector<8x32x16xbf16>, vector<8x32x32xf32> -> vector<8x32x32xf32>
    %cst_24 = arith.constant dense<0xFF800000> : vector<8x32xf32>
    %74 = vector.multi_reduction <maximumf>, %73, %cst_24 [2] : vector<8x32x32xf32> to vector<8x32xf32>
    %75 = vector.shape_cast %74 : vector<8x32xf32> to vector<8x32x1xf32>
    %76 = vector.broadcast %75 : vector<8x32x1xf32> to vector<8x32x32xf32>
    %77 = arith.subf %73, %76 : vector<8x32x32xf32>
    %78 = math.exp %77 : vector<8x32x32xf32>
    %cst_25 = arith.constant dense<0.000000e+00> : vector<8x32xf32>
    %79 = vector.multi_reduction <add>, %78, %cst_25 [2] : vector<8x32x32xf32> to vector<8x32xf32>
    %80 = vector.shape_cast %79 : vector<8x32xf32> to vector<8x32x1xf32>
    %81 = tpu.reciprocal %80 {approx = true} : vector<8x32x1xf32> -> vector<8x32x1xf32>
    %82 = vector.broadcast %81 : vector<8x32x1xf32> to vector<8x32x32xf32>
    %83 = arith.mulf %78, %82 : vector<8x32x32xf32>
    %84 = arith.truncf %83 : vector<8x32x32xf32> to vector<8x32x32xbf16>
    %cst_26 = arith.constant dense<0.000000e+00> : vector<8x32x16xf32>
    %85 = tpu.matmul %84, %72, %cst_26 {dimension_numbers = #tpu.dot_dimension_numbers<[2], [1], [1], [2], [0, 0, 0, 1, 1, 2], [0], [0]>} : vector<8x32x32xbf16>, vector<8x32x16xbf16>, vector<8x32x16xf32> -> vector<8x32x16xf32>
    %86 = arith.truncf %85 : vector<8x32x16xf32> to vector<8x32x16xbf16>
    %87 = vector.shape_cast %86 : vector<8x32x16xbf16> to vector<4x64x16xbf16>
    %88 = vector.extract_strided_slice %87 {offsets = [0, 0, 0], sizes = [1, 64, 16], strides = [1, 1, 1]} : vector<4x64x16xbf16> to vector<1x64x16xbf16>
    %89 = vector.shape_cast %88 : vector<1x64x16xbf16> to vector<64x16xbf16>
    %90 = vector.extract_strided_slice %87 {offsets = [1, 0, 0], sizes = [1, 64, 16], strides = [1, 1, 1]} : vector<4x64x16xbf16> to vector<1x64x16xbf16>
    %91 = vector.shape_cast %90 : vector<1x64x16xbf16> to vector<64x16xbf16>
    %92 = vector.extract_strided_slice %87 {offsets = [2, 0, 0], sizes = [1, 64, 16], strides = [1, 1, 1]} : vector<4x64x16xbf16> to vector<1x64x16xbf16>
    %93 = vector.shape_cast %92 : vector<1x64x16xbf16> to vector<64x16xbf16>
    %94 = vector.extract_strided_slice %87 {offsets = [3, 0, 0], sizes = [1, 64, 16], strides = [1, 1, 1]} : vector<4x64x16xbf16> to vector<1x64x16xbf16>
    %95 = vector.shape_cast %94 : vector<1x64x16xbf16> to vector<64x16xbf16>
    %96 = tpu.concatenate %89, %91, %93, %95 in 1 : vector<64x16xbf16>, vector<64x16xbf16>, vector<64x16xbf16>, vector<64x16xbf16> -> vector<64x64xbf16>
    %c0_27 = arith.constant 0 : index
    %c0_28 = arith.constant 0 : index
    %c0_29 = arith.constant 0 : index
    %97 = vector.load %arg8[%c0_27, %c0_28, %c0_29] : memref<2x64x64xbf16, #tpu.memory_space<vmem>>, vector<1x64x64xbf16>
    %98 = vector.shape_cast %97 : vector<1x64x64xbf16> to vector<64x64xbf16>
    %cst_30 = arith.constant dense<0.000000e+00> : vector<64x64xf32>
    %99 = tpu.matmul %96, %98, %cst_30 {dimension_numbers = #tpu.dot_dimension_numbers<[1], [0], [0], [1], [0, 0, 1, 1], [], []>} : vector<64x64xbf16>, vector<64x64xbf16>, vector<64x64xf32> -> vector<64x64xf32>
    %c0_31 = arith.constant 0 : index
    %c0_32 = arith.constant 0 : index
    %c0_33 = arith.constant 0 : index
    %100 = vector.load %arg9[%c0_31, %c0_32, %c0_33] : memref<2x1x64xf32, #tpu.memory_space<vmem>>, vector<1x1x64xf32>
    %101 = vector.shape_cast %100 : vector<1x1x64xf32> to vector<1x64xf32>
    %102 = vector.broadcast %101 : vector<1x64xf32> to vector<64x64xf32>
    %103 = arith.addf %99, %102 : vector<64x64xf32>
    %104 = arith.addf %4, %103 : vector<64x64xf32>
    %c0_34 = arith.constant 0 : index
    %c0_35 = arith.constant 0 : index
    %c0_36 = arith.constant 0 : index
    %105 = vector.load %arg10[%c0_34, %c0_35, %c0_36] : memref<2x1x64xf32, #tpu.memory_space<vmem>>, vector<1x1x64xf32>
    %106 = vector.shape_cast %105 : vector<1x1x64xf32> to vector<1x64xf32>
    %c0_37 = arith.constant 0 : index
    %c0_38 = arith.constant 0 : index
    %c0_39 = arith.constant 0 : index
    %107 = vector.load %arg11[%c0_37, %c0_38, %c0_39] : memref<2x1x64xf32, #tpu.memory_space<vmem>>, vector<1x1x64xf32>
    %108 = vector.shape_cast %107 : vector<1x1x64xf32> to vector<1x64xf32>
    %cst_40 = arith.constant dense<0.000000e+00> : vector<64xf32>
    %109 = vector.multi_reduction <add>, %104, %cst_40 [1] : vector<64x64xf32> to vector<64xf32>
    %110 = vector.shape_cast %109 : vector<64xf32> to vector<64x1xf32>
    %cst_41 = arith.constant 6.400000e+01 : f32
    %111 = vector.broadcast %cst_41 : f32 to vector<64x1xf32>
    %112 = arith.divf %110, %111 : vector<64x1xf32>
    %113 = vector.broadcast %112 : vector<64x1xf32> to vector<64x64xf32>
    %114 = arith.subf %104, %113 : vector<64x64xf32>
    %115 = arith.mulf %114, %114 : vector<64x64xf32>
    %cst_42 = arith.constant dense<0.000000e+00> : vector<64xf32>
    %116 = vector.multi_reduction <add>, %115, %cst_42 [1] : vector<64x64xf32> to vector<64xf32>
    %117 = vector.shape_cast %116 : vector<64xf32> to vector<64x1xf32>
    %cst_43 = arith.constant 6.400000e+01 : f32
    %118 = vector.broadcast %cst_43 : f32 to vector<64x1xf32>
    %119 = arith.divf %117, %118 : vector<64x1xf32>
    %120 = vector.broadcast %112 : vector<64x1xf32> to vector<64x64xf32>
    %121 = arith.subf %104, %120 : vector<64x64xf32>
    %cst_44 = arith.constant 9.99999997E-7 : f32
    %122 = vector.broadcast %cst_44 : f32 to vector<64x1xf32>
    %123 = arith.addf %119, %122 : vector<64x1xf32>
    %124 = math.rsqrt %123 : vector<64x1xf32>
    %125 = vector.broadcast %124 : vector<64x1xf32> to vector<64x64xf32>
    %126 = arith.mulf %121, %125 : vector<64x64xf32>
    %127 = vector.broadcast %106 : vector<1x64xf32> to vector<64x64xf32>
    %128 = arith.mulf %126, %127 : vector<64x64xf32>
    %129 = vector.broadcast %108 : vector<1x64xf32> to vector<64x64xf32>
    %130 = arith.addf %128, %129 : vector<64x64xf32>
    %131 = arith.truncf %130 : vector<64x64xf32> to vector<64x64xbf16>
    %c0_45 = arith.constant 0 : index
    %c0_46 = arith.constant 0 : index
    %c0_47 = arith.constant 0 : index
    %132 = vector.load %arg12[%c0_45, %c0_46, %c0_47] : memref<2x64x256xbf16, #tpu.memory_space<vmem>>, vector<1x64x256xbf16>
    %133 = vector.shape_cast %132 : vector<1x64x256xbf16> to vector<64x256xbf16>
    %cst_48 = arith.constant dense<0.000000e+00> : vector<64x256xf32>
    %134 = tpu.matmul %131, %133, %cst_48 {dimension_numbers = #tpu.dot_dimension_numbers<[1], [0], [0], [1], [0, 0, 1, 1], [], []>} : vector<64x64xbf16>, vector<64x256xbf16>, vector<64x256xf32> -> vector<64x256xf32>
    %c0_49 = arith.constant 0 : index
    %c0_50 = arith.constant 0 : index
    %c0_51 = arith.constant 0 : index
    %135 = vector.load %arg13[%c0_49, %c0_50, %c0_51] : memref<2x1x256xf32, #tpu.memory_space<vmem>>, vector<1x1x256xf32>
    %136 = vector.shape_cast %135 : vector<1x1x256xf32> to vector<1x256xf32>
    %137 = vector.broadcast %136 : vector<1x256xf32> to vector<64x256xf32>
    %138 = arith.addf %134, %137 : vector<64x256xf32>
    %cst_52 = arith.constant 0.707106769 : f32
    %139 = vector.broadcast %cst_52 : f32 to vector<64x256xf32>
    %140 = arith.mulf %138, %139 : vector<64x256xf32>
    %141 = math.absf %140 : vector<64x256xf32>
    %cst_53 = arith.constant 0.327591091 : f32
    %142 = vector.broadcast %cst_53 : f32 to vector<64x256xf32>
    %143 = arith.mulf %142, %141 : vector<64x256xf32>
    %cst_54 = arith.constant 1.000000e+00 : f32
    %144 = vector.broadcast %cst_54 : f32 to vector<64x256xf32>
    %145 = arith.addf %144, %143 : vector<64x256xf32>
    %146 = tpu.reciprocal %145 {approx = true} : vector<64x256xf32> -> vector<64x256xf32>
    %cst_55 = arith.constant 1.06140542 : f32
    %147 = vector.broadcast %cst_55 : f32 to vector<64x256xf32>
    %148 = arith.mulf %147, %146 : vector<64x256xf32>
    %cst_56 = arith.constant -1.45315206 : f32
    %149 = vector.broadcast %cst_56 : f32 to vector<64x256xf32>
    %150 = arith.addf %148, %149 : vector<64x256xf32>
    %151 = arith.mulf %150, %146 : vector<64x256xf32>
    %cst_57 = arith.constant 1.42141378 : f32
    %152 = vector.broadcast %cst_57 : f32 to vector<64x256xf32>
    %153 = arith.addf %151, %152 : vector<64x256xf32>
    %154 = arith.mulf %153, %146 : vector<64x256xf32>
    %cst_58 = arith.constant -0.284496725 : f32
    %155 = vector.broadcast %cst_58 : f32 to vector<64x256xf32>
    %156 = arith.addf %154, %155 : vector<64x256xf32>
    %157 = arith.mulf %156, %146 : vector<64x256xf32>
    %cst_59 = arith.constant 0.254829586 : f32
    %158 = vector.broadcast %cst_59 : f32 to vector<64x256xf32>
    %159 = arith.addf %157, %158 : vector<64x256xf32>
    %160 = arith.mulf %159, %146 : vector<64x256xf32>
    %cst_60 = arith.constant 0.000000e+00 : f32
    %161 = vector.broadcast %cst_60 : f32 to vector<64x256xf32>
    %162 = arith.subf %161, %141 : vector<64x256xf32>
    %163 = arith.mulf %162, %141 : vector<64x256xf32>
    %164 = math.exp %163 : vector<64x256xf32>
    %165 = arith.mulf %160, %164 : vector<64x256xf32>
    %cst_61 = arith.constant 1.000000e+00 : f32
    %166 = vector.broadcast %cst_61 : f32 to vector<64x256xf32>
    %167 = arith.subf %166, %165 : vector<64x256xf32>
    %cst_62 = arith.constant 0.000000e+00 : f32
    %168 = vector.broadcast %cst_62 : f32 to vector<64x256xf32>
    %169 = arith.cmpf oge, %140, %168 : vector<64x256xf32>
    %cst_63 = arith.constant 0.000000e+00 : f32
    %170 = vector.broadcast %cst_63 : f32 to vector<64x256xf32>
    %171 = arith.subf %170, %167 : vector<64x256xf32>
    %172 = arith.select %169, %167, %171 : vector<64x256xi1>, vector<64x256xf32>
    %cst_64 = arith.constant 5.000000e-01 : f32
    %173 = vector.broadcast %cst_64 : f32 to vector<64x256xf32>
    %174 = arith.mulf %173, %138 : vector<64x256xf32>
    %cst_65 = arith.constant 1.000000e+00 : f32
    %175 = vector.broadcast %cst_65 : f32 to vector<64x256xf32>
    %176 = arith.addf %175, %172 : vector<64x256xf32>
    %177 = arith.mulf %174, %176 : vector<64x256xf32>
    %178 = arith.truncf %177 : vector<64x256xf32> to vector<64x256xbf16>
    %c0_66 = arith.constant 0 : index
    %c0_67 = arith.constant 0 : index
    %c0_68 = arith.constant 0 : index
    %179 = vector.load %arg14[%c0_66, %c0_67, %c0_68] : memref<2x256x64xbf16, #tpu.memory_space<vmem>>, vector<1x256x64xbf16>
    %180 = vector.shape_cast %179 : vector<1x256x64xbf16> to vector<256x64xbf16>
    %cst_69 = arith.constant dense<0.000000e+00> : vector<64x64xf32>
    %181 = tpu.matmul %178, %180, %cst_69 {dimension_numbers = #tpu.dot_dimension_numbers<[1], [0], [0], [1], [0, 0, 1, 1], [], []>} : vector<64x256xbf16>, vector<256x64xbf16>, vector<64x64xf32> -> vector<64x64xf32>
    %c0_70 = arith.constant 0 : index
    %c0_71 = arith.constant 0 : index
    %c0_72 = arith.constant 0 : index
    %182 = vector.load %arg15[%c0_70, %c0_71, %c0_72] : memref<2x1x64xf32, #tpu.memory_space<vmem>>, vector<1x1x64xf32>
    %183 = vector.shape_cast %182 : vector<1x1x64xf32> to vector<1x64xf32>
    %184 = vector.broadcast %183 : vector<1x64xf32> to vector<64x64xf32>
    %185 = arith.addf %181, %184 : vector<64x64xf32>
    %186 = arith.addf %104, %185 : vector<64x64xf32>
    %c1 = arith.constant 1 : index
    %c0_73 = arith.constant 0 : index
    %c0_74 = arith.constant 0 : index
    %187 = vector.load %arg4[%c1, %c0_73, %c0_74] : memref<2x1x64xf32, #tpu.memory_space<vmem>>, vector<1x1x64xf32>
    %188 = vector.shape_cast %187 : vector<1x1x64xf32> to vector<1x64xf32>
    %c1_75 = arith.constant 1 : index
    %c0_76 = arith.constant 0 : index
    %c0_77 = arith.constant 0 : index
    %189 = vector.load %arg5[%c1_75, %c0_76, %c0_77] : memref<2x1x64xf32, #tpu.memory_space<vmem>>, vector<1x1x64xf32>
    %190 = vector.shape_cast %189 : vector<1x1x64xf32> to vector<1x64xf32>
    %cst_78 = arith.constant dense<0.000000e+00> : vector<64xf32>
    %191 = vector.multi_reduction <add>, %186, %cst_78 [1] : vector<64x64xf32> to vector<64xf32>
    %192 = vector.shape_cast %191 : vector<64xf32> to vector<64x1xf32>
    %cst_79 = arith.constant 6.400000e+01 : f32
    %193 = vector.broadcast %cst_79 : f32 to vector<64x1xf32>
    %194 = arith.divf %192, %193 : vector<64x1xf32>
    %195 = vector.broadcast %194 : vector<64x1xf32> to vector<64x64xf32>
    %196 = arith.subf %186, %195 : vector<64x64xf32>
    %197 = arith.mulf %196, %196 : vector<64x64xf32>
    %cst_80 = arith.constant dense<0.000000e+00> : vector<64xf32>
    %198 = vector.multi_reduction <add>, %197, %cst_80 [1] : vector<64x64xf32> to vector<64xf32>
    %199 = vector.shape_cast %198 : vector<64xf32> to vector<64x1xf32>
    %cst_81 = arith.constant 6.400000e+01 : f32
    %200 = vector.broadcast %cst_81 : f32 to vector<64x1xf32>
    %201 = arith.divf %199, %200 : vector<64x1xf32>
    %202 = vector.broadcast %194 : vector<64x1xf32> to vector<64x64xf32>
    %203 = arith.subf %186, %202 : vector<64x64xf32>
    %cst_82 = arith.constant 9.99999997E-7 : f32
    %204 = vector.broadcast %cst_82 : f32 to vector<64x1xf32>
    %205 = arith.addf %201, %204 : vector<64x1xf32>
    %206 = math.rsqrt %205 : vector<64x1xf32>
    %207 = vector.broadcast %206 : vector<64x1xf32> to vector<64x64xf32>
    %208 = arith.mulf %203, %207 : vector<64x64xf32>
    %209 = vector.broadcast %188 : vector<1x64xf32> to vector<64x64xf32>
    %210 = arith.mulf %208, %209 : vector<64x64xf32>
    %211 = vector.broadcast %190 : vector<1x64xf32> to vector<64x64xf32>
    %212 = arith.addf %210, %211 : vector<64x64xf32>
    %213 = arith.truncf %212 : vector<64x64xf32> to vector<64x64xbf16>
    %c1_83 = arith.constant 1 : index
    %c0_84 = arith.constant 0 : index
    %c0_85 = arith.constant 0 : index
    %214 = vector.load %arg6[%c1_83, %c0_84, %c0_85] : memref<2x64x192xbf16, #tpu.memory_space<vmem>>, vector<1x64x192xbf16>
    %215 = vector.shape_cast %214 : vector<1x64x192xbf16> to vector<64x192xbf16>
    %cst_86 = arith.constant dense<0.000000e+00> : vector<64x192xf32>
    %216 = tpu.matmul %213, %215, %cst_86 {dimension_numbers = #tpu.dot_dimension_numbers<[1], [0], [0], [1], [0, 0, 1, 1], [], []>} : vector<64x64xbf16>, vector<64x192xbf16>, vector<64x192xf32> -> vector<64x192xf32>
    %c1_87 = arith.constant 1 : index
    %c0_88 = arith.constant 0 : index
    %c0_89 = arith.constant 0 : index
    %217 = vector.load %arg7[%c1_87, %c0_88, %c0_89] : memref<2x1x192xf32, #tpu.memory_space<vmem>>, vector<1x1x192xf32>
    %218 = vector.shape_cast %217 : vector<1x1x192xf32> to vector<1x192xf32>
    %219 = vector.broadcast %218 : vector<1x192xf32> to vector<64x192xf32>
    %220 = arith.addf %216, %219 : vector<64x192xf32>
    %221 = arith.truncf %220 : vector<64x192xf32> to vector<64x192xbf16>
    %222 = vector.extract_strided_slice %221 {offsets = [0, 0], sizes = [64, 64], strides = [1, 1]} : vector<64x192xbf16> to vector<64x64xbf16>
    %223 = vector.extract_strided_slice %222 {offsets = [0, 0], sizes = [64, 16], strides = [1, 1]} : vector<64x64xbf16> to vector<64x16xbf16>
    %224 = vector.extract_strided_slice %222 {offsets = [0, 16], sizes = [64, 16], strides = [1, 1]} : vector<64x64xbf16> to vector<64x16xbf16>
    %225 = vector.extract_strided_slice %222 {offsets = [0, 32], sizes = [64, 16], strides = [1, 1]} : vector<64x64xbf16> to vector<64x16xbf16>
    %226 = vector.extract_strided_slice %222 {offsets = [0, 48], sizes = [64, 16], strides = [1, 1]} : vector<64x64xbf16> to vector<64x16xbf16>
    %227 = vector.shape_cast %223 : vector<64x16xbf16> to vector<1x64x16xbf16>
    %228 = vector.shape_cast %224 : vector<64x16xbf16> to vector<1x64x16xbf16>
    %229 = vector.shape_cast %225 : vector<64x16xbf16> to vector<1x64x16xbf16>
    %230 = vector.shape_cast %226 : vector<64x16xbf16> to vector<1x64x16xbf16>
    %231 = tpu.concatenate %227, %228, %229, %230 in 0 : vector<1x64x16xbf16>, vector<1x64x16xbf16>, vector<1x64x16xbf16>, vector<1x64x16xbf16> -> vector<4x64x16xbf16>
    %232 = vector.shape_cast %231 : vector<4x64x16xbf16> to vector<8x32x16xbf16>
    %233 = vector.extract_strided_slice %221 {offsets = [0, 64], sizes = [64, 64], strides = [1, 1]} : vector<64x192xbf16> to vector<64x64xbf16>
    %234 = vector.extract_strided_slice %233 {offsets = [0, 0], sizes = [64, 16], strides = [1, 1]} : vector<64x64xbf16> to vector<64x16xbf16>
    %235 = vector.extract_strided_slice %233 {offsets = [0, 16], sizes = [64, 16], strides = [1, 1]} : vector<64x64xbf16> to vector<64x16xbf16>
    %236 = vector.extract_strided_slice %233 {offsets = [0, 32], sizes = [64, 16], strides = [1, 1]} : vector<64x64xbf16> to vector<64x16xbf16>
    %237 = vector.extract_strided_slice %233 {offsets = [0, 48], sizes = [64, 16], strides = [1, 1]} : vector<64x64xbf16> to vector<64x16xbf16>
    %238 = vector.shape_cast %234 : vector<64x16xbf16> to vector<1x64x16xbf16>
    %239 = vector.shape_cast %235 : vector<64x16xbf16> to vector<1x64x16xbf16>
    %240 = vector.shape_cast %236 : vector<64x16xbf16> to vector<1x64x16xbf16>
    %241 = vector.shape_cast %237 : vector<64x16xbf16> to vector<1x64x16xbf16>
    %242 = tpu.concatenate %238, %239, %240, %241 in 0 : vector<1x64x16xbf16>, vector<1x64x16xbf16>, vector<1x64x16xbf16>, vector<1x64x16xbf16> -> vector<4x64x16xbf16>
    %243 = vector.shape_cast %242 : vector<4x64x16xbf16> to vector<8x32x16xbf16>
    %244 = vector.extract_strided_slice %221 {offsets = [0, 128], sizes = [64, 64], strides = [1, 1]} : vector<64x192xbf16> to vector<64x64xbf16>
    %245 = vector.extract_strided_slice %244 {offsets = [0, 0], sizes = [64, 16], strides = [1, 1]} : vector<64x64xbf16> to vector<64x16xbf16>
    %246 = vector.extract_strided_slice %244 {offsets = [0, 16], sizes = [64, 16], strides = [1, 1]} : vector<64x64xbf16> to vector<64x16xbf16>
    %247 = vector.extract_strided_slice %244 {offsets = [0, 32], sizes = [64, 16], strides = [1, 1]} : vector<64x64xbf16> to vector<64x16xbf16>
    %248 = vector.extract_strided_slice %244 {offsets = [0, 48], sizes = [64, 16], strides = [1, 1]} : vector<64x64xbf16> to vector<64x16xbf16>
    %249 = vector.shape_cast %245 : vector<64x16xbf16> to vector<1x64x16xbf16>
    %250 = vector.shape_cast %246 : vector<64x16xbf16> to vector<1x64x16xbf16>
    %251 = vector.shape_cast %247 : vector<64x16xbf16> to vector<1x64x16xbf16>
    %252 = vector.shape_cast %248 : vector<64x16xbf16> to vector<1x64x16xbf16>
    %253 = tpu.concatenate %249, %250, %251, %252 in 0 : vector<1x64x16xbf16>, vector<1x64x16xbf16>, vector<1x64x16xbf16>, vector<1x64x16xbf16> -> vector<4x64x16xbf16>
    %254 = vector.shape_cast %253 : vector<4x64x16xbf16> to vector<8x32x16xbf16>
    %cst_90 = arith.constant dense<0.000000e+00> : vector<8x32x32xf32>
    %255 = tpu.matmul %232, %243, %cst_90 {dimension_numbers = #tpu.dot_dimension_numbers<[2], [2], [1], [1], [0, 0, 0, 1, 1, 1], [0], [0]>} : vector<8x32x16xbf16>, vector<8x32x16xbf16>, vector<8x32x32xf32> -> vector<8x32x32xf32>
    %cst_91 = arith.constant dense<0xFF800000> : vector<8x32xf32>
    %256 = vector.multi_reduction <maximumf>, %255, %cst_91 [2] : vector<8x32x32xf32> to vector<8x32xf32>
    %257 = vector.shape_cast %256 : vector<8x32xf32> to vector<8x32x1xf32>
    %258 = vector.broadcast %257 : vector<8x32x1xf32> to vector<8x32x32xf32>
    %259 = arith.subf %255, %258 : vector<8x32x32xf32>
    %260 = math.exp %259 : vector<8x32x32xf32>
    %cst_92 = arith.constant dense<0.000000e+00> : vector<8x32xf32>
    %261 = vector.multi_reduction <add>, %260, %cst_92 [2] : vector<8x32x32xf32> to vector<8x32xf32>
    %262 = vector.shape_cast %261 : vector<8x32xf32> to vector<8x32x1xf32>
    %263 = tpu.reciprocal %262 {approx = true} : vector<8x32x1xf32> -> vector<8x32x1xf32>
    %264 = vector.broadcast %263 : vector<8x32x1xf32> to vector<8x32x32xf32>
    %265 = arith.mulf %260, %264 : vector<8x32x32xf32>
    %266 = arith.truncf %265 : vector<8x32x32xf32> to vector<8x32x32xbf16>
    %cst_93 = arith.constant dense<0.000000e+00> : vector<8x32x16xf32>
    %267 = tpu.matmul %266, %254, %cst_93 {dimension_numbers = #tpu.dot_dimension_numbers<[2], [1], [1], [2], [0, 0, 0, 1, 1, 2], [0], [0]>} : vector<8x32x32xbf16>, vector<8x32x16xbf16>, vector<8x32x16xf32> -> vector<8x32x16xf32>
    %268 = arith.truncf %267 : vector<8x32x16xf32> to vector<8x32x16xbf16>
    %269 = vector.shape_cast %268 : vector<8x32x16xbf16> to vector<4x64x16xbf16>
    %270 = vector.extract_strided_slice %269 {offsets = [0, 0, 0], sizes = [1, 64, 16], strides = [1, 1, 1]} : vector<4x64x16xbf16> to vector<1x64x16xbf16>
    %271 = vector.shape_cast %270 : vector<1x64x16xbf16> to vector<64x16xbf16>
    %272 = vector.extract_strided_slice %269 {offsets = [1, 0, 0], sizes = [1, 64, 16], strides = [1, 1, 1]} : vector<4x64x16xbf16> to vector<1x64x16xbf16>
    %273 = vector.shape_cast %272 : vector<1x64x16xbf16> to vector<64x16xbf16>
    %274 = vector.extract_strided_slice %269 {offsets = [2, 0, 0], sizes = [1, 64, 16], strides = [1, 1, 1]} : vector<4x64x16xbf16> to vector<1x64x16xbf16>
    %275 = vector.shape_cast %274 : vector<1x64x16xbf16> to vector<64x16xbf16>
    %276 = vector.extract_strided_slice %269 {offsets = [3, 0, 0], sizes = [1, 64, 16], strides = [1, 1, 1]} : vector<4x64x16xbf16> to vector<1x64x16xbf16>
    %277 = vector.shape_cast %276 : vector<1x64x16xbf16> to vector<64x16xbf16>
    %278 = tpu.concatenate %271, %273, %275, %277 in 1 : vector<64x16xbf16>, vector<64x16xbf16>, vector<64x16xbf16>, vector<64x16xbf16> -> vector<64x64xbf16>
    %c1_94 = arith.constant 1 : index
    %c0_95 = arith.constant 0 : index
    %c0_96 = arith.constant 0 : index
    %279 = vector.load %arg8[%c1_94, %c0_95, %c0_96] : memref<2x64x64xbf16, #tpu.memory_space<vmem>>, vector<1x64x64xbf16>
    %280 = vector.shape_cast %279 : vector<1x64x64xbf16> to vector<64x64xbf16>
    %cst_97 = arith.constant dense<0.000000e+00> : vector<64x64xf32>
    %281 = tpu.matmul %278, %280, %cst_97 {dimension_numbers = #tpu.dot_dimension_numbers<[1], [0], [0], [1], [0, 0, 1, 1], [], []>} : vector<64x64xbf16>, vector<64x64xbf16>, vector<64x64xf32> -> vector<64x64xf32>
    %c1_98 = arith.constant 1 : index
    %c0_99 = arith.constant 0 : index
    %c0_100 = arith.constant 0 : index
    %282 = vector.load %arg9[%c1_98, %c0_99, %c0_100] : memref<2x1x64xf32, #tpu.memory_space<vmem>>, vector<1x1x64xf32>
    %283 = vector.shape_cast %282 : vector<1x1x64xf32> to vector<1x64xf32>
    %284 = vector.broadcast %283 : vector<1x64xf32> to vector<64x64xf32>
    %285 = arith.addf %281, %284 : vector<64x64xf32>
    %286 = arith.addf %186, %285 : vector<64x64xf32>
    %c1_101 = arith.constant 1 : index
    %c0_102 = arith.constant 0 : index
    %c0_103 = arith.constant 0 : index
    %287 = vector.load %arg10[%c1_101, %c0_102, %c0_103] : memref<2x1x64xf32, #tpu.memory_space<vmem>>, vector<1x1x64xf32>
    %288 = vector.shape_cast %287 : vector<1x1x64xf32> to vector<1x64xf32>
    %c1_104 = arith.constant 1 : index
    %c0_105 = arith.constant 0 : index
    %c0_106 = arith.constant 0 : index
    %289 = vector.load %arg11[%c1_104, %c0_105, %c0_106] : memref<2x1x64xf32, #tpu.memory_space<vmem>>, vector<1x1x64xf32>
    %290 = vector.shape_cast %289 : vector<1x1x64xf32> to vector<1x64xf32>
    %cst_107 = arith.constant dense<0.000000e+00> : vector<64xf32>
    %291 = vector.multi_reduction <add>, %286, %cst_107 [1] : vector<64x64xf32> to vector<64xf32>
    %292 = vector.shape_cast %291 : vector<64xf32> to vector<64x1xf32>
    %cst_108 = arith.constant 6.400000e+01 : f32
    %293 = vector.broadcast %cst_108 : f32 to vector<64x1xf32>
    %294 = arith.divf %292, %293 : vector<64x1xf32>
    %295 = vector.broadcast %294 : vector<64x1xf32> to vector<64x64xf32>
    %296 = arith.subf %286, %295 : vector<64x64xf32>
    %297 = arith.mulf %296, %296 : vector<64x64xf32>
    %cst_109 = arith.constant dense<0.000000e+00> : vector<64xf32>
    %298 = vector.multi_reduction <add>, %297, %cst_109 [1] : vector<64x64xf32> to vector<64xf32>
    %299 = vector.shape_cast %298 : vector<64xf32> to vector<64x1xf32>
    %cst_110 = arith.constant 6.400000e+01 : f32
    %300 = vector.broadcast %cst_110 : f32 to vector<64x1xf32>
    %301 = arith.divf %299, %300 : vector<64x1xf32>
    %302 = vector.broadcast %294 : vector<64x1xf32> to vector<64x64xf32>
    %303 = arith.subf %286, %302 : vector<64x64xf32>
    %cst_111 = arith.constant 9.99999997E-7 : f32
    %304 = vector.broadcast %cst_111 : f32 to vector<64x1xf32>
    %305 = arith.addf %301, %304 : vector<64x1xf32>
    %306 = math.rsqrt %305 : vector<64x1xf32>
    %307 = vector.broadcast %306 : vector<64x1xf32> to vector<64x64xf32>
    %308 = arith.mulf %303, %307 : vector<64x64xf32>
    %309 = vector.broadcast %288 : vector<1x64xf32> to vector<64x64xf32>
    %310 = arith.mulf %308, %309 : vector<64x64xf32>
    %311 = vector.broadcast %290 : vector<1x64xf32> to vector<64x64xf32>
    %312 = arith.addf %310, %311 : vector<64x64xf32>
    %313 = arith.truncf %312 : vector<64x64xf32> to vector<64x64xbf16>
    %c1_112 = arith.constant 1 : index
    %c0_113 = arith.constant 0 : index
    %c0_114 = arith.constant 0 : index
    %314 = vector.load %arg12[%c1_112, %c0_113, %c0_114] : memref<2x64x256xbf16, #tpu.memory_space<vmem>>, vector<1x64x256xbf16>
    %315 = vector.shape_cast %314 : vector<1x64x256xbf16> to vector<64x256xbf16>
    %cst_115 = arith.constant dense<0.000000e+00> : vector<64x256xf32>
    %316 = tpu.matmul %313, %315, %cst_115 {dimension_numbers = #tpu.dot_dimension_numbers<[1], [0], [0], [1], [0, 0, 1, 1], [], []>} : vector<64x64xbf16>, vector<64x256xbf16>, vector<64x256xf32> -> vector<64x256xf32>
    %c1_116 = arith.constant 1 : index
    %c0_117 = arith.constant 0 : index
    %c0_118 = arith.constant 0 : index
    %317 = vector.load %arg13[%c1_116, %c0_117, %c0_118] : memref<2x1x256xf32, #tpu.memory_space<vmem>>, vector<1x1x256xf32>
    %318 = vector.shape_cast %317 : vector<1x1x256xf32> to vector<1x256xf32>
    %319 = vector.broadcast %318 : vector<1x256xf32> to vector<64x256xf32>
    %320 = arith.addf %316, %319 : vector<64x256xf32>
    %cst_119 = arith.constant 0.707106769 : f32
    %321 = vector.broadcast %cst_119 : f32 to vector<64x256xf32>
    %322 = arith.mulf %320, %321 : vector<64x256xf32>
    %323 = math.absf %322 : vector<64x256xf32>
    %cst_120 = arith.constant 0.327591091 : f32
    %324 = vector.broadcast %cst_120 : f32 to vector<64x256xf32>
    %325 = arith.mulf %324, %323 : vector<64x256xf32>
    %cst_121 = arith.constant 1.000000e+00 : f32
    %326 = vector.broadcast %cst_121 : f32 to vector<64x256xf32>
    %327 = arith.addf %326, %325 : vector<64x256xf32>
    %328 = tpu.reciprocal %327 {approx = true} : vector<64x256xf32> -> vector<64x256xf32>
    %cst_122 = arith.constant 1.06140542 : f32
    %329 = vector.broadcast %cst_122 : f32 to vector<64x256xf32>
    %330 = arith.mulf %329, %328 : vector<64x256xf32>
    %cst_123 = arith.constant -1.45315206 : f32
    %331 = vector.broadcast %cst_123 : f32 to vector<64x256xf32>
    %332 = arith.addf %330, %331 : vector<64x256xf32>
    %333 = arith.mulf %332, %328 : vector<64x256xf32>
    %cst_124 = arith.constant 1.42141378 : f32
    %334 = vector.broadcast %cst_124 : f32 to vector<64x256xf32>
    %335 = arith.addf %333, %334 : vector<64x256xf32>
    %336 = arith.mulf %335, %328 : vector<64x256xf32>
    %cst_125 = arith.constant -0.284496725 : f32
    %337 = vector.broadcast %cst_125 : f32 to vector<64x256xf32>
    %338 = arith.addf %336, %337 : vector<64x256xf32>
    %339 = arith.mulf %338, %328 : vector<64x256xf32>
    %cst_126 = arith.constant 0.254829586 : f32
    %340 = vector.broadcast %cst_126 : f32 to vector<64x256xf32>
    %341 = arith.addf %339, %340 : vector<64x256xf32>
    %342 = arith.mulf %341, %328 : vector<64x256xf32>
    %cst_127 = arith.constant 0.000000e+00 : f32
    %343 = vector.broadcast %cst_127 : f32 to vector<64x256xf32>
    %344 = arith.subf %343, %323 : vector<64x256xf32>
    %345 = arith.mulf %344, %323 : vector<64x256xf32>
    %346 = math.exp %345 : vector<64x256xf32>
    %347 = arith.mulf %342, %346 : vector<64x256xf32>
    %cst_128 = arith.constant 1.000000e+00 : f32
    %348 = vector.broadcast %cst_128 : f32 to vector<64x256xf32>
    %349 = arith.subf %348, %347 : vector<64x256xf32>
    %cst_129 = arith.constant 0.000000e+00 : f32
    %350 = vector.broadcast %cst_129 : f32 to vector<64x256xf32>
    %351 = arith.cmpf oge, %322, %350 : vector<64x256xf32>
    %cst_130 = arith.constant 0.000000e+00 : f32
    %352 = vector.broadcast %cst_130 : f32 to vector<64x256xf32>
    %353 = arith.subf %352, %349 : vector<64x256xf32>
    %354 = arith.select %351, %349, %353 : vector<64x256xi1>, vector<64x256xf32>
    %cst_131 = arith.constant 5.000000e-01 : f32
    %355 = vector.broadcast %cst_131 : f32 to vector<64x256xf32>
    %356 = arith.mulf %355, %320 : vector<64x256xf32>
    %cst_132 = arith.constant 1.000000e+00 : f32
    %357 = vector.broadcast %cst_132 : f32 to vector<64x256xf32>
    %358 = arith.addf %357, %354 : vector<64x256xf32>
    %359 = arith.mulf %356, %358 : vector<64x256xf32>
    %360 = arith.truncf %359 : vector<64x256xf32> to vector<64x256xbf16>
    %c1_133 = arith.constant 1 : index
    %c0_134 = arith.constant 0 : index
    %c0_135 = arith.constant 0 : index
    %361 = vector.load %arg14[%c1_133, %c0_134, %c0_135] : memref<2x256x64xbf16, #tpu.memory_space<vmem>>, vector<1x256x64xbf16>
    %362 = vector.shape_cast %361 : vector<1x256x64xbf16> to vector<256x64xbf16>
    %cst_136 = arith.constant dense<0.000000e+00> : vector<64x64xf32>
    %363 = tpu.matmul %360, %362, %cst_136 {dimension_numbers = #tpu.dot_dimension_numbers<[1], [0], [0], [1], [0, 0, 1, 1], [], []>} : vector<64x256xbf16>, vector<256x64xbf16>, vector<64x64xf32> -> vector<64x64xf32>
    %c1_137 = arith.constant 1 : index
    %c0_138 = arith.constant 0 : index
    %c0_139 = arith.constant 0 : index
    %364 = vector.load %arg15[%c1_137, %c0_138, %c0_139] : memref<2x1x64xf32, #tpu.memory_space<vmem>>, vector<1x1x64xf32>
    %365 = vector.shape_cast %364 : vector<1x1x64xf32> to vector<1x64xf32>
    %366 = vector.broadcast %365 : vector<1x64xf32> to vector<64x64xf32>
    %367 = arith.addf %363, %366 : vector<64x64xf32>
    %368 = arith.addf %286, %367 : vector<64x64xf32>
    %c0_140 = arith.constant 0 : index
    %c0_141 = arith.constant 0 : index
    %369 = vector.load %arg16[%c0_140, %c0_141] : memref<1x64xf32, #tpu.memory_space<vmem>>, vector<1x64xf32>
    %c0_142 = arith.constant 0 : index
    %c0_143 = arith.constant 0 : index
    %370 = vector.load %arg17[%c0_142, %c0_143] : memref<1x64xf32, #tpu.memory_space<vmem>>, vector<1x64xf32>
    %cst_144 = arith.constant dense<0.000000e+00> : vector<64xf32>
    %371 = vector.multi_reduction <add>, %368, %cst_144 [1] : vector<64x64xf32> to vector<64xf32>
    %372 = vector.shape_cast %371 : vector<64xf32> to vector<64x1xf32>
    %cst_145 = arith.constant 6.400000e+01 : f32
    %373 = vector.broadcast %cst_145 : f32 to vector<64x1xf32>
    %374 = arith.divf %372, %373 : vector<64x1xf32>
    %375 = vector.broadcast %374 : vector<64x1xf32> to vector<64x64xf32>
    %376 = arith.subf %368, %375 : vector<64x64xf32>
    %377 = arith.mulf %376, %376 : vector<64x64xf32>
    %cst_146 = arith.constant dense<0.000000e+00> : vector<64xf32>
    %378 = vector.multi_reduction <add>, %377, %cst_146 [1] : vector<64x64xf32> to vector<64xf32>
    %379 = vector.shape_cast %378 : vector<64xf32> to vector<64x1xf32>
    %cst_147 = arith.constant 6.400000e+01 : f32
    %380 = vector.broadcast %cst_147 : f32 to vector<64x1xf32>
    %381 = arith.divf %379, %380 : vector<64x1xf32>
    %382 = vector.broadcast %374 : vector<64x1xf32> to vector<64x64xf32>
    %383 = arith.subf %368, %382 : vector<64x64xf32>
    %cst_148 = arith.constant 9.99999997E-7 : f32
    %384 = vector.broadcast %cst_148 : f32 to vector<64x1xf32>
    %385 = arith.addf %381, %384 : vector<64x1xf32>
    %386 = math.rsqrt %385 : vector<64x1xf32>
    %387 = vector.broadcast %386 : vector<64x1xf32> to vector<64x64xf32>
    %388 = arith.mulf %383, %387 : vector<64x64xf32>
    %389 = vector.broadcast %369 : vector<1x64xf32> to vector<64x64xf32>
    %390 = arith.mulf %388, %389 : vector<64x64xf32>
    %391 = vector.broadcast %370 : vector<1x64xf32> to vector<64x64xf32>
    %392 = arith.addf %390, %391 : vector<64x64xf32>
    %c0_149 = arith.constant 0 : index
    %c0_150 = arith.constant 0 : index
    %393 = vector.load %arg18[%c0_149, %c0_150] : memref<64x64xf32, #tpu.memory_space<vmem>>, vector<64x64xf32>
    tpu.vector_store %arg18[%c0_149, %c0_150], %392 {strides = array<i32>} : memref<64x64xf32, #tpu.memory_space<vmem>>, vector<64x64xf32>,
    return
  }
  func.func @transform_0(%arg0: i32) -> (i32, i32) {
    %c0_i32 = arith.constant 0 : i32
    %c0_i32_0 = arith.constant 0 : i32
    return %arg0, %c0_i32 : i32, i32
  }
  func.func @transform_1(%arg0: i32) -> (i32, i32) {
    %c0_i32 = arith.constant 0 : i32
    %c0_i32_0 = arith.constant 0 : i32
    %c0_i32_1 = arith.constant 0 : i32
    return %c0_i32, %c0_i32_0 : i32, i32
  }
  func.func @transform_2(%arg0: i32) -> (i32, i32) {
    %c0_i32 = arith.constant 0 : i32
    %c0_i32_0 = arith.constant 0 : i32
    %c0_i32_1 = arith.constant 0 : i32
    return %c0_i32, %c0_i32_0 : i32, i32
  }
  func.func @transform_3(%arg0: i32) -> (i32, i32, i32) {
    %c0_i32 = arith.constant 0 : i32
    %c0_i32_0 = arith.constant 0 : i32
    %c0_i32_1 = arith.constant 0 : i32
    %c0_i32_2 = arith.constant 0 : i32
    return %c0_i32, %c0_i32_0, %c0_i32_1 : i32, i32, i32
  }
  func.func @transform_4(%arg0: i32) -> (i32, i32, i32) {
    %c0_i32 = arith.constant 0 : i32
    %c0_i32_0 = arith.constant 0 : i32
    %c0_i32_1 = arith.constant 0 : i32
    %c0_i32_2 = arith.constant 0 : i32
    return %c0_i32, %c0_i32_0, %c0_i32_1 : i32, i32, i32
  }
  func.func @transform_5(%arg0: i32) -> (i32, i32, i32) {
    %c0_i32 = arith.constant 0 : i32
    %c0_i32_0 = arith.constant 0 : i32
    %c0_i32_1 = arith.constant 0 : i32
    %c0_i32_2 = arith.constant 0 : i32
    return %c0_i32, %c0_i32_0, %c0_i32_1 : i32, i32, i32
  }
  func.func @transform_6(%arg0: i32) -> (i32, i32, i32) {
    %c0_i32 = arith.constant 0 : i32
    %c0_i32_0 = arith.constant 0 : i32
    %c0_i32_1 = arith.constant 0 : i32
    %c0_i32_2 = arith.constant 0 : i32
    return %c0_i32, %c0_i32_0, %c0_i32_1 : i32, i32, i32
  }
  func.func @transform_7(%arg0: i32) -> (i32, i32, i32) {
    %c0_i32 = arith.constant 0 : i32
    %c0_i32_0 = arith.constant 0 : i32
    %c0_i32_1 = arith.constant 0 : i32
    %c0_i32_2 = arith.constant 0 : i32
    return %c0_i32, %c0_i32_0, %c0_i32_1 : i32, i32, i32
  }
  func.func @transform_8(%arg0: i32) -> (i32, i32, i32) {
    %c0_i32 = arith.constant 0 : i32
    %c0_i32_0 = arith.constant 0 : i32
    %c0_i32_1 = arith.constant 0 : i32
    %c0_i32_2 = arith.constant 0 : i32
    return %c0_i32, %c0_i32_0, %c0_i32_1 : i32, i32, i32
  }
  func.func @transform_9(%arg0: i32) -> (i32, i32, i32) {
    %c0_i32 = arith.constant 0 : i32
    %c0_i32_0 = arith.constant 0 : i32
    %c0_i32_1 = arith.constant 0 : i32
    %c0_i32_2 = arith.constant 0 : i32
    return %c0_i32, %c0_i32_0, %c0_i32_1 : i32, i32, i32
  }
  func.func @transform_10(%arg0: i32) -> (i32, i32, i32) {
    %c0_i32 = arith.constant 0 : i32
    %c0_i32_0 = arith.constant 0 : i32
    %c0_i32_1 = arith.constant 0 : i32
    %c0_i32_2 = arith.constant 0 : i32
    return %c0_i32, %c0_i32_0, %c0_i32_1 : i32, i32, i32
  }
  func.func @transform_11(%arg0: i32) -> (i32, i32, i32) {
    %c0_i32 = arith.constant 0 : i32
    %c0_i32_0 = arith.constant 0 : i32
    %c0_i32_1 = arith.constant 0 : i32
    %c0_i32_2 = arith.constant 0 : i32
    return %c0_i32, %c0_i32_0, %c0_i32_1 : i32, i32, i32
  }
  func.func @transform_12(%arg0: i32) -> (i32, i32, i32) {
    %c0_i32 = arith.constant 0 : i32
    %c0_i32_0 = arith.constant 0 : i32
    %c0_i32_1 = arith.constant 0 : i32
    %c0_i32_2 = arith.constant 0 : i32
    return %c0_i32, %c0_i32_0, %c0_i32_1 : i32, i32, i32
  }
  func.func @transform_13(%arg0: i32) -> (i32, i32, i32) {
    %c0_i32 = arith.constant 0 : i32
    %c0_i32_0 = arith.constant 0 : i32
    %c0_i32_1 = arith.constant 0 : i32
    %c0_i32_2 = arith.constant 0 : i32
    return %c0_i32, %c0_i32_0, %c0_i32_1 : i32, i32, i32
  }
  func.func @transform_14(%arg0: i32) -> (i32, i32, i32) {
    %c0_i32 = arith.constant 0 : i32
    %c0_i32_0 = arith.constant 0 : i32
    %c0_i32_1 = arith.constant 0 : i32
    %c0_i32_2 = arith.constant 0 : i32
    return %c0_i32, %c0_i32_0, %c0_i32_1 : i32, i32, i32
  }
  func.func @transform_15(%arg0: i32) -> (i32, i32) {
    %c0_i32 = arith.constant 0 : i32
    %c0_i32_0 = arith.constant 0 : i32
    %c0_i32_1 = arith.constant 0 : i32
    return %c0_i32, %c0_i32_0 : i32, i32
  }
  func.func @transform_16(%arg0: i32) -> (i32, i32) {
    %c0_i32 = arith.constant 0 : i32
    %c0_i32_0 = arith.constant 0 : i32
    %c0_i32_1 = arith.constant 0 : i32
    return %c0_i32, %c0_i32_0 : i32, i32
  }
  func.func @transform_17(%arg0: i32) -> (i32, i32) {
    %c0_i32 = arith.constant 0 : i32
    %c0_i32_0 = arith.constant 0 : i32
    return %arg0, %c0_i32 : i32, i32
  }
}

</mosaic_0001>

<bundles_post_ra>
// kernel: forward.1
= control target key start
LH: loop header
LB: loop body
LE: loop exit
PB: predicated region body
PF: predicated region fallthrough
CT: control target
= control target key end

     0   :  { %s12479_s0 = inlined_call_operand.vmem [shape: bf16[64,1536], index: 0, kind: input, shape index: {}]   ;;  %s12480_s1 = inlined_call_operand.vmem [shape: f32[64,64], index: 1, kind: input, shape index: {}]   ;;  %s12481_s2 = inlined_call_operand.vmem [shape: bf16[1536,64], index: 2, kind: input, shape index: {}]   ;;  %s12482_s3 = inlined_call_operand.vmem [shape: f32[2,1,64], index: 3, kind: input, shape index: {}]   ;;  %s12483_s4 = inlined_call_operand.vmem [shape: f32[2,1,64], index: 4, kind: input, shape index: {}]   ;;  %s12484_s5 = inlined_call_operand.vmem [shape: bf16[2,64,192], index: 5, kind: input, shape index: {}]   ;;  %s12485_s6 = inlined_call_operand.vmem [shape: f32[2,1,192], index: 6, kind: input, shape index: {}]   ;;  %s12486_s7 = inlined_call_operand.vmem [shape: bf16[2,64,64], index: 7, kind: input, shape index: {}]   ;;  %s12487_s8 = inlined_call_operand.vmem [shape: f32[2,1,64], index: 8, kind: input, shape index: {}]   ;;  %s12488_s9 = inlined_call_operand.vmem [shape: f32[2,1,64], index: 9, kind: input, shape index: {}]   ;;  %s12489_s10 = inlined_call_operand.vmem [shape: f32[2,1,64], index: 10, kind: input, shape index: {}]   ;;  %s12490_s11 = inlined_call_operand.vmem [shape: bf16[2,64,256], index: 11, kind: input, shape index: {}]   ;;  %s12491_s12 = inlined_call_operand.vmem [shape: f32[2,1,256], index: 12, kind: input, shape index: {}]   ;;  %s12492_s13 = inlined_call_operand.vmem [shape: bf16[2,256,64], index: 13, kind: input, shape index: {}]   ;;  %s12493_s14 = inlined_call_operand.vmem [shape: f32[2,1,64], index: 14, kind: input, shape index: {}]   ;;  %s12494_s15 = inlined_call_operand.vmem [shape: f32[1,64], index: 15, kind: input, shape index: {}]   ;;  %s12495_s16 = inlined_call_operand.vmem [shape: f32[1,64], index: 16, kind: input, shape index: {}]   ;;  %s12496_s17 = inlined_call_operand.hbm [shape: f32[64,64], index: 17, kind: output, shape index: {}]  }
   0x1   :  { %12514 = sst [smem:[#allocation10_spill]] %s12479_s0 }
   0x2   :  { %12515 = sst [smem:[#allocation11_spill]] %s12480_s1 }
   0x3   :  { %v8476_v0 = vld [vmem:[%s12481_s2 + $0x40] sm:$0xff]   ;;  %v8480_v4 = vld [vmem:[%s12481_s2 + $0x48] sm:$0xff]   ;;  %v8484_v8 = vld [vmem:[%s12481_s2 + $0x50] sm:$0xff]   ;;  %s12516_s0 = sld [smem:[#allocation10_spill]] }
   0x4   :  { %v8477_v1 = vld [vmem:[%s12481_s2 + $0xc0] sm:$0xff]   ;;  %7673 = vmatprep.subr.bf16.mxu0 %v8476_v0  ;;  %v8481_v5 = vld [vmem:[%s12481_s2 + $0xc8] sm:$0xff]   ;;  %v8485_v9 = vld [vmem:[%s12481_s2 + $0xd0] sm:$0xff]  }
   0x5   :  { %v8478_v2 = vld [vmem:[%s12481_s2] sm:$0xff]   ;;  %7713 = vmatprep.subr.bf16.mxu1 %v8477_v1  ;;  %v8482_v6 = vld [vmem:[%s12481_s2 + $0x8] sm:$0xff]   ;;  %v8486_v10 = vld [vmem:[%s12481_s2 + $0x10] sm:$0xff]  }
   0x6   :  { %v8479_v3 = vld [vmem:[%s12481_s2 + $0x80] sm:$0xff]   ;;  %7674 = vmatpush3.bf16.msra.mxu0 %v8478_v2  ;;  %v8483_v7 = vld [vmem:[%s12481_s2 + $0x88] sm:$0xff]   ;;  %v8487_v11 = vld [vmem:[%s12481_s2 + $0x90] sm:$0xff]  }
   0x7   :  { %7714 = vmatpush3.bf16.msra.mxu1 %v8479_v3  ;;  %7675 = vmatprep.subr.bf16.mxu0 %v8480_v4  ;;  %v8488_v12 = vld [vmem:[%s12481_s2 + $0x58] sm:$0xff]   ;;  %v8492_v16 = vld [vmem:[%s12481_s2 + $0x60] sm:$0xff]   ;;  %v8496_v20 = vld [vmem:[%s12481_s2 + $0x68] sm:$0xff]  }
   0x8   :  { %7715 = vmatprep.subr.bf16.mxu1 %v8481_v5  ;;  %v8489_v13 = vld [vmem:[%s12481_s2 + $0xd8] sm:$0xff]   ;;  %v8493_v17 = vld [vmem:[%s12481_s2 + $0xe0] sm:$0xff]   ;;  %v8497_v21 = vld [vmem:[%s12481_s2 + $0xe8] sm:$0xff]  }
   0x9   :  { %v8490_v14 = vld [vmem:[%s12481_s2 + $0x18] sm:$0xff]   ;;  %v8494_v18 = vld [vmem:[%s12481_s2 + $0x20] sm:$0xff]   ;;  %v8498_v22 = vld [vmem:[%s12481_s2 + $0x28] sm:$0xff]  }
   0xa   :  { %7676 = vmatpush3.bf16.msra.mxu0 %v8482_v6  ;;  %v8491_v15 = vld [vmem:[%s12481_s2 + $0x98] sm:$0xff]   ;;  %v8495_v19 = vld [vmem:[%s12481_s2 + $0xa0] sm:$0xff]   ;;  %v8499_v23 = vld [vmem:[%s12481_s2 + $0xa8] sm:$0xff]  }
   0xb   :  { %7716 = vmatpush3.bf16.msra.mxu1 %v8483_v7  ;;  %7677 = vmatprep.subr.bf16.mxu0 %v8484_v8  ;;  %v8500_v24 = vld [vmem:[%s12481_s2 + $0x70] sm:$0xff]   ;;  %v8504_v28 = vld [vmem:[%s12481_s2 + $0x78] sm:$0xff]   ;;  %v8514_v36 = vld [vmem:[%s12481_s2 + $0x140] sm:$0xff]  }
   0xc   :  { %7717 = vmatprep.subr.bf16.mxu1 %v8485_v9  ;;  %v8501_v25 = vld [vmem:[%s12481_s2 + $0xf0] sm:$0xff]   ;;  %v8505_v29 = vld [vmem:[%s12481_s2 + $0xf8] sm:$0xff]   ;;  %v8515_v37 = vld [vmem:[%s12481_s2 + $0x1c0] sm:$0xff]  }
   0xd   :  { %v8502_v26 = vld [vmem:[%s12481_s2 + $0x30] sm:$0xff]   ;;  %v8506_v30 = vld [vmem:[%s12481_s2 + $0x38] sm:$0xff]   ;;  %v8516_v38 = vld [vmem:[%s12481_s2 + $0x100] sm:$0xff]  }
   0xe   :  { %7678 = vmatpush3.bf16.msra.mxu0 %v8486_v10  ;;  %v8503_v27 = vld [vmem:[%s12481_s2 + $0xb0] sm:$0xff]   ;;  %v8507_v31 = vld [vmem:[%s12481_s2 + $0xb8] sm:$0xff]   ;;  %v8517_v39 = vld [vmem:[%s12481_s2 + $0x180] sm:$0xff]  }
   0xf   :  { %7718 = vmatpush3.bf16.msra.mxu1 %v8487_v11  ;;  %7679 = vmatprep.subr.bf16.mxu0 %v8488_v12  ;;  %v8508_v32 = vld [vmem:[%s12516_s0] ss:$48 sps:$4 sm:$0xff]   ;;  %v8510_v33 = vld [vmem:[%s12516_s0 + $0x4] ss:$48 sps:$4 sm:$0xff]   ;;  %v8511_v34 = vld [vmem:[%s12516_s0 + $0x8] ss:$48 sps:$4 sm:$0xff]  }
  0x10   :  { %7719 = vmatprep.subr.bf16.mxu1 %v8489_v13  ;;  %v8513_v35 = vld [vmem:[%s12516_s0 + $0xc] ss:$48 sps:$4 sm:$0xff]   ;;  %1154 = vmatprep.mubr.bf16.mxu0 %v8510_v33  ;;  %v8522_v44 = vld [vmem:[%s12516_s0 + $0x64] ss:$48 sps:$4 sm:$0xff]   ;;  %v8526_v46 = vld [vmem:[%s12516_s0 + $0x60] ss:$48 sps:$4 sm:$0xff]  }
  0x11   :  { %1219 = vmatprep.mubr.bf16.mxu1 %v8513_v35  ;;  %v8518_v40 = vld [vmem:[%s12481_s2 + $0x148] sm:$0xff]   ;;  %v8528_v48 = vld [vmem:[%s12481_s2 + $0x150] sm:$0xff]   ;;  %v8532_v52 = vld [vmem:[%s12481_s2 + $0x158] sm:$0xff]  }
  0x12   :  { %7680 = vmatpush3.bf16.msra.mxu0 %v8490_v14  ;;  %v8519_v41 = vld [vmem:[%s12481_s2 + $0x1c8] sm:$0xff]   ;;  %v8529_v49 = vld [vmem:[%s12481_s2 + $0x1d0] sm:$0xff]   ;;  %v8533_v53 = vld [vmem:[%s12481_s2 + $0x1d8] sm:$0xff]  }
  0x13   :  { %7720 = vmatpush3.bf16.msra.mxu1 %v8491_v15  ;;  %7681 = vmatprep.subr.bf16.mxu0 %v8492_v16  ;;  %v8520_v42 = vld [vmem:[%s12481_s2 + $0x108] sm:$0xff]   ;;  %v8530_v50 = vld [vmem:[%s12481_s2 + $0x110] sm:$0xff]   ;;  %v8534_v54 = vld [vmem:[%s12481_s2 + $0x118] sm:$0xff]  }
  0x14   :  { %7721 = vmatprep.subr.bf16.mxu1 %v8493_v17  ;;  %v8521_v43 = vld [vmem:[%s12481_s2 + $0x188] sm:$0xff]   ;;  %v8531_v51 = vld [vmem:[%s12481_s2 + $0x190] sm:$0xff]   ;;  %v8535_v55 = vld [vmem:[%s12481_s2 + $0x198] sm:$0xff]  }
  0x15   :  { %v8524_v45 = vld [vmem:[%s12516_s0 + $0x6c] ss:$48 sps:$4 sm:$0xff]   ;;  %v8527_v47 = vld [vmem:[%s12516_s0 + $0x68] ss:$48 sps:$4 sm:$0xff]   ;;  %v8536_v56 = vld [vmem:[%s12516_s0 + $0xc4] ss:$48 sps:$4 sm:$0xff]  }
  0x16   :  { %7682 = vmatpush3.bf16.msra.mxu0 %v8494_v18  ;;  %v8538_v57 = vld [vmem:[%s12516_s0 + $0xcc] ss:$48 sps:$4 sm:$0xff]   ;;  %v8540_v58 = vld [vmem:[%s12516_s0 + $0xc0] ss:$48 sps:$4 sm:$0xff]   ;;  %v8541_v59 = vld [vmem:[%s12516_s0 + $0xc8] ss:$48 sps:$4 sm:$0xff]  }
  0x17   :  { %7722 = vmatpush3.bf16.msra.mxu1 %v8495_v19  ;;  %7683 = vmatprep.subr.bf16.mxu0 %v8496_v20  ;;  %v8542_v60 = vld [vmem:[%s12481_s2 + $0x160] sm:$0xff]   ;;  %v8546_v0 = vld [vmem:[%s12481_s2 + $0x168] sm:$0xff]   ;;  %v8556_v8 = vld [vmem:[%s12481_s2 + $0x170] sm:$0xff]  }
  0x18   :  { %7723 = vmatprep.subr.bf16.mxu1 %v8497_v21  ;;  %v8543_v61 = vld [vmem:[%s12481_s2 + $0x1e0] sm:$0xff]   ;;  %v8547_v1 = vld [vmem:[%s12481_s2 + $0x1e8] sm:$0xff]   ;;  %v8557_v9 = vld [vmem:[%s12481_s2 + $0x1f0] sm:$0xff]  }
  0x19   :  { %v8544_v62 = vld [vmem:[%s12481_s2 + $0x120] sm:$0xff]   ;;  %v8548_v2 = vld [vmem:[%s12481_s2 + $0x128] sm:$0xff]   ;;  %v8558_v10 = vld [vmem:[%s12481_s2 + $0x130] sm:$0xff]  }
  0x1a   :  { %7684 = vmatpush3.bf16.msra.mxu0 %v8498_v22  ;;  %v8545_v63 = vld [vmem:[%s12481_s2 + $0x1a0] sm:$0xff]   ;;  %v8549_v3 = vld [vmem:[%s12481_s2 + $0x1a8] sm:$0xff]   ;;  %v8559_v11 = vld [vmem:[%s12481_s2 + $0x1b0] sm:$0xff]  }
  0x1b   :  { %7724 = vmatpush3.bf16.msra.mxu1 %v8499_v23  ;;  %7685 = vmatprep.subr.bf16.mxu0 %v8500_v24  ;;  %v8550_v4 = vld [vmem:[%s12516_s0 + $0x124] ss:$48 sps:$4 sm:$0xff]   ;;  %v8552_v5 = vld [vmem:[%s12516_s0 + $0x12c] ss:$48 sps:$4 sm:$0xff]   ;;  %v8554_v6 = vld [vmem:[%s12516_s0 + $0x120] ss:$48 sps:$4 sm:$0xff]  }
  0x1c   :  { %7725 = vmatprep.subr.bf16.mxu1 %v8501_v25  ;;  %v8555_v7 = vld [vmem:[%s12516_s0 + $0x128] ss:$48 sps:$4 sm:$0xff]   ;;  %v8564_v16 = vld [vmem:[%s12516_s0 + $0x10] ss:$48 sps:$4 sm:$0xff]   ;;  %v8566_v17 = vld [vmem:[%s12516_s0 + $0x14] ss:$48 sps:$4 sm:$0xff]  }
  0x1d   :  { %v8560_v12 = vld [vmem:[%s12481_s2 + $0x178] sm:$0xff]   ;;  %v8570_v20 = vld [vmem:[%s12481_s2 + $0x240] sm:$0xff]   ;;  %v8574_v24 = vld [vmem:[%s12481_s2 + $0x248] sm:$0xff]  }
  0x1e   :  { %7686 = vmatpush3.bf16.msra.mxu0 %v8502_v26  ;;  %v8561_v13 = vld [vmem:[%s12481_s2 + $0x1f8] sm:$0xff]   ;;  %v8571_v21 = vld [vmem:[%s12481_s2 + $0x2c0] sm:$0xff]   ;;  %v8575_v25 = vld [vmem:[%s12481_s2 + $0x2c8] sm:$0xff]  }
  0x1f   :  { %7726 = vmatpush3.bf16.msra.mxu1 %v8503_v27  ;;  %7687 = vmatprep.subr.bf16.mxu0 %v8504_v28  ;;  %v8562_v14 = vld [vmem:[%s12481_s2 + $0x138] sm:$0xff]   ;;  %v8572_v22 = vld [vmem:[%s12481_s2 + $0x200] sm:$0xff]   ;;  %v8576_v26 = vld [vmem:[%s12481_s2 + $0x208] sm:$0xff]  }
  0x20   :  { %7727 = vmatprep.subr.bf16.mxu1 %v8505_v29  ;;  %v8563_v15 = vld [vmem:[%s12481_s2 + $0x1b8] sm:$0xff]   ;;  %v8573_v23 = vld [vmem:[%s12481_s2 + $0x280] sm:$0xff]   ;;  %v8577_v27 = vld [vmem:[%s12481_s2 + $0x288] sm:$0xff]  }
  0x21   :  { %v8567_v18 = vld [vmem:[%s12516_s0 + $0x18] ss:$48 sps:$4 sm:$0xff]   ;;  %v8569_v19 = vld [vmem:[%s12516_s0 + $0x1c] ss:$48 sps:$4 sm:$0xff]   ;;  %v8578_v28 = vld [vmem:[%s12516_s0 + $0x74] ss:$48 sps:$4 sm:$0xff]  }
  0x22   :  { %7688 = vmatpush3.bf16.msra.mxu0 %v8506_v30  ;;  %v8580_v29 = vld [vmem:[%s12516_s0 + $0x7c] ss:$48 sps:$4 sm:$0xff]   ;;  %v8582_v30 = vld [vmem:[%s12516_s0 + $0x70] ss:$48 sps:$4 sm:$0xff]  }
  0x23   :  { %7728 = vmatpush3.bf16.msra.mxu1 %v8507_v31  ;;  %7753 = vmatprep.subr.bf16.mxu0 %v8514_v36  ;;  %v8583_v31 = vld [vmem:[%s12516_s0 + $0x78] ss:$48 sps:$4 sm:$0xff]   ;;  %v8585_v33 = vld [vmem:[%s12481_s2 + $0x2d0] sm:$0xff]  }
  0x24   :  { %7793 = vmatprep.subr.bf16.mxu1 %v8515_v37  ;;  %v8587_v35 = vld [vmem:[%s12481_s2 + $0x290] sm:$0xff]   ;;  %v8588_v36 = vld [vmem:[%s12481_s2 + $0x258] sm:$0xff]  }
  0x25   :  { %1155 = vmatmul.mubr.bf16.vlgmr.msra.gmra.mrb[0].mxu0 %v8508_v32  ;;  %v8584_v32 = vld [vmem:[%s12481_s2 + $0x250] sm:$0xff]   ;;  %v8589_v37 = vld [vmem:[%s12481_s2 + $0x2d8] sm:$0xff]  }
  0x26   :  { %1220 = vmatmul.mubr.bf16.vlgmr.msra.gmra.mrb[0].mxu1 %v8511_v34  ;;  %7754 = vmatpush3.bf16.msra.mxu0 %v8516_v38  ;;  %v8586_v34 = vld [vmem:[%s12481_s2 + $0x210] sm:$0xff]   ;;  %v8590_v38 = vld [vmem:[%s12481_s2 + $0x218] sm:$0xff]  }
  0x27   :  { %7794 = vmatpush3.bf16.msra.mxu1 %v8517_v39  ;;  %7755 = vmatprep.subr.bf16.mxu0 %v8518_v40  ;;  %v8591_v39 = vld [vmem:[%s12481_s2 + $0x298] sm:$0xff]   ;;  %v8592_v40 = vld [vmem:[%s12516_s0 + $0xd4] ss:$48 sps:$4 sm:$0xff]  }
  0x28   :  { %7795 = vmatprep.subr.bf16.mxu1 %v8519_v41  ;;  %1162 = vmatprep.mubr.bf16.mxu0 %v8522_v44  ;;  %v8594_v41 = vld [vmem:[%s12516_s0 + $0xdc] ss:$48 sps:$4 sm:$0xff]   ;;  %v8598_v44 = vld [vmem:[%s12481_s2 + $0x260] sm:$0xff]  }
  0x29   :  { %1227 = vmatprep.mubr.bf16.mxu1 %v8524_v45  ;;  %v8599_v45 = vld [vmem:[%s12481_s2 + $0x2e0] sm:$0xff]  }
  0x2a   :  { %7756 = vmatpush3.bf16.msra.mxu0 %v8520_v42  ;;  %v8596_v42 = vld [vmem:[%s12516_s0 + $0xd0] ss:$48 sps:$4 sm:$0xff]  }
  0x2b   :  { %7796 = vmatpush3.bf16.msra.mxu1 %v8521_v43  ;;  %7757 = vmatprep.subr.bf16.mxu0 %v8528_v48  ;;  %v8597_v43 = vld [vmem:[%s12516_s0 + $0xd8] ss:$48 sps:$4 sm:$0xff]  }
  0x2c   :  { %7797 = vmatprep.subr.bf16.mxu1 %v8529_v49  ;;  %v8602_v48 = vld [vmem:[%s12481_s2 + $0x268] sm:$0xff]  }
  0x2d   :  { %1163 = vmatmul.mubr.bf16.gmra.mrb[4].mxu0 %v8526_v46  ;;  %v8600_v46 = vld [vmem:[%s12481_s2 + $0x220] sm:$0xff]   ;;  %v8603_v49 = vld [vmem:[%s12481_s2 + $0x2e8] sm:$0xff]  }
  0x2e   :  { %1228 = vmatmul.mubr.bf16.gmra.mrb[4].mxu1 %v8527_v47  ;;  %7758 = vmatpush3.bf16.msra.mxu0 %v8530_v50  ;;  %v8601_v47 = vld [vmem:[%s12481_s2 + $0x2a0] sm:$0xff]   ;;  %v8604_v50 = vld [vmem:[%s12481_s2 + $0x228] sm:$0xff]  }
  0x2f   :  { %7798 = vmatpush3.bf16.msra.mxu1 %v8531_v51  ;;  %7759 = vmatprep.subr.bf16.mxu0 %v8532_v52  ;;  %v8605_v51 = vld [vmem:[%s12481_s2 + $0x2a8] sm:$0xff]   ;;  %v8606_v52 = vld [vmem:[%s12516_s0 + $0x134] ss:$48 sps:$4 sm:$0xff]  }
  0x30   :  { %7799 = vmatprep.subr.bf16.mxu1 %v8533_v53  ;;  %1170 = vmatprep.mubr.bf16.mxu0 %v8536_v56  ;;  %v8608_v53 = vld [vmem:[%s12516_s0 + $0x13c] ss:$48 sps:$4 sm:$0xff]   ;;  %v8612_v56 = vld [vmem:[%s12481_s2 + $0x270] sm:$0xff]  }
  0x31   :  { %1235 = vmatprep.mubr.bf16.mxu1 %v8538_v57  ;;  %v8613_v57 = vld [vmem:[%s12481_s2 + $0x2f0] sm:$0xff]  }
  0x32   :  { %7760 = vmatpush3.bf16.msra.mxu0 %v8534_v54  ;;  %v8610_v54 = vld [vmem:[%s12516_s0 + $0x130] ss:$48 sps:$4 sm:$0xff]  }
  0x33   :  { %7800 = vmatpush3.bf16.msra.mxu1 %v8535_v55  ;;  %7761 = vmatprep.subr.bf16.mxu0 %v8542_v60  ;;  %v8611_v55 = vld [vmem:[%s12516_s0 + $0x138] ss:$48 sps:$4 sm:$0xff]  }
  0x34   :  { %7801 = vmatprep.subr.bf16.mxu1 %v8543_v61  ;;  %v8616_v60 = vld [vmem:[%s12481_s2 + $0x278] sm:$0xff]  }
  0x35   :  { %1171 = vmatmul.mubr.bf16.gmra.mrb[8].mxu0 %v8540_v58  ;;  %v8614_v58 = vld [vmem:[%s12481_s2 + $0x230] sm:$0xff]   ;;  %v8617_v61 = vld [vmem:[%s12481_s2 + $0x2f8] sm:$0xff]  }
  0x36   :  { %1236 = vmatmul.mubr.bf16.gmra.mrb[8].mxu1 %v8541_v59  ;;  %7762 = vmatpush3.bf16.msra.mxu0 %v8544_v62  ;;  %v8615_v59 = vld [vmem:[%s12481_s2 + $0x2b0] sm:$0xff]   ;;  %v8618_v62 = vld [vmem:[%s12481_s2 + $0x238] sm:$0xff]  }
  0x37   :  { %7802 = vmatpush3.bf16.msra.mxu1 %v8545_v63  ;;  %7763 = vmatprep.subr.bf16.mxu0 %v8546_v0  ;;  %v8619_v63 = vld [vmem:[%s12481_s2 + $0x2b8] sm:$0xff]   ;;  %v8620_v0 = vld [vmem:[%s12516_s0 + $0x20] ss:$48 sps:$4 sm:$0xff]  }
  0x38   :  { %7803 = vmatprep.subr.bf16.mxu1 %v8547_v1  ;;  %1178 = vmatprep.mubr.bf16.mxu0 %v8550_v4  ;;  %v8622_v1 = vld [vmem:[%s12516_s0 + $0x24] ss:$48 sps:$4 sm:$0xff]  }
  0x39   :  { %1243 = vmatprep.mubr.bf16.mxu1 %v8552_v5  ;;  %v8626_v4 = vld [vmem:[%s12516_s0 + $0x84] ss:$48 sps:$4 sm:$0xff]   ;;  %v8628_v5 = vld [vmem:[%s12516_s0 + $0x8c] ss:$48 sps:$4 sm:$0xff]  }
  0x3a   :  { %7764 = vmatpush3.bf16.msra.mxu0 %v8548_v2  ;;  %v8623_v2 = vld [vmem:[%s12516_s0 + $0x28] ss:$48 sps:$4 sm:$0xff]  }
  0x3b   :  { %7804 = vmatpush3.bf16.msra.mxu1 %v8549_v3  ;;  %7765 = vmatprep.subr.bf16.mxu0 %v8556_v8  ;;  %v8625_v3 = vld [vmem:[%s12516_s0 + $0x2c] ss:$48 sps:$4 sm:$0xff]   ;;  %v8632_v8 = vld [vmem:[%s12516_s0 + $0xe4] ss:$48 sps:$4 sm:$0xff]  }
  0x3c   :  { %7805 = vmatprep.subr.bf16.mxu1 %v8557_v9  ;;  %v8634_v9 = vld [vmem:[%s12516_s0 + $0xec] ss:$48 sps:$4 sm:$0xff]  }
  0x3d   :  { %1179 = vmatmul.mubr.bf16.gmra.mrb[12].mxu0 %v8554_v6  ;;  %v8630_v6 = vld [vmem:[%s12516_s0 + $0x80] ss:$48 sps:$4 sm:$0xff]  }
  0x3e   :  { %1244 = vmatmul.mubr.bf16.gmra.mrb[12].mxu1 %v8555_v7  ;;  %7766 = vmatpush3.bf16.msra.mxu0 %v8558_v10  ;;  %v8631_v7 = vld [vmem:[%s12516_s0 + $0x88] ss:$48 sps:$4 sm:$0xff]   ;;  %v8636_v10 = vld [vmem:[%s12516_s0 + $0xe0] ss:$48 sps:$4 sm:$0xff]  }
  0x3f   :  { %7806 = vmatpush3.bf16.msra.mxu1 %v8559_v11  ;;  %7767 = vmatprep.subr.bf16.mxu0 %v8560_v12  ;;  %v8637_v11 = vld [vmem:[%s12516_s0 + $0xe8] ss:$48 sps:$4 sm:$0xff]   ;;  %v8638_v12 = vld [vmem:[%s12516_s0 + $0x144] ss:$48 sps:$4 sm:$0xff]  }
  0x40   :  { %7807 = vmatprep.subr.bf16.mxu1 %v8561_v13  ;;  %1284 = vmatprep.mubr.bf16.mxu0 %v8566_v17  ;;  %v8640_v13 = vld [vmem:[%s12516_s0 + $0x14c] ss:$48 sps:$4 sm:$0xff]  }
  0x41   :  { %1349 = vmatprep.mubr.bf16.mxu1 %v8569_v19 }
  0x42   :  { %7768 = vmatpush3.bf16.msra.mxu0 %v8562_v14  ;;  %v8642_v14 = vld [vmem:[%s12516_s0 + $0x140] ss:$48 sps:$4 sm:$0xff]  }
  0x43   :  { %7808 = vmatpush3.bf16.msra.mxu1 %v8563_v15  ;;  %7833 = vmatprep.subr.bf16.mxu0 %v8570_v20  ;;  %v8643_v15 = vld [vmem:[%s12516_s0 + $0x148] ss:$48 sps:$4 sm:$0xff]  }
  0x44   :  { %7873 = vmatprep.subr.bf16.mxu1 %v8571_v21 }
  0x45   :  { %1285 = vmatmul.mubr.bf16.vlgmr.msra.gmra.mrb[16].mxu0 %v8564_v16 }
  0x46   :  { %1350 = vmatmul.mubr.bf16.vlgmr.msra.gmra.mrb[16].mxu1 %v8567_v18  ;;  %7834 = vmatpush3.bf16.msra.mxu0 %v8572_v22 }
  0x47   :  { %7874 = vmatpush3.bf16.msra.mxu1 %v8573_v23  ;;  %7835 = vmatprep.subr.bf16.mxu0 %v8574_v24 }
  0x48   :  { %7875 = vmatprep.subr.bf16.mxu1 %v8575_v25  ;;  %1292 = vmatprep.mubr.bf16.mxu0 %v8578_v28 }
  0x49   :  { %1357 = vmatprep.mubr.bf16.mxu1 %v8580_v29 }
  0x4a   :  { %7836 = vmatpush3.bf16.msra.mxu0 %v8576_v26 }
  0x4b   :  { %7876 = vmatpush3.bf16.msra.mxu1 %v8577_v27  ;;  %7837 = vmatprep.subr.bf16.mxu0 %v8584_v32 }
  0x4c   :  { %7877 = vmatprep.subr.bf16.mxu1 %v8585_v33 }
  0x4d   :  { %1293 = vmatmul.mubr.bf16.gmra.mrb[20].mxu0 %v8582_v30 }
  0x4e   :  { %1358 = vmatmul.mubr.bf16.gmra.mrb[20].mxu1 %v8583_v31  ;;  %7838 = vmatpush3.bf16.msra.mxu0 %v8586_v34 }
  0x4f   :  { %7878 = vmatpush3.bf16.msra.mxu1 %v8587_v35  ;;  %7839 = vmatprep.subr.bf16.mxu0 %v8588_v36 }
  0x50   :  { %7879 = vmatprep.subr.bf16.mxu1 %v8589_v37  ;;  %1300 = vmatprep.mubr.bf16.mxu0 %v8592_v40 }
  0x51   :  { %1365 = vmatprep.mubr.bf16.mxu1 %v8594_v41 }
  0x52   :  { %7840 = vmatpush3.bf16.msra.mxu0 %v8590_v38 }
  0x53   :  { %7880 = vmatpush3.bf16.msra.mxu1 %v8591_v39  ;;  %7841 = vmatprep.subr.bf16.mxu0 %v8598_v44 }
  0x54   :  { %7881 = vmatprep.subr.bf16.mxu1 %v8599_v45 }
  0x55   :  { %1301 = vmatmul.mubr.bf16.gmra.mrb[24].mxu0 %v8596_v42 }
  0x56   :  { %1366 = vmatmul.mubr.bf16.gmra.mrb[24].mxu1 %v8597_v43  ;;  %7842 = vmatpush3.bf16.msra.mxu0 %v8600_v46 }
  0x57   :  { %7882 = vmatpush3.bf16.msra.mxu1 %v8601_v47  ;;  %7843 = vmatprep.subr.bf16.mxu0 %v8602_v48 }
  0x58   :  { %7883 = vmatprep.subr.bf16.mxu1 %v8603_v49  ;;  %1308 = vmatprep.mubr.bf16.mxu0 %v8606_v52 }
  0x59   :  { %1373 = vmatprep.mubr.bf16.mxu1 %v8608_v53 }
  0x5a   :  { %7844 = vmatpush3.bf16.msra.mxu0 %v8604_v50 }
  0x5b   :  { %7884 = vmatpush3.bf16.msra.mxu1 %v8605_v51  ;;  %7845 = vmatprep.subr.bf16.mxu0 %v8612_v56 }
  0x5c   :  { %7885 = vmatprep.subr.bf16.mxu1 %v8613_v57 }
  0x5d   :  { %1309 = vmatmul.mubr.bf16.gmra.mrb[28].mxu0 %v8610_v54 }
  0x5e   :  { %1374 = vmatmul.mubr.bf16.gmra.mrb[28].mxu1 %v8611_v55  ;;  %7846 = vmatpush3.bf16.msra.mxu0 %v8614_v58 }
  0x5f   :  { %7886 = vmatpush3.bf16.msra.mxu1 %v8615_v59  ;;  %7847 = vmatprep.subr.bf16.mxu0 %v8616_v60 }
  0x60   :  { %7887 = vmatprep.subr.bf16.mxu1 %v8617_v61  ;;  %1414 = vmatprep.mubr.bf16.mxu0 %v8622_v1 }
  0x61   :  { %1479 = vmatprep.mubr.bf16.mxu1 %v8625_v3 }
  0x62   :  { %7848 = vmatpush3.bf16.msra.mxu0 %v8618_v62 }
  0x63   :  { %7888 = vmatpush3.bf16.msra.mxu1 %v8619_v63 }
  0x65   :  { %1415 = vmatmul.mubr.bf16.vlgmr.msra.gmra.mrb[32].mxu0 %v8620_v0 }
  0x66   :  { %1480 = vmatmul.mubr.bf16.vlgmr.msra.gmra.mrb[32].mxu1 %v8623_v2  ;;  %1422 = vmatprep.mubr.bf16.mxu0 %v8626_v4 }
  0x67   :  { %1487 = vmatprep.mubr.bf16.mxu1 %v8628_v5 }
  0x6d   :  { %1423 = vmatmul.mubr.bf16.gmra.mrb[36].mxu0 %v8630_v6 }
  0x6e   :  { %1488 = vmatmul.mubr.bf16.gmra.mrb[36].mxu1 %v8631_v7  ;;  %1430 = vmatprep.mubr.bf16.mxu0 %v8632_v8 }
  0x6f   :  { %1495 = vmatprep.mubr.bf16.mxu1 %v8634_v9 }
  0x75   :  { %1431 = vmatmul.mubr.bf16.gmra.mrb[40].mxu0 %v8636_v10 }
  0x76   :  { %1496 = vmatmul.mubr.bf16.gmra.mrb[40].mxu1 %v8637_v11  ;;  %1438 = vmatprep.mubr.bf16.mxu0 %v8638_v12 }
  0x77   :  { %1503 = vmatprep.mubr.bf16.mxu1 %v8640_v13 }
  0x7d   :  { %1439 = vmatmul.mubr.bf16.gmra.mrb[44].mxu0 %v8642_v14 }
  0x7e   :  { %1504 = vmatmul.mubr.bf16.gmra.mrb[44].mxu1 %v8643_v15 }
  0x7f   :  { %22 = vsyncpa [#allocation3], 0  ;;  %s12517_s28 = sld [smem:[#allocation11_spill]]  ;;  %vm1514_vm0 = vcmask 523264   ;;  %vm1877_vm1 = vcmask 130048   ;;  %s9221_s2 = smov 112  }
  0x80   :  { %s9222_s19 = smov 96   ;;  %s9223_s1 = smov 80   ;;  %vm2394_vm2 = vcmask 261120   ;;  %vm3275_vm3 = vcmask 392192  }
  0x81   :  { %s9224_s20 = smov 64   ;;  %s9225_s21 = smov 16  }
  0x82   :  { %s9226_s30 = smov 32   ;;  %s12507_s0 = smov 48  }
  0x85   :  { %v298_v18 = vld [vmem:[%s12517_s28] sm:$0xff]  ;;  %v299_v25 = vld [vmem:[%s12517_s28 + $0x8] sm:$0xff]  ;;  %v300_v36 = vld [vmem:[%s12517_s28 + $0x10] sm:$0xff] }
  0x86   :  { %v301_v43 = vld [vmem:[%s12517_s28 + $0x18] sm:$0xff]  ;;  %v302_v54 = vld [vmem:[%s12517_s28 + $0x20] sm:$0xff]  ;;  %v303_v61 = vld [vmem:[%s12517_s28 + $0x28] sm:$0xff] }
  0x87   :  { %v304_v8 = vld [vmem:[%s12517_s28 + $0x30] sm:$0xff]  ;;  %v305_v15 = vld [vmem:[%s12517_s28 + $0x38] sm:$0xff] }
  0xf8   :  { %v7689_v16 = vpop.f32.mrb[0].mxu0 }
  0xf9   :  { %v7729_v17 = vpop.f32.mrb[0].mxu1  ;;  %v7690_v19 = vpop.f32.mrb[1].mxu0 }
  0xfa   :  { %v7691_v20 = vadd.f32 %v7690_v19, %v7689_v16  ;;  %v7730_v21 = vpop.f32.mrb[1].mxu1  ;;  %v7692_v22 = vpop.f32.mrb[2].mxu0 }
  0xfb   :  { %v7731_v23 = vadd.f32 %v7730_v21, %v7729_v17  ;;  %v7732_v24 = vpop.f32.mrb[2].mxu1  ;;  %v7693_v26 = vpop.f32.mrb[3].mxu0 }
  0xfc   :  { %v1157_v27 = vadd.f32 %v7691_v20, %v298_v18  ;;  %v7694_v28 = vadd.f32 %v7693_v26, %v7692_v22  ;;  %v7733_v29 = vpop.f32.mrb[3].mxu1 }
  0xfd   :  { %v7734_v30 = vadd.f32 %v7733_v29, %v7732_v24 }
  0xfe   :  { %v9759_v31 = vadd.f32 %v7731_v23, %v1157_v27  ;;  %v1160_v32 = vadd.f32 %v7694_v28, %v299_v25 }
 0x100   :  { %v9761_v33 = vadd.f32 %v7734_v30, %v1160_v32  ;;  %v7695_v34 = vpop.f32.mrb[4].mxu0 }
 0x101   :  { %v7735_v35 = vpop.f32.mrb[4].mxu1  ;;  %v7696_v37 = vpop.f32.mrb[5].mxu0 }
 0x102   :  { %v7697_v38 = vadd.f32 %v7696_v37, %v7695_v34  ;;  %v7736_v39 = vpop.f32.mrb[5].mxu1  ;;  %v7698_v40 = vpop.f32.mrb[6].mxu0 }
 0x103   :  { %v7737_v41 = vadd.f32 %v7736_v39, %v7735_v35  ;;  %v7738_v42 = vpop.f32.mrb[6].mxu1  ;;  %v7699_v44 = vpop.f32.mrb[7].mxu0 }
 0x104   :  { %v1165_v45 = vadd.f32 %v7697_v38, %v300_v36  ;;  %v7700_v46 = vadd.f32 %v7699_v44, %v7698_v40  ;;  %v7739_v47 = vpop.f32.mrb[7].mxu1 }
 0x105   :  { %v7740_v48 = vadd.f32 %v7739_v47, %v7738_v42 }
 0x106   :  { %v9769_v49 = vadd.f32 %v7737_v41, %v1165_v45  ;;  %v1168_v50 = vadd.f32 %v7700_v46, %v301_v43 }
 0x108   :  { %v9771_v51 = vadd.f32 %v7740_v48, %v1168_v50  ;;  %v7701_v52 = vpop.f32.mrb[8].mxu0 }
 0x109   :  { %v7741_v53 = vpop.f32.mrb[8].mxu1  ;;  %v7702_v55 = vpop.f32.mrb[9].mxu0 }
 0x10a   :  { %v7703_v56 = vadd.f32 %v7702_v55, %v7701_v52  ;;  %v7742_v57 = vpop.f32.mrb[9].mxu1  ;;  %v7704_v58 = vpop.f32.mrb[10].mxu0 }
 0x10b   :  { %v7743_v59 = vadd.f32 %v7742_v57, %v7741_v53  ;;  %v7744_v60 = vpop.f32.mrb[10].mxu1  ;;  %v7705_v62 = vpop.f32.mrb[11].mxu0 }
 0x10c   :  { %v1173_v63 = vadd.f32 %v7703_v56, %v302_v54  ;;  %v7706_v0 = vadd.f32 %v7705_v62, %v7704_v58  ;;  %v7745_v1 = vpop.f32.mrb[11].mxu1 }
 0x10d   :  { %v7746_v2 = vadd.f32 %v7745_v1, %v7744_v60 }
 0x10e   :  { %v9779_v3 = vadd.f32 %v7743_v59, %v1173_v63  ;;  %v1176_v4 = vadd.f32 %v7706_v0, %v303_v61 }
 0x110   :  { %v9781_v5 = vadd.f32 %v7746_v2, %v1176_v4  ;;  %v7707_v6 = vpop.f32.mrb[12].mxu0 }
 0x111   :  { %v7747_v7 = vpop.f32.mrb[12].mxu1  ;;  %v7708_v9 = vpop.f32.mrb[13].mxu0 }
 0x112   :  { %v7748_v10 = vpop.f32.mrb[13].mxu1  ;;  %v7709_v11 = vadd.f32 %v7708_v9, %v7707_v6  ;;  %v7710_v13 = vpop.f32.mrb[14].mxu0 }
 0x113   :  { %v7749_v12 = vadd.f32 %v7748_v10, %v7747_v7  ;;  %v7750_v14 = vpop.f32.mrb[14].mxu1  ;;  %v7711_v16 = vpop.f32.mrb[15].mxu0 }
 0x114   :  { %v7751_v17 = vpop.f32.mrb[15].mxu1  ;;  %v1181_v18 = vadd.f32 %v7709_v11, %v304_v8  ;;  %v7712_v19 = vadd.f32 %v7711_v16, %v7710_v13 }
 0x115   :  { %v7752_v20 = vadd.f32 %v7751_v17, %v7750_v14 }
 0x116   :  { %v1246_v21 = vadd.f32 %v7749_v12, %v1181_v18  ;;  %v1184_v22 = vadd.f32 %v7712_v19, %v305_v15 }
 0x118   :  { %v9789_v23 = vadd.f32 %v7752_v20, %v1184_v22  ;;  %v7769_v24 = vpop.f32.mrb[16].mxu0 }
 0x119   :  { %v7770_v25 = vpop.f32.mrb[17].mxu0  ;;  %v7809_v26 = vpop.f32.mrb[16].mxu1 }
 0x11a   :  { %v7771_v27 = vadd.f32 %v7770_v25, %v7769_v24  ;;  %v7772_v28 = vpop.f32.mrb[18].mxu0  ;;  %v7810_v29 = vpop.f32.mrb[17].mxu1 }
 0x11b   :  { %v7773_v30 = vpop.f32.mrb[19].mxu0  ;;  %v7811_v34 = vadd.f32 %v7810_v29, %v7809_v26  ;;  %v7812_v35 = vpop.f32.mrb[18].mxu1 }
 0x11c   :  { %v1287_v32 = vadd.f32 %v7771_v27, %v9759_v31  ;;  %v7774_v36 = vadd.f32 %v7773_v30, %v7772_v28  ;;  %v7813_v37 = vpop.f32.mrb[19].mxu1 }
 0x11d   :  { %v7814_v40 = vadd.f32 %v7813_v37, %v7812_v35 }
 0x11e   :  { %v1352_v38 = vadd.f32 %v7811_v34, %v1287_v32  ;;  %v1290_v39 = vadd.f32 %v7774_v36, %v9761_v33 }
 0x120   :  { %v9793_v41 = vadd.f32 %v7814_v40, %v1290_v39  ;;  %v7775_v42 = vpop.f32.mrb[20].mxu0 }
 0x121   :  { %v7815_v43 = vpop.f32.mrb[20].mxu1  ;;  %v7776_v44 = vpop.f32.mrb[21].mxu0 }
 0x122   :  { %v7777_v45 = vadd.f32 %v7776_v44, %v7775_v42  ;;  %v7816_v46 = vpop.f32.mrb[21].mxu1  ;;  %v7778_v47 = vpop.f32.mrb[22].mxu0 }
 0x123   :  { %v7817_v48 = vadd.f32 %v7816_v46, %v7815_v43  ;;  %v7818_v50 = vpop.f32.mrb[22].mxu1  ;;  %v7779_v52 = vpop.f32.mrb[23].mxu0 }
 0x124   :  { %v1295_v31 = vadd.f32 %v7777_v45, %v9769_v49  ;;  %v7780_v53 = vadd.f32 %v7779_v52, %v7778_v47  ;;  %v7819_v54 = vpop.f32.mrb[23].mxu1 }
 0x125   :  { %v7820_v55 = vadd.f32 %v7819_v54, %v7818_v50 }
 0x126   :  { %v9796_v56 = vadd.f32 %v7817_v48, %v1295_v31  ;;  %v1298_v33 = vadd.f32 %v7780_v53, %v9771_v51 }
 0x128   :  { %v9799_v57 = vadd.f32 %v7820_v55, %v1298_v33  ;;  %v7781_v58 = vpop.f32.mrb[24].mxu0 }
 0x129   :  { %v7821_v59 = vpop.f32.mrb[24].mxu1  ;;  %v7782_v60 = vpop.f32.mrb[25].mxu0 }
 0x12a   :  { %v7822_v61 = vpop.f32.mrb[25].mxu1  ;;  %v7783_v62 = vadd.f32 %v7782_v60, %v7781_v58  ;;  %v7784_v0 = vpop.f32.mrb[26].mxu0 }
 0x12b   :  { %v7823_v63 = vadd.f32 %v7822_v61, %v7821_v59  ;;  %v7824_v1 = vpop.f32.mrb[26].mxu1  ;;  %v7785_v2 = vpop.f32.mrb[27].mxu0 }
 0x12c   :  { %v7825_v4 = vpop.f32.mrb[27].mxu1  ;;  %v1303_v49 = vadd.f32 %v7783_v62, %v9779_v3  ;;  %v7786_v6 = vadd.f32 %v7785_v2, %v7784_v0 }
 0x12d   :  { %v7826_v7 = vadd.f32 %v7825_v4, %v7824_v1 }
 0x12e   :  { %v9802_v8 = vadd.f32 %v7823_v63, %v1303_v49  ;;  %v1306_v51 = vadd.f32 %v7786_v6, %v9781_v5 }
 0x130   :  { %v9805_v9 = vadd.f32 %v7826_v7, %v1306_v51  ;;  %v7787_v10 = vpop.f32.mrb[28].mxu0 }
 0x131   :  { %v7827_v11 = vpop.f32.mrb[28].mxu1  ;;  %v7788_v12 = vpop.f32.mrb[29].mxu0 }
 0x132   :  { %v7789_v13 = vadd.f32 %v7788_v12, %v7787_v10  ;;  %v7828_v14 = vpop.f32.mrb[29].mxu1  ;;  %v7790_v15 = vpop.f32.mrb[30].mxu0 }
 0x133   :  { %v7829_v16 = vadd.f32 %v7828_v14, %v7827_v11  ;;  %v7830_v17 = vpop.f32.mrb[30].mxu1  ;;  %v7791_v18 = vpop.f32.mrb[31].mxu0 }
 0x134   :  { %v1311_v19 = vadd.f32 %v7789_v13, %v1246_v21  ;;  %v7792_v20 = vadd.f32 %v7791_v18, %v7790_v15  ;;  %v7831_v3 = vpop.f32.mrb[31].mxu1 }
 0x135   :  { %v7832_v22 = vadd.f32 %v7831_v3, %v7830_v17 }
 0x136   :  { %v9807_v24 = vadd.f32 %v7829_v16, %v1311_v19  ;;  %v1314_v25 = vadd.f32 %v7792_v20, %v9789_v23 }
 0x138   :  { %v9810_v5 = vadd.f32 %v7832_v22, %v1314_v25  ;;  %v7849_v26 = vpop.f32.mrb[32].mxu0 }
 0x139   :  { %v7889_v27 = vpop.f32.mrb[32].mxu1  ;;  %v7850_v28 = vpop.f32.mrb[33].mxu0 }
 0x13a   :  { %v7851_v29 = vadd.f32 %v7850_v28, %v7849_v26  ;;  %v7890_v30 = vpop.f32.mrb[33].mxu1  ;;  %v7852_v32 = vpop.f32.mrb[34].mxu0 }
 0x13b   :  { %v7891_v34 = vadd.f32 %v7890_v30, %v7889_v27  ;;  %v7892_v35 = vpop.f32.mrb[34].mxu1  ;;  %v7853_v36 = vpop.f32.mrb[35].mxu0 }
 0x13c   :  { %v1417_v37 = vadd.f32 %v7851_v29, %v1352_v38  ;;  %v7854_v21 = vadd.f32 %v7853_v36, %v7852_v32  ;;  %v7893_v39 = vpop.f32.mrb[35].mxu1 }
 0x13d   :  { %v7894_v40 = vadd.f32 %v7893_v39, %v7892_v35 }
 0x13e   :  { %v9812_v42 = vadd.f32 %v7891_v34, %v1417_v37  ;;  %v1420_v23 = vadd.f32 %v7854_v21, %v9793_v41 }
 0x140   :  { %v9815_v43 = vadd.f32 %v7894_v40, %v1420_v23  ;;  %v7855_v44 = vpop.f32.mrb[36].mxu0  ;;  %v1515_v45 = vsel %vm1514_vm0, %v9812_v42, 0.0 }
 0x141   :  { %v7895_v46 = vpop.f32.mrb[36].mxu1  ;;  %v7856_v47 = vpop.f32.mrb[37].mxu0  ;;  %1516 = vadd.xlane.f32.xlu0 %v1515_v45 }
 0x142   :  { %v7857_v48 = vadd.f32 %v7856_v47, %v7855_v44  ;;  %v7896_v50 = vpop.f32.mrb[37].mxu1  ;;  %v7858_v38 = vpop.f32.mrb[38].mxu0  ;;  %v1518_v41 = vsel %vm1514_vm0, %v9815_v43, 0.0 }
 0x143   :  { %v7897_v52 = vadd.f32 %v7896_v50, %v7895_v46  ;;  %v7898_v31 = vpop.f32.mrb[38].mxu1  ;;  %v7859_v53 = vpop.f32.mrb[39].mxu0 }
 0x144   :  { %v1425_v54 = vadd.f32 %v7857_v48, %v9796_v56  ;;  %v7860_v55 = vadd.f32 %v7859_v53, %v7858_v38  ;;  %v7899_v33 = vpop.f32.mrb[39].mxu1 }
 0x145   :  { %v7900_v58 = vadd.f32 %v7899_v33, %v7898_v31  ;;  %1519 = vadd.xlane.f32.xlu0 %v1518_v41 }
 0x146   :  { %v9822_v59 = vadd.f32 %v7897_v52, %v1425_v54  ;;  %v1428_v60 = vadd.f32 %v7860_v55, %v9799_v57 }
 0x148   :  { %v9825_v61 = vadd.f32 %v7900_v58, %v1428_v60  ;;  %v7861_v62 = vpop.f32.mrb[40].mxu0  ;;  %v1521_v63 = vsel %vm1514_vm0, %v9822_v59, 0.0 }
 0x149   :  { %v7901_v0 = vpop.f32.mrb[40].mxu1  ;;  %v7862_v1 = vpop.f32.mrb[41].mxu0  ;;  %1522 = vadd.xlane.f32.xlu1 %v1521_v63 }
 0x14a   :  { %v7863_v56 = vadd.f32 %v7862_v1, %v7861_v62  ;;  %v7902_v2 = vpop.f32.mrb[41].mxu1  ;;  %v7864_v4 = vpop.f32.mrb[42].mxu0  ;;  %v1524_v57 = vsel %vm1514_vm0, %v9825_v61, 0.0 }
 0x14b   :  { %v7903_v49 = vadd.f32 %v7902_v2, %v7901_v0  ;;  %v7904_v6 = vpop.f32.mrb[42].mxu1  ;;  %v7865_v7 = vpop.f32.mrb[43].mxu0 }
 0x14c   :  { %v1433_v51 = vadd.f32 %v7863_v56, %v9802_v8  ;;  %v7866_v10 = vadd.f32 %v7865_v7, %v7864_v4  ;;  %v7905_v11 = vpop.f32.mrb[43].mxu1 }
 0x14d   :  { %v7906_v12 = vadd.f32 %v7905_v11, %v7904_v6  ;;  %1525 = vadd.xlane.f32.xlu1 %v1524_v57 }
 0x14e   :  { %v9832_v13 = vadd.f32 %v7903_v49, %v1433_v51  ;;  %v1436_v14 = vadd.f32 %v7866_v10, %v9805_v9 }
 0x150   :  { %v9835_v15 = vadd.f32 %v7906_v12, %v1436_v14  ;;  %v7867_v16 = vpop.f32.mrb[44].mxu0  ;;  %v1527_v17 = vsel %vm1514_vm0, %v9832_v13, 0.0 }
 0x151   :  { %v7907_v18 = vpop.f32.mrb[44].mxu1  ;;  %v7868_v19 = vpop.f32.mrb[45].mxu0  ;;  %1528 = vadd.xlane.f32.xlu0 %v1527_v17  ;;  %v8646_v17 = vld [vmem:[%s12484_s5 + $0x4] ss:$8 sps:$4 sm:$0xff]  }
 0x152   :  { %12518 = vst [vmem:[#allocation5_spill] sm:$0xff] %v9835_v15  ;;  %v7869_v8 = vadd.f32 %v7868_v19, %v7867_v16  ;;  %v7908_v20 = vpop.f32.mrb[45].mxu1  ;;  %v7870_v3 = vpop.f32.mrb[46].mxu0  ;;  %v1530_v22 = vsel %vm1514_vm0, %v9835_v15, 0.0  ;;  %v8644_v19 = vld [vmem:[%s12484_s5] ss:$8 sps:$4 sm:$0xff]   ;;  %1724 = vmatprep.subr.bf16.mxu0 %v8646_v17  ;;  %8425 = vmatprep.subr.bf16.mxu1 %v8646_v17 }
 0x153   :  { %v7909_v25 = vadd.f32 %v7908_v20, %v7907_v18  ;;  %v7910_v26 = vpop.f32.mrb[46].mxu1  ;;  %v7871_v27 = vpop.f32.mrb[47].mxu0  ;;  %1531 = vadd.xlane.f32.xlu1 %v1530_v22  ;;  %1725 = vmatpush1.bf16.msra.mxu0 %v8644_v19  ;;  %v8647_v20 = vld [vmem:[%s12484_s5 + $0x10] ss:$8 sps:$4 sm:$0xff]   ;;  %v8650_v22 = vld [vmem:[%s12484_s5 + $0x20] ss:$8 sps:$4 sm:$0xff]  }
 0x154   :  { %v1441_v9 = vadd.f32 %v7869_v8, %v9807_v24  ;;  %v7872_v28 = vadd.f32 %v7871_v27, %v7870_v3  ;;  %v7911_v29 = vpop.f32.mrb[47].mxu1  ;;  %v8649_v8 = vld [vmem:[%s12484_s5 + $0x14] ss:$8 sps:$4 sm:$0xff]   ;;  %8429 = vmatpush1.bf16.msra.mxu1 %v8644_v19  ;;  %v8652_v3 = vld [vmem:[%s12484_s5 + $0x24] ss:$8 sps:$4 sm:$0xff]   ;;  %v12499_v27 = vmov 0  }
 0x155   :  { %v7912_v30 = vadd.f32 %v7911_v29, %v7910_v26  ;;  %1726 = vmatprep.subr.bf16.mxu0 %v8649_v8  ;;  %8426 = vmatprep.subr.bf16.mxu1 %v8649_v8  ;;  %v8653_v26 = vld [vmem:[%s12484_s5 + $0x30] ss:$8 sps:$4 sm:$0xff]  }
 0x156   :  { %v9842_v32 = vadd.f32 %v7909_v25, %v1441_v9  ;;  %v1444_v34 = vadd.f32 %v7872_v28, %v9810_v5  ;;  %v8655_v25 = vld [vmem:[%s12484_s5 + $0x34] ss:$8 sps:$4 sm:$0xff]   ;;  %1756 = vmatprep.mubr.bf16.mxu0 %v12499_v27  ;;  %1776 = vmatprep.mubr.bf16.mxu1 %v12499_v27 }
 0x157   :  { %1727 = vmatpush1.bf16.msra.mxu0 %v8647_v20 }
 0x158   :  { %v9845_v35 = vadd.f32 %v7912_v30, %v1444_v34  ;;  %v1533_v36 = vsel %vm1514_vm0, %v9842_v32, 0.0  ;;  %8430 = vmatpush1.bf16.msra.mxu1 %v8647_v20  ;;  %1728 = vmatprep.subr.bf16.mxu0 %v8652_v3 }
 0x159   :  { %1534 = vadd.xlane.f32.xlu0 %v1533_v36  ;;  %8427 = vmatprep.subr.bf16.mxu1 %v8652_v3 }
 0x15a   :  { %12519 = vst [vmem:[#allocation6_spill] sm:$0xff] %v9845_v35  ;;  %v1536_v37 = vsel %vm1514_vm0, %v9845_v35, 0.0 }
 0x15b   :  { %1537 = vadd.xlane.f32.xlu1 %v1536_v37  ;;  %1729 = vmatpush1.bf16.msra.mxu0 %v8650_v22 }
 0x15c   :  { %8431 = vmatpush1.bf16.msra.mxu1 %v8650_v22  ;;  %1730 = vmatprep.subr.bf16.mxu0 %v8655_v25 }
 0x15d   :  { %8428 = vmatprep.subr.bf16.mxu1 %v8655_v25 }
 0x15f   :  { %1731 = vmatpush1.bf16.msra.mxu0 %v8653_v26 }
 0x160   :  { %8432 = vmatpush1.bf16.msra.mxu1 %v8653_v26 }
 0x1ce   :  { %v1517_v21 = vpop.xlane.xlu0 %1516 }
 0x1cf   :  { %v1540_v39 = vmul.f32 0.015625, %v1517_v21 }
 0x1d1   :  { %v9852_v24 = vsub.f32 %v9812_v42, %v1540_v39 }
 0x1d2   :  { %v1520_v40 = vpop.xlane.xlu0 %1519 }
 0x1d3   :  { %v1541_v23 = vmul.f32 0.015625, %v1520_v40  ;;  %v1556_v5 = vmul.f32 %v9852_v24, %v9852_v24 }
 0x1d5   :  { %v9857_v44 = vsub.f32 %v9815_v43, %v1541_v23  ;;  %v1564_v45 = vsel %vm1514_vm0, %v1556_v5, 0.0 }
 0x1d6   :  { %v1523_v46 = vpop.xlane.xlu1 %1522  ;;  %1565 = vadd.xlane.f32.xlu0 %v1564_v45 }
 0x1d7   :  { %v1542_v47 = vmul.f32 0.015625, %v1523_v46  ;;  %v1557_v48 = vmul.f32 %v9857_v44, %v9857_v44 }
 0x1d9   :  { %v9863_v50 = vsub.f32 %v9822_v59, %v1542_v47  ;;  %v1567_v38 = vsel %vm1514_vm0, %v1557_v48, 0.0  ;;  %v7435_v48 = vld [vmem:[%s12482_s3] ss:$0 sm:$0xff] }
 0x1da   :  { %v1526_v52 = vpop.xlane.xlu1 %1525  ;;  %1568 = vadd.xlane.f32.xlu1 %v1567_v38 }
 0x1db   :  { %v1543_v31 = vmul.f32 0.015625, %v1526_v52  ;;  %v1558_v53 = vmul.f32 %v9863_v50, %v9863_v50 }
 0x1dd   :  { %v9869_v54 = vsub.f32 %v9825_v61, %v1543_v31  ;;  %v1570_v55 = vsel %vm1514_vm0, %v1558_v53, 0.0 }
 0x1de   :  { %1571 = vadd.xlane.f32.xlu0 %v1570_v55  ;;  %v1529_v33 = vpop.xlane.xlu0 %1528 }
 0x1df   :  { %v1544_v41 = vmul.f32 0.015625, %v1529_v33  ;;  %v1559_v58 = vmul.f32 %v9869_v54, %v9869_v54 }
 0x1e0   :  { %v1532_v60 = vpop.xlane.xlu1 %1531 }
 0x1e1   :  { %v9875_v62 = vsub.f32 %v9832_v13, %v1544_v41  ;;  %v1545_v63 = vmul.f32 0.015625, %v1532_v60  ;;  %v1573_v0 = vsel %vm1514_vm0, %v1559_v58, 0.0  ;;  %v7436_v58 = vld [vmem:[%s12483_s4] ss:$0 sm:$0xff] }
 0x1e2   :  { %1574 = vadd.xlane.f32.xlu1 %v1573_v0 }
 0x1e3   :  { %v9879_v1 = vsub.f32 %v9835_v15, %v1545_v63  ;;  %v1560_v56 = vmul.f32 %v9875_v62, %v9875_v62 }
 0x1e5   :  { %v1576_v2 = vsel %vm1514_vm0, %v1560_v56, 0.0  ;;  %v1561_v4 = vmul.f32 %v9879_v1, %v9879_v1 }
 0x1e6   :  { %1577 = vadd.xlane.f32.xlu0 %v1576_v2  ;;  %v1535_v49 = vpop.xlane.xlu0 %1534 }
 0x1e7   :  { %v1546_v6 = vmul.f32 0.015625, %v1535_v49  ;;  %v1579_v7 = vsel %vm1514_vm0, %v1561_v4, 0.0 }
 0x1e8   :  { %v1538_v51 = vpop.xlane.xlu1 %1537  ;;  %1580 = vadd.xlane.f32.xlu1 %v1579_v7 }
 0x1e9   :  { %v9888_v10 = vsub.f32 %v9842_v32, %v1546_v6  ;;  %v1547_v11 = vmul.f32 0.015625, %v1538_v51 }
 0x1eb   :  { %v9891_v57 = vsub.f32 %v9845_v35, %v1547_v11  ;;  %v1562_v12 = vmul.f32 %v9888_v10, %v9888_v10 }
 0x1ed   :  { %v1582_v14 = vsel %vm1514_vm0, %v1562_v12, 0.0  ;;  %v1563_v16 = vmul.f32 %v9891_v57, %v9891_v57 }
 0x1ee   :  { %1583 = vadd.xlane.f32.xlu0 %v1582_v14 }
 0x1ef   :  { %v1585_v18 = vsel %vm1514_vm0, %v1563_v16, 0.0 }
 0x1f0   :  { %1586 = vadd.xlane.f32.xlu1 %v1585_v18 }
 0x263   :  { %v1566_v9 = vpop.xlane.xlu0 %1565 }
 0x264   :  { %v1588_v28 = vmul.f32 0.015625, %v1566_v9 }
 0x266   :  { %v1596_v29 = vadd.f32 1e-06, %v1588_v28 }
 0x267   :  { %v1569_v30 = vpop.xlane.xlu1 %1568 }
 0x268   :  { %8732 = vrsqrt.f32 %v1596_v29  ;;  %v1589_v34 = vmul.f32 0.015625, %v1569_v30 }
 0x26a   :  { %v1597_v36 = vadd.f32 1e-06, %v1589_v34 }
 0x26b   :  { %v1572_v37 = vpop.xlane.xlu0 %1571 }
 0x26c   :  { %8734 = vrsqrt.f32 %v1597_v36  ;;  %v1590_v21 = vmul.f32 0.015625, %v1572_v37 }
 0x26e   :  { %v1598_v39 = vadd.f32 1e-06, %v1590_v21 }
 0x26f   :  { %v1575_v40 = vpop.xlane.xlu1 %1574 }
 0x270   :  { %8736 = vrsqrt.f32 %v1598_v39  ;;  %v1591_v23 = vmul.f32 0.015625, %v1575_v40  ;;  %v1662_v40 = vlaneseq }
 0x272   :  { %v8733_v5 = vpop.eup %8732  ;;  %v1599_v45 = vadd.f32 1e-06, %v1591_v23  ;;  %v1663_v23 = vshrl.u32 %v1662_v40, 7 }
 0x273   :  { %v1612_v46 = vmul.f32 %v8733_v5, %v9852_v24  ;;  %v1578_v47 = vpop.xlane.xlu0 %1577 }
 0x274   :  { %8738 = vrsqrt.f32 %v1599_v45  ;;  %v1592_v38 = vmul.f32 0.015625, %v1578_v47  ;;  %v9945_v5 = vsub.s32 0, %v1663_v23  ;;  %v9950_v45 = vsub.s32 1, %v1663_v23 }
 0x275   :  { %v1581_v52 = vpop.xlane.xlu1 %1580  ;;  %v1626_v33 = vmul.f32 %v7435_v48, %v1612_v46 }
 0x276   :  { %v8735_v31 = vpop.eup %8734  ;;  %v1600_v53 = vadd.f32 1e-06, %v1592_v38  ;;  %v1593_v55 = vmul.f32 0.015625, %v1581_v52  ;;  %12520 = vst [vmem:[#allocation7_spill] sm:$0xff] %v9945_v5  ;;  %12521 = vst [vmem:[#allocation8_spill] sm:$0xff] %v9950_v45 }
 0x277   :  { %v1613_v41 = vmul.f32 %v8735_v31, %v9857_v44  ;;  %v1640_v0 = vadd.f32 %v7436_v58, %v1626_v33 }
 0x278   :  { %8740 = vrsqrt.f32 %v1600_v53  ;;  %v1601_v24 = vadd.f32 1e-06, %v1593_v55 }
 0x279   :  { %v1627_v60 = vmul.f32 %v7435_v48, %v1613_v41 }
 0x27a   :  { %v8737_v63 = vpop.eup %8736  ;;  %8742 = vrsqrt.f32 %v1601_v24 }
 0x27b   :  { %v1641_v56 = vadd.f32 %v7436_v58, %v1627_v60  ;;  %v1584_v2 = vpop.xlane.xlu0 %1583  ;;  %v1614_v4 = vmul.f32 %v8737_v63, %v9863_v50 }
 0x27c   :  { %v1594_v49 = vmul.f32 0.015625, %v1584_v2 }
 0x27d   :  { %v1587_v6 = vpop.xlane.xlu1 %1586  ;;  %v1648_v7 = vpack.c.bf16 %v1641_v56, %v1640_v0  ;;  %v1628_v14 = vmul.f32 %v7435_v48, %v1614_v4 }
 0x27e   :  { %v8739_v51 = vpop.eup %8738  ;;  %v1602_v11 = vadd.f32 1e-06, %v1594_v49  ;;  %v1595_v44 = vmul.f32 0.015625, %v1587_v6 }
 0x27f   :  { %7445 = vmatmul.mubr.msk.bf16.vlgmr.msra.gmra.mrb[48].mxu0 %vm1514_vm0, %v1648_v7  ;;  %v1615_v12 = vmul.f32 %v8739_v51, %v9869_v54  ;;  %v1642_v19 = vadd.f32 %v7436_v58, %v1628_v14 }
 0x280   :  { %8744 = vrsqrt.f32 %v1602_v11  ;;  %v1603_v16 = vadd.f32 1e-06, %v1595_v44  ;;  %1766 = vmatprep.mubr.bf16.mxu0 %v12499_v27 }
 0x281   :  { %v1629_v17 = vmul.f32 %v7435_v48, %v1615_v12 }
 0x282   :  { %v8741_v18 = vpop.eup %8740  ;;  %8746 = vrsqrt.f32 %v1603_v16 }
 0x283   :  { %v1616_v50 = vmul.f32 %v8741_v18, %v9875_v62  ;;  %v1643_v8 = vadd.f32 %v7436_v58, %v1629_v17 }
 0x284   :  { %v8743_v20 = vpop.eup %8742 }
 0x285   :  { %v1630_v3 = vmul.f32 %v7435_v48, %v1616_v50  ;;  %v1617_v22 = vmul.f32 %v8743_v20, %v9879_v1  ;;  %v1649_v25 = vpack.c.bf16 %v1643_v8, %v1642_v19 }
 0x287   :  { %v1631_v26 = vmul.f32 %v7435_v48, %v1617_v22  ;;  %7446 = vmatmul.mubr.msk.bf16.gmra.mrb[52].mxu0 %vm1514_vm0, %v1649_v25  ;;  %v1644_v54 = vadd.f32 %v7436_v58, %v1630_v3 }
 0x289   :  { %v1645_v9 = vadd.f32 %v7436_v58, %v1631_v26 }
 0x28a   :  { %v8745_v28 = vpop.eup %8744 }
 0x28b   :  { %v1650_v29 = vpack.c.bf16 %v1645_v9, %v1644_v54  ;;  %v1618_v30 = vmul.f32 %v8745_v28, %v9888_v10  ;;  %v1660_v10 = vld [vmem:[%s12485_s6] sm:$0x3] }
 0x28c   :  { %v8747_v34 = vpop.eup %8746  ;;  %v1669_v47 = vrot.slane %v1660_v10, %v9950_v45 }
 0x28d   :  { %7447 = vmatmul.mubr.msk.bf16.vlgmr.msra.gmra.mrb[48].mxu1 %vm1514_vm0, %v1650_v29  ;;  %v1619_v62 = vmul.f32 %v8747_v34, %v9891_v57  ;;  %v1632_v36 = vmul.f32 %v7435_v48, %v1618_v30  ;;  %v1665_v57 = vrot.slane %v1660_v10, %v9945_v5 }
 0x28e   :  { %1786 = vmatprep.mubr.bf16.mxu1 %v12499_v27 }
 0x28f   :  { %v1633_v37 = vmul.f32 %v7435_v48, %v1619_v62  ;;  %v1646_v1 = vadd.f32 %v7436_v58, %v1632_v36 }
 0x291   :  { %v1647_v21 = vadd.f32 %v7436_v58, %v1633_v37 }
 0x293   :  { %v1651_v39 = vpack.c.bf16 %v1647_v21, %v1646_v1 }
 0x295   :  { %7448 = vmatmul.mubr.msk.bf16.gmra.mrb[52].mxu1 %vm1514_vm0, %v1651_v39 }
 0x352   :  { %v1758_v46 = vpop.f32.mrb[48].mxu0 }
 0x353   :  { %v1760_v48 = vpop.f32.mrb[49].mxu0  ;;  %v1759_v52 = vadd.f32 %v1758_v46, %v1665_v57 }
 0x354   :  { %v1762_v38 = vpop.f32.mrb[50].mxu0  ;;  %v1761_v55 = vadd.f32 %v1760_v48, %v1669_v47 }
 0x355   :  { %v1763_v31 = vadd.f32 %v1762_v38, %v1665_v57  ;;  %v1764_v53 = vpop.f32.mrb[51].mxu0 }
 0x356   :  { %v1765_v33 = vadd.f32 %v1764_v53, %v1669_v47 }
 0x357   :  { %v1797_v41 = vpack.c.bf16 %v1763_v31, %v1759_v52 }
 0x358   :  { %v9954_v58 = vpack.c.bf16 %v1765_v33, %v1761_v55 }
 0x359   :  { %1809 = vrot.lane.b32.xlu0 %v1797_v41, %s9221_s2  ;;  %8141 = vmatprep.mubr.msk.bf16.mxu1 %vm1877_vm1, %v1797_v41 }
 0x35a   :  { %v1768_v24 = vpop.f32.mrb[52].mxu0 }
 0x35b   :  { %v1770_v60 = vpop.f32.mrb[53].mxu0  ;;  %v1769_v0 = vadd.f32 %v1768_v24, %v1665_v57 }
 0x35c   :  { %v1772_v63 = vpop.f32.mrb[54].mxu0  ;;  %v1771_v4 = vadd.f32 %v1770_v60, %v1669_v47 }
 0x35d   :  { %v1773_v56 = vadd.f32 %v1772_v63, %v1665_v57  ;;  %v1774_v2 = vpop.f32.mrb[55].mxu0 }
 0x35e   :  { %v1775_v49 = vadd.f32 %v1774_v2, %v1669_v47 }
 0x35f   :  { %v9958_v6 = vpack.c.bf16 %v1773_v56, %v1769_v0 }
 0x360   :  { %v9960_v7 = vpack.c.bf16 %v1775_v49, %v1771_v4  ;;  %v1778_v51 = vpop.f32.mrb[48].mxu1 }
 0x361   :  { %1811 = vrot.lane.b32.xlu1 %v9958_v6, %s9221_s2  ;;  %v1780_v11 = vpop.f32.mrb[49].mxu1  ;;  %v1779_v12 = vadd.f32 %v1778_v51, %v1665_v57 }
 0x362   :  { %v1782_v44 = vpop.f32.mrb[50].mxu1  ;;  %v1781_v17 = vadd.f32 %v1780_v11, %v1669_v47 }
 0x363   :  { %v1783_v14 = vadd.f32 %v1782_v44, %v1665_v57  ;;  %v1784_v16 = vpop.f32.mrb[51].mxu1 }
 0x364   :  { %v1785_v18 = vadd.f32 %v1784_v16, %v1669_v47 }
 0x365   :  { %v9964_v50 = vpack.c.bf16 %v1783_v14, %v1779_v12 }
 0x366   :  { %v9966_v19 = vpack.c.bf16 %v1785_v18, %v1781_v17 }
 0x367   :  { %1813 = vrot.lane.b32.xlu1 %v9964_v50, %s9221_s2 }
 0x368   :  { %v1788_v8 = vpop.f32.mrb[52].mxu1 }
 0x369   :  { %v1790_v20 = vpop.f32.mrb[53].mxu1  ;;  %v1789_v22 = vadd.f32 %v1788_v8, %v1665_v57 }
 0x36a   :  { %v1792_v3 = vpop.f32.mrb[54].mxu1  ;;  %v1791_v54 = vadd.f32 %v1790_v20, %v1669_v47 }
 0x36b   :  { %v1793_v25 = vadd.f32 %v1792_v3, %v1665_v57  ;;  %1817 = vrot.lane.b32.xlu1 %v1797_v41, %s9222_s19  ;;  %v1794_v26 = vpop.f32.mrb[55].mxu1 }
 0x36c   :  { %v1795_v9 = vadd.f32 %v1794_v26, %v1669_v47 }
 0x36d   :  { %v9971_v28 = vpack.c.bf16 %v1793_v25, %v1789_v22 }
 0x36e   :  { %v9973_v29 = vpack.c.bf16 %v1795_v9, %v1791_v54 }
 0x36f   :  { %1819 = vrot.lane.b32.xlu1 %v9958_v6, %s9222_s19  ;;  %1815 = vrot.lane.b32.xlu0 %v9971_v28, %s9221_s2 }
 0x373   :  { %1825 = vrot.lane.b32.xlu1 %v1797_v41, %s9223_s1  ;;  %1821 = vrot.lane.b32.xlu0 %v9964_v50, %s9222_s19 }
 0x377   :  { %1827 = vrot.lane.b32.xlu1 %v9958_v6, %s9223_s1  ;;  %1823 = vrot.lane.b32.xlu0 %v9971_v28, %s9222_s19 }
 0x37b   :  { %1829 = vrot.lane.b32.xlu1 %v9964_v50, %s9223_s1  ;;  %1873 = vrot.lane.b32.xlu0 %v1797_v41, %s9224_s20 }
 0x37f   :  { %1831 = vrot.lane.b32.xlu1 %v9971_v28, %s9223_s1  ;;  %1875 = vrot.lane.b32.xlu0 %v9958_v6, %s9224_s20 }
 0x383   :  { %1939 = vrot.lane.b32.xlu0 %v9964_v50, %s9224_s20 }
 0x387   :  { %1941 = vrot.lane.b32.xlu0 %v9971_v28, %s9224_s20 }
 0x3cb   :  { %v1810_v30 = vpop.permute.xlu0 %1809 }
 0x3cc   :  { %8157 = vmatprep.mubr.msk.bf16.mxu0 %vm1877_vm1, %v1810_v30  ;;  %2004 = vrot.lane.b32.xlu1 %v1810_v30, %s9224_s20 }
 0x3d3   :  { %v1812_v34 = vpop.permute.xlu1 %1811 }
 0x3d4   :  { %2006 = vrot.lane.b32.xlu1 %v1812_v34, %s9224_s20 }
 0x3d9   :  { %v1814_v62 = vpop.permute.xlu1 %1813 }
 0x3da   :  { %2069 = vrot.lane.b32.xlu0 %v1814_v62, %s9224_s20 }
 0x3dd   :  { %v1818_v36 = vpop.permute.xlu1 %1817 }
 0x3de   :  { %2134 = vrot.lane.b32.xlu1 %v1818_v36, %s9224_s20 }
 0x3e1   :  { %v10002_v37 = vpop.permute.xlu1 %1819  ;;  %v10004_v1 = vpop.permute.xlu0 %1815 }
 0x3e2   :  { %2136 = vrot.lane.b32.xlu1 %v10002_v37, %s9224_s20  ;;  %2071 = vrot.lane.b32.xlu0 %v10004_v1, %s9224_s20 }
 0x3e5   :  { %v10010_v21 = vpop.permute.xlu1 %1825  ;;  %v10012_v39 = vpop.permute.xlu0 %1821 }
 0x3e6   :  { %2264 = vrot.lane.b32.xlu1 %v10010_v21, %s9224_s20  ;;  %2199 = vrot.lane.b32.xlu0 %v10012_v39, %s9224_s20 }
 0x3e9   :  { %v10018_v40 = vpop.permute.xlu1 %1827  ;;  %v10020_v23 = vpop.permute.xlu0 %1823 }
 0x3ea   :  { %2266 = vrot.lane.b32.xlu1 %v10018_v40, %s9224_s20  ;;  %2201 = vrot.lane.b32.xlu0 %v10020_v23, %s9224_s20 }
 0x3ed   :  { %v10026_v10 = vpop.permute.xlu1 %1829  ;;  %v1874_v57 = vpop.permute.xlu0 %1873 }
 0x3ee   :  { %2329 = vrot.lane.b32.xlu0 %v10026_v10, %s9224_s20  ;;  %8433 = vmatprep.subr.msk.bf16.mxu1 %vm1877_vm1, %v1874_v57  ;;  %v1885_v46 = vsel %vm1877_vm1, %v1874_v57, 0 }
 0x3ef   :  { %8138 = vmatpush3.bf16.xpose.msra.mxu1 %v1885_v46 }
 0x3f1   :  { %v10032_v47 = vpop.permute.xlu1 %1831  ;;  %v1876_v48 = vpop.permute.xlu0 %1875 }
 0x3f2   :  { %2331 = vrot.lane.b32.xlu1 %v10032_v47, %s9224_s20  ;;  %1837 = vrot.lane.b32.xlu0 %v9954_v58, %s9221_s2  ;;  %v1888_v38 = vsel %vm1877_vm1, %v1876_v48, 0 }
 0x3f3   :  { %8434 = vmatprep.subr.msk.bf16.mxu1 %vm1877_vm1, %v1876_v48 }
 0x3f5   :  { %v1940_v52 = vpop.permute.xlu0 %1939 }
 0x3f6   :  { %1839 = vrot.lane.b32.xlu1 %v9960_v7, %s9221_s2  ;;  %1849 = vrot.lane.b32.xlu0 %v9954_v58, %s9222_s19  ;;  %v1950_v31 = vsel %vm1877_vm1, %v1940_v52, 0 }
 0x3f7   :  { %8140 = vmatpush3.bf16.xpose.msra.mxu1 %v1888_v38 }
 0x3f8   :  { %8435 = vmatprep.subr.msk.bf16.mxu1 %vm1877_vm1, %v1940_v52 }
 0x3f9   :  { %v1942_v53 = vpop.permute.xlu0 %1941 }
 0x3fa   :  { %1841 = vrot.lane.b32.xlu1 %v9966_v19, %s9221_s2  ;;  %1851 = vrot.lane.b32.xlu0 %v9960_v7, %s9222_s19  ;;  %v1953_v55 = vsel %vm1877_vm1, %v1942_v53, 0 }
 0x3fe   :  { %1861 = vrot.lane.b32.xlu1 %v9954_v58, %s9223_s1  ;;  %1843 = vrot.lane.b32.xlu0 %v9973_v29, %s9221_s2 }
 0x3ff   :  { %8142 = vmatmul.mubr.msk.bf16.vlgmr.msra.gmra.mrb[56].mxu1 %vm1877_vm1, %v9958_v6 }
 0x400   :  { %8146 = vmatpush3.bf16.xpose.msra.mxu1 %v1950_v31  ;;  %8149 = vmatprep.mubr.msk.bf16.mxu1 %vm1877_vm1, %v9964_v50 }
 0x401   :  { %8436 = vmatprep.subr.msk.bf16.mxu1 %vm1877_vm1, %v1942_v53 }
 0x402   :  { %1863 = vrot.lane.b32.xlu1 %v9960_v7, %s9223_s1 }
 0x408   :  { %8148 = vmatpush3.bf16.xpose.msra.mxu1 %v1953_v55 }
 0x40f   :  { %8150 = vmatmul.mubr.msk.bf16.vlgmr.msra.gmra.mrb[60].mxu1 %vm1877_vm1, %v9971_v28 }
 0x410   :  { %8165 = vmatprep.mubr.msk.bf16.mxu1 %vm1877_vm1, %v1814_v62 }
 0x43e   :  { %v2005_v33 = vpop.permute.xlu1 %2004 }
 0x43f   :  { %8437 = vmatprep.subr.msk.bf16.mxu0 %vm1877_vm1, %v2005_v33  ;;  %v2015_v41 = vsel %vm1877_vm1, %v2005_v33, 0 }
 0x440   :  { %8154 = vmatpush3.bf16.xpose.msra.mxu0 %v2015_v41 }
 0x446   :  { %v2007_v24 = vpop.permute.xlu1 %2006 }
 0x447   :  { %8438 = vmatprep.subr.msk.bf16.mxu0 %vm1877_vm1, %v2007_v24  ;;  %v2018_v60 = vsel %vm1877_vm1, %v2007_v24, 0 }
 0x448   :  { %8156 = vmatpush3.bf16.xpose.msra.mxu0 %v2018_v60 }
 0x44c   :  { %v2070_v63 = vpop.permute.xlu0 %2069 }
 0x44d   :  { %8439 = vmatprep.subr.msk.bf16.mxu1 %vm1877_vm1, %v2070_v63  ;;  %v2080_v0 = vsel %vm1877_vm1, %v2070_v63, 0 }
 0x44e   :  { %8162 = vmatpush3.bf16.xpose.msra.mxu1 %v2080_v0 }
 0x44f   :  { %8158 = vmatmul.mubr.msk.bf16.vlgmr.msra.gmra.mrb[56].mxu0 %vm1877_vm1, %v1812_v34 }
 0x450   :  { %8173 = vmatprep.mubr.msk.bf16.mxu0 %vm1877_vm1, %v1818_v36  ;;  %v2135_v56 = vpop.permute.xlu1 %2134 }
 0x451   :  { %8441 = vmatprep.subr.msk.bf16.mxu0 %vm1877_vm1, %v2135_v56  ;;  %v2145_v2 = vsel %vm1877_vm1, %v2135_v56, 0 }
 0x452   :  { %8170 = vmatpush3.bf16.xpose.msra.mxu0 %v2145_v2 }
 0x454   :  { %v2137_v4 = vpop.permute.xlu1 %2136  ;;  %v2072_v49 = vpop.permute.xlu0 %2071 }
 0x455   :  { %8440 = vmatprep.subr.msk.bf16.mxu1 %vm1877_vm1, %v2072_v49  ;;  %8442 = vmatprep.subr.msk.bf16.mxu0 %vm1877_vm1, %v2137_v4  ;;  %v2083_v6 = vsel %vm1877_vm1, %v2072_v49, 0  ;;  %v2148_v11 = vsel %vm1877_vm1, %v2137_v4, 0 }
 0x456   :  { %8164 = vmatpush3.bf16.xpose.msra.mxu1 %v2083_v6 }
 0x458   :  { %v2200_v51 = vpop.permute.xlu0 %2199  ;;  %v2265_v44 = vpop.permute.xlu1 %2264 }
 0x459   :  { %8443 = vmatprep.subr.msk.bf16.mxu1 %vm1877_vm1, %v2200_v51  ;;  %v2210_v12 = vsel %vm1877_vm1, %v2200_v51, 0  ;;  %v2275_v16 = vsel %vm1877_vm1, %v2265_v44, 0 }
 0x45a   :  { %8172 = vmatpush3.bf16.xpose.msra.mxu0 %v2148_v11 }
 0x45b   :  { %8445 = vmatprep.subr.msk.bf16.mxu0 %vm1877_vm1, %v2265_v44 }
 0x45c   :  { %v2202_v14 = vpop.permute.xlu0 %2201  ;;  %v2267_v17 = vpop.permute.xlu1 %2266 }
 0x45d   :  { %8166 = vmatmul.mubr.msk.bf16.vlgmr.msra.gmra.mrb[64].mxu1 %vm1877_vm1, %v10004_v1  ;;  %v2213_v18 = vsel %vm1877_vm1, %v2202_v14, 0  ;;  %v2278_v8 = vsel %vm1877_vm1, %v2267_v17, 0 }
 0x45e   :  { %8178 = vmatpush3.bf16.xpose.msra.mxu1 %v2210_v12  ;;  %8181 = vmatprep.mubr.msk.bf16.mxu1 %vm1877_vm1, %v10012_v39 }
 0x45f   :  { %8444 = vmatprep.subr.msk.bf16.mxu1 %vm1877_vm1, %v2202_v14 }
 0x460   :  { %v2330_v50 = vpop.permute.xlu0 %2329 }
 0x461   :  { %8174 = vmatmul.mubr.msk.bf16.vlgmr.msra.gmra.mrb[60].mxu0 %vm1877_vm1, %v10002_v37  ;;  %v2340_v20 = vsel %vm1877_vm1, %v2330_v50, 0 }
 0x462   :  { %8186 = vmatpush3.bf16.xpose.msra.mxu0 %v2275_v16  ;;  %8189 = vmatprep.mubr.msk.bf16.mxu0 %vm1877_vm1, %v10010_v21 }
 0x463   :  { %8446 = vmatprep.subr.msk.bf16.mxu0 %vm1877_vm1, %v2267_v17 }
 0x464   :  { %v2332_v3 = vpop.permute.xlu1 %2331  ;;  %v10108_v25 = vpop.permute.xlu0 %1837 }
 0x465   :  { %v2343_v22 = vsel %vm1877_vm1, %v2332_v3, 0 }
 0x466   :  { %8180 = vmatpush3.bf16.xpose.msra.mxu1 %v2213_v18 }
 0x467   :  { %8447 = vmatprep.subr.msk.bf16.mxu1 %vm1877_vm1, %v2330_v50 }
 0x468   :  { %v10113_v26 = vpop.permute.xlu1 %1839 }
 0x46a   :  { %8188 = vmatpush3.bf16.xpose.msra.mxu0 %v2278_v8 }
 0x46b   :  { %8201 = vmatprep.subr.bf16.mxu0 %v9954_v58 }
 0x46d   :  { %8182 = vmatmul.mubr.msk.bf16.vlgmr.msra.gmra.mrb[68].mxu1 %vm1877_vm1, %v10020_v23 }
 0x46e   :  { %8194 = vmatpush3.bf16.xpose.msra.mxu1 %v2340_v20  ;;  %8197 = vmatprep.mubr.msk.bf16.mxu1 %vm1877_vm1, %v10026_v10 }
 0x46f   :  { %8448 = vmatprep.subr.msk.bf16.mxu1 %vm1877_vm1, %v2332_v3 }
 0x471   :  { %8190 = vmatmul.mubr.msk.bf16.vlgmr.msra.gmra.mrb[64].mxu0 %vm1877_vm1, %v10018_v40 }
 0x472   :  { %8202 = vmatpush3.bf16.msra.mxu0 %v9954_v58  ;;  %v10119_v58 = vpop.permute.xlu1 %1841 }
 0x473   :  { %8203 = vmatprep.subr.bf16.mxu0 %v9960_v7 }
 0x476   :  { %8196 = vmatpush3.bf16.xpose.msra.mxu1 %v2343_v22  ;;  %8204 = vmatpush3.bf16.msra.mxu0 %v9960_v7 }
 0x477   :  { %8209 = vmatprep.subr.bf16.mxu1 %v9966_v19  ;;  %8217 = vmatprep.subr.bf16.mxu0 %v10108_v25 }
 0x47d   :  { %8198 = vmatmul.mubr.msk.bf16.vlgmr.msra.gmra.mrb[72].mxu1 %vm1877_vm1, %v10032_v47 }
 0x47e   :  { %8210 = vmatpush3.bf16.msra.mxu1 %v9966_v19 }
 0x47f   :  { %8211 = vmatprep.subr.bf16.mxu1 %v9973_v29 }
 0x482   :  { %8212 = vmatpush3.bf16.msra.mxu1 %v9973_v29 }
 0x483   :  { %8225 = vmatprep.subr.bf16.mxu1 %v10119_v58 }
 0x4d2   :  { %v10123_v7 = vpop.f32.mrb[56].mxu1 }
 0x4d3   :  { %v10125_v54 = vpop.f32.mrb[57].mxu1  ;;  %v2401_v9 = vsel %vm2394_vm2, %v10123_v7, -inf }
 0x4d4   :  { %2402 = vmax.xlane.f32.xlu0 %v2401_v9  ;;  %v10129_v28 = vpop.f32.mrb[58].mxu1  ;;  %v2395_v62 = vsel %vm2394_vm2, %v10125_v54, -inf }
 0x4d5   :  { %v10131_v30 = vpop.f32.mrb[59].mxu1  ;;  %v2404_v36 = vsel %vm2394_vm2, %v10129_v28, -inf }
 0x4d6   :  { %v2398_v34 = vsel %vm2394_vm2, %v10131_v30, -inf }
 0x4d7   :  { %2399 = vmax.xlane.f32.xlu1 %v2398_v34 }
 0x4d8   :  { %2396 = vmax.xlane.f32.xlu0 %v2395_v62 }
 0x4dc   :  { %2405 = vmax.xlane.f32.xlu0 %v2404_v36 }
 0x4e2   :  { %v10139_v37 = vpop.f32.mrb[60].mxu1 }
 0x4e3   :  { %v10141_v1 = vpop.f32.mrb[61].mxu1  ;;  %v2413_v21 = vsel %vm2394_vm2, %v10139_v37, -inf }
 0x4e4   :  { %2414 = vmax.xlane.f32.xlu0 %v2413_v21  ;;  %v10145_v39 = vpop.f32.mrb[62].mxu1  ;;  %v2407_v10 = vsel %vm2394_vm2, %v10141_v1, -inf }
 0x4e5   :  { %v10147_v40 = vpop.f32.mrb[63].mxu1  ;;  %v2416_v23 = vsel %vm2394_vm2, %v10145_v39, -inf }
 0x4e6   :  { %2417 = vmax.xlane.f32.xlu1 %v2416_v23  ;;  %v2410_v57 = vsel %vm2394_vm2, %v10147_v40, -inf }
 0x4e8   :  { %2408 = vmax.xlane.f32.xlu0 %v2407_v10 }
 0x4ea   :  { %2411 = vmax.xlane.f32.xlu1 %v2410_v57  ;;  %v10233_v57 = vpop.permute.xlu0 %1849 }
 0x522   :  { %v10155_v46 = vpop.f32.mrb[56].mxu0 }
 0x523   :  { %v10157_v47 = vpop.f32.mrb[57].mxu0  ;;  %v2425_v48 = vsel %vm2394_vm2, %v10155_v46, -inf }
 0x524   :  { %v10161_v38 = vpop.f32.mrb[58].mxu0  ;;  %2426 = vmax.xlane.f32.xlu0 %v2425_v48  ;;  %v2419_v53 = vsel %vm2394_vm2, %v10157_v47, -inf }
 0x525   :  { %v10163_v52 = vpop.f32.mrb[59].mxu0  ;;  %v2428_v31 = vsel %vm2394_vm2, %v10161_v38, -inf }
 0x526   :  { %2429 = vmax.xlane.f32.xlu1 %v2428_v31  ;;  %v2422_v55 = vsel %vm2394_vm2, %v10163_v52, -inf }
 0x528   :  { %2420 = vmax.xlane.f32.xlu0 %v2419_v53 }
 0x52a   :  { %2423 = vmax.xlane.f32.xlu1 %v2422_v55 }
 0x530   :  { %v10171_v33 = vpop.f32.mrb[64].mxu1 }
 0x531   :  { %v10173_v41 = vpop.f32.mrb[65].mxu1  ;;  %v2437_v6 = vsel %vm2394_vm2, %v10171_v33, -inf }
 0x532   :  { %v10175_v24 = vpop.f32.mrb[66].mxu1  ;;  %v2431_v16 = vsel %vm2394_vm2, %v10173_v41, -inf }
 0x533   :  { %v10177_v60 = vpop.f32.mrb[67].mxu1  ;;  %v2440_v51 = vsel %vm2394_vm2, %v10175_v24, -inf }
 0x534   :  { %v10179_v63 = vpop.f32.mrb[60].mxu0  ;;  %v2434_v50 = vsel %vm2394_vm2, %v10177_v60, -inf }
 0x535   :  { %v10181_v0 = vpop.f32.mrb[61].mxu0  ;;  %v2449_v56 = vsel %vm2394_vm2, %v10179_v63, -inf }
 0x536   :  { %v10185_v2 = vpop.f32.mrb[62].mxu0  ;;  %2450 = vmax.xlane.f32.xlu0 %v2449_v56  ;;  %v2443_v11 = vsel %vm2394_vm2, %v10181_v0, -inf }
 0x537   :  { %v10187_v4 = vpop.f32.mrb[63].mxu0  ;;  %v2452_v49 = vsel %vm2394_vm2, %v10185_v2, -inf }
 0x538   :  { %2453 = vmax.xlane.f32.xlu1 %v2452_v49  ;;  %v2446_v44 = vsel %vm2394_vm2, %v10187_v4, -inf  ;;  %v10245_v49 = vpop.permute.xlu0 %1851 }
 0x53a   :  { %2438 = vmax.xlane.f32.xlu0 %v2437_v6  ;;  %v10247_v6 = vpop.permute.xlu1 %1861 }
 0x53c   :  { %2441 = vmax.xlane.f32.xlu1 %v2440_v51  ;;  %v10249_v51 = vpop.permute.xlu0 %1843 }
 0x53e   :  { %2444 = vmax.xlane.f32.xlu0 %v2443_v11  ;;  %v10251_v11 = vpop.permute.xlu1 %1863 }
 0x540   :  { %2447 = vmax.xlane.f32.xlu1 %v2446_v44  ;;  %v10199_v12 = vpop.f32.mrb[68].mxu1 }
 0x541   :  { %v10201_v14 = vpop.f32.mrb[69].mxu1  ;;  %v2461_v62 = vsel %vm2394_vm2, %v10199_v12, -inf }
 0x542   :  { %2432 = vmax.xlane.f32.xlu0 %v2431_v16  ;;  %v10205_v17 = vpop.f32.mrb[70].mxu1  ;;  %v2455_v31 = vsel %vm2394_vm2, %v10201_v14, -inf }
 0x543   :  { %v10207_v18 = vpop.f32.mrb[71].mxu1  ;;  %v2464_v36 = vsel %vm2394_vm2, %v10205_v17, -inf }
 0x544   :  { %v10211_v8 = vpop.f32.mrb[64].mxu0  ;;  %2435 = vmax.xlane.f32.xlu1 %v2434_v50  ;;  %v2458_v56 = vsel %vm2394_vm2, %v10207_v18, -inf }
 0x545   :  { %v10213_v20 = vpop.f32.mrb[65].mxu0  ;;  %v2473_v3 = vsel %vm2394_vm2, %v10211_v8, -inf }
 0x546   :  { %v10217_v22 = vpop.f32.mrb[66].mxu0  ;;  %2474 = vmax.xlane.f32.xlu0 %v2473_v3  ;;  %v2467_v21 = vsel %vm2394_vm2, %v10213_v20, -inf }
 0x547   :  { %v10219_v9 = vpop.f32.mrb[67].mxu0  ;;  %v2476_v34 = vsel %vm2394_vm2, %v10217_v22, -inf }
 0x548   :  { %2477 = vmax.xlane.f32.xlu1 %v2476_v34  ;;  %v2470_v23 = vsel %vm2394_vm2, %v10219_v9, -inf }
 0x54a   :  { %2462 = vmax.xlane.f32.xlu0 %v2461_v62 }
 0x54c   :  { %2465 = vmax.xlane.f32.xlu1 %v2464_v36 }
 0x54e   :  { %2468 = vmax.xlane.f32.xlu0 %v2467_v21 }
 0x550   :  { %2471 = vmax.xlane.f32.xlu1 %v2470_v23  ;;  %v10231_v10 = vpop.f32.mrb[72].mxu1 }
 0x551   :  { %v10235_v48 = vpop.f32.mrb[73].mxu1 }
 0x552   :  { %2456 = vmax.xlane.f32.xlu0 %v2455_v31  ;;  %v10239_v53 = vpop.f32.mrb[74].mxu1 }
 0x553   :  { %v10241_v55 = vpop.f32.mrb[75].mxu1 }
 0x554   :  { %2459 = vmax.xlane.f32.xlu1 %v2458_v56 }
 0x561   :  { %v2403_v44 = vpop.xlane.xlu0 %2402 }
 0x562   :  { %v2493_v16 = vsub.f32 %v10123_v7, %v2403_v44 }
 0x564   :  { %v2527_v50 = vmul.f32 1.442695, %v2493_v16  ;;  %v2400_v3 = vpop.xlane.xlu1 %2399 }
 0x565   :  { %v2397_v34 = vpop.xlane.xlu0 %2396  ;;  %v2492_v36 = vsub.f32 %v10131_v30, %v2400_v3 }
 0x566   :  { %8748 = vpow2.f32 %v2527_v50  ;;  %v2491_v62 = vsub.f32 %v10125_v54, %v2397_v34  ;;  %v2479_v50 = vsel %vm2394_vm2, %v10235_v48, -inf  ;;  %v2488_v34 = vsel %vm2394_vm2, %v10239_v53, -inf }
 0x567   :  { %v2525_v56 = vmul.f32 1.442695, %v2492_v36 }
 0x568   :  { %v2523_v21 = vmul.f32 1.442695, %v2491_v62  ;;  %v2482_v62 = vsel %vm2394_vm2, %v10241_v55, -inf }
 0x569   :  { %v2406_v23 = vpop.xlane.xlu0 %2405 }
 0x56a   :  { %8750 = vpow2.f32 %v2523_v21  ;;  %v2494_v31 = vsub.f32 %v10129_v28, %v2406_v23  ;;  %v2485_v28 = vsel %vm2394_vm2, %v10231_v10, -inf }
 0x56c   :  { %v2529_v27 = vmul.f32 1.442695, %v2494_v31 }
 0x56e   :  { %8752 = vpow2.f32 %v2529_v27 }
 0x56f   :  { %8754 = vpow2.f32 %v2525_v56 }
 0x570   :  { %v10257_v45 = vpop.eup %8748 }
 0x571   :  { %v2593_v7 = vsel %vm2394_vm2, %v10257_v45, 0.0  ;;  %v2415_v36 = vpop.xlane.xlu0 %2414 }
 0x572   :  { %2594 = vadd.xlane.f32.xlu0 %v2593_v7  ;;  %v2497_v21 = vsub.f32 %v10139_v37, %v2415_v36 }
 0x573   :  { %v2418_v31 = vpop.xlane.xlu1 %2417 }
 0x574   :  { %v10261_v44 = vpop.eup %8750  ;;  %v2535_v56 = vmul.f32 1.442695, %v2497_v21 }
 0x575   :  { %v2587_v54 = vsel %vm2394_vm2, %v10261_v44, 0.0  ;;  %v2409_v23 = vpop.xlane.xlu0 %2408 }
 0x576   :  { %2588 = vadd.xlane.f32.xlu0 %v2587_v54  ;;  %v2495_v7 = vsub.f32 %v10141_v1, %v2409_v23  ;;  %8756 = vpow2.f32 %v2535_v56  ;;  %v2498_v54 = vsub.f32 %v10145_v39, %v2418_v31 }
 0x578   :  { %v10265_v30 = vpop.eup %8752 }
 0x579   :  { %v2596_v27 = vsel %vm2394_vm2, %v10265_v30, 0.0  ;;  %v10271_v16 = vpop.eup %8754 }
 0x57a   :  { %2486 = vmax.xlane.f32.xlu0 %v2485_v28  ;;  %2597 = vadd.xlane.f32.xlu1 %v2596_v27  ;;  %v2590_v3 = vsel %vm2394_vm2, %v10271_v16, 0.0  ;;  %v2531_v28 = vmul.f32 1.442695, %v2495_v7  ;;  %v2412_v27 = vpop.xlane.xlu1 %2411 }
 0x57c   :  { %8758 = vpow2.f32 %v2531_v28 }
 0x57e   :  { %2480 = vmax.xlane.f32.xlu0 %v2479_v50  ;;  %2591 = vadd.xlane.f32.xlu1 %v2590_v3  ;;  %v2537_v50 = vmul.f32 1.442695, %v2498_v54  ;;  %v2496_v3 = vsub.f32 %v10147_v40, %v2412_v27 }
 0x580   :  { %8760 = vpow2.f32 %v2537_v50 }
 0x582   :  { %2489 = vmax.xlane.f32.xlu1 %v2488_v34  ;;  %v2533_v34 = vmul.f32 1.442695, %v2496_v3 }
 0x584   :  { %8762 = vpow2.f32 %v2533_v34 }
 0x586   :  { %2483 = vmax.xlane.f32.xlu1 %v2482_v62  ;;  %v10289_v62 = vpop.eup %8756 }
 0x587   :  { %v2605_v1 = vsel %vm2394_vm2, %v10289_v62, 0.0  ;;  %v10294_v21 = vpop.eup %8758 }
 0x588   :  { %v2599_v54 = vsel %vm2394_vm2, %v10294_v21, 0.0 }
 0x58a   :  { %v10300_v28 = vpop.eup %8760 }
 0x58e   :  { %v10305_v34 = vpop.eup %8762 }
 0x594   :  { %1853 = vrot.lane.b32.xlu0 %v9966_v19, %s9222_s19 }
 0x597   :  { %1855 = vrot.lane.b32.xlu1 %v9973_v29, %s9222_s19 }
 0x5b1   :  { %v2427_v37 = vpop.xlane.xlu0 %2426 }
 0x5b2   :  { %v2501_v36 = vsub.f32 %v10155_v46, %v2427_v37 }
 0x5b3   :  { %2606 = vadd.xlane.f32.xlu0 %v2605_v1  ;;  %v2430_v39 = vpop.xlane.xlu1 %2429 }
 0x5b4   :  { %v2543_v23 = vmul.f32 1.442695, %v2501_v36  ;;  %v2502_v31 = vsub.f32 %v10161_v38, %v2430_v39  ;;  %v2608_v38 = vsel %vm2394_vm2, %v10300_v28, 0.0 }
 0x5b5   :  { %v2421_v56 = vpop.xlane.xlu0 %2420 }
 0x5b6   :  { %8764 = vpow2.f32 %v2543_v23  ;;  %v2545_v40 = vmul.f32 1.442695, %v2502_v31  ;;  %v2499_v7 = vsub.f32 %v10157_v47, %v2421_v56  ;;  %v2602_v47 = vsel %vm2394_vm2, %v10305_v34, 0.0 }
 0x5b7   :  { %2600 = vadd.xlane.f32.xlu0 %v2599_v54  ;;  %v2424_v46 = vpop.xlane.xlu1 %2423 }
 0x5b8   :  { %8766 = vpow2.f32 %v2545_v40  ;;  %v2539_v27 = vmul.f32 1.442695, %v2499_v7  ;;  %v2500_v50 = vsub.f32 %v10163_v52, %v2424_v46 }
 0x5ba   :  { %8768 = vpow2.f32 %v2539_v27  ;;  %v2541_v3 = vmul.f32 1.442695, %v2500_v50 }
 0x5bb   :  { %2609 = vadd.xlane.f32.xlu1 %v2608_v38 }
 0x5bc   :  { %8770 = vpow2.f32 %v2541_v3 }
 0x5bf   :  { %2603 = vadd.xlane.f32.xlu1 %v2602_v47 }
 0x5c0   :  { %v10309_v37 = vpop.eup %8764 }
 0x5c1   :  { %v2617_v36 = vsel %vm2394_vm2, %v10309_v37, 0.0 }
 0x5c2   :  { %v10313_v1 = vpop.eup %8766  ;;  %2618 = vadd.xlane.f32.xlu0 %v2617_v36 }
 0x5c3   :  { %v2451_v52 = vpop.xlane.xlu0 %2450  ;;  %v2620_v39 = vsel %vm2394_vm2, %v10313_v1, 0.0 }
 0x5c4   :  { %v10317_v23 = vpop.eup %8768  ;;  %v2509_v31 = vsub.f32 %v10179_v63, %v2451_v52  ;;  %2621 = vadd.xlane.f32.xlu1 %v2620_v39 }
 0x5c5   :  { %v2454_v56 = vpop.xlane.xlu1 %2453  ;;  %v2611_v40 = vsel %vm2394_vm2, %v10317_v23, 0.0 }
 0x5c6   :  { %v10322_v7 = vpop.eup %8770  ;;  %v2559_v54 = vmul.f32 1.442695, %v2509_v31  ;;  %v2510_v46 = vsub.f32 %v10185_v2, %v2454_v56  ;;  %2612 = vadd.xlane.f32.xlu0 %v2611_v40 }
 0x5c7   :  { %v2439_v27 = vpop.xlane.xlu0 %2438  ;;  %v2614_v50 = vsel %vm2394_vm2, %v10322_v7, 0.0 }
 0x5c8   :  { %8772 = vpow2.f32 %v2559_v54  ;;  %v2561_v3 = vmul.f32 1.442695, %v2510_v46  ;;  %v2505_v38 = vsub.f32 %v10171_v33, %v2439_v27  ;;  %2615 = vadd.xlane.f32.xlu1 %v2614_v50 }
 0x5c9   :  { %v2442_v63 = vpop.xlane.xlu1 %2441 }
 0x5ca   :  { %8774 = vpow2.f32 %v2561_v3  ;;  %v2551_v47 = vmul.f32 1.442695, %v2505_v38  ;;  %v2506_v36 = vsub.f32 %v10175_v24, %v2442_v63 }
 0x5cb   :  { %v2445_v52 = vpop.xlane.xlu0 %2444 }
 0x5cc   :  { %8776 = vpow2.f32 %v2551_v47  ;;  %v2553_v39 = vmul.f32 1.442695, %v2506_v36  ;;  %v2507_v2 = vsub.f32 %v10181_v0, %v2445_v52 }
 0x5cd   :  { %v2448_v31 = vpop.xlane.xlu1 %2447 }
 0x5ce   :  { %8778 = vpow2.f32 %v2553_v39  ;;  %v2555_v56 = vmul.f32 1.442695, %v2507_v2  ;;  %v2508_v40 = vsub.f32 %v10187_v4, %v2448_v31 }
 0x5cf   :  { %v2433_v54 = vpop.xlane.xlu0 %2432 }
 0x5d0   :  { %8780 = vpow2.f32 %v2555_v56  ;;  %v2557_v46 = vmul.f32 1.442695, %v2508_v40  ;;  %v2503_v33 = vsub.f32 %v10173_v41, %v2433_v54 }
 0x5d1   :  { %v2436_v27 = vpop.xlane.xlu1 %2435 }
 0x5d2   :  { %v10332_v50 = vpop.eup %8772  ;;  %8782 = vpow2.f32 %v2557_v46  ;;  %v2547_v24 = vmul.f32 1.442695, %v2503_v33  ;;  %v2504_v3 = vsub.f32 %v10177_v60, %v2436_v27 }
 0x5d3   :  { %v2475_v38 = vpop.xlane.xlu0 %2474  ;;  %v2641_v0 = vsel %vm2394_vm2, %v10332_v50, 0.0 }
 0x5d4   :  { %v10337_v63 = vpop.eup %8774  ;;  %8784 = vpow2.f32 %v2547_v24  ;;  %v2549_v4 = vmul.f32 1.442695, %v2504_v3  ;;  %v2517_v47 = vsub.f32 %v10211_v8, %v2475_v38  ;;  %2642 = vadd.xlane.f32.xlu0 %v2641_v0 }
 0x5d5   :  { %v2478_v36 = vpop.xlane.xlu1 %2477  ;;  %v2644_v41 = vsel %vm2394_vm2, %v10337_v63, 0.0 }
 0x5d6   :  { %v10342_v52 = vpop.eup %8776  ;;  %8786 = vpow2.f32 %v2549_v4  ;;  %v2575_v39 = vmul.f32 1.442695, %v2517_v47  ;;  %2645 = vadd.xlane.f32.xlu1 %v2644_v41  ;;  %v2518_v0 = vsub.f32 %v10217_v22, %v2478_v36 }
 0x5d7   :  { %v2463_v60 = vpop.xlane.xlu0 %2462  ;;  %v2629_v2 = vsel %vm2394_vm2, %v10342_v52, 0.0 }
 0x5d8   :  { %v10346_v31 = vpop.eup %8778  ;;  %8788 = vpow2.f32 %v2575_v39  ;;  %v2513_v56 = vsub.f32 %v10199_v12, %v2463_v60  ;;  %2630 = vadd.xlane.f32.xlu0 %v2629_v2 }
 0x5d9   :  { %v2632_v8 = vsel %vm2394_vm2, %v10346_v31, 0.0  ;;  %v2466_v46 = vpop.xlane.xlu1 %2465 }
 0x5da   :  { %v10351_v40 = vpop.eup %8780  ;;  %v2567_v54 = vmul.f32 1.442695, %v2513_v56  ;;  %2633 = vadd.xlane.f32.xlu1 %v2632_v8  ;;  %v2577_v8 = vmul.f32 1.442695, %v2518_v0  ;;  %v2514_v22 = vsub.f32 %v10205_v17, %v2466_v46 }
 0x5db   :  { %v2469_v33 = vpop.xlane.xlu0 %2468  ;;  %v2635_v27 = vsel %vm2394_vm2, %v10351_v40, 0.0 }
 0x5dc   :  { %v10355_v24 = vpop.eup %8782  ;;  %8790 = vpow2.f32 %v2567_v54  ;;  %v2515_v3 = vsub.f32 %v10213_v20, %v2469_v33  ;;  %2636 = vadd.xlane.f32.xlu0 %v2635_v27 }
 0x5dd   :  { %v2638_v12 = vsel %vm2394_vm2, %v10355_v24, 0.0  ;;  %v2472_v20 = vpop.xlane.xlu1 %2471 }
 0x5de   :  { %v10360_v38 = vpop.eup %8784  ;;  %v2571_v4 = vmul.f32 1.442695, %v2515_v3  ;;  %2639 = vadd.xlane.f32.xlu1 %v2638_v12  ;;  %v2516_v27 = vsub.f32 %v10219_v9, %v2472_v20 }
 0x5df   :  { %v2457_v47 = vpop.xlane.xlu0 %2456  ;;  %v2623_v41 = vsel %vm2394_vm2, %v10360_v38, 0.0 }
 0x5e0   :  { %v10365_v39 = vpop.eup %8786  ;;  %8792 = vpow2.f32 %v2571_v4  ;;  %v2511_v60 = vsub.f32 %v10201_v14, %v2457_v47  ;;  %2624 = vadd.xlane.f32.xlu0 %v2623_v41  ;;  %v2569_v14 = vmul.f32 1.442695, %v2514_v22  ;;  %v2573_v17 = vmul.f32 1.442695, %v2516_v27 }
 0x5e1   :  { %v2626_v2 = vsel %vm2394_vm2, %v10365_v39, 0.0  ;;  %v2460_v3 = vpop.xlane.xlu1 %2459 }
 0x5e2   :  { %v10370_v56 = vpop.eup %8788  ;;  %v2563_v36 = vmul.f32 1.442695, %v2511_v60  ;;  %2627 = vadd.xlane.f32.xlu1 %v2626_v2  ;;  %v2512_v46 = vsub.f32 %v10207_v18, %v2460_v3 }
 0x5e3   :  { %v2665_v54 = vsel %vm2394_vm2, %v10370_v56, 0.0 }
 0x5e4   :  { %8794 = vpow2.f32 %v2563_v36  ;;  %2666 = vadd.xlane.f32.xlu0 %v2665_v54  ;;  %v2565_v41 = vmul.f32 1.442695, %v2512_v46 }
 0x5e5   :  { %8796 = vpow2.f32 %v2577_v8 }
 0x5e6   :  { %v10375_v33 = vpop.eup %8790  ;;  %8798 = vpow2.f32 %v2569_v14 }
 0x5e7   :  { %v2653_v12 = vsel %vm2394_vm2, %v10375_v33, 0.0  ;;  %8800 = vpow2.f32 %v2573_v17 }
 0x5e8   :  { %2654 = vadd.xlane.f32.xlu1 %v2653_v12  ;;  %8802 = vpow2.f32 %v2565_v41 }
 0x5ea   :  { %v10380_v0 = vpop.eup %8792 }
 0x5eb   :  { %v2659_v4 = vsel %vm2394_vm2, %v10380_v0, 0.0 }
 0x5ec   :  { %2660 = vadd.xlane.f32.xlu0 %v2659_v4 }
 0x5ee   :  { %v10385_v47 = vpop.eup %8794 }
 0x5ef   :  { %v2647_v9 = vsel %vm2394_vm2, %v10385_v47, 0.0  ;;  %v10389_v60 = vpop.eup %8796 }
 0x5f0   :  { %2648 = vadd.xlane.f32.xlu1 %v2647_v9  ;;  %v2668_v20 = vsel %vm2394_vm2, %v10389_v60, 0.0  ;;  %v10393_v2 = vpop.eup %8798 }
 0x5f1   :  { %v2656_v18 = vsel %vm2394_vm2, %v10393_v2, 0.0  ;;  %v10397_v8 = vpop.eup %8800 }
 0x5f2   :  { %v2662_v22 = vsel %vm2394_vm2, %v10397_v8, 0.0  ;;  %v10401_v36 = vpop.eup %8802 }
 0x5f3   :  { %v2650_v14 = vsel %vm2394_vm2, %v10401_v36, 0.0 }
 0x5f4   :  { %2669 = vadd.xlane.f32.xlu1 %v2668_v20 }
 0x5f8   :  { %2657 = vadd.xlane.f32.xlu1 %v2656_v18 }
 0x5fc   :  { %2663 = vadd.xlane.f32.xlu1 %v2662_v22 }
 0x5ff   :  { %v2595_v54 = vpop.xlane.xlu0 %2594 }
 0x600   :  { %2651 = vadd.xlane.f32.xlu1 %v2650_v14  ;;  %8804 = vrcp.f32 %v2595_v54 }
 0x603   :  { %v2589_v27 = vpop.xlane.xlu0 %2588 }
 0x607   :  { %v2598_v3 = vpop.xlane.xlu1 %2597  ;;  %v2487_v12 = vpop.xlane.xlu0 %2486 }
 0x608   :  { %v2521_v17 = vsub.f32 %v10231_v10, %v2487_v12  ;;  %8806 = vrcp.f32 %v2598_v3 }
 0x609   :  { %8808 = vrcp.f32 %v2589_v27 }
 0x60a   :  { %v2583_v46 = vmul.f32 1.442695, %v2521_v17  ;;  %v8805_v5 = vpop.eup %8804 }
 0x60b   :  { %v2592_v4 = vpop.xlane.xlu1 %2591  ;;  %v2481_v41 = vpop.xlane.xlu0 %2480 }
 0x60c   :  { %8810 = vpow2.f32 %v2583_v46  ;;  %v2519_v9 = vsub.f32 %v10235_v48, %v2481_v41 }
 0x60d   :  { %8812 = vrcp.f32 %v2592_v4  ;;  %v2717_v4 = vmul.f32 %v8805_v5, %v10257_v45 }
 0x60e   :  { %v2579_v20 = vmul.f32 1.442695, %v2519_v9 }
 0x60f   :  { %v2490_v18 = vpop.xlane.xlu1 %2489 }
 0x610   :  { %8814 = vpow2.f32 %v2579_v20  ;;  %v2522_v22 = vsub.f32 %v10239_v53, %v2490_v18 }
 0x612   :  { %v2585_v14 = vmul.f32 1.442695, %v2522_v22  ;;  %v8807_v15 = vpop.eup %8806 }
 0x613   :  { %v2484_v35 = vpop.xlane.xlu1 %2483  ;;  %v8809_v54 = vpop.eup %8808  ;;  %v2718_v48 = vmul.f32 %v8807_v15, %v10265_v30 }
 0x614   :  { %8816 = vpow2.f32 %v2585_v14  ;;  %v2520_v10 = vsub.f32 %v10241_v55, %v2484_v35  ;;  %v2715_v53 = vmul.f32 %v8809_v54, %v10261_v44 }
 0x615   :  { %v2748_v55 = vpack.c.bf16 %v2718_v48, %v2717_v4 }
 0x616   :  { %v10409_v27 = vpop.eup %8810  ;;  %v2581_v3 = vmul.f32 1.442695, %v2520_v10 }
 0x617   :  { %v8813_v12 = vpop.eup %8812  ;;  %v2677_v17 = vsel %vm2394_vm2, %v10409_v27, 0.0 }
 0x618   :  { %8818 = vpow2.f32 %v2581_v3  ;;  %2678 = vadd.xlane.f32.xlu0 %v2677_v17  ;;  %v2716_v46 = vmul.f32 %v8813_v12, %v10271_v16  ;;  %v10441_v16 = vpop.permute.xlu1 %1855 }
 0x61a   :  { %v10417_v41 = vpop.eup %8814  ;;  %v2747_v35 = vpack.c.bf16 %v2716_v46, %v2715_v53 }
 0x61b   :  { %v2671_v9 = vsel %vm2394_vm2, %v10417_v41, 0.0 }
 0x61c   :  { %8205 = vmatprep.mubr.msk.bf16.mxu0 %vm2394_vm2, %v2747_v35  ;;  %2672 = vadd.xlane.f32.xlu0 %v2671_v9 }
 0x61d   :  { %8206 = vmatmul.mubr.msk.bf16.vlgmr.msra.gmra.mrb[68].mxu0 %vm2394_vm2, %v2748_v55 }
 0x61e   :  { %v10423_v15 = vpop.eup %8816  ;;  %8218 = vmatpush3.bf16.msra.mxu0 %v10108_v25  ;;  %v10439_v25 = vpop.permute.xlu0 %1853 }
 0x61f   :  { %8219 = vmatprep.subr.bf16.mxu0 %v10113_v26  ;;  %v2680_v5 = vsel %vm2394_vm2, %v10423_v15, 0.0 }
 0x620   :  { %2681 = vadd.xlane.f32.xlu0 %v2680_v5 }
 0x622   :  { %v10429_v45 = vpop.eup %8818  ;;  %8220 = vmatpush3.bf16.msra.mxu0 %v10113_v26 }
 0x623   :  { %8233 = vmatprep.subr.bf16.mxu0 %v10233_v57  ;;  %v2674_v44 = vsel %vm2394_vm2, %v10429_v45, 0.0 }
 0x624   :  { %2675 = vadd.xlane.f32.xlu1 %v2674_v44 }
 0x635   :  { %1867 = vrot.lane.b32.xlu1 %v9973_v29, %s9223_s1 }
 0x636   :  { %1865 = vrot.lane.b32.xlu0 %v9966_v19, %s9223_s1 }
 0x640   :  { %v2607_v30 = vpop.xlane.xlu0 %2606 }
 0x644   :  { %v2601_v20 = vpop.xlane.xlu0 %2600 }
 0x648   :  { %v2610_v18 = vpop.xlane.xlu1 %2609 }
 0x649   :  { %8820 = vrcp.f32 %v2610_v18 }
 0x64a   :  { %8822 = vrcp.f32 %v2601_v20 }
 0x64b   :  { %8824 = vrcp.f32 %v2607_v30 }
 0x64c   :  { %v2604_v26 = vpop.xlane.xlu1 %2603 }
 0x64d   :  { %8826 = vrcp.f32 %v2604_v26 }
 0x64f   :  { %v2619_v22 = vpop.xlane.xlu0 %2618 }
 0x651   :  { %v2622_v14 = vpop.xlane.xlu1 %2621 }
 0x652   :  { %8828 = vrcp.f32 %v2622_v14 }
 0x653   :  { %v2613_v10 = vpop.xlane.xlu0 %2612  ;;  %v8821_v29 = vpop.eup %8820 }
 0x654   :  { %8830 = vrcp.f32 %v2613_v10  ;;  %v8823_v54 = vpop.eup %8822  ;;  %v2722_v48 = vmul.f32 %v8821_v29, %v10300_v28 }
 0x655   :  { %8832 = vrcp.f32 %v2619_v22  ;;  %v2616_v19 = vpop.xlane.xlu1 %2615  ;;  %v8825_v3 = vpop.eup %8824  ;;  %v2719_v17 = vmul.f32 %v8823_v54, %v10294_v21 }
 0x656   :  { %8834 = vrcp.f32 %v2616_v19  ;;  %v2721_v46 = vmul.f32 %v8825_v3, %v10289_v62 }
 0x657   :  { %v8827_v12 = vpop.eup %8826 }
 0x658   :  { %v2720_v53 = vmul.f32 %v8827_v12, %v10305_v34  ;;  %v2750_v35 = vpack.c.bf16 %v2722_v48, %v2721_v46 }
 0x65a   :  { %v2749_v4 = vpack.c.bf16 %v2720_v53, %v2719_v17 }
 0x65c   :  { %8213 = vmatprep.mubr.msk.bf16.mxu1 %vm2394_vm2, %v2749_v4  ;;  %v8829_v55 = vpop.eup %8828 }
 0x65d   :  { %8214 = vmatmul.mubr.msk.bf16.vlgmr.msra.gmra.mrb[76].mxu1 %vm2394_vm2, %v2750_v35  ;;  %v2726_v21 = vmul.f32 %v8829_v55, %v10313_v1 }
 0x65e   :  { %v8831_v9 = vpop.eup %8830  ;;  %8226 = vmatpush3.bf16.msra.mxu1 %v10119_v58 }
 0x65f   :  { %v8833_v5 = vpop.eup %8832  ;;  %8227 = vmatprep.subr.bf16.mxu1 %v10249_v51  ;;  %v2723_v34 = vmul.f32 %v8831_v9, %v10317_v23 }
 0x660   :  { %v8835_v28 = vpop.eup %8834  ;;  %v2725_v30 = vmul.f32 %v8833_v5, %v10309_v37 }
 0x661   :  { %v2643_v44 = vpop.xlane.xlu0 %2642  ;;  %v2724_v62 = vmul.f32 %v8835_v28, %v10322_v7 }
 0x662   :  { %8228 = vmatpush3.bf16.msra.mxu1 %v10249_v51  ;;  %v2752_v58 = vpack.c.bf16 %v2726_v21, %v2725_v30 }
 0x663   :  { %8241 = vmatprep.subr.bf16.mxu1 %v10439_v25  ;;  %v2646_v20 = vpop.xlane.xlu1 %2645  ;;  %v2751_v18 = vpack.c.bf16 %v2724_v62, %v2723_v34 }
 0x664   :  { %8836 = vrcp.f32 %v2646_v20 }
 0x665   :  { %8221 = vmatprep.mubr.msk.bf16.mxu0 %vm2394_vm2, %v2751_v18  ;;  %v2631_v26 = vpop.xlane.xlu0 %2630 }
 0x666   :  { %8222 = vmatmul.mubr.msk.bf16.vlgmr.msra.gmra.mrb[72].mxu0 %vm2394_vm2, %v2752_v58 }
 0x667   :  { %8234 = vmatpush3.bf16.msra.mxu0 %v10233_v57  ;;  %v2634_v1 = vpop.xlane.xlu1 %2633 }
 0x668   :  { %8235 = vmatprep.subr.bf16.mxu0 %v10245_v49 }
 0x669   :  { %v2637_v23 = vpop.xlane.xlu0 %2636 }
 0x66a   :  { %8838 = vrcp.f32 %v2637_v23 }
 0x66b   :  { %8840 = vrcp.f32 %v2643_v44  ;;  %8236 = vmatpush3.bf16.msra.mxu0 %v10245_v49  ;;  %v2640_v51 = vpop.xlane.xlu1 %2639 }
 0x66c   :  { %8842 = vrcp.f32 %v2640_v51  ;;  %8249 = vmatprep.subr.bf16.mxu0 %v10247_v6 }
 0x66d   :  { %8844 = vrcp.f32 %v2634_v1  ;;  %v2625_v37 = vpop.xlane.xlu0 %2624 }
 0x66e   :  { %8846 = vrcp.f32 %v2625_v37  ;;  %v8837_v57 = vpop.eup %8836 }
 0x66f   :  { %8848 = vrcp.f32 %v2631_v26  ;;  %v2628_v7 = vpop.xlane.xlu1 %2627  ;;  %v2734_v29 = vmul.f32 %v8837_v57, %v10337_v63 }
 0x670   :  { %8850 = vrcp.f32 %v2628_v7 }
 0x674   :  { %v8839_v22 = vpop.eup %8838 }
 0x675   :  { %v8841_v14 = vpop.eup %8840  ;;  %v2731_v19 = vmul.f32 %v8839_v22, %v10351_v40  ;;  %v2655_v17 = vpop.xlane.xlu1 %2654 }
 0x676   :  { %v8843_v10 = vpop.eup %8842  ;;  %v2733_v12 = vmul.f32 %v8841_v14, %v10332_v50 }
 0x677   :  { %v8845_v54 = vpop.eup %8844  ;;  %v2732_v49 = vmul.f32 %v8843_v10, %v10355_v24 }
 0x678   :  { %v8847_v3 = vpop.eup %8846  ;;  %v2730_v4 = vmul.f32 %v8845_v54, %v10346_v31  ;;  %v2756_v35 = vpack.c.bf16 %v2734_v29, %v2733_v12  ;;  %v2667_v31 = vpop.xlane.xlu0 %2666 }
 0x679   :  { %v8849_v48 = vpop.eup %8848  ;;  %v2755_v53 = vpack.c.bf16 %v2732_v49, %v2731_v19  ;;  %v2727_v55 = vmul.f32 %v8847_v3, %v10360_v38 }
 0x67a   :  { %v8851_v46 = vpop.eup %8850  ;;  %v2729_v40 = vmul.f32 %v8849_v48, %v10342_v52  ;;  %v12522_v48 = vmov 0  }
 0x67b   :  { %8237 = vmatprep.mubr.msk.bf16.mxu0 %vm2394_vm2, %v2755_v53  ;;  %v2728_v63 = vmul.f32 %v8851_v46, %v10365_v39 }
 0x67c   :  { %8238 = vmatmul.mubr.msk.bf16.vlgmr.msra.gmra.mrb[76].mxu0 %vm2394_vm2, %v2756_v35  ;;  %v2754_v9 = vpack.c.bf16 %v2730_v4, %v2729_v40  ;;  %v2661_v52 = vpop.xlane.xlu0 %2660 }
 0x67d   :  { %8250 = vmatpush3.bf16.msra.mxu0 %v10247_v6  ;;  %v2649_v50 = vpop.xlane.xlu1 %2648  ;;  %v2753_v24 = vpack.c.bf16 %v2728_v63, %v2727_v55 }
 0x67e   :  { %8251 = vmatprep.subr.bf16.mxu0 %v10251_v11 }
 0x67f   :  { %8229 = vmatprep.mubr.msk.bf16.mxu1 %vm2394_vm2, %v2753_v24 }
 0x680   :  { %8230 = vmatmul.mubr.msk.bf16.vlgmr.msra.gmra.mrb[80].mxu1 %vm2394_vm2, %v2754_v9 }
 0x681   :  { %8242 = vmatpush3.bf16.msra.mxu1 %v10439_v25  ;;  %8252 = vmatpush3.bf16.msra.mxu0 %v10251_v11  ;;  %v2670_v38 = vpop.xlane.xlu1 %2669 }
 0x682   :  { %8243 = vmatprep.subr.bf16.mxu1 %v10441_v16  ;;  %8852 = vrcp.f32 %v2670_v38 }
 0x683   :  { %8854 = vrcp.f32 %v2661_v52 }
 0x684   :  { %8856 = vrcp.f32 %v2667_v31 }
 0x685   :  { %8244 = vmatpush3.bf16.msra.mxu1 %v10441_v16  ;;  %v2658_v6 = vpop.xlane.xlu1 %2657 }
 0x689   :  { %v2664_v39 = vpop.xlane.xlu1 %2663 }
 0x68a   :  { %8858 = vrcp.f32 %v2664_v39  ;;  %v8657_v39 = vld [vmem:[%s12486_s7 + $0x8] sm:$0xff]  }
 0x68b   :  { %8860 = vrcp.f32 %v2658_v6  ;;  %v8656_v6 = vld [vmem:[%s12486_s7] sm:$0xff]  }
 0x68c   :  { %8862 = vrcp.f32 %v2649_v50  ;;  %v8853_v25 = vpop.eup %8852  ;;  %8265 = vmatprep.subr.bf16.mxu0 %v8656_v6 }
 0x68d   :  { %8864 = vrcp.f32 %v2655_v17  ;;  %v2652_v5 = vpop.xlane.xlu1 %2651  ;;  %v8855_v28 = vpop.eup %8854  ;;  %v2742_v44 = vmul.f32 %v8853_v25, %v10389_v60 }
 0x68e   :  { %8866 = vrcp.f32 %v2652_v5  ;;  %v8857_v11 = vpop.eup %8856  ;;  %v2739_v16 = vmul.f32 %v8855_v28, %v10380_v0  ;;  %v8658_v5 = vld [vmem:[%s12486_s7 + $0x10] sm:$0xff]  }
 0x68f   :  { %v2741_v20 = vmul.f32 %v8857_v11, %v10370_v56  ;;  %v8659_v11 = vld [vmem:[%s12486_s7 + $0x18] sm:$0xff]  }
 0x691   :  { %v2760_v23 = vpack.c.bf16 %v2742_v44, %v2741_v20 }
 0x694   :  { %v8859_v21 = vpop.eup %8858 }
 0x695   :  { %v8861_v34 = vpop.eup %8860  ;;  %v2740_v62 = vmul.f32 %v8859_v21, %v10397_v8 }
 0x696   :  { %v8863_v30 = vpop.eup %8862  ;;  %v2738_v1 = vmul.f32 %v8861_v34, %v10393_v2 }
 0x697   :  { %v8865_v18 = vpop.eup %8864  ;;  %v2759_v58 = vpack.c.bf16 %v2740_v62, %v2739_v16  ;;  %v2735_v51 = vmul.f32 %v8863_v30, %v10385_v47 }
 0x698   :  { %v8867_v26 = vpop.eup %8866  ;;  %v2737_v37 = vmul.f32 %v8865_v18, %v10375_v33 }
 0x699   :  { %8253 = vmatprep.mubr.msk.bf16.mxu0 %vm2394_vm2, %v2759_v58  ;;  %v2736_v60 = vmul.f32 %v8867_v26, %v10401_v36 }
 0x69a   :  { %8254 = vmatmul.mubr.msk.bf16.vlgmr.msra.gmra.mrb[80].mxu0 %vm2394_vm2, %v2760_v23  ;;  %v2758_v8 = vpack.c.bf16 %v2738_v1, %v2737_v37 }
 0x69b   :  { %v2757_v0 = vpack.c.bf16 %v2736_v60, %v2735_v51  ;;  %8266 = vmatpush3.bf16.msra.mxu0 %v8656_v6 }
 0x69c   :  { %8267 = vmatprep.subr.bf16.mxu0 %v8657_v39 }
 0x69d   :  { %8245 = vmatprep.mubr.msk.bf16.mxu1 %vm2394_vm2, %v2757_v0 }
 0x69e   :  { %8246 = vmatmul.mubr.msk.bf16.vlgmr.msra.gmra.mrb[84].mxu1 %vm2394_vm2, %v2758_v8 }
 0x69f   :  { %8268 = vmatpush3.bf16.msra.mxu0 %v8657_v39 }
 0x6a0   :  { %8269 = vmatprep.subr.bf16.mxu0 %v8658_v5 }
 0x6a3   :  { %8270 = vmatpush3.bf16.msra.mxu0 %v8658_v5 }
 0x6a4   :  { %8271 = vmatprep.subr.bf16.mxu0 %v8659_v11 }
 0x6a5   :  { %v2679_v56 = vpop.xlane.xlu0 %2678 }
 0x6a7   :  { %8272 = vmatpush3.bf16.msra.mxu0 %v8659_v11 }
 0x6a9   :  { %v2673_v7 = vpop.xlane.xlu0 %2672 }
 0x6ad   :  { %v2682_v2 = vpop.xlane.xlu0 %2681 }
 0x6ae   :  { %8868 = vrcp.f32 %v2682_v2 }
 0x6af   :  { %8870 = vrcp.f32 %v2673_v7 }
 0x6b0   :  { %8872 = vrcp.f32 %v2679_v56 }
 0x6b1   :  { %v2676_v57 = vpop.xlane.xlu1 %2675  ;;  %v1866_v47 = vpop.permute.xlu0 %1865 }
 0x6b2   :  { %8874 = vrcp.f32 %v2676_v57  ;;  %8257 = vmatprep.subr.bf16.mxu1 %v1866_v47 }
 0x6b3   :  { %8258 = vmatpush3.bf16.msra.mxu1 %v1866_v47 }
 0x6b5   :  { %v1868_v33 = vpop.permute.xlu1 %1867 }
 0x6b6   :  { %8259 = vmatprep.subr.bf16.mxu1 %v1868_v33 }
 0x6b7   :  { %8260 = vmatpush3.bf16.msra.mxu1 %v1868_v33 }
 0x6b8   :  { %v8869_v36 = vpop.eup %8868 }
 0x6b9   :  { %v8871_v22 = vpop.eup %8870  ;;  %v2746_v29 = vmul.f32 %v8869_v36, %v10423_v15 }
 0x6ba   :  { %v8873_v14 = vpop.eup %8872  ;;  %v2743_v54 = vmul.f32 %v8871_v22, %v10417_v41 }
 0x6bb   :  { %v2745_v49 = vmul.f32 %v8873_v14, %v10409_v27 }
 0x6bc   :  { %v8875_v10 = vpop.eup %8874 }
 0x6bd   :  { %v2744_v19 = vmul.f32 %v8875_v10, %v10429_v45  ;;  %v2762_v12 = vpack.c.bf16 %v2746_v29, %v2745_v49 }
 0x6bf   :  { %v2761_v3 = vpack.c.bf16 %v2744_v19, %v2743_v54 }
 0x6c1   :  { %8261 = vmatprep.mubr.msk.bf16.mxu1 %vm2394_vm2, %v2761_v3 }
 0x6c2   :  { %8262 = vmatmul.mubr.msk.bf16.vlgmr.msra.gmra.mrb[88].mxu1 %vm2394_vm2, %v2762_v12 }
 0x6c3   :  { %3646 = vmatprep.mubr.bf16.mxu1 %v12522_v48 }
 0x6f0   :  { %v10500_v17 = vpop.f32.mrb[68].mxu0 }
 0x6f1   :  { %v10502_v53 = vpop.f32.mrb[69].mxu0 }
 0x6f2   :  { %v10504_v46 = vpop.f32.mrb[70].mxu0 }
 0x6f3   :  { %v3204_v41 = vpack.c.bf16 %v10504_v46, %v10500_v17  ;;  %v10508_v15 = vpop.f32.mrb[71].mxu0 }
 0x6f4   :  { %v3203_v27 = vpack.c.bf16 %v10508_v15, %v10502_v53 }
 0x730   :  { %v10512_v45 = vpop.f32.mrb[76].mxu1 }
 0x731   :  { %v10514_v4 = vpop.f32.mrb[77].mxu1 }
 0x732   :  { %v10516_v35 = vpop.f32.mrb[78].mxu1 }
 0x733   :  { %v3206_v55 = vpack.c.bf16 %v10516_v35, %v10512_v45  ;;  %v10520_v63 = vpop.f32.mrb[79].mxu1 }
 0x734   :  { %v3205_v40 = vpack.c.bf16 %v10520_v63, %v10514_v4  ;;  %v7481_v4 = vld [vmem:[%s12487_s8] ss:$0 sm:$0xff] }
 0x739   :  { %v8223_v50 = vpop.f32.mrb[72].mxu0 }
 0x73a   :  { %v2913_v24 = vpop.f32.mrb[73].mxu0 }
 0x73b   :  { %v8224_v9 = vpop.f32.mrb[74].mxu0 }
 0x73c   :  { %v3208_v31 = vpack.c.bf16 %v8224_v9, %v8223_v50  ;;  %v2916_v38 = vpop.f32.mrb[75].mxu0 }
 0x73d   :  { %v3207_v52 = vpack.c.bf16 %v2916_v38, %v2913_v24 }
 0x73e   :  { %3225 = vrot.lane.b32.xlu1 %v3208_v31, %s9225_s21 }
 0x73f   :  { %3223 = vrot.lane.b32.xlu0 %v3207_v52, %s9225_s21 }
 0x74f   :  { %v8239_v25 = vpop.f32.mrb[76].mxu0 }
 0x750   :  { %v3023_v28 = vpop.f32.mrb[77].mxu0 }
 0x751   :  { %v8240_v21 = vpop.f32.mrb[78].mxu0 }
 0x752   :  { %v3212_v44 = vpack.c.bf16 %v8240_v21, %v8239_v25  ;;  %v3026_v34 = vpop.f32.mrb[79].mxu0 }
 0x753   :  { %v3211_v16 = vpack.c.bf16 %v3026_v34, %v3023_v28  ;;  %v8231_v62 = vpop.f32.mrb[80].mxu1 }
 0x754   :  { %3237 = vrot.lane.b32.xlu1 %v3212_v44, %s9226_s30  ;;  %v2968_v30 = vpop.f32.mrb[81].mxu1 }
 0x755   :  { %3235 = vrot.lane.b32.xlu0 %v3211_v16, %s9226_s30  ;;  %v8232_v20 = vpop.f32.mrb[82].mxu1 }
 0x756   :  { %v3210_v18 = vpack.c.bf16 %v8232_v20, %v8231_v62  ;;  %v2971_v58 = vpop.f32.mrb[83].mxu1 }
 0x757   :  { %v3209_v26 = vpack.c.bf16 %v2971_v58, %v2968_v30 }
 0x76d   :  { %v8255_v1 = vpop.f32.mrb[80].mxu0 }
 0x76e   :  { %v3133_v23 = vpop.f32.mrb[81].mxu0 }
 0x76f   :  { %v8256_v51 = vpop.f32.mrb[82].mxu0 }
 0x770   :  { %v3216_v60 = vpack.c.bf16 %v8256_v51, %v8255_v1  ;;  %v3136_v37 = vpop.f32.mrb[83].mxu0 }
 0x771   :  { %v3215_v0 = vpack.c.bf16 %v3136_v37, %v3133_v23  ;;  %v8247_v8 = vpop.f32.mrb[84].mxu1 }
 0x772   :  { %v3078_v56 = vpop.f32.mrb[85].mxu1  ;;  %3249 = vrot.lane.b32.xlu1 %v3216_v60, %s12507_s0 }
 0x773   :  { %v8248_v7 = vpop.f32.mrb[86].mxu1  ;;  %3247 = vrot.lane.b32.xlu0 %v3215_v0, %s12507_s0 }
 0x774   :  { %v3214_v2 = vpack.c.bf16 %v8248_v7, %v8247_v8  ;;  %v3081_v57 = vpop.f32.mrb[87].mxu1  ;;  %v12523_v7 = vld [vmem:[#allocation5_spill] sm:$0xff] }
 0x775   :  { %v3213_v47 = vpack.c.bf16 %v3081_v57, %v3078_v56 }
 0x776   :  { %3229 = vrot.lane.b32.xlu1 %v3210_v18, %s9225_s21 }
 0x777   :  { %3227 = vrot.lane.b32.xlu0 %v3209_v26, %s9225_s21 }
 0x77a   :  { %3241 = vrot.lane.b32.xlu1 %v3214_v2, %s9226_s30 }
 0x77b   :  { %3239 = vrot.lane.b32.xlu0 %v3213_v47, %s9226_s30  ;;  %v12524_v47 = vld [vmem:[#allocation6_spill] sm:$0xff] }
 0x795   :  { %v8263_v33 = vpop.f32.mrb[88].mxu1 }
 0x796   :  { %v3188_v36 = vpop.f32.mrb[89].mxu1 }
 0x797   :  { %v8264_v22 = vpop.f32.mrb[90].mxu1 }
 0x798   :  { %v3218_v14 = vpack.c.bf16 %v8264_v22, %v8263_v33  ;;  %v3191_v10 = vpop.f32.mrb[91].mxu1 }
 0x799   :  { %v3217_v29 = vpack.c.bf16 %v3191_v10, %v3188_v36 }
 0x79a   :  { %3253 = vrot.lane.b32.xlu1 %v3218_v14, %s12507_s0 }
 0x79b   :  { %3251 = vrot.lane.b32.xlu0 %v3217_v29, %s12507_s0 }
 0x7b0   :  { %v3226_v54 = vpop.permute.xlu1 %3225 }
 0x7b1   :  { %v3224_v19 = vpop.permute.xlu0 %3223  ;;  %v3260_v24 = vsel %vm1877_vm1, %v3204_v41, %v3226_v54 }
 0x7b2   :  { %v3257_v12 = vsel %vm1877_vm1, %v3203_v27, %v3224_v19 }
 0x7c6   :  { %v3238_v49 = vpop.permute.xlu1 %3237 }
 0x7c7   :  { %v3236_v3 = vpop.permute.xlu0 %3235  ;;  %v3270_v38 = vsel %vm2394_vm2, %v3260_v24, %v3238_v49 }
 0x7c8   :  { %v3268_v9 = vsel %vm2394_vm2, %v3257_v12, %v3236_v3 }
 0x7e4   :  { %v3250_v50 = vpop.permute.xlu1 %3249 }
 0x7e5   :  { %v3248_v31 = vpop.permute.xlu0 %3247  ;;  %v3279_v6 = vsel %vm3275_vm3, %v3270_v38, %v3250_v50 }
 0x7e6   :  { %v3277_v52 = vsel %vm3275_vm3, %v3268_v9, %v3248_v31 }
 0x7e7   :  { %8273 = vmatprep.mubr.msk.bf16.mxu0 %vm1514_vm0, %v3277_v52 }
 0x7e8   :  { %8274 = vmatmul.mubr.msk.bf16.vlgmr.msra.gmra.mrb[84].mxu0 %vm1514_vm0, %v3279_v6  ;;  %v3230_v53 = vpop.permute.xlu1 %3229 }
 0x7e9   :  { %v3228_v15 = vpop.permute.xlu0 %3227  ;;  %v3266_v41 = vsel %vm1877_vm1, %v3206_v55, %v3230_v53 }
 0x7ea   :  { %v3263_v17 = vsel %vm1877_vm1, %v3205_v40, %v3228_v15 }
 0x7ec   :  { %v3242_v27 = vpop.permute.xlu1 %3241 }
 0x7ed   :  { %v3240_v39 = vpop.permute.xlu0 %3239  ;;  %v3274_v28 = vsel %vm2394_vm2, %v3266_v41, %v3242_v27  ;;  %v8665_v41 = vld [vmem:[%s12490_s11 + $0x14] ss:$8 sps:$4 sm:$0xff]  }
 0x7ee   :  { %v3272_v5 = vsel %vm2394_vm2, %v3263_v17, %v3240_v39  ;;  %v8662_v17 = vld [vmem:[%s12490_s11 + $0x4] ss:$8 sps:$4 sm:$0xff]  }
 0x7ef   :  { %3614 = vmatprep.subr.bf16.mxu1 %v8662_v17 }
 0x80c   :  { %v3254_v46 = vpop.permute.xlu1 %3253 }
 0x80d   :  { %v3252_v25 = vpop.permute.xlu0 %3251  ;;  %v3283_v21 = vsel %vm3275_vm3, %v3274_v28, %v3254_v46  ;;  %v8660_v46 = vld [vmem:[%s12490_s11] ss:$8 sps:$4 sm:$0xff]   ;;  %v8668_v28 = vld [vmem:[%s12490_s11 + $0x24] ss:$8 sps:$4 sm:$0xff]  }
 0x80e   :  { %v3281_v11 = vsel %vm3275_vm3, %v3272_v5, %v3252_v25  ;;  %3615 = vmatpush1.bf16.msra.mxu1 %v8660_v46  ;;  %v8663_v5 = vld [vmem:[%s12490_s11 + $0x10] ss:$8 sps:$4 sm:$0xff]  }
 0x80f   :  { %8277 = vmatprep.mubr.msk.bf16.mxu0 %vm1514_vm0, %v3281_v11  ;;  %3616 = vmatprep.subr.bf16.mxu1 %v8665_v41 }
 0x810   :  { %8278 = vmatmul.mubr.msk.bf16.gmra.mrb[88].mxu0 %vm1514_vm0, %v3283_v21  ;;  %v8666_v21 = vld [vmem:[%s12490_s11 + $0x20] ss:$8 sps:$4 sm:$0xff]  }
 0x812   :  { %3617 = vmatpush1.bf16.msra.mxu1 %v8663_v5 }
 0x813   :  { %3618 = vmatprep.subr.bf16.mxu1 %v8668_v28 }
 0x816   :  { %3619 = vmatpush1.bf16.msra.mxu1 %v8666_v21 }
 0x8bb   :  { %v8275_v45 = vpop.f32.mrb[84].mxu0 }
 0x8bc   :  { %v3365_v35 = vpop.f32.mrb[85].mxu0  ;;  %v3374_v55 = vadd.f32 %v8275_v45, %v7481_v4  ;;  %v8671_v45 = vld [vmem:[%s12490_s11 + $0x34] ss:$8 sps:$4 sm:$0xff]  }
 0x8bd   :  { %v3366_v63 = vadd.f32 %v7481_v4, %v3365_v35  ;;  %v8276_v40 = vpop.f32.mrb[86].mxu0  ;;  %3620 = vmatprep.subr.bf16.mxu1 %v8671_v45 }
 0x8be   :  { %v3368_v44 = vpop.f32.mrb[87].mxu0  ;;  %v10583_v62 = vadd.f32 %v3374_v55, %v9822_v59  ;;  %v3377_v30 = vadd.f32 %v8276_v40, %v7481_v4 }
 0x8bf   :  { %v10580_v34 = vadd.f32 %v3366_v63, %v9812_v42  ;;  %v3369_v16 = vadd.f32 %v7481_v4, %v3368_v44  ;;  %v8669_v63 = vld [vmem:[%s12490_s11 + $0x30] ss:$8 sps:$4 sm:$0xff]  }
 0x8c0   :  { %v10593_v26 = vadd.f32 %v3377_v30, %v9825_v61  ;;  %v3412_v42 = vsel %vm1514_vm0, %v10583_v62, 0.0  ;;  %3621 = vmatpush1.bf16.msra.mxu1 %v8669_v63 }
 0x8c1   :  { %v10586_v20 = vadd.f32 %v3369_v16, %v9815_v43  ;;  %v3406_v18 = vsel %vm1514_vm0, %v10580_v34, 0.0 }
 0x8c2   :  { %3407 = vadd.xlane.f32.xlu0 %v3406_v18  ;;  %v3415_v59 = vsel %vm1514_vm0, %v10593_v26, 0.0 }
 0x8c3   :  { %v3409_v58 = vsel %vm1514_vm0, %v10586_v20, 0.0 }
 0x8c4   :  { %3410 = vadd.xlane.f32.xlu1 %v3409_v58 }
 0x8c6   :  { %3413 = vadd.xlane.f32.xlu0 %v3412_v42 }
 0x8ca   :  { %3416 = vadd.xlane.f32.xlu0 %v3415_v59 }
 0x8e3   :  { %v8279_v43 = vpop.f32.mrb[88].mxu0 }
 0x8e4   :  { %v3381_v1 = vpop.f32.mrb[89].mxu0  ;;  %v3390_v23 = vadd.f32 %v8279_v43, %v7481_v4 }
 0x8e5   :  { %v3382_v51 = vadd.f32 %v7481_v4, %v3381_v1  ;;  %v8280_v60 = vpop.f32.mrb[90].mxu0 }
 0x8e6   :  { %v3384_v37 = vpop.f32.mrb[91].mxu0  ;;  %v3393_v8 = vadd.f32 %v8280_v60, %v7481_v4  ;;  %v10603_v56 = vadd.f32 %v3390_v23, %v9842_v32 }
 0x8e7   :  { %v10600_v0 = vadd.f32 %v3382_v51, %v9832_v13  ;;  %v3385_v61 = vadd.f32 %v7481_v4, %v3384_v37 }
 0x8e8   :  { %v10611_v33 = vadd.f32 %v3393_v8, %v12524_v47  ;;  %v3424_v13 = vsel %vm1514_vm0, %v10603_v56, 0.0 }
 0x8e9   :  { %v10606_v2 = vadd.f32 %v3385_v61, %v12523_v7  ;;  %v3418_v57 = vsel %vm1514_vm0, %v10600_v0, 0.0 }
 0x8ea   :  { %3419 = vadd.xlane.f32.xlu0 %v3418_v57  ;;  %v3427_v32 = vsel %vm1514_vm0, %v10611_v33, 0.0 }
 0x8eb   :  { %v3421_v36 = vsel %vm1514_vm0, %v10606_v2, 0.0 }
 0x8ec   :  { %3422 = vadd.xlane.f32.xlu1 %v3421_v36 }
 0x8ee   :  { %3425 = vadd.xlane.f32.xlu0 %v3424_v13 }
 0x8f0   :  { %3428 = vadd.xlane.f32.xlu1 %v3427_v32 }
 0x94f   :  { %v3408_v22 = vpop.xlane.xlu0 %3407 }
 0x950   :  { %v3430_v14 = vmul.f32 0.015625, %v3408_v22 }
 0x951   :  { %v3411_v10 = vpop.xlane.xlu1 %3410 }
 0x952   :  { %v10620_v29 = vsub.f32 %v10580_v34, %v3430_v14  ;;  %v3431_v54 = vmul.f32 0.015625, %v3411_v10 }
 0x953   :  { %v3414_v19 = vpop.xlane.xlu0 %3413 }
 0x954   :  { %v10623_v49 = vsub.f32 %v10586_v20, %v3431_v54  ;;  %v3432_v3 = vmul.f32 0.015625, %v3414_v19  ;;  %v3446_v12 = vmul.f32 %v10620_v29, %v10620_v29 }
 0x956   :  { %v10628_v50 = vsub.f32 %v10583_v62, %v3432_v3  ;;  %v3454_v24 = vsel %vm1514_vm0, %v3446_v12, 0.0  ;;  %v3447_v9 = vmul.f32 %v10623_v49, %v10623_v49  ;;  %v7490_v12 = vld [vmem:[%s12488_s9] ss:$0 sm:$0xff] }
 0x957   :  { %3455 = vadd.xlane.f32.xlu0 %v3454_v24  ;;  %v3417_v31 = vpop.xlane.xlu0 %3416 }
 0x958   :  { %v3433_v38 = vmul.f32 0.015625, %v3417_v31  ;;  %v3457_v52 = vsel %vm1514_vm0, %v3447_v9, 0.0  ;;  %v3448_v6 = vmul.f32 %v10628_v50, %v10628_v50 }
 0x959   :  { %3458 = vadd.xlane.f32.xlu1 %v3457_v52 }
 0x95a   :  { %v10637_v53 = vsub.f32 %v10593_v26, %v3433_v38  ;;  %v3460_v15 = vsel %vm1514_vm0, %v3448_v6, 0.0  ;;  %v7491_v6 = vld [vmem:[%s12489_s10] ss:$0 sm:$0xff] }
 0x95b   :  { %3461 = vadd.xlane.f32.xlu0 %v3460_v15 }
 0x95c   :  { %v3449_v27 = vmul.f32 %v10637_v53, %v10637_v53 }
 0x95e   :  { %v3463_v39 = vsel %vm1514_vm0, %v3449_v27, 0.0 }
 0x95f   :  { %3464 = vadd.xlane.f32.xlu1 %v3463_v39 }
 0x977   :  { %v3420_v25 = vpop.xlane.xlu0 %3419 }
 0x978   :  { %v3434_v11 = vmul.f32 0.015625, %v3420_v25 }
 0x979   :  { %v3423_v4 = vpop.xlane.xlu1 %3422 }
 0x97a   :  { %v10665_v35 = vsub.f32 %v10600_v0, %v3434_v11  ;;  %v3435_v55 = vmul.f32 0.015625, %v3423_v4 }
 0x97b   :  { %v3426_v40 = vpop.xlane.xlu0 %3425 }
 0x97c   :  { %v10671_v44 = vsub.f32 %v10606_v2, %v3435_v55  ;;  %v3436_v16 = vmul.f32 0.015625, %v3426_v40  ;;  %v3450_v30 = vmul.f32 %v10665_v35, %v10665_v35 }
 0x97d   :  { %v3429_v18 = vpop.xlane.xlu1 %3428 }
 0x97e   :  { %v10676_v58 = vsub.f32 %v10603_v56, %v3436_v16  ;;  %v3437_v42 = vmul.f32 0.015625, %v3429_v18  ;;  %v3466_v59 = vsel %vm1514_vm0, %v3450_v30, 0.0  ;;  %v3451_v43 = vmul.f32 %v10671_v44, %v10671_v44 }
 0x97f   :  { %3467 = vadd.xlane.f32.xlu0 %v3466_v59 }
 0x980   :  { %v10682_v1 = vsub.f32 %v10611_v33, %v3437_v42  ;;  %v3469_v23 = vsel %vm1514_vm0, %v3451_v43, 0.0  ;;  %v3452_v51 = vmul.f32 %v10676_v58, %v10676_v58 }
 0x981   :  { %3470 = vadd.xlane.f32.xlu1 %v3469_v23 }
 0x982   :  { %v3472_v60 = vsel %vm1514_vm0, %v3452_v51, 0.0  ;;  %v3453_v37 = vmul.f32 %v10682_v1, %v10682_v1 }
 0x983   :  { %3473 = vadd.xlane.f32.xlu0 %v3472_v60 }
 0x984   :  { %v3475_v8 = vsel %vm1514_vm0, %v3453_v37, 0.0 }
 0x985   :  { %3476 = vadd.xlane.f32.xlu1 %v3475_v8 }
 0x9e4   :  { %v3456_v61 = vpop.xlane.xlu0 %3455 }
 0x9e5   :  { %v3478_v7 = vmul.f32 0.015625, %v3456_v61 }
 0x9e6   :  { %v3459_v57 = vpop.xlane.xlu1 %3458 }
 0x9e7   :  { %v3486_v47 = vadd.f32 1e-06, %v3478_v7  ;;  %v3479_v36 = vmul.f32 0.015625, %v3459_v57 }
 0x9e8   :  { %v3462_v13 = vpop.xlane.xlu0 %3461 }
 0x9e9   :  { %8876 = vrsqrt.f32 %v3486_v47  ;;  %v3487_v32 = vadd.f32 1e-06, %v3479_v36  ;;  %v3480_v22 = vmul.f32 0.015625, %v3462_v13 }
 0x9eb   :  { %8878 = vrsqrt.f32 %v3487_v32  ;;  %v3488_v14 = vadd.f32 1e-06, %v3480_v22 }
 0x9ec   :  { %v3465_v10 = vpop.xlane.xlu1 %3464 }
 0x9ed   :  { %8880 = vrsqrt.f32 %v3488_v14  ;;  %v3481_v54 = vmul.f32 0.015625, %v3465_v10  ;;  %v8674_v10 = vld [vmem:[%s12492_s13 + $0x48] sm:$0xff]  }
 0x9ef   :  { %v3489_v19 = vadd.f32 1e-06, %v3481_v54  ;;  %v8675_v54 = vld [vmem:[%s12492_s13 + $0x8] sm:$0xff]  }
 0x9f1   :  { %8882 = vrsqrt.f32 %v3489_v19  ;;  %v8676_v19 = vld [vmem:[%s12492_s13 + $0x50] sm:$0xff]  }
 0x9f3   :  { %v8877_v3 = vpop.eup %8876 }
 0x9f4   :  { %v3502_v24 = vmul.f32 %v8877_v3, %v10620_v29  ;;  %v8677_v3 = vld [vmem:[%s12492_s13 + $0x10] sm:$0xff]  }
 0x9f5   :  { %v8879_v9 = vpop.eup %8878 }
 0x9f6   :  { %v3516_v31 = vmul.f32 %v7490_v12, %v3502_v24  ;;  %v3503_v38 = vmul.f32 %v8879_v9, %v10623_v49  ;;  %v8679_v24 = vld [vmem:[%s12492_s13 + $0x18] sm:$0xff]   ;;  %v8680_v9 = vld [vmem:[%s12492_s13 + $0x60] sm:$0xff]  }
 0x9f7   :  { %v8881_v52 = vpop.eup %8880 }
 0x9f8   :  { %v3517_v15 = vmul.f32 %v7490_v12, %v3503_v38  ;;  %v3530_v27 = vadd.f32 %v7491_v6, %v3516_v31  ;;  %v3504_v17 = vmul.f32 %v8881_v52, %v10628_v50  ;;  %v8681_v31 = vld [vmem:[%s12492_s13 + $0x20] sm:$0xff]   ;;  %v8682_v38 = vld [vmem:[%s12492_s13 + $0x68] sm:$0xff]  }
 0x9f9   :  { %v8683_v52 = vld [vmem:[%s12492_s13 + $0x28] sm:$0xff]  }
 0x9fa   :  { %v3531_v39 = vadd.f32 %v7491_v6, %v3517_v15  ;;  %v3518_v29 = vmul.f32 %v7490_v12, %v3504_v17  ;;  %v8685_v15 = vld [vmem:[%s12492_s13 + $0x30] sm:$0xff]   ;;  %v3550_v17 = vld [vmem:[%s12491_s12] sm:$0x3] }
 0x9fb   :  { %v8883_v46 = vpop.eup %8882 }
 0x9fc   :  { %v3538_v41 = vpack.c.bf16 %v3531_v39, %v3530_v27  ;;  %v3505_v5 = vmul.f32 %v8883_v46, %v10637_v53  ;;  %v3532_v28 = vadd.f32 %v7491_v6, %v3518_v29  ;;  %v8686_v27 = vld [vmem:[%s12492_s13 + $0x78] sm:$0xff]   ;;  %v12525_v46 = vld [vmem:[#allocation7_spill] sm:$0xff] }
 0x9fd   :  { %v8687_v39 = vld [vmem:[%s12492_s13 + $0x38] sm:$0xff]  }
 0x9fe   :  { %7500 = vmatmul.mubr.msk.bf16.vlgmr.msra.gmra.mrb[92].mxu1 %vm1514_vm0, %v3538_v41  ;;  %v3519_v25 = vmul.f32 %v7490_v12, %v3505_v5  ;;  %v10765_v41 = vrot.slane %v3550_v17, %v12525_v46  ;;  %v12526_v5 = vld [vmem:[#allocation8_spill] sm:$0xff] }
 0x9ff   :  { %3656 = vmatprep.mubr.bf16.mxu1 %v12522_v48  ;;  %v10768_v29 = vrot.slane %v3550_v17, %v12526_v5 }
 0xa00   :  { %v3533_v49 = vadd.f32 %v7491_v6, %v3519_v25 }
 0xa02   :  { %v3539_v11 = vpack.c.bf16 %v3533_v49, %v3532_v28 }
 0xa06   :  { %7501 = vmatmul.mubr.msk.bf16.gmra.mrb[96].mxu1 %vm1514_vm0, %v3539_v11 }
 0xa07   :  { %3666 = vmatprep.mubr.bf16.mxu1 %v12522_v48 }
 0xa0c   :  { %v3468_v21 = vpop.xlane.xlu0 %3467 }
 0xa0d   :  { %v3482_v4 = vmul.f32 0.015625, %v3468_v21 }
 0xa0e   :  { %v3471_v50 = vpop.xlane.xlu1 %3470 }
 0xa0f   :  { %v3490_v45 = vadd.f32 1e-06, %v3482_v4  ;;  %v3483_v55 = vmul.f32 0.015625, %v3471_v50 }
 0xa10   :  { %v3474_v63 = vpop.xlane.xlu0 %3473 }
 0xa11   :  { %8884 = vrsqrt.f32 %v3490_v45  ;;  %v3491_v53 = vadd.f32 1e-06, %v3483_v55  ;;  %v3484_v40 = vmul.f32 0.015625, %v3474_v63 }
 0xa12   :  { %v3477_v16 = vpop.xlane.xlu1 %3476 }
 0xa13   :  { %8886 = vrsqrt.f32 %v3491_v53  ;;  %v3492_v30 = vadd.f32 1e-06, %v3484_v40  ;;  %v3485_v18 = vmul.f32 0.015625, %v3477_v16 }
 0xa15   :  { %8888 = vrsqrt.f32 %v3492_v30  ;;  %v3493_v42 = vadd.f32 1e-06, %v3485_v18 }
 0xa17   :  { %8890 = vrsqrt.f32 %v3493_v42 }
 0xa1b   :  { %v8885_v59 = vpop.eup %8884 }
 0xa1c   :  { %v3506_v43 = vmul.f32 %v8885_v59, %v10665_v35 }
 0xa1d   :  { %v8887_v23 = vpop.eup %8886 }
 0xa1e   :  { %v3507_v51 = vmul.f32 %v8887_v23, %v10671_v44  ;;  %v3520_v60 = vmul.f32 %v7490_v12, %v3506_v43 }
 0xa1f   :  { %v8889_v37 = vpop.eup %8888 }
 0xa20   :  { %v3521_v8 = vmul.f32 %v7490_v12, %v3507_v51  ;;  %v3534_v7 = vadd.f32 %v7491_v6, %v3520_v60  ;;  %v3508_v47 = vmul.f32 %v8889_v37, %v10676_v58  ;;  %v8672_v58 = vld [vmem:[%s12492_s13 + $0x40] sm:$0xff]  }
 0xa21   :  { %v8891_v61 = vpop.eup %8890  ;;  %7985 = vmatprep.subr.bf16.mxu0 %v8672_v58 }
 0xa22   :  { %v3535_v57 = vadd.f32 %v7491_v6, %v3521_v8  ;;  %v3509_v36 = vmul.f32 %v8891_v61, %v10682_v1  ;;  %v3522_v22 = vmul.f32 %v7490_v12, %v3508_v47  ;;  %v8673_v1 = vld [vmem:[%s12492_s13] sm:$0xff]  }
 0xa23   :  { %7986 = vmatpush3.bf16.msra.mxu0 %v8673_v1 }
 0xa24   :  { %v3540_v13 = vpack.c.bf16 %v3535_v57, %v3534_v7  ;;  %v3523_v32 = vmul.f32 %v7490_v12, %v3509_v36  ;;  %v3536_v14 = vadd.f32 %v7491_v6, %v3522_v22  ;;  %7987 = vmatprep.subr.bf16.mxu0 %v8674_v10  ;;  %v8678_v12 = vld [vmem:[%s12492_s13 + $0x58] sm:$0xff]  }
 0xa26   :  { %7502 = vmatmul.mubr.msk.bf16.gmra.mrb[100].mxu1 %vm1514_vm0, %v3540_v13  ;;  %v3537_v35 = vadd.f32 %v7491_v6, %v3523_v32  ;;  %v8684_v6 = vld [vmem:[%s12492_s13 + $0x70] sm:$0xff]  }
 0xa27   :  { %3676 = vmatprep.mubr.bf16.mxu1 %v12522_v48  ;;  %7988 = vmatpush3.bf16.msra.mxu0 %v8675_v54 }
 0xa28   :  { %v3541_v44 = vpack.c.bf16 %v3537_v35, %v3536_v14  ;;  %7989 = vmatprep.subr.bf16.mxu0 %v8676_v19 }
 0xa2b   :  { %7990 = vmatpush3.bf16.msra.mxu0 %v8677_v3 }
 0xa2c   :  { %7991 = vmatprep.subr.bf16.mxu0 %v8678_v12 }
 0xa2e   :  { %7503 = vmatmul.mubr.msk.bf16.gmra.mrb[104].mxu1 %vm1514_vm0, %v3541_v44 }
 0xa2f   :  { %4565 = vmatprep.mubr.bf16.mxu1 %v12522_v48  ;;  %7992 = vmatpush3.bf16.msra.mxu0 %v8679_v24 }
 0xa30   :  { %7993 = vmatprep.subr.bf16.mxu0 %v8680_v9 }
 0xa33   :  { %7994 = vmatpush3.bf16.msra.mxu0 %v8681_v31 }
 0xa34   :  { %7995 = vmatprep.subr.bf16.mxu0 %v8682_v38 }
 0xa37   :  { %7996 = vmatpush3.bf16.msra.mxu0 %v8683_v52 }
 0xa38   :  { %7997 = vmatprep.subr.bf16.mxu0 %v8684_v6 }
 0xa3b   :  { %7998 = vmatpush3.bf16.msra.mxu0 %v8685_v15 }
 0xa3c   :  { %7999 = vmatprep.subr.bf16.mxu0 %v8686_v27 }
 0xa3f   :  { %8000 = vmatpush3.bf16.msra.mxu0 %v8687_v39 }
 0xad1   :  { %v3648_v25 = vpop.f32.mrb[92].mxu1 }
 0xad2   :  { %v10771_v49 = vadd.f32 %v3648_v25, %v10765_v41  ;;  %v3650_v28 = vpop.f32.mrb[93].mxu1 }
 0xad3   :  { %v10774_v11 = vadd.f32 %v3650_v28, %v10768_v29  ;;  %v3652_v21 = vpop.f32.mrb[94].mxu1 }
 0xad4   :  { %v10777_v4 = vmul.f32 0.70710677, %v10771_v49  ;;  %v10780_v50 = vadd.f32 %v3652_v21, %v10765_v41  ;;  %v3654_v45 = vpop.f32.mrb[95].mxu1 }
 0xad5   :  { %v10783_v55 = vmul.f32 0.70710677, %v10774_v11  ;;  %v10786_v63 = vadd.f32 %v3654_v45, %v10768_v29 }
 0xad6   :  { %v3703_v53 = vand.u32 2147483647, %v10777_v4  ;;  %v10790_v40 = vmul.f32 0.70710677, %v10780_v50  ;;  %vm4007_vm4 = vcmp.ge.f32.partialorder %v10777_v4, 0.0 }
 0xad7   :  { %v3704_v16 = vand.u32 2147483647, %v10783_v55  ;;  %v10794_v30 = vmul.f32 0.70710677, %v10786_v63  ;;  %vm4008_vm6 = vcmp.ge.f32.partialorder %v10783_v55, 0.0 }
 0xad8   :  { %v3719_v18 = vmul.f32 0.3275911, %v3703_v53  ;;  %v3705_v42 = vand.u32 2147483647, %v10790_v40  ;;  %v3911_v44 = vsub.f32 0.0, %v3703_v53  ;;  %vm4009_vm5 = vcmp.ge.f32.partialorder %v10790_v40, 0.0 }
 0xad9   :  { %v3720_v59 = vmul.f32 0.3275911, %v3704_v16  ;;  %v3706_v43 = vand.u32 2147483647, %v10794_v30  ;;  %v3658_v60 = vpop.f32.mrb[96].mxu1  ;;  %v3912_v19 = vsub.f32 0.0, %v3704_v16 }
 0xada   :  { %v3735_v23 = vadd.f32 1.0, %v3719_v18  ;;  %v3721_v51 = vmul.f32 0.3275911, %v3705_v42  ;;  %v3660_v61 = vpop.f32.mrb[97].mxu1  ;;  %v10799_v13 = vadd.f32 %v3658_v60, %v10765_v41  ;;  %v3927_v9 = vmul.f32 %v3911_v44, %v3703_v53 }
 0xadb   :  { %v3736_v37 = vadd.f32 1.0, %v3720_v59  ;;  %v3722_v8 = vmul.f32 0.3275911, %v3706_v43  ;;  %v3662_v57 = vpop.f32.mrb[98].mxu1  ;;  %v10802_v32 = vadd.f32 %v3660_v61, %v10768_v29  ;;  %v3913_v6 = vsub.f32 0.0, %v3705_v42 }
 0xadc   :  { %8892 = vrcp.f32 %v3735_v23  ;;  %v3737_v7 = vadd.f32 1.0, %v3721_v51  ;;  %v3664_v47 = vpop.f32.mrb[99].mxu1  ;;  %v10805_v22 = vadd.f32 %v3662_v57, %v10765_v41  ;;  %v10808_v35 = vmul.f32 0.70710677, %v10799_v13 }
 0xadd   :  { %8894 = vrcp.f32 %v3736_v37  ;;  %v3738_v36 = vadd.f32 1.0, %v3722_v8  ;;  %v10811_v14 = vmul.f32 0.70710677, %v10802_v32  ;;  %v10817_v1 = vadd.f32 %v3664_v47, %v10768_v29 }
 0xade   :  { %8896 = vrcp.f32 %v3737_v7  ;;  %v10814_v58 = vmul.f32 0.70710677, %v10805_v22  ;;  %v3707_v10 = vand.u32 2147483647, %v10808_v35  ;;  %v3928_v25 = vmul.f32 %v3912_v19, %v3704_v16 }
 0xadf   :  { %8898 = vrcp.f32 %v3738_v36  ;;  %v3708_v54 = vand.u32 2147483647, %v10811_v14  ;;  %v10826_v38 = vmul.f32 0.70710677, %v10817_v1  ;;  %v3914_v45 = vsub.f32 0.0, %v3706_v43 }
 0xae0   :  { %v10822_v3 = vand.u32 2147483647, %v10814_v58  ;;  %v3723_v12 = vmul.f32 0.3275911, %v3707_v10  ;;  %v3943_v59 = vmul.f32 1.442695, %v3927_v9  ;;  %v3929_v37 = vmul.f32 %v3913_v6, %v3705_v42 }
 0xae1   :  { %v3724_v24 = vmul.f32 0.3275911, %v3708_v54  ;;  %v10834_v28 = vand.u32 2147483647, %v10826_v38  ;;  %v3945_v16 = vmul.f32 1.442695, %v3928_v25  ;;  %v3930_v36 = vmul.f32 %v3914_v45, %v3706_v43 }
 0xae2   :  { %v3725_v31 = vmul.f32 0.3275911, %v10822_v3  ;;  %v3739_v15 = vadd.f32 1.0, %v3723_v12  ;;  %v3915_v44 = vsub.f32 0.0, %v3707_v10  ;;  %v3947_v42 = vmul.f32 1.442695, %v3929_v37 }
 0xae3   :  { %v3740_v27 = vadd.f32 1.0, %v3724_v24  ;;  %v3726_v23 = vmul.f32 0.3275911, %v10834_v28  ;;  %vm4010_vm7 = vcmp.ge.f32.partialorder %v10794_v30, 0.0  ;;  %vm4011_vm8 = vcmp.ge.f32.partialorder %v10808_v35, 0.0 }
 0xae4   :  { %8900 = vrcp.f32 %v3739_v15  ;;  %v3741_v53 = vadd.f32 1.0, %v3725_v31  ;;  %v3916_v31 = vsub.f32 0.0, %v3708_v54  ;;  %v3931_v25 = vmul.f32 %v3915_v44, %v3707_v10 }
 0xae5   :  { %8902 = vrcp.f32 %v3740_v27  ;;  %v3742_v7 = vadd.f32 1.0, %v3726_v23  ;;  %vm4012_vm9 = vcmp.ge.f32.partialorder %v10811_v14, 0.0  ;;  %vm4013_vm10 = vcmp.ge.f32.partialorder %v10814_v58, 0.0 }
 0xae6   :  { %v10828_v52 = vpop.eup %8892  ;;  %8904 = vrcp.f32 %v3741_v53  ;;  %v3932_v37 = vmul.f32 %v3916_v31, %v3708_v54  ;;  %vm4014_vm11 = vcmp.ge.f32.partialorder %v10826_v38, 0.0 }
 0xae7   :  { %v10830_v39 = vpop.eup %8894  ;;  %v3767_v17 = vmul.f32 1.0614054, %v10828_v52  ;;  %8906 = vpow2.f32 %v3943_v59 }
 0xae8   :  { %v3768_v21 = vmul.f32 1.0614054, %v10830_v39  ;;  %v10838_v51 = vpop.eup %8896  ;;  %8908 = vrcp.f32 %v3742_v7  ;;  %v3953_v31 = vmul.f32 1.442695, %v3932_v37 }
 0xae9   :  { %v3783_v18 = vadd.f32 -1.4531521, %v3767_v17  ;;  %v3769_v61 = vmul.f32 1.0614054, %v10838_v51  ;;  %v10842_v57 = vpop.eup %8898  ;;  %v10849_v17 = vmul.f32 0.5, %v10771_v49  ;;  %8910 = vpow2.f32 %v3945_v16 }
 0xaea   :  { %v3784_v60 = vadd.f32 -1.4531521, %v3768_v21  ;;  %v3770_v24 = vmul.f32 1.0614054, %v10842_v57  ;;  %v3917_v21 = vsub.f32 0.0, %v10822_v3  ;;  %8912 = vpow2.f32 %v3947_v42 }
 0xaeb   :  { %v3799_v8 = vmul.f32 %v10828_v52, %v3783_v18  ;;  %v3785_v12 = vadd.f32 -1.4531521, %v3769_v61 }
 0xaec   :  { %v3800_v47 = vmul.f32 %v10830_v39, %v3784_v60  ;;  %v3786_v27 = vadd.f32 -1.4531521, %v3770_v24  ;;  %v3949_v60 = vmul.f32 1.442695, %v3930_v36 }
 0xaed   :  { %v3815_v19 = vadd.f32 1.4214138, %v3799_v8  ;;  %v3801_v15 = vmul.f32 %v10838_v51, %v3785_v12 }
 0xaee   :  { %v3816_v9 = vadd.f32 1.4214138, %v3800_v47  ;;  %v3802_v18 = vmul.f32 %v10842_v57, %v3786_v27  ;;  %v10854_v59 = vpop.eup %8900  ;;  %v3951_v47 = vmul.f32 1.442695, %v3931_v25  ;;  %8914 = vpow2.f32 %v3949_v60 }
 0xaef   :  { %v3831_v6 = vmul.f32 %v10828_v52, %v3815_v19  ;;  %v3817_v53 = vadd.f32 1.4214138, %v3801_v15  ;;  %v10856_v8 = vpop.eup %8902  ;;  %v3771_v7 = vmul.f32 1.0614054, %v10854_v59  ;;  %v3933_v19 = vmul.f32 %v3917_v21, %v10822_v3 }
 0xaf0   :  { %v3832_v43 = vmul.f32 %v10830_v39, %v3816_v9  ;;  %v3818_v10 = vadd.f32 1.4214138, %v3802_v18  ;;  %v3772_v44 = vmul.f32 1.0614054, %v10856_v8  ;;  %v10865_v9 = vpop.eup %8904  ;;  %8916 = vpow2.f32 %v3951_v47 }
 0xaf1   :  { %v3847_v45 = vadd.f32 -0.28449672, %v3831_v6  ;;  %v3833_v61 = vmul.f32 %v10838_v51, %v3817_v53  ;;  %v3787_v36 = vadd.f32 -1.4531521, %v3771_v7  ;;  %v3918_v6 = vsub.f32 0.0, %v10834_v28  ;;  %v8907_v15 = vpop.eup %8906 }
 0xaf2   :  { %v3848_v23 = vadd.f32 -0.28449672, %v3832_v43  ;;  %v3834_v54 = vmul.f32 %v10842_v57, %v3818_v10  ;;  %v3788_v42 = vadd.f32 -1.4531521, %v3772_v44  ;;  %v10872_v21 = vpop.eup %8908  ;;  %v3773_v18 = vmul.f32 1.0614054, %v10865_v9 }
 0xaf3   :  { %v3863_v49 = vmul.f32 %v10828_v52, %v3847_v45  ;;  %v3849_v24 = vadd.f32 -0.28449672, %v3833_v61  ;;  %v3803_v25 = vmul.f32 %v10854_v59, %v3787_v36  ;;  %v3774_v44 = vmul.f32 1.0614054, %v10872_v21 }
 0xaf4   :  { %v3864_v16 = vmul.f32 %v10830_v39, %v3848_v23  ;;  %v3850_v3 = vadd.f32 -0.28449672, %v3834_v54  ;;  %v3804_v53 = vmul.f32 %v10856_v8, %v3788_v42  ;;  %v3955_v23 = vmul.f32 1.442695, %v3933_v19 }
 0xaf5   :  { %v3879_v12 = vadd.f32 0.2548296, %v3863_v49  ;;  %v3865_v43 = vmul.f32 %v10838_v51, %v3849_v24  ;;  %v3819_v61 = vadd.f32 1.4214138, %v3803_v25  ;;  %v3789_v7 = vadd.f32 -1.4531521, %v3773_v18 }
 0xaf6   :  { %v3880_v45 = vadd.f32 0.2548296, %v3864_v16  ;;  %v3866_v49 = vmul.f32 %v10842_v57, %v3850_v3  ;;  %v3934_v36 = vmul.f32 %v3918_v6, %v10834_v28  ;;  %8918 = vpow2.f32 %v3953_v31 }
 0xaf7   :  { %v3895_v27 = vmul.f32 %v10828_v52, %v3879_v12  ;;  %v3881_v37 = vadd.f32 0.2548296, %v3865_v43  ;;  %v3820_v52 = vadd.f32 1.4214138, %v3804_v53  ;;  %v8911_v12 = vpop.eup %8910  ;;  %v3835_v54 = vmul.f32 %v10854_v59, %v3819_v61 }
 0xaf8   :  { %v8913_v42 = vpop.eup %8912  ;;  %v3805_v47 = vmul.f32 %v10865_v9, %v3789_v7  ;;  %v3790_v43 = vadd.f32 -1.4531521, %v3774_v44  ;;  %v3882_v18 = vadd.f32 0.2548296, %v3866_v49  ;;  %8920 = vpow2.f32 %v3955_v23 }
 0xaf9   :  { %v3975_v60 = vmul.f32 %v8907_v15, %v3895_v27  ;;  %v3668_v10 = vpop.f32.mrb[100].mxu1  ;;  %v3897_v16 = vmul.f32 %v10838_v51, %v3881_v37  ;;  %v3896_v15 = vmul.f32 %v10830_v39, %v3880_v45  ;;  %v3836_v27 = vmul.f32 %v10856_v8, %v3820_v52  ;;  %v8915_v7 = vpop.eup %8914 }
 0xafa   :  { %v3670_v19 = vpop.f32.mrb[101].mxu1  ;;  %v3821_v28 = vadd.f32 1.4214138, %v3805_v47  ;;  %v3806_v6 = vmul.f32 %v10872_v21, %v3790_v43  ;;  %v3957_v52 = vmul.f32 1.442695, %v3934_v36 }
 0xafb   :  { %v3991_v24 = vsub.f32 1.0, %v3975_v60  ;;  %v10884_v3 = vpop.f32.mrb[102].mxu1  ;;  %v3977_v53 = vmul.f32 %v8913_v42, %v3897_v16  ;;  %v3851_v60 = vadd.f32 -0.28449672, %v3835_v54  ;;  %v3852_v37 = vadd.f32 -0.28449672, %v3836_v27 }
 0xafc   :  { %v10886_v51 = vpop.f32.mrb[103].mxu1  ;;  %v3976_v44 = vmul.f32 %v8911_v12, %v3896_v15  ;;  %v3837_v16 = vmul.f32 %v10865_v9, %v3821_v28  ;;  %v3898_v42 = vmul.f32 %v10842_v57, %v3882_v18  ;;  %v3822_v43 = vadd.f32 1.4214138, %v3806_v6 }
 0xafd   :  { %v4023_v25 = vsub.f32 0.0, %v3991_v24  ;;  %v3993_v45 = vsub.f32 1.0, %v3977_v53  ;;  %v3867_v61 = vmul.f32 %v10854_v59, %v3851_v60  ;;  %v3868_v49 = vmul.f32 %v10856_v8, %v3852_v37 }
 0xafe   :  { %v4057_v12 = vmul.f32 0.5, %v10780_v50  ;;  %8922 = vpow2.f32 %v3957_v52  ;;  %v3992_v53 = vsub.f32 1.0, %v3976_v44  ;;  %v3838_v18 = vmul.f32 %v10872_v21, %v3822_v43 }
 0xaff   :  { %v4039_v39 = vsel %vm4007_vm4, %v3991_v24, %v4023_v25  ;;  %v4025_v31 = vsub.f32 0.0, %v3993_v45  ;;  %v3883_v27 = vadd.f32 0.2548296, %v3867_v61  ;;  %v3884_v4 = vadd.f32 0.2548296, %v3868_v49  ;;  %v8917_v25 = vpop.eup %8916 }
 0xb00   :  { %v4071_v54 = vadd.f32 1.0, %v4039_v39  ;;  %v3853_v24 = vadd.f32 -0.28449672, %v3837_v16  ;;  %v3978_v28 = vmul.f32 %v8915_v7, %v3898_v42  ;;  %v10908_v6 = vadd.f32 %v3668_v10, %v10765_v41 }
 0xb01   :  { %v10896_v47 = vpop.f32.mrb[104].mxu1  ;;  %v4041_v36 = vsel %vm4009_vm5, %v3993_v45, %v4025_v31  ;;  %v3899_v40 = vmul.f32 %v10854_v59, %v3883_v27  ;;  %v3900_v23 = vmul.f32 %v10856_v8, %v3884_v4  ;;  %v10918_v45 = vadd.f32 %v3670_v19, %v10768_v29  ;;  %v8919_v8 = vpop.eup %8918 }
 0xb02   :  { %v10900_v15 = vpop.f32.mrb[105].mxu1  ;;  %v4073_v60 = vadd.f32 1.0, %v4041_v36  ;;  %v3869_v57 = vmul.f32 %v10865_v9, %v3853_v24  ;;  %v10913_v59 = vmul.f32 %v4071_v54, %v10849_v17  ;;  %v3854_v44 = vadd.f32 -0.28449672, %v3838_v18  ;;  %v8921_v36 = vpop.eup %8920 }
 0xb03   :  { %v10904_v37 = vpop.f32.mrb[106].mxu1  ;;  %v3979_v61 = vmul.f32 %v8917_v25, %v3899_v40  ;;  %v10921_v7 = vmul.f32 0.70710677, %v10908_v6  ;;  %v4024_v49 = vsub.f32 0.0, %v3992_v53  ;;  %v3994_v16 = vsub.f32 1.0, %v3978_v28 }
 0xb04   :  { %v10910_v50 = vpop.f32.mrb[107].mxu1  ;;  %v10915_v39 = vmul.f32 %v4073_v60, %v4057_v12  ;;  %v3885_v52 = vadd.f32 0.2548296, %v3869_v57  ;;  %v3980_v31 = vmul.f32 %v8919_v8, %v3900_v23  ;;  %v3870_v17 = vmul.f32 %v10872_v21, %v3854_v44 }
 0xb05   :  { %v10927_v54 = vand.u32 2147483647, %v10921_v7  ;;  %v4056_v19 = vmul.f32 0.5, %v10774_v11  ;;  %v10932_v42 = vmul.f32 0.70710677, %v10918_v45  ;;  %v3995_v27 = vsub.f32 1.0, %v3979_v61 }
 0xb06   :  { %v4103_v10 = vpack.c.bf16 %v10915_v39, %v10913_v59  ;;  %v3901_v4 = vmul.f32 %v10865_v9, %v3885_v52  ;;  %v3886_v24 = vadd.f32 0.2548296, %v3870_v17  ;;  %v4040_v12 = vsel %vm4008_vm6, %v3992_v53, %v4024_v49 }
 0xb07   :  { %v3727_v43 = vmul.f32 0.3275911, %v10927_v54  ;;  %v4058_v40 = vmul.f32 0.5, %v10786_v63  ;;  %v3712_v25 = vand.u32 2147483647, %v10932_v42  ;;  %v4026_v60 = vsub.f32 0.0, %v3994_v16 }
 0xb08   :  { %v8923_v55 = vpop.eup %8922  ;;  %v3996_v11 = vsub.f32 1.0, %v3980_v31  ;;  %v3902_v57 = vmul.f32 %v10872_v21, %v3886_v24  ;;  %v4059_v28 = vmul.f32 0.5, %v10799_v13  ;;  %v4060_v9 = vmul.f32 0.5, %v10802_v32 }
 0xb09   :  { %v3743_v18 = vadd.f32 1.0, %v3727_v43  ;;  %v10943_v23 = vmul.f32 0.5, %v10805_v22  ;;  %v3728_v53 = vmul.f32 0.3275911, %v3712_v25  ;;  %v4027_v61 = vsub.f32 0.0, %v3995_v27 }
 0xb0a   :  { %v3981_v52 = vmul.f32 %v8921_v36, %v3901_v4  ;;  %v3982_v44 = vmul.f32 %v8923_v55, %v3902_v57  ;;  %v4072_v63 = vadd.f32 1.0, %v4040_v12  ;;  %v4042_v21 = vsel %vm4010_vm7, %v3994_v16, %v4026_v60 }
 0xb0b   :  { %8924 = vrcp.f32 %v3743_v18  ;;  %v3744_v8 = vadd.f32 1.0, %v3728_v53  ;;  %v4028_v13 = vsub.f32 0.0, %v3996_v11  ;;  %v10951_v32 = vadd.f32 %v10884_v3, %v10765_v41 }
 0xb0c   :  { %v3998_v49 = vsub.f32 1.0, %v3982_v44  ;;  %v4062_v22 = vmul.f32 0.5, %v10817_v1  ;;  %v10957_v35 = vadd.f32 %v10886_v51, %v10768_v29  ;;  %v10961_v31 = vadd.f32 %v10896_v47, %v10765_v41 }
 0xb0d   :  { %8926 = vrcp.f32 %v3744_v8  ;;  %v4043_v30 = vsel %vm4011_vm8, %v3995_v27, %v4027_v61  ;;  %v3997_v16 = vsub.f32 1.0, %v3981_v52  ;;  %v10965_v3 = vmul.f32 0.70710677, %v10951_v32 }
 0xb0e   :  { %v10967_v17 = vmul.f32 %v4072_v63, %v4056_v19  ;;  %v4074_v4 = vadd.f32 1.0, %v4042_v21  ;;  %v10970_v1 = vmul.f32 0.70710677, %v10957_v35  ;;  %v10973_v51 = vmul.f32 0.70710677, %v10961_v31 }
 0xb0f   :  { %v4044_v47 = vsel %vm4012_vm9, %v3996_v11, %v4028_v13  ;;  %v4030_v24 = vsub.f32 0.0, %v3998_v49  ;;  %v3919_v27 = vsub.f32 0.0, %v10927_v54  ;;  %v3713_v43 = vand.u32 2147483647, %v10965_v3 }
 0xb10   :  { %v4075_v36 = vadd.f32 1.0, %v4043_v30  ;;  %v3920_v12 = vsub.f32 0.0, %v3712_v25  ;;  %v3714_v19 = vand.u32 2147483647, %v10970_v1  ;;  %v3715_v55 = vand.u32 2147483647, %v10973_v51 }
 0xb11   :  { %v4029_v60 = vsub.f32 0.0, %v3997_v16  ;;  %v10982_v57 = vmul.f32 0.5, %v10908_v6  ;;  %v3729_v18 = vmul.f32 0.3275911, %v3713_v43  ;;  %v10986_v14 = vadd.f32 %v10900_v15, %v10768_v29 }
 0xb12   :  { %v4090_v11 = vmul.f32 %v4074_v4, %v4058_v40  ;;  %v4076_v53 = vadd.f32 1.0, %v4044_v47  ;;  %v3730_v61 = vmul.f32 0.3275911, %v3714_v19  ;;  %v3731_v52 = vmul.f32 0.3275911, %v3715_v55 }
 0xb13   :  { %v4046_v63 = vsel %vm4014_vm11, %v3998_v49, %v4030_v24  ;;  %v3935_v8 = vmul.f32 %v3919_v27, %v10927_v54  ;;  %v3745_v21 = vadd.f32 1.0, %v3729_v18  ;;  %v10994_v6 = vmul.f32 0.70710677, %v10986_v14 }
 0xb14   :  { %v10996_v13 = vmul.f32 %v4075_v36, %v4059_v28  ;;  %v3936_v30 = vmul.f32 %v3920_v12, %v3712_v25  ;;  %v3746_v40 = vadd.f32 1.0, %v3730_v61  ;;  %v4045_v4 = vsel %vm4013_vm10, %v3997_v16, %v4029_v60 }
 0xb15   :  { %v10988_v44 = vpop.eup %8924  ;;  %8928 = vrcp.f32 %v3745_v21  ;;  %v3747_v47 = vadd.f32 1.0, %v3731_v52  ;;  %v11002_v38 = vand.u32 2147483647, %v10994_v6  ;;  %v4078_v54 = vadd.f32 1.0, %v4046_v63 }
 0xb16   :  { %v3775_v15 = vmul.f32 1.0614054, %v10988_v44  ;;  %v3921_v27 = vsub.f32 0.0, %v3713_v43  ;;  %8930 = vrcp.f32 %v3746_v40  ;;  %v4092_v28 = vmul.f32 %v4076_v53, %v4060_v9 }
 0xb17   :  { %v11004_v49 = vpop.eup %8926  ;;  %v3959_v36 = vmul.f32 1.442695, %v3935_v8  ;;  %v3732_v25 = vmul.f32 0.3275911, %v11002_v38  ;;  %v4077_v12 = vadd.f32 1.0, %v4045_v4  ;;  %v3922_v60 = vsub.f32 0.0, %v3714_v19 }
 0xb18   :  { %v3791_v24 = vadd.f32 -1.4531521, %v3775_v15  ;;  %v3776_v18 = vmul.f32 1.0614054, %v11004_v49  ;;  %v3961_v16 = vmul.f32 1.442695, %v3936_v30  ;;  %8932 = vrcp.f32 %v3747_v47 }
 0xb19   :  { %v3748_v52 = vadd.f32 1.0, %v3732_v25  ;;  %v11011_v63 = vadd.f32 %v10904_v37, %v10765_v41  ;;  %v4094_v21 = vmul.f32 %v4078_v54, %v4062_v22  ;;  %v3937_v9 = vmul.f32 %v3921_v27, %v3713_v43 }
 0xb1a   :  { %v3807_v58 = vmul.f32 %v10988_v44, %v3791_v24  ;;  %v3792_v61 = vadd.f32 -1.4531521, %v3776_v18  ;;  %v11015_v53 = vadd.f32 %v10910_v50, %v10768_v29  ;;  %v3923_v40 = vsub.f32 0.0, %v3715_v55 }
 0xb1b   :  { %8934 = vrcp.f32 %v3748_v52  ;;  %v11019_v30 = vmul.f32 0.70710677, %v11011_v63  ;;  %v3938_v47 = vmul.f32 %v3922_v60, %v3714_v19  ;;  %v4093_v37 = vmul.f32 %v4077_v12, %v10943_v23 }
 0xb1c   :  { %v3823_v15 = vadd.f32 1.4214138, %v3807_v58  ;;  %v3808_v8 = vmul.f32 %v11004_v49, %v3792_v61  ;;  %8936 = vpow2.f32 %v3959_v36  ;;  %v11023_v41 = vmul.f32 0.70710677, %v11015_v53 }
 0xb1d   :  { %v3717_v29 = vand.u32 2147483647, %v11019_v30  ;;  %v4104_v50 = vpack.c.bf16 %v4090_v11, %v10967_v17  ;;  %8938 = vpow2.f32 %v3961_v16  ;;  %v3963_v54 = vmul.f32 1.442695, %v3937_v9 }
 0xb1e   :  { %v3839_v4 = vmul.f32 %v10988_v44, %v3823_v15  ;;  %v3824_v22 = vadd.f32 1.4214138, %v3808_v8  ;;  %v11029_v24 = vand.u32 2147483647, %v11023_v41  ;;  %v3939_v36 = vmul.f32 %v3923_v40, %v3715_v55 }
 0xb1f   :  { %v11031_v27 = vpop.eup %8928  ;;  %v3733_v18 = vmul.f32 0.3275911, %v3717_v29  ;;  %4278 = vmatprep.mubr.bf16.mxu0 %v4104_v50  ;;  %v4106_v25 = vpack.c.bf16 %v4094_v21, %v4092_v28  ;;  %v3965_v11 = vmul.f32 1.442695, %v3938_v47  ;;  %v3924_v55 = vsub.f32 0.0, %v11002_v38 }
 0xb20   :  { %v3855_v43 = vadd.f32 -0.28449672, %v3839_v4  ;;  %v3840_v19 = vmul.f32 %v11004_v49, %v3824_v22  ;;  %v11034_v23 = vpop.eup %8930  ;;  %v3777_v17 = vmul.f32 1.0614054, %v11031_v27  ;;  %v3734_v58 = vmul.f32 0.3275911, %v11029_v24  ;;  %4279 = vmatmul.mubr.bf16.vlgmr.msra.gmra.mrb[92].mxu0 %v4103_v10 }
 0xb21   :  { %v3778_v60 = vmul.f32 1.0614054, %v11034_v23  ;;  %v3749_v61 = vadd.f32 1.0, %v3733_v18  ;;  %4286 = vmatprep.mubr.bf16.mxu0 %v4106_v25  ;;  %8940 = vpow2.f32 %v3963_v54  ;;  %v3967_v40 = vmul.f32 1.442695, %v3939_v36 }
 0xb22   :  { %v3871_v12 = vmul.f32 %v10988_v44, %v3855_v43  ;;  %v3856_v16 = vadd.f32 -0.28449672, %v3840_v19  ;;  %v3793_v52 = vadd.f32 -1.4531521, %v3777_v17  ;;  %v3750_v21 = vadd.f32 1.0, %v3734_v58  ;;  %v11044_v15 = vpop.eup %8932 }
 0xb23   :  { %v3794_v8 = vadd.f32 -1.4531521, %v3778_v60  ;;  %8942 = vrcp.f32 %v3749_v61  ;;  %v3779_v10 = vmul.f32 1.0614054, %v11044_v15  ;;  %v3940_v50 = vmul.f32 %v3924_v55, %v11002_v38 }
 0xb24   :  { %v3887_v28 = vadd.f32 0.2548296, %v3871_v12  ;;  %v3872_v9 = vmul.f32 %v11004_v49, %v3856_v16  ;;  %v3809_v39 = vmul.f32 %v11031_v27, %v3793_v52  ;;  %8944 = vrcp.f32 %v3750_v21 }
 0xb25   :  { %v11050_v4 = vpop.eup %8934  ;;  %v3810_v22 = vmul.f32 %v11034_v23, %v3794_v8  ;;  %v3925_v43 = vsub.f32 0.0, %v3717_v29  ;;  %8946 = vpow2.f32 %v3965_v11  ;;  %v3795_v36 = vadd.f32 -1.4531521, %v3779_v10 }
 0xb26   :  { %v3903_v59 = vmul.f32 %v10988_v44, %v3887_v28  ;;  %v3888_v47 = vadd.f32 0.2548296, %v3872_v9  ;;  %v8937_v54 = vpop.eup %8936  ;;  %v3825_v19 = vadd.f32 1.4214138, %v3809_v39  ;;  %v3780_v18 = vmul.f32 1.0614054, %v11050_v4 }
 0xb27   :  { %v3826_v12 = vadd.f32 1.4214138, %v3810_v22  ;;  %v4105_v17 = vpack.c.bf16 %v4093_v37, %v10996_v13  ;;  %v8939_v58 = vpop.eup %8938  ;;  %v3811_v60 = vmul.f32 %v11044_v15, %v3795_v36  ;;  %v3926_v38 = vsub.f32 0.0, %v11029_v24 }
 0xb28   :  { %v3983_v44 = vmul.f32 %v8937_v54, %v3903_v59  ;;  %v3904_v25 = vmul.f32 %v11004_v49, %v3888_v47  ;;  %v3841_v16 = vmul.f32 %v11031_v27, %v3825_v19  ;;  %v3796_v61 = vadd.f32 -1.4531521, %v3780_v18 }
 0xb29   :  { %v3842_v11 = vmul.f32 %v11034_v23, %v3826_v12  ;;  %v3969_v28 = vmul.f32 1.442695, %v3940_v50  ;;  %v3941_v52 = vmul.f32 %v3925_v43, %v3717_v29  ;;  %4287 = vmatmul.mubr.bf16.gmra.mrb[96].mxu0 %v4105_v17  ;;  %vm4015_vm12 = vcmp.ge.f32.partialorder %v10921_v7, 0.0 }
 0xb2a   :  { %v3984_v55 = vmul.f32 %v8939_v58, %v3904_v25  ;;  %v3857_v49 = vadd.f32 -0.28449672, %v3841_v16  ;;  %v3827_v21 = vadd.f32 1.4214138, %v3811_v60  ;;  %v3812_v13 = vmul.f32 %v11050_v4, %v3796_v61 }
 0xb2b   :  { %v3999_v37 = vsub.f32 1.0, %v3983_v44  ;;  %v11064_v9 = vmul.f32 0.5, %v10918_v45  ;;  %v3858_v8 = vadd.f32 -0.28449672, %v3842_v11  ;;  %8948 = vpow2.f32 %v3967_v40  ;;  %v8941_v59 = vpop.eup %8940 }
 0xb2c   :  { %vm4016_vm13 = vcmp.ge.f32.partialorder %v10932_v42, 0.0  ;;  %v3873_v39 = vmul.f32 %v11031_v27, %v3857_v49  ;;  %v3843_v29 = vmul.f32 %v11044_v15, %v3827_v21  ;;  %v3828_v10 = vadd.f32 1.4214138, %v3812_v13 }
 0xb2d   :  { %v3942_v47 = vmul.f32 %v3926_v38, %v11029_v24  ;;  %v11070_v22 = vpop.eup %8942  ;;  %v4000_v50 = vsub.f32 1.0, %v3984_v55  ;;  %v3874_v43 = vmul.f32 %v11034_v23, %v3858_v8  ;;  %8950 = vpow2.f32 %v3969_v28 }
 0xb2e   :  { %v3971_v45 = vmul.f32 1.442695, %v3941_v52  ;;  %v11073_v54 = vpop.eup %8944  ;;  %v3889_v40 = vadd.f32 0.2548296, %v3873_v39  ;;  %v3859_v19 = vadd.f32 -0.28449672, %v3843_v29  ;;  %v3844_v36 = vmul.f32 %v11050_v4, %v3828_v10 }
 0xb2f   :  { %v3781_v18 = vmul.f32 1.0614054, %v11070_v22  ;;  %v4031_v44 = vsub.f32 0.0, %v3999_v37  ;;  %v4065_v25 = vmul.f32 0.5, %v10951_v32  ;;  %v3890_v12 = vadd.f32 0.2548296, %v3874_v43  ;;  %v8947_v17 = vpop.eup %8946 }
 0xb30   :  { %v3782_v24 = vmul.f32 1.0614054, %v11073_v54  ;;  %v3905_v58 = vmul.f32 %v11031_v27, %v3889_v40  ;;  %v3875_v16 = vmul.f32 %v11044_v15, %v3859_v19  ;;  %v3860_v60 = vadd.f32 -0.28449672, %v3844_v36 }
 0xb31   :  { %v3973_v61 = vmul.f32 1.442695, %v3942_v47  ;;  %v4032_v38 = vsub.f32 0.0, %v4000_v50  ;;  %v3906_v55 = vmul.f32 %v11034_v23, %v3890_v12  ;;  %v3797_v11 = vadd.f32 -1.4531521, %v3781_v18 }
 0xb32   :  { %v3798_v28 = vadd.f32 -1.4531521, %v3782_v24  ;;  %v3985_v52 = vmul.f32 %v8941_v59, %v3905_v58  ;;  %v3891_v49 = vadd.f32 0.2548296, %v3875_v16  ;;  %v3876_v21 = vmul.f32 %v11050_v4, %v3860_v60 }
 0xb33   :  { %8952 = vpow2.f32 %v3971_v45  ;;  %v4047_v32 = vsel %vm4015_vm12, %v3999_v37, %v4031_v44  ;;  %v3986_v13 = vmul.f32 %v8947_v17, %v3906_v55  ;;  %v3813_v27 = vmul.f32 %v11070_v22, %v3797_v11 }
 0xb34   :  { %v3814_v8 = vmul.f32 %v11073_v54, %v3798_v28  ;;  %v4001_v39 = vsub.f32 1.0, %v3985_v52  ;;  %v3907_v29 = vmul.f32 %v11044_v15, %v3891_v49  ;;  %v3892_v10 = vadd.f32 0.2548296, %v3876_v21 }
 0xb35   :  { %8954 = vpow2.f32 %v3973_v61  ;;  %v8949_v23 = vpop.eup %8948  ;;  %v4048_v59 = vsel %vm4016_vm13, %v4000_v50, %v4032_v38  ;;  %v4002_v47 = vsub.f32 1.0, %v3986_v13  ;;  %v3829_v43 = vadd.f32 1.4214138, %v3813_v27 }
 0xb36   :  { %v3830_v45 = vadd.f32 1.4214138, %v3814_v8  ;;  %v4079_v40 = vadd.f32 1.0, %v4047_v32  ;;  %v4033_v7 = vsub.f32 0.0, %v4001_v39  ;;  %v3987_v37 = vmul.f32 %v8949_v23, %v3907_v29 }
 0xb37   :  { %v3908_v19 = vmul.f32 %v11050_v4, %v3892_v10  ;;  %v8951_v36 = vpop.eup %8950  ;;  %vm4017_vm14 = vcmp.ge.f32.partialorder %v10965_v3, 0.0  ;;  %v4034_v18 = vsub.f32 0.0, %v4002_v47  ;;  %v3845_v15 = vmul.f32 %v11070_v22, %v3829_v43 }
 0xb38   :  { %v3846_v44 = vmul.f32 %v11073_v54, %v3830_v45  ;;  %v4080_v12 = vadd.f32 1.0, %v4048_v59  ;;  %v4049_v24 = vsel %vm4017_vm14, %v4001_v39, %v4033_v7  ;;  %vm4018_vm15 = vcmp.ge.f32.partialorder %v10970_v1, 0.0 }
 0xb39   :  { %v3988_v42 = vmul.f32 %v8951_v36, %v3908_v19  ;;  %v4081_v50 = vadd.f32 1.0, %v4049_v24  ;;  %v4050_v17 = vsel %vm4018_vm15, %v4002_v47, %v4034_v18  ;;  %v3861_v58 = vadd.f32 -0.28449672, %v3845_v15 }
 0xb3a   :  { %v3862_v16 = vadd.f32 -0.28449672, %v3846_v44  ;;  %v4095_v60 = vmul.f32 %v4079_v40, %v10982_v57  ;;  %v4066_v4 = vmul.f32 0.5, %v10957_v35  ;;  %v4082_v61 = vadd.f32 1.0, %v4050_v17 }
 0xb3b   :  { %v4003_v3 = vsub.f32 1.0, %v3987_v37  ;;  %v4097_v38 = vmul.f32 %v4081_v50, %v4065_v25  ;;  %v4004_v55 = vsub.f32 1.0, %v3988_v42  ;;  %v3877_v11 = vmul.f32 %v11070_v22, %v3861_v58 }
 0xb3c   :  { %v3878_v28 = vmul.f32 %v11073_v54, %v3862_v16  ;;  %v4096_v1 = vmul.f32 %v4080_v12, %v11064_v9  ;;  %v4098_v49 = vmul.f32 %v4082_v61, %v4066_v4  ;;  %vm4019_vm4 = vcmp.ge.f32.partialorder %v10973_v51, 0.0 }
 0xb3d   :  { %v8953_v52 = vpop.eup %8952  ;;  %v3893_v21 = vadd.f32 0.2548296, %v3877_v11  ;;  %v4107_v13 = vpack.c.bf16 %v4097_v38, %v4095_v60  ;;  %v4035_v57 = vsub.f32 0.0, %v4003_v3  ;;  %v4036_v39 = vsub.f32 0.0, %v4004_v55 }
 0xb3e   :  { %v3894_v32 = vadd.f32 0.2548296, %v3878_v28  ;;  %v4108_v8 = vpack.c.bf16 %v4098_v49, %v4096_v1  ;;  %vm4020_vm5 = vcmp.ge.f32.partialorder %v10994_v6, 0.0  ;;  %vm4021_vm6 = vcmp.ge.f32.partialorder %v11019_v30, 0.0 }
 0xb3f   :  { %v8955_v27 = vpop.eup %8954  ;;  %v3909_v35 = vmul.f32 %v11070_v22, %v3893_v21  ;;  %v4051_v9 = vsel %vm4019_vm4, %v4003_v3, %v4035_v57  ;;  %v4052_v23 = vsel %vm4020_vm5, %v4004_v55, %v4036_v39  ;;  %vm4022_vm7 = vcmp.ge.f32.partialorder %v11023_v41, 0.0 }
 0xb40   :  { %v3910_v25 = vmul.f32 %v11073_v54, %v3894_v32  ;;  %4294 = vmatprep.mubr.bf16.mxu0 %v4108_v8  ;;  %v4083_v40 = vadd.f32 1.0, %v4051_v9  ;;  %v4084_v7 = vadd.f32 1.0, %v4052_v23  ;;  %v4067_v22 = vmul.f32 0.5, %v10961_v31  ;;  %v7504_v31 = vld [vmem:[%s12493_s14] ss:$0 sm:$0xff] }
 0xb41   :  { %v3989_v29 = vmul.f32 %v8953_v52, %v3909_v35  ;;  %4295 = vmatmul.mubr.bf16.gmra.mrb[100].mxu0 %v4107_v13  ;;  %v4068_v54 = vmul.f32 0.5, %v10986_v14  ;;  %v4069_v6 = vmul.f32 0.5, %v11011_v63  ;;  %v4070_v36 = vmul.f32 0.5, %v11015_v53 }
 0xb42   :  { %v3990_v10 = vmul.f32 %v8955_v27, %v3910_v25  ;;  %v4099_v15 = vmul.f32 %v4083_v40, %v4067_v22 }
 0xb43   :  { %v4005_v59 = vsub.f32 1.0, %v3989_v29  ;;  %v4100_v44 = vmul.f32 %v4084_v7, %v4068_v54 }
 0xb44   :  { %v4006_v47 = vsub.f32 1.0, %v3990_v10 }
 0xb45   :  { %v4037_v43 = vsub.f32 0.0, %v4005_v59 }
 0xb46   :  { %v4038_v45 = vsub.f32 0.0, %v4006_v47 }
 0xb47   :  { %v4053_v37 = vsel %vm4021_vm6, %v4005_v59, %v4037_v43 }
 0xb48   :  { %v4054_v51 = vsel %vm4022_vm7, %v4006_v47, %v4038_v45  ;;  %v4085_v19 = vadd.f32 1.0, %v4053_v37 }
 0xb49   :  { %v4086_v18 = vadd.f32 1.0, %v4054_v51 }
 0xb4a   :  { %v4101_v12 = vmul.f32 %v4085_v19, %v4069_v6 }
 0xb4b   :  { %v4102_v24 = vmul.f32 %v4086_v18, %v4070_v36 }
 0xb4c   :  { %v4109_v30 = vpack.c.bf16 %v4101_v12, %v4099_v15 }
 0xb4d   :  { %v4110_v42 = vpack.c.bf16 %v4102_v24, %v4100_v44 }
 0xb4f   :  { %4302 = vmatprep.mubr.bf16.mxu0 %v4110_v42 }
 0xb50   :  { %4303 = vmatmul.mubr.bf16.gmra.mrb[104].mxu0 %v4109_v30 }
 0xbf3   :  { %v8001_v41 = vpop.f32.mrb[92].mxu0 }
 0xbf4   :  { %v8002_v14 = vpop.f32.mrb[93].mxu0 }
 0xbf5   :  { %v8003_v50 = vadd.f32 %v8002_v14, %v8001_v41  ;;  %v8004_v63 = vpop.f32.mrb[94].mxu0 }
 0xbf6   :  { %v8005_v17 = vpop.f32.mrb[95].mxu0 }
 0xbf7   :  { %v4281_v58 = vadd.f32 %v8003_v50, %v7504_v31  ;;  %v8006_v53 = vadd.f32 %v8005_v17, %v8004_v63 }
 0xbf9   :  { %v11114_v16 = vadd.f32 %v4281_v58, %v10580_v34  ;;  %v4284_v60 = vadd.f32 %v8006_v53, %v7504_v31 }
 0xbfb   :  { %v11117_v4 = vadd.f32 %v4284_v60, %v10586_v20  ;;  %v4323_v61 = vsel %vm1514_vm0, %v11114_v16, 0.0  ;;  %v8690_v60 = vld [vmem:[%s12484_s5 + $0x44] ss:$8 sps:$4 sm:$0xff]  }
 0xbfc   :  { %v8007_v3 = vpop.f32.mrb[96].mxu0  ;;  %4324 = vadd.xlane.f32.xlu0 %v4323_v61  ;;  %4533 = vmatprep.subr.bf16.mxu1 %v8690_v60 }
 0xbfd   :  { %v8008_v38 = vpop.f32.mrb[97].mxu0  ;;  %v4326_v55 = vsel %vm1514_vm0, %v11117_v4, 0.0 }
 0xbfe   :  { %v8009_v11 = vadd.f32 %v8008_v38, %v8007_v3  ;;  %v8010_v28 = vpop.f32.mrb[98].mxu0  ;;  %4327 = vadd.xlane.f32.xlu1 %v4326_v55  ;;  %v8688_v3 = vld [vmem:[%s12484_s5 + $0x40] ss:$8 sps:$4 sm:$0xff]  }
 0xbff   :  { %v8011_v52 = vpop.f32.mrb[99].mxu0  ;;  %4534 = vmatpush1.bf16.msra.mxu1 %v8688_v3 }
 0xc00   :  { %v4289_v1 = vadd.f32 %v8009_v11, %v7504_v31  ;;  %v8012_v34 = vadd.f32 %v8011_v52, %v8010_v28  ;;  %v8693_v52 = vld [vmem:[%s12484_s5 + $0x54] ss:$8 sps:$4 sm:$0xff]  }
 0xc01   :  { %4535 = vmatprep.subr.bf16.mxu1 %v8693_v52 }
 0xc02   :  { %v11124_v49 = vadd.f32 %v4289_v1, %v10583_v62  ;;  %v4292_v20 = vadd.f32 %v8012_v34, %v7504_v31  ;;  %v8691_v1 = vld [vmem:[%s12484_s5 + $0x50] ss:$8 sps:$4 sm:$0xff]  }
 0xc03   :  { %4536 = vmatpush1.bf16.msra.mxu1 %v8691_v1 }
 0xc04   :  { %v11127_v21 = vadd.f32 %v4292_v20, %v10593_v26  ;;  %v4329_v32 = vsel %vm1514_vm0, %v11124_v49, 0.0 }
 0xc05   :  { %4330 = vadd.xlane.f32.xlu0 %v4329_v32 }
 0xc06   :  { %v4332_v13 = vsel %vm1514_vm0, %v11127_v21, 0.0 }
 0xc07   :  { %4333 = vadd.xlane.f32.xlu1 %v4332_v13 }
 0xc14   :  { %v8013_v27 = vpop.f32.mrb[100].mxu0 }
 0xc15   :  { %v8014_v8 = vpop.f32.mrb[101].mxu0 }
 0xc16   :  { %v8015_v57 = vadd.f32 %v8014_v8, %v8013_v27  ;;  %v8016_v39 = vpop.f32.mrb[102].mxu0  ;;  %v8696_v27 = vld [vmem:[%s12484_s5 + $0x64] ss:$8 sps:$4 sm:$0xff]   ;;  %v8694_v8 = vld [vmem:[%s12484_s5 + $0x60] ss:$8 sps:$4 sm:$0xff]  }
 0xc17   :  { %v8017_v35 = vpop.f32.mrb[103].mxu0  ;;  %4537 = vmatprep.subr.bf16.mxu1 %v8696_v27 }
 0xc18   :  { %v4297_v25 = vadd.f32 %v8015_v57, %v7504_v31  ;;  %v8018_v62 = vadd.f32 %v8017_v35, %v8016_v39  ;;  %4538 = vmatpush1.bf16.msra.mxu1 %v8694_v8  ;;  %v8697_v39 = vld [vmem:[%s12484_s5 + $0x70] ss:$8 sps:$4 sm:$0xff]   ;;  %v8699_v35 = vld [vmem:[%s12484_s5 + $0x74] ss:$8 sps:$4 sm:$0xff]  }
 0xc19   :  { %4539 = vmatprep.subr.bf16.mxu1 %v8699_v35 }
 0xc1a   :  { %v11134_v29 = vadd.f32 %v4297_v25, %v10600_v0  ;;  %v4300_v26 = vadd.f32 %v8018_v62, %v7504_v31 }
 0xc1c   :  { %v11137_v10 = vadd.f32 %v4300_v26, %v10606_v2  ;;  %v4335_v9 = vsel %vm1514_vm0, %v11134_v29, 0.0  ;;  %4540 = vmatpush1.bf16.msra.mxu1 %v8697_v39 }
 0xc1d   :  { %4336 = vadd.xlane.f32.xlu0 %v4335_v9 }
 0xc1e   :  { %12527 = vst [vmem:[#allocation5_spill] sm:$0xff] %v11137_v10  ;;  %v4338_v23 = vsel %vm1514_vm0, %v11137_v10, 0.0 }
 0xc1f   :  { %4339 = vadd.xlane.f32.xlu1 %v4338_v23 }
 0xc23   :  { %v8019_v59 = vpop.f32.mrb[104].mxu0 }
 0xc24   :  { %v8020_v47 = vpop.f32.mrb[105].mxu0 }
 0xc25   :  { %v8021_v43 = vadd.f32 %v8020_v47, %v8019_v59  ;;  %v8022_v45 = vpop.f32.mrb[106].mxu0 }
 0xc26   :  { %v8023_v40 = vpop.f32.mrb[107].mxu0 }
 0xc27   :  { %v4305_v7 = vadd.f32 %v8021_v43, %v7504_v31  ;;  %v8024_v0 = vadd.f32 %v8023_v40, %v8022_v45 }
 0xc29   :  { %v11144_v22 = vadd.f32 %v4305_v7, %v10603_v56  ;;  %v4308_v2 = vadd.f32 %v8024_v0, %v7504_v31 }
 0xc2b   :  { %12528 = vst [vmem:[#allocation6_spill] sm:$0xff] %v11144_v22  ;;  %v11147_v54 = vadd.f32 %v4308_v2, %v10611_v33  ;;  %v4341_v37 = vsel %vm1514_vm0, %v11144_v22, 0.0 }
 0xc2c   :  { %4342 = vadd.xlane.f32.xlu0 %v4341_v37 }
 0xc2d   :  { %12529 = vst [vmem:[#allocation9_spill] sm:$0xff] %v11147_v54  ;;  %v4344_v51 = vsel %vm1514_vm0, %v11147_v54, 0.0 }
 0xc2e   :  { %4345 = vadd.xlane.f32.xlu1 %v4344_v51 }
 0xc89   :  { %v4325_v6 = vpop.xlane.xlu0 %4324 }
 0xc8a   :  { %v4347_v19 = vmul.f32 0.015625, %v4325_v6 }
 0xc8b   :  { %v4328_v36 = vpop.xlane.xlu1 %4327 }
 0xc8c   :  { %v11154_v18 = vsub.f32 %v11114_v16, %v4347_v19  ;;  %v4348_v56 = vmul.f32 0.015625, %v4328_v36 }
 0xc8e   :  { %v11157_v15 = vsub.f32 %v11117_v4, %v4348_v56  ;;  %v4363_v33 = vmul.f32 %v11154_v18, %v11154_v18 }
 0xc90   :  { %v4371_v44 = vsel %vm1514_vm0, %v4363_v33, 0.0  ;;  %v4364_v12 = vmul.f32 %v11157_v15, %v11157_v15 }
 0xc91   :  { %4372 = vadd.xlane.f32.xlu0 %v4371_v44 }
 0xc92   :  { %v4331_v24 = vpop.xlane.xlu0 %4330  ;;  %v4374_v42 = vsel %vm1514_vm0, %v4364_v12, 0.0 }
 0xc93   :  { %v4349_v30 = vmul.f32 0.015625, %v4331_v24  ;;  %4375 = vadd.xlane.f32.xlu1 %v4374_v42  ;;  %v7523_v42 = vld [vmem:[%s12482_s3 + $0x1] ss:$0 sm:$0xff] }
 0xc94   :  { %v4334_v41 = vpop.xlane.xlu1 %4333 }
 0xc95   :  { %v11166_v31 = vsub.f32 %v11124_v49, %v4349_v30  ;;  %v4350_v14 = vmul.f32 0.015625, %v4334_v41 }
 0xc97   :  { %v11169_v50 = vsub.f32 %v11127_v21, %v4350_v14  ;;  %v4365_v63 = vmul.f32 %v11166_v31, %v11166_v31 }
 0xc99   :  { %v4377_v17 = vsel %vm1514_vm0, %v4365_v63, 0.0  ;;  %v4366_v58 = vmul.f32 %v11169_v50, %v11169_v50 }
 0xc9a   :  { %4378 = vadd.xlane.f32.xlu0 %v4377_v17  ;;  %v7524_v17 = vld [vmem:[%s12483_s4 + $0x1] ss:$0 sm:$0xff] }
 0xc9b   :  { %v4380_v53 = vsel %vm1514_vm0, %v4366_v58, 0.0 }
 0xc9c   :  { %4381 = vadd.xlane.f32.xlu1 %v4380_v53 }
 0xcaa   :  { %v4337_v61 = vpop.xlane.xlu0 %4336 }
 0xcab   :  { %v4351_v38 = vmul.f32 0.015625, %v4337_v61 }
 0xcac   :  { %v4340_v55 = vpop.xlane.xlu1 %4339 }
 0xcad   :  { %v11184_v11 = vsub.f32 %v11134_v29, %v4351_v38  ;;  %v4352_v28 = vmul.f32 0.015625, %v4340_v55 }
 0xcaf   :  { %v11193_v34 = vsub.f32 %v11137_v10, %v4352_v28  ;;  %v4367_v20 = vmul.f32 %v11184_v11, %v11184_v11 }
 0xcb1   :  { %v4383_v32 = vsel %vm1514_vm0, %v4367_v20, 0.0  ;;  %v4368_v13 = vmul.f32 %v11193_v34, %v11193_v34 }
 0xcb2   :  { %4384 = vadd.xlane.f32.xlu0 %v4383_v32 }
 0xcb3   :  { %v4386_v57 = vsel %vm1514_vm0, %v4368_v13, 0.0 }
 0xcb4   :  { %4387 = vadd.xlane.f32.xlu1 %v4386_v57 }
 0xcb9   :  { %v4343_v25 = vpop.xlane.xlu0 %4342 }
 0xcba   :  { %v4353_v62 = vmul.f32 0.015625, %v4343_v25 }
 0xcbb   :  { %v4346_v26 = vpop.xlane.xlu1 %4345 }
 0xcbc   :  { %v11214_v9 = vsub.f32 %v11144_v22, %v4353_v62  ;;  %v4354_v23 = vmul.f32 0.015625, %v4346_v26 }
 0xcbe   :  { %v11217_v59 = vsub.f32 %v11147_v54, %v4354_v23  ;;  %v4369_v47 = vmul.f32 %v11214_v9, %v11214_v9 }
 0xcc0   :  { %v4389_v43 = vsel %vm1514_vm0, %v4369_v47, 0.0  ;;  %v4370_v45 = vmul.f32 %v11217_v59, %v11217_v59 }
 0xcc1   :  { %4390 = vadd.xlane.f32.xlu0 %v4389_v43 }
 0xcc2   :  { %v4392_v40 = vsel %vm1514_vm0, %v4370_v45, 0.0 }
 0xcc3   :  { %4393 = vadd.xlane.f32.xlu1 %v4392_v40 }
 0xd1e   :  { %v4373_v7 = vpop.xlane.xlu0 %4372 }
 0xd1f   :  { %v4395_v0 = vmul.f32 0.015625, %v4373_v7 }
 0xd20   :  { %v4376_v2 = vpop.xlane.xlu1 %4375 }
 0xd21   :  { %v4403_v37 = vadd.f32 1e-06, %v4395_v0  ;;  %v4396_v51 = vmul.f32 0.015625, %v4376_v2 }
 0xd23   :  { %8956 = vrsqrt.f32 %v4403_v37  ;;  %v4404_v6 = vadd.f32 1e-06, %v4396_v51 }
 0xd25   :  { %8958 = vrsqrt.f32 %v4404_v6 }
 0xd27   :  { %v4379_v19 = vpop.xlane.xlu0 %4378 }
 0xd28   :  { %v4397_v36 = vmul.f32 0.015625, %v4379_v19 }
 0xd29   :  { %v4382_v56 = vpop.xlane.xlu1 %4381 }
 0xd2a   :  { %v4405_v33 = vadd.f32 1e-06, %v4397_v36  ;;  %v4398_v44 = vmul.f32 0.015625, %v4382_v56 }
 0xd2c   :  { %8960 = vrsqrt.f32 %v4405_v33  ;;  %v4406_v12 = vadd.f32 1e-06, %v4398_v44 }
 0xd2d   :  { %v8957_v24 = vpop.eup %8956 }
 0xd2e   :  { %v4419_v30 = vmul.f32 %v8957_v24, %v11154_v18  ;;  %8962 = vrsqrt.f32 %v4406_v12  ;;  %v7533_v12 = vld [vmem:[%s12485_s6 + $0x2] sm:$0x3] }
 0xd2f   :  { %v8959_v41 = vpop.eup %8958  ;;  %v4474_v24 = vrot.slane %v7533_v12, %v12525_v46 }
 0xd30   :  { %v4433_v14 = vmul.f32 %v7523_v42, %v4419_v30  ;;  %v4420_v63 = vmul.f32 %v8959_v41, %v11157_v15  ;;  %v4478_v41 = vrot.slane %v7533_v12, %v12526_v5 }
 0xd32   :  { %v4434_v58 = vmul.f32 %v7523_v42, %v4420_v63  ;;  %v4447_v53 = vadd.f32 %v7524_v17, %v4433_v14 }
 0xd34   :  { %v4448_v60 = vadd.f32 %v7524_v17, %v4434_v58 }
 0xd36   :  { %v8961_v61 = vpop.eup %8960  ;;  %v4455_v3 = vpack.c.bf16 %v4448_v60, %v4447_v53 }
 0xd37   :  { %v4421_v38 = vmul.f32 %v8961_v61, %v11166_v31 }
 0xd38   :  { %v8963_v55 = vpop.eup %8962  ;;  %7542 = vmatmul.mubr.msk.bf16.vlgmr.msra.gmra.mrb[108].mxu1 %vm1514_vm0, %v4455_v3 }
 0xd39   :  { %4575 = vmatprep.mubr.bf16.mxu1 %v12522_v48  ;;  %v4422_v18 = vmul.f32 %v8963_v55, %v11169_v50  ;;  %v4435_v28 = vmul.f32 %v7523_v42, %v4421_v38 }
 0xd3b   :  { %v4436_v15 = vmul.f32 %v7523_v42, %v4422_v18  ;;  %v4449_v52 = vadd.f32 %v7524_v17, %v4435_v28 }
 0xd3d   :  { %v4450_v1 = vadd.f32 %v7524_v17, %v4436_v15 }
 0xd3f   :  { %v4456_v20 = vpack.c.bf16 %v4450_v1, %v4449_v52  ;;  %v4385_v32 = vpop.xlane.xlu0 %4384 }
 0xd40   :  { %v4399_v13 = vmul.f32 0.015625, %v4385_v32 }
 0xd41   :  { %7543 = vmatmul.mubr.msk.bf16.gmra.mrb[112].mxu1 %vm1514_vm0, %v4456_v20  ;;  %v4388_v27 = vpop.xlane.xlu1 %4387 }
 0xd42   :  { %v4407_v8 = vadd.f32 1e-06, %v4399_v13  ;;  %v4400_v57 = vmul.f32 0.015625, %v4388_v27  ;;  %4585 = vmatprep.mubr.bf16.mxu1 %v12522_v48 }
 0xd44   :  { %8964 = vrsqrt.f32 %v4407_v8  ;;  %v4408_v31 = vadd.f32 1e-06, %v4400_v57 }
 0xd46   :  { %8966 = vrsqrt.f32 %v4408_v31 }
 0xd4e   :  { %v4391_v39 = vpop.xlane.xlu0 %4390  ;;  %v8965_v35 = vpop.eup %8964 }
 0xd4f   :  { %v4401_v50 = vmul.f32 0.015625, %v4391_v39  ;;  %v4423_v62 = vmul.f32 %v8965_v35, %v11184_v11 }
 0xd50   :  { %v4394_v25 = vpop.xlane.xlu1 %4393  ;;  %v8967_v26 = vpop.eup %8966 }
 0xd51   :  { %v4409_v23 = vadd.f32 1e-06, %v4401_v50  ;;  %v4402_v47 = vmul.f32 0.015625, %v4394_v25  ;;  %v4424_v43 = vmul.f32 %v8967_v26, %v11193_v34  ;;  %v4437_v45 = vmul.f32 %v7523_v42, %v4423_v62 }
 0xd53   :  { %8968 = vrsqrt.f32 %v4409_v23  ;;  %v4410_v40 = vadd.f32 1e-06, %v4402_v47  ;;  %v4438_v7 = vmul.f32 %v7523_v42, %v4424_v43  ;;  %v4451_v0 = vadd.f32 %v7524_v17, %v4437_v45 }
 0xd55   :  { %8970 = vrsqrt.f32 %v4410_v40  ;;  %v4452_v2 = vadd.f32 %v7524_v17, %v4438_v7 }
 0xd57   :  { %v4457_v37 = vpack.c.bf16 %v4452_v2, %v4451_v0 }
 0xd59   :  { %7544 = vmatmul.mubr.msk.bf16.gmra.mrb[116].mxu1 %vm1514_vm0, %v4457_v37 }
 0xd5a   :  { %4595 = vmatprep.mubr.bf16.mxu1 %v12522_v48 }
 0xd5d   :  { %v8969_v51 = vpop.eup %8968 }
 0xd5e   :  { %v4425_v11 = vmul.f32 %v8969_v51, %v11214_v9 }
 0xd5f   :  { %v8971_v6 = vpop.eup %8970 }
 0xd60   :  { %v4426_v19 = vmul.f32 %v8971_v6, %v11217_v59  ;;  %v4439_v36 = vmul.f32 %v7523_v42, %v4425_v11 }
 0xd62   :  { %v4440_v34 = vmul.f32 %v7523_v42, %v4426_v19  ;;  %v4453_v56 = vadd.f32 %v7524_v17, %v4439_v36 }
 0xd64   :  { %v4454_v33 = vadd.f32 %v7524_v17, %v4440_v34 }
 0xd66   :  { %v4458_v44 = vpack.c.bf16 %v4454_v33, %v4453_v56 }
 0xd68   :  { %7545 = vmatmul.mubr.msk.bf16.gmra.mrb[120].mxu1 %vm1514_vm0, %v4458_v44 }
 0xe0b   :  { %v4567_v30 = vpop.f32.mrb[108].mxu1 }
 0xe0c   :  { %v4569_v9 = vpop.f32.mrb[109].mxu1  ;;  %v4568_v63 = vadd.f32 %v4567_v30, %v4474_v24 }
 0xe0d   :  { %v4571_v14 = vpop.f32.mrb[110].mxu1  ;;  %v4570_v42 = vadd.f32 %v4569_v9, %v4478_v41 }
 0xe0e   :  { %v4572_v59 = vadd.f32 %v4571_v14, %v4474_v24  ;;  %v4573_v58 = vpop.f32.mrb[111].mxu1 }
 0xe0f   :  { %v4574_v53 = vadd.f32 %v4573_v58, %v4478_v41 }
 0xe10   :  { %v4606_v17 = vpack.c.bf16 %v4572_v59, %v4568_v63 }
 0xe11   :  { %v11251_v60 = vpack.c.bf16 %v4574_v53, %v4570_v42 }
 0xe12   :  { %4618 = vrot.lane.b32.xlu0 %v4606_v17, %s9221_s2  ;;  %8285 = vmatprep.mubr.msk.bf16.mxu0 %vm1877_vm1, %v4606_v17 }
 0xe14   :  { %v4577_v61 = vpop.f32.mrb[112].mxu1 }
 0xe15   :  { %v4579_v3 = vpop.f32.mrb[113].mxu1  ;;  %v4578_v55 = vadd.f32 %v4577_v61, %v4474_v24 }
 0xe16   :  { %v4581_v38 = vpop.f32.mrb[114].mxu1  ;;  %v4580_v15 = vadd.f32 %v4579_v3, %v4478_v41 }
 0xe17   :  { %v4582_v18 = vadd.f32 %v4581_v38, %v4474_v24  ;;  %v4583_v28 = vpop.f32.mrb[115].mxu1 }
 0xe18   :  { %v4584_v52 = vadd.f32 %v4583_v28, %v4478_v41 }
 0xe19   :  { %v11255_v1 = vpack.c.bf16 %v4582_v18, %v4578_v55 }
 0xe1a   :  { %v11257_v20 = vpack.c.bf16 %v4584_v52, %v4580_v15 }
 0xe1b   :  { %4620 = vrot.lane.b32.xlu1 %v11255_v1, %s9221_s2 }
 0xe2c   :  { %v4587_v32 = vpop.f32.mrb[116].mxu1 }
 0xe2d   :  { %v4589_v13 = vpop.f32.mrb[117].mxu1  ;;  %v4588_v8 = vadd.f32 %v4587_v32, %v4474_v24 }
 0xe2e   :  { %v4591_v27 = vpop.f32.mrb[118].mxu1  ;;  %v4590_v39 = vadd.f32 %v4589_v13, %v4478_v41 }
 0xe2f   :  { %v4592_v57 = vadd.f32 %v4591_v27, %v4474_v24  ;;  %v4593_v31 = vpop.f32.mrb[119].mxu1 }
 0xe30   :  { %v4594_v35 = vadd.f32 %v4593_v31, %v4478_v41 }
 0xe31   :  { %v4610_v50 = vpack.c.bf16 %v4592_v57, %v4588_v8 }
 0xe32   :  { %v11261_v25 = vpack.c.bf16 %v4594_v35, %v4590_v39 }
 0xe33   :  { %4622 = vrot.lane.b32.xlu1 %v4610_v50, %s9221_s2  ;;  %8293 = vmatprep.mubr.msk.bf16.mxu1 %vm1877_vm1, %v4610_v50 }
 0xe37   :  { %4626 = vrot.lane.b32.xlu1 %v4606_v17, %s9222_s19 }
 0xe3b   :  { %v4597_v62 = vpop.f32.mrb[120].mxu1  ;;  %4628 = vrot.lane.b32.xlu1 %v11255_v1, %s9222_s19 }
 0xe3c   :  { %v4599_v26 = vpop.f32.mrb[121].mxu1  ;;  %v4598_v47 = vadd.f32 %v4597_v62, %v4474_v24 }
 0xe3d   :  { %v4601_v23 = vpop.f32.mrb[122].mxu1  ;;  %v4600_v40 = vadd.f32 %v4599_v26, %v4478_v41 }
 0xe3e   :  { %v4602_v43 = vadd.f32 %v4601_v23, %v4474_v24  ;;  %v4603_v45 = vpop.f32.mrb[123].mxu1 }
 0xe3f   :  { %v4604_v7 = vadd.f32 %v4603_v45, %v4478_v41  ;;  %4634 = vrot.lane.b32.xlu1 %v4606_v17, %s9223_s1 }
 0xe40   :  { %v11268_v0 = vpack.c.bf16 %v4602_v43, %v4598_v47 }
 0xe41   :  { %v11271_v2 = vpack.c.bf16 %v4604_v7, %v4600_v40 }
 0xe42   :  { %4624 = vrot.lane.b32.xlu0 %v11268_v0, %s9221_s2 }
 0xe43   :  { %4636 = vrot.lane.b32.xlu1 %v11255_v1, %s9223_s1 }
 0xe46   :  { %4630 = vrot.lane.b32.xlu0 %v4610_v50, %s9222_s19 }
 0xe47   :  { %4638 = vrot.lane.b32.xlu1 %v4610_v50, %s9223_s1 }
 0xe4a   :  { %4632 = vrot.lane.b32.xlu0 %v11268_v0, %s9222_s19 }
 0xe4b   :  { %4640 = vrot.lane.b32.xlu1 %v11268_v0, %s9223_s1 }
 0xe4e   :  { %4682 = vrot.lane.b32.xlu0 %v4606_v17, %s9224_s20 }
 0xe52   :  { %4684 = vrot.lane.b32.xlu0 %v11255_v1, %s9224_s20 }
 0xe56   :  { %4747 = vrot.lane.b32.xlu0 %v4610_v50, %s9224_s20 }
 0xe5a   :  { %4749 = vrot.lane.b32.xlu0 %v11268_v0, %s9224_s20 }
 0xe84   :  { %v4619_v37 = vpop.permute.xlu0 %4618 }
 0xe85   :  { %4812 = vrot.lane.b32.xlu1 %v4619_v37, %s9224_s20 }
 0xe8d   :  { %v4621_v51 = vpop.permute.xlu1 %4620 }
 0xe8e   :  { %4814 = vrot.lane.b32.xlu1 %v4621_v51, %s9224_s20 }
 0xea5   :  { %v4623_v11 = vpop.permute.xlu1 %4622 }
 0xea6   :  { %4877 = vrot.lane.b32.xlu0 %v4623_v11, %s9224_s20 }
 0xea9   :  { %v4627_v6 = vpop.permute.xlu1 %4626 }
 0xeaa   :  { %4942 = vrot.lane.b32.xlu1 %v4627_v6, %s9224_s20 }
 0xead   :  { %v11293_v19 = vpop.permute.xlu1 %4628 }
 0xeae   :  { %4944 = vrot.lane.b32.xlu1 %v11293_v19, %s9224_s20 }
 0xeb1   :  { %v11297_v36 = vpop.permute.xlu1 %4634 }
 0xeb2   :  { %5072 = vrot.lane.b32.xlu1 %v11297_v36, %s9224_s20 }
 0xeb4   :  { %v11301_v34 = vpop.permute.xlu0 %4624 }
 0xeb5   :  { %4879 = vrot.lane.b32.xlu0 %v11301_v34, %s9224_s20  ;;  %v11305_v56 = vpop.permute.xlu1 %4636 }
 0xeb6   :  { %5074 = vrot.lane.b32.xlu1 %v11305_v56, %s9224_s20 }
 0xeb8   :  { %v11309_v33 = vpop.permute.xlu0 %4630 }
 0xeb9   :  { %5007 = vrot.lane.b32.xlu0 %v11309_v33, %s9224_s20  ;;  %v11313_v44 = vpop.permute.xlu1 %4638 }
 0xebc   :  { %v11315_v12 = vpop.permute.xlu0 %4632 }
 0xebd   :  { %5009 = vrot.lane.b32.xlu0 %v11315_v12, %s9224_s20  ;;  %v11319_v24 = vpop.permute.xlu1 %4640 }
 0xebe   :  { %5139 = vrot.lane.b32.xlu1 %v11319_v24, %s9224_s20 }
 0xec0   :  { %v4683_v30 = vpop.permute.xlu0 %4682 }
 0xec1   :  { %5137 = vrot.lane.b32.xlu0 %v11313_v44, %s9224_s20  ;;  %8449 = vmatprep.subr.msk.bf16.mxu0 %vm1877_vm1, %v4683_v30  ;;  %v4693_v41 = vsel %vm1877_vm1, %v4683_v30, 0 }
 0xec2   :  { %8282 = vmatpush3.bf16.xpose.msra.mxu0 %v4693_v41  ;;  %4648 = vrot.lane.b32.xlu1 %v11257_v20, %s9221_s2 }
 0xec4   :  { %v4685_v9 = vpop.permute.xlu0 %4684 }
 0xec5   :  { %4646 = vrot.lane.b32.xlu0 %v11251_v60, %s9221_s2  ;;  %8450 = vmatprep.subr.msk.bf16.mxu0 %vm1877_vm1, %v4685_v9  ;;  %v4696_v63 = vsel %vm1877_vm1, %v4685_v9, 0 }
 0xec6   :  { %4650 = vrot.lane.b32.xlu1 %v11261_v25, %s9221_s2 }
 0xec8   :  { %v4748_v14 = vpop.permute.xlu0 %4747 }
 0xec9   :  { %4658 = vrot.lane.b32.xlu0 %v11251_v60, %s9222_s19  ;;  %8451 = vmatprep.subr.msk.bf16.mxu1 %vm1877_vm1, %v4748_v14  ;;  %v4758_v59 = vsel %vm1877_vm1, %v4748_v14, 0 }
 0xeca   :  { %8284 = vmatpush3.bf16.xpose.msra.mxu0 %v4696_v63  ;;  %8290 = vmatpush3.bf16.xpose.msra.mxu1 %v4758_v59 }
 0xecb   :  { %4670 = vrot.lane.b32.xlu1 %v11251_v60, %s9223_s1 }
 0xecc   :  { %v4750_v58 = vpop.permute.xlu0 %4749 }
 0xecd   :  { %4660 = vrot.lane.b32.xlu0 %v11257_v20, %s9222_s19  ;;  %8452 = vmatprep.subr.msk.bf16.mxu1 %vm1877_vm1, %v4750_v58  ;;  %v4761_v42 = vsel %vm1877_vm1, %v4750_v58, 0 }
 0xecf   :  { %4672 = vrot.lane.b32.xlu1 %v11257_v20, %s9223_s1 }
 0xed1   :  { %4652 = vrot.lane.b32.xlu0 %v11271_v2, %s9221_s2  ;;  %8286 = vmatmul.mubr.msk.bf16.vlgmr.msra.gmra.mrb[108].mxu0 %vm1877_vm1, %v11255_v1 }
 0xed2   :  { %8292 = vmatpush3.bf16.xpose.msra.mxu1 %v4761_v42  ;;  %8301 = vmatprep.mubr.msk.bf16.mxu0 %vm1877_vm1, %v4619_v37 }
 0xed9   :  { %8294 = vmatmul.mubr.msk.bf16.vlgmr.msra.gmra.mrb[124].mxu1 %vm1877_vm1, %v11268_v0 }
 0xeda   :  { %8309 = vmatprep.mubr.msk.bf16.mxu1 %vm1877_vm1, %v4623_v11 }
 0xef7   :  { %v4813_v53 = vpop.permute.xlu1 %4812 }
 0xef8   :  { %8453 = vmatprep.subr.msk.bf16.mxu0 %vm1877_vm1, %v4813_v53  ;;  %v4823_v17 = vsel %vm1877_vm1, %v4813_v53, 0 }
 0xef9   :  { %8298 = vmatpush3.bf16.xpose.msra.mxu0 %v4823_v17 }
 0xf00   :  { %v4815_v61 = vpop.permute.xlu1 %4814 }
 0xf01   :  { %8454 = vmatprep.subr.msk.bf16.mxu0 %vm1877_vm1, %v4815_v61  ;;  %v4826_v3 = vsel %vm1877_vm1, %v4815_v61, 0 }
 0xf02   :  { %8300 = vmatpush3.bf16.xpose.msra.mxu0 %v4826_v3 }
 0xf09   :  { %8302 = vmatmul.mubr.msk.bf16.vlgmr.msra.gmra.mrb[112].mxu0 %vm1877_vm1, %v4621_v51 }
 0xf0a   :  { %8317 = vmatprep.mubr.msk.bf16.mxu0 %vm1877_vm1, %v4627_v6 }
 0xf18   :  { %v4878_v38 = vpop.permute.xlu0 %4877 }
 0xf19   :  { %8455 = vmatprep.subr.msk.bf16.mxu1 %vm1877_vm1, %v4878_v38  ;;  %v4888_v55 = vsel %vm1877_vm1, %v4878_v38, 0 }
 0xf1a   :  { %8306 = vmatpush3.bf16.xpose.msra.mxu1 %v4888_v55 }
 0xf1c   :  { %v4943_v18 = vpop.permute.xlu1 %4942 }
 0xf1d   :  { %8457 = vmatprep.subr.msk.bf16.mxu0 %vm1877_vm1, %v4943_v18  ;;  %v4953_v28 = vsel %vm1877_vm1, %v4943_v18, 0 }
 0xf1e   :  { %8314 = vmatpush3.bf16.xpose.msra.mxu0 %v4953_v28 }
 0xf20   :  { %v4945_v15 = vpop.permute.xlu1 %4944 }
 0xf21   :  { %8458 = vmatprep.subr.msk.bf16.mxu0 %vm1877_vm1, %v4945_v15  ;;  %v4956_v52 = vsel %vm1877_vm1, %v4945_v15, 0 }
 0xf24   :  { %v5073_v32 = vpop.permute.xlu1 %5072 }
 0xf25   :  { %v5083_v8 = vsel %vm1877_vm1, %v5073_v32, 0 }
 0xf26   :  { %8316 = vmatpush3.bf16.xpose.msra.mxu0 %v4956_v52 }
 0xf27   :  { %v4880_v1 = vpop.permute.xlu0 %4879  ;;  %8461 = vmatprep.subr.msk.bf16.mxu0 %vm1877_vm1, %v5073_v32 }
 0xf28   :  { %8456 = vmatprep.subr.msk.bf16.mxu1 %vm1877_vm1, %v4880_v1  ;;  %v4891_v13 = vsel %vm1877_vm1, %v4880_v1, 0  ;;  %v5075_v57 = vpop.permute.xlu1 %5074 }
 0xf29   :  { %8308 = vmatpush3.bf16.xpose.msra.mxu1 %v4891_v13  ;;  %v5086_v35 = vsel %vm1877_vm1, %v5075_v57, 0 }
 0xf2b   :  { %v5008_v27 = vpop.permute.xlu0 %5007 }
 0xf2c   :  { %8459 = vmatprep.subr.msk.bf16.mxu1 %vm1877_vm1, %v5008_v27  ;;  %v5018_v31 = vsel %vm1877_vm1, %v5008_v27, 0 }
 0xf2d   :  { %8318 = vmatmul.mubr.msk.bf16.vlgmr.msra.gmra.mrb[116].mxu0 %vm1877_vm1, %v11293_v19 }
 0xf2e   :  { %8330 = vmatpush3.bf16.xpose.msra.mxu0 %v5083_v8  ;;  %8333 = vmatprep.mubr.msk.bf16.mxu0 %vm1877_vm1, %v11297_v36 }
 0xf2f   :  { %8462 = vmatprep.subr.msk.bf16.mxu0 %vm1877_vm1, %v5075_v57  ;;  %v5010_v39 = vpop.permute.xlu0 %5009 }
 0xf30   :  { %8310 = vmatmul.mubr.msk.bf16.vlgmr.msra.gmra.mrb[128].mxu1 %vm1877_vm1, %v11301_v34  ;;  %v5021_v50 = vsel %vm1877_vm1, %v5010_v39, 0  ;;  %v5140_v23 = vpop.permute.xlu1 %5139 }
 0xf31   :  { %8322 = vmatpush3.bf16.xpose.msra.mxu1 %v5018_v31  ;;  %8325 = vmatprep.mubr.msk.bf16.mxu1 %vm1877_vm1, %v11309_v33 }
 0xf32   :  { %8460 = vmatprep.subr.msk.bf16.mxu1 %vm1877_vm1, %v5010_v39 }
 0xf33   :  { %v5138_v62 = vpop.permute.xlu0 %5137 }
 0xf34   :  { %v5148_v26 = vsel %vm1877_vm1, %v5138_v62, 0  ;;  %v11403_v43 = vpop.permute.xlu1 %4648 }
 0xf36   :  { %8332 = vmatpush3.bf16.xpose.msra.mxu0 %v5086_v35 }
 0xf37   :  { %8345 = vmatprep.subr.bf16.mxu0 %v11251_v60  ;;  %v11397_v47 = vpop.permute.xlu0 %4646 }
 0xf38   :  { %v11409_v45 = vpop.permute.xlu1 %4650 }
 0xf39   :  { %8324 = vmatpush3.bf16.xpose.msra.mxu1 %v5021_v50 }
 0xf3a   :  { %8463 = vmatprep.subr.msk.bf16.mxu1 %vm1877_vm1, %v5138_v62 }
 0xf3d   :  { %8334 = vmatmul.mubr.msk.bf16.vlgmr.msra.gmra.mrb[120].mxu0 %vm1877_vm1, %v11305_v56 }
 0xf3e   :  { %8346 = vmatpush3.bf16.msra.mxu0 %v11251_v60  ;;  %v5151_v60 = vsel %vm1877_vm1, %v5140_v23, 0 }
 0xf3f   :  { %8347 = vmatprep.subr.bf16.mxu0 %v11257_v20 }
 0xf40   :  { %8326 = vmatmul.mubr.msk.bf16.vlgmr.msra.gmra.mrb[132].mxu1 %vm1877_vm1, %v11315_v12 }
 0xf41   :  { %8338 = vmatpush3.bf16.xpose.msra.mxu1 %v5148_v26  ;;  %8341 = vmatprep.mubr.msk.bf16.mxu1 %vm1877_vm1, %v11313_v44 }
 0xf42   :  { %8464 = vmatprep.subr.msk.bf16.mxu1 %vm1877_vm1, %v5140_v23  ;;  %8348 = vmatpush3.bf16.msra.mxu0 %v11257_v20 }
 0xf43   :  { %8361 = vmatprep.subr.bf16.mxu0 %v11397_v47 }
 0xf49   :  { %8340 = vmatpush3.bf16.xpose.msra.mxu1 %v5151_v60 }
 0xf4a   :  { %8353 = vmatprep.subr.bf16.mxu1 %v11261_v25 }
 0xf50   :  { %8342 = vmatmul.mubr.msk.bf16.vlgmr.msra.gmra.mrb[136].mxu1 %vm1877_vm1, %v11319_v24 }
 0xf51   :  { %8354 = vmatpush3.bf16.msra.mxu1 %v11261_v25 }
 0xf52   :  { %8355 = vmatprep.subr.bf16.mxu1 %v11271_v2 }
 0xf55   :  { %8356 = vmatpush3.bf16.msra.mxu1 %v11271_v2 }
 0xf56   :  { %8369 = vmatprep.subr.bf16.mxu1 %v11409_v45 }
 0xfa4   :  { %v11413_v20 = vpop.f32.mrb[108].mxu0 }
 0xfa5   :  { %v11415_v40 = vpop.f32.mrb[109].mxu0  ;;  %v5208_v7 = vsel %vm2394_vm2, %v11413_v20, -inf }
 0xfa6   :  { %5209 = vmax.xlane.f32.xlu0 %v5208_v7  ;;  %v11419_v0 = vpop.f32.mrb[110].mxu0  ;;  %v5202_v11 = vsel %vm2394_vm2, %v11415_v40, -inf }
 0xfa7   :  { %v11421_v37 = vpop.f32.mrb[111].mxu0  ;;  %v5211_v36 = vsel %vm2394_vm2, %v11419_v0, -inf }
 0xfa8   :  { %v5205_v51 = vsel %vm2394_vm2, %v11421_v37, -inf }
 0xfa9   :  { %5206 = vmax.xlane.f32.xlu1 %v5205_v51 }
 0xfaa   :  { %5203 = vmax.xlane.f32.xlu0 %v5202_v11 }
 0xfac   :  { %v11427_v6 = vpop.f32.mrb[124].mxu1 }
 0xfad   :  { %v11429_v19 = vpop.f32.mrb[125].mxu1  ;;  %v5220_v44 = vsel %vm2394_vm2, %v11427_v6, -inf }
 0xfae   :  { %5212 = vmax.xlane.f32.xlu0 %v5211_v36  ;;  %v11433_v34 = vpop.f32.mrb[126].mxu1  ;;  %v5214_v24 = vsel %vm2394_vm2, %v11429_v19, -inf }
 0xfaf   :  { %v11435_v56 = vpop.f32.mrb[127].mxu1  ;;  %v5223_v33 = vsel %vm2394_vm2, %v11433_v34, -inf }
 0xfb0   :  { %5224 = vmax.xlane.f32.xlu1 %v5223_v33  ;;  %v5217_v12 = vsel %vm2394_vm2, %v11435_v56, -inf }
 0xfb2   :  { %5221 = vmax.xlane.f32.xlu0 %v5220_v44 }
 0xfb4   :  { %5218 = vmax.xlane.f32.xlu1 %v5217_v12 }
 0xfb6   :  { %5215 = vmax.xlane.f32.xlu0 %v5214_v24 }
 0xfdc   :  { %v11445_v30 = vpop.f32.mrb[112].mxu0 }
 0xfdd   :  { %v11447_v41 = vpop.f32.mrb[113].mxu0  ;;  %v5232_v9 = vsel %vm2394_vm2, %v11445_v30, -inf }
 0xfde   :  { %v11451_v14 = vpop.f32.mrb[114].mxu0  ;;  %5233 = vmax.xlane.f32.xlu0 %v5232_v9  ;;  %v5226_v58 = vsel %vm2394_vm2, %v11447_v41, -inf  ;;  %v11525_v9 = vpop.permute.xlu0 %4658 }
 0xfdf   :  { %v11453_v63 = vpop.f32.mrb[115].mxu0  ;;  %v5235_v59 = vsel %vm2394_vm2, %v11451_v14, -inf }
 0xfe0   :  { %5236 = vmax.xlane.f32.xlu1 %v5235_v59  ;;  %v5229_v42 = vsel %vm2394_vm2, %v11453_v63, -inf }
 0xfe2   :  { %5227 = vmax.xlane.f32.xlu0 %v5226_v58 }
 0xfe4   :  { %5230 = vmax.xlane.f32.xlu1 %v5229_v42 }
0x1000   :  { %v11461_v53 = vpop.f32.mrb[116].mxu0 }
0x1001   :  { %v11463_v17 = vpop.f32.mrb[117].mxu0  ;;  %v5256_v61 = vsel %vm2394_vm2, %v11461_v53, -inf }
0x1002   :  { %v11469_v38 = vpop.f32.mrb[118].mxu0  ;;  %5257 = vmax.xlane.f32.xlu0 %v5256_v61  ;;  %v5250_v13 = vsel %vm2394_vm2, %v11463_v17, -inf }
0x1003   :  { %v11467_v3 = vpop.f32.mrb[128].mxu1  ;;  %v11473_v18 = vpop.f32.mrb[119].mxu0  ;;  %v5259_v28 = vsel %vm2394_vm2, %v11469_v38, -inf }
0x1004   :  { %v11471_v55 = vpop.f32.mrb[129].mxu1  ;;  %5260 = vmax.xlane.f32.xlu1 %v5259_v28  ;;  %v5244_v1 = vsel %vm2394_vm2, %v11467_v3, -inf  ;;  %v5253_v27 = vsel %vm2394_vm2, %v11473_v18, -inf  ;;  %v11535_v28 = vpop.permute.xlu0 %4660 }
0x1005   :  { %v11477_v15 = vpop.f32.mrb[130].mxu1  ;;  %v5238_v8 = vsel %vm2394_vm2, %v11471_v55, -inf }
0x1006   :  { %v11479_v52 = vpop.f32.mrb[131].mxu1  ;;  %5245 = vmax.xlane.f32.xlu0 %v5244_v1  ;;  %v5247_v32 = vsel %vm2394_vm2, %v11477_v15, -inf  ;;  %v11537_v1 = vpop.permute.xlu1 %4670 }
0x1007   :  { %v5241_v57 = vsel %vm2394_vm2, %v11479_v52, -inf }
0x1008   :  { %5248 = vmax.xlane.f32.xlu1 %v5247_v32  ;;  %v11539_v32 = vpop.permute.xlu0 %4652 }
0x100a   :  { %5251 = vmax.xlane.f32.xlu0 %v5250_v13  ;;  %v11541_v13 = vpop.permute.xlu1 %4672 }
0x100c   :  { %5254 = vmax.xlane.f32.xlu1 %v5253_v27 }
0x100e   :  { %5239 = vmax.xlane.f32.xlu0 %v5238_v8 }
0x1010   :  { %v11493_v31 = vpop.f32.mrb[120].mxu0  ;;  %5242 = vmax.xlane.f32.xlu1 %v5241_v57 }
0x1011   :  { %v11495_v39 = vpop.f32.mrb[121].mxu0  ;;  %v5280_v35 = vsel %vm2394_vm2, %v11493_v31, -inf }
0x1012   :  { %v11501_v62 = vpop.f32.mrb[122].mxu0  ;;  %5281 = vmax.xlane.f32.xlu0 %v5280_v35  ;;  %v5274_v33 = vsel %vm2394_vm2, %v11495_v39, -inf }
0x1013   :  { %v11499_v50 = vpop.f32.mrb[132].mxu1  ;;  %v11505_v23 = vpop.f32.mrb[123].mxu0  ;;  %v5283_v60 = vsel %vm2394_vm2, %v11501_v62, -inf }
0x1014   :  { %v11503_v26 = vpop.f32.mrb[133].mxu1  ;;  %5284 = vmax.xlane.f32.xlu1 %v5283_v60  ;;  %v5268_v11 = vsel %vm2394_vm2, %v11499_v50, -inf  ;;  %v5277_v44 = vsel %vm2394_vm2, %v11505_v23, -inf }
0x1015   :  { %v11509_v7 = vpop.f32.mrb[134].mxu1  ;;  %v5262_v12 = vsel %vm2394_vm2, %v11503_v26, -inf }
0x1016   :  { %v11511_v51 = vpop.f32.mrb[135].mxu1  ;;  %5269 = vmax.xlane.f32.xlu0 %v5268_v11  ;;  %v5271_v36 = vsel %vm2394_vm2, %v11509_v7, -inf }
0x1017   :  { %v5265_v24 = vsel %vm2394_vm2, %v11511_v51, -inf }
0x1018   :  { %5272 = vmax.xlane.f32.xlu1 %v5271_v36 }
0x101a   :  { %5275 = vmax.xlane.f32.xlu0 %v5274_v33 }
0x101c   :  { %5278 = vmax.xlane.f32.xlu1 %v5277_v44 }
0x101e   :  { %5263 = vmax.xlane.f32.xlu0 %v5262_v12 }
0x1020   :  { %5266 = vmax.xlane.f32.xlu1 %v5265_v24 }
0x1023   :  { %v11527_v59 = vpop.f32.mrb[136].mxu1 }
0x1024   :  { %v11529_v58 = vpop.f32.mrb[137].mxu1 }
0x1025   :  { %v11531_v42 = vpop.f32.mrb[138].mxu1 }
0x1026   :  { %v11533_v61 = vpop.f32.mrb[139].mxu1 }
0x1033   :  { %v5210_v27 = vpop.xlane.xlu0 %5209 }
0x1034   :  { %v5300_v8 = vsub.f32 %v11413_v20, %v5210_v27 }
0x1036   :  { %v5334_v57 = vmul.f32 1.442695, %v5300_v8  ;;  %v5207_v35 = vpop.xlane.xlu1 %5206 }
0x1037   :  { %v5204_v60 = vpop.xlane.xlu0 %5203  ;;  %v5299_v36 = vsub.f32 %v11421_v37, %v5207_v35 }
0x1038   :  { %8972 = vpow2.f32 %v5334_v57  ;;  %v5298_v11 = vsub.f32 %v11415_v40, %v5204_v60  ;;  %v5286_v57 = vsel %vm2394_vm2, %v11529_v58, -inf  ;;  %v5295_v60 = vsel %vm2394_vm2, %v11531_v42, -inf }
0x1039   :  { %v5332_v24 = vmul.f32 1.442695, %v5299_v36 }
0x103a   :  { %v5330_v33 = vmul.f32 1.442695, %v5298_v11  ;;  %v5289_v11 = vsel %vm2394_vm2, %v11533_v61, -inf }
0x103b   :  { %v5213_v44 = vpop.xlane.xlu0 %5212 }
0x103c   :  { %8974 = vpow2.f32 %v5330_v33  ;;  %v5301_v12 = vsub.f32 %v11419_v0, %v5213_v44  ;;  %v5292_v0 = vsel %vm2394_vm2, %v11527_v59, -inf }
0x103e   :  { %v5336_v5 = vmul.f32 1.442695, %v5301_v12  ;;  %v5225_v12 = vpop.xlane.xlu1 %5224 }
0x103f   :  { %v5222_v36 = vpop.xlane.xlu0 %5221 }
0x1040   :  { %8976 = vpow2.f32 %v5336_v5  ;;  %v5304_v44 = vsub.f32 %v11427_v6, %v5222_v36 }
0x1041   :  { %8978 = vpow2.f32 %v5332_v24 }
0x1042   :  { %v11547_v46 = vpop.eup %8972 }
0x1043   :  { %v5400_v20 = vsel %vm2394_vm2, %v11547_v46, 0.0  ;;  %v5216_v33 = vpop.xlane.xlu0 %5215 }
0x1044   :  { %5401 = vadd.xlane.f32.xlu0 %v5400_v20  ;;  %v5342_v20 = vmul.f32 1.442695, %v5304_v44 }
0x1046   :  { %v11551_v27 = vpop.eup %8974  ;;  %8980 = vpow2.f32 %v5342_v20 }
0x1047   :  { %v5394_v40 = vsel %vm2394_vm2, %v11551_v27, 0.0 }
0x1048   :  { %5395 = vadd.xlane.f32.xlu0 %v5394_v40  ;;  %v5302_v40 = vsub.f32 %v11429_v19, %v5216_v33 }
0x104a   :  { %v11555_v37 = vpop.eup %8976 }
0x104b   :  { %v5403_v5 = vsel %vm2394_vm2, %v11555_v37, 0.0  ;;  %v11561_v8 = vpop.eup %8978 }
0x104c   :  { %5293 = vmax.xlane.f32.xlu0 %v5292_v0  ;;  %5404 = vadd.xlane.f32.xlu1 %v5403_v5  ;;  %v5397_v35 = vsel %vm2394_vm2, %v11561_v8, 0.0  ;;  %v5305_v0 = vsub.f32 %v11433_v34, %v5225_v12  ;;  %v5219_v5 = vpop.xlane.xlu1 %5218 }
0x104d   :  { %v5303_v54 = vsub.f32 %v11435_v56, %v5219_v5 }
0x104f   :  { %v5340_v36 = vmul.f32 1.442695, %v5303_v54 }
0x1050   :  { %5287 = vmax.xlane.f32.xlu0 %v5286_v57  ;;  %5398 = vadd.xlane.f32.xlu1 %v5397_v35  ;;  %v5338_v57 = vmul.f32 1.442695, %v5302_v40  ;;  %v11582_v44 = vpop.eup %8980 }
0x1051   :  { %v5412_v56 = vsel %vm2394_vm2, %v11582_v44, 0.0 }
0x1052   :  { %8982 = vpow2.f32 %v5338_v57 }
0x1054   :  { %5296 = vmax.xlane.f32.xlu1 %v5295_v60 }
0x1058   :  { %5290 = vmax.xlane.f32.xlu1 %v5289_v11  ;;  %v5344_v11 = vmul.f32 1.442695, %v5305_v0 }
0x105a   :  { %8984 = vpow2.f32 %v5344_v11 }
0x1066   :  { %4662 = vrot.lane.b32.xlu0 %v11261_v25, %s9222_s19 }
0x1069   :  { %4664 = vrot.lane.b32.xlu1 %v11271_v2, %s9222_s19 }
0x106b   :  { %v5234_v24 = vpop.xlane.xlu0 %5233 }
0x106c   :  { %v5308_v35 = vsub.f32 %v11445_v30, %v5234_v24  ;;  %v11587_v24 = vpop.eup %8982 }
0x106d   :  { %v5237_v10 = vpop.xlane.xlu1 %5236 }
0x106e   :  { %v5350_v22 = vmul.f32 1.442695, %v5308_v35  ;;  %v5309_v19 = vsub.f32 %v11451_v14, %v5237_v10  ;;  %v5406_v10 = vsel %vm2394_vm2, %v11587_v24, 0.0 }
0x106f   :  { %v5228_v60 = vpop.xlane.xlu0 %5227 }
0x1070   :  { %v5306_v6 = vsub.f32 %v11447_v41, %v5228_v60  ;;  %8986 = vpow2.f32 %v5350_v22  ;;  %v5352_v30 = vmul.f32 1.442695, %v5309_v19  ;;  %v11589_v22 = vpop.eup %8984 }
0x1071   :  { %v5231_v33 = vpop.xlane.xlu1 %5230  ;;  %8988 = vpow2.f32 %v5340_v36 }
0x1072   :  { %v5346_v34 = vmul.f32 1.442695, %v5306_v6  ;;  %v5307_v12 = vsub.f32 %v11453_v63, %v5231_v33  ;;  %v5415_v63 = vsel %vm2394_vm2, %v11589_v22, 0.0 }
0x1074   :  { %8990 = vpow2.f32 %v5346_v34  ;;  %v5348_v54 = vmul.f32 1.442695, %v5307_v12 }
0x1075   :  { %8992 = vpow2.f32 %v5352_v30 }
0x1076   :  { %8994 = vpow2.f32 %v5348_v54 }
0x107a   :  { %v11593_v41 = vpop.eup %8986 }
0x107b   :  { %v11595_v14 = vpop.eup %8988  ;;  %v5424_v20 = vsel %vm2394_vm2, %v11593_v41, 0.0 }
0x107c   :  { %v5409_v0 = vsel %vm2394_vm2, %v11595_v14, 0.0 }
0x107e   :  { %v11601_v40 = vpop.eup %8990 }
0x107f   :  { %v5418_v5 = vsel %vm2394_vm2, %v11601_v40, 0.0  ;;  %v11607_v35 = vpop.eup %8992 }
0x1080   :  { %v5427_v19 = vsel %vm2394_vm2, %v11607_v35, 0.0  ;;  %v11613_v33 = vpop.eup %8994 }
0x1085   :  { %5413 = vadd.xlane.f32.xlu0 %v5412_v56 }
0x1089   :  { %5407 = vadd.xlane.f32.xlu0 %v5406_v10  ;;  %v5421_v10 = vsel %vm2394_vm2, %v11613_v33, 0.0 }
0x108d   :  { %5416 = vadd.xlane.f32.xlu1 %v5415_v63  ;;  %5425 = vadd.xlane.f32.xlu0 %v5424_v20 }
0x108f   :  { %v5258_v57 = vpop.xlane.xlu0 %5257 }
0x1090   :  { %v5316_v60 = vsub.f32 %v11461_v53, %v5258_v57 }
0x1091   :  { %5410 = vadd.xlane.f32.xlu1 %v5409_v0  ;;  %5419 = vadd.xlane.f32.xlu0 %v5418_v5  ;;  %v5261_v11 = vpop.xlane.xlu1 %5260 }
0x1092   :  { %v5366_v6 = vmul.f32 1.442695, %v5316_v60  ;;  %v5317_v36 = vsub.f32 %v11469_v38, %v5261_v11 }
0x1093   :  { %v5246_v34 = vpop.xlane.xlu0 %5245 }
0x1094   :  { %8996 = vpow2.f32 %v5366_v6  ;;  %v5368_v30 = vmul.f32 1.442695, %v5317_v36  ;;  %v5312_v12 = vsub.f32 %v11467_v3, %v5246_v34 }
0x1095   :  { %5428 = vadd.xlane.f32.xlu1 %v5427_v19  ;;  %v5249_v56 = vpop.xlane.xlu1 %5248 }
0x1096   :  { %8998 = vpow2.f32 %v5368_v30  ;;  %v5358_v54 = vmul.f32 1.442695, %v5312_v12  ;;  %v5313_v53 = vsub.f32 %v11477_v15, %v5249_v56 }
0x1097   :  { %v5252_v38 = vpop.xlane.xlu0 %5251 }
0x1098   :  { %9000 = vpow2.f32 %v5358_v54  ;;  %v5360_v63 = vmul.f32 1.442695, %v5313_v53  ;;  %v5314_v20 = vsub.f32 %v11463_v17, %v5252_v38 }
0x1099   :  { %5422 = vadd.xlane.f32.xlu1 %v5421_v10  ;;  %v5255_v0 = vpop.xlane.xlu1 %5254 }
0x109a   :  { %9002 = vpow2.f32 %v5360_v63  ;;  %v5362_v5 = vmul.f32 1.442695, %v5314_v20  ;;  %v5315_v57 = vsub.f32 %v11473_v18, %v5255_v0 }
0x109b   :  { %v5240_v3 = vpop.xlane.xlu0 %5239 }
0x109c   :  { %9004 = vpow2.f32 %v5362_v5  ;;  %v5364_v60 = vmul.f32 1.442695, %v5315_v57  ;;  %v5310_v11 = vsub.f32 %v11471_v55, %v5240_v3 }
0x109d   :  { %v5243_v15 = vpop.xlane.xlu1 %5242 }
0x109e   :  { %v11622_v6 = vpop.eup %8996  ;;  %9006 = vpow2.f32 %v5364_v60  ;;  %v5354_v36 = vmul.f32 1.442695, %v5310_v11  ;;  %v5311_v19 = vsub.f32 %v11479_v52, %v5243_v15 }
0x109f   :  { %v5282_v34 = vpop.xlane.xlu0 %5281  ;;  %v5448_v17 = vsel %vm2394_vm2, %v11622_v6, 0.0 }
0x10a0   :  { %v11627_v30 = vpop.eup %8998  ;;  %9008 = vpow2.f32 %v5354_v36  ;;  %v5356_v18 = vmul.f32 1.442695, %v5311_v19  ;;  %v5324_v12 = vsub.f32 %v11493_v31, %v5282_v34  ;;  %5449 = vadd.xlane.f32.xlu0 %v5448_v17 }
0x10a1   :  { %v5285_v56 = vpop.xlane.xlu1 %5284  ;;  %v5451_v55 = vsel %vm2394_vm2, %v11627_v30, 0.0 }
0x10a2   :  { %v11632_v54 = vpop.eup %9000  ;;  %9010 = vpow2.f32 %v5356_v18  ;;  %v5382_v53 = vmul.f32 1.442695, %v5324_v12  ;;  %5452 = vadd.xlane.f32.xlu1 %v5451_v55  ;;  %v5325_v36 = vsub.f32 %v11501_v62, %v5285_v56 }
0x10a3   :  { %v5270_v52 = vpop.xlane.xlu0 %5269  ;;  %v5436_v10 = vsel %vm2394_vm2, %v11632_v54, 0.0 }
0x10a4   :  { %v11636_v38 = vpop.eup %9002  ;;  %9012 = vpow2.f32 %v5382_v53  ;;  %v5320_v63 = vsub.f32 %v11499_v50, %v5270_v52  ;;  %5437 = vadd.xlane.f32.xlu0 %v5436_v10  ;;  %v5384_v52 = vmul.f32 1.442695, %v5325_v36 }
0x10a5   :  { %v5439_v31 = vsel %vm2394_vm2, %v11636_v38, 0.0  ;;  %v5273_v5 = vpop.xlane.xlu1 %5272 }
0x10a6   :  { %v11641_v20 = vpop.eup %9004  ;;  %v5374_v0 = vmul.f32 1.442695, %v5320_v63  ;;  %5440 = vadd.xlane.f32.xlu1 %v5439_v31  ;;  %v5321_v62 = vsub.f32 %v11509_v7, %v5273_v5 }
0x10a7   :  { %v5276_v57 = vpop.xlane.xlu0 %5275  ;;  %v5442_v3 = vsel %vm2394_vm2, %v11641_v20, 0.0 }
0x10a8   :  { %v11645_v60 = vpop.eup %9006  ;;  %9014 = vpow2.f32 %v5374_v0  ;;  %v5322_v11 = vsub.f32 %v11495_v39, %v5276_v57  ;;  %5443 = vadd.xlane.f32.xlu0 %v5442_v3 }
0x10a9   :  { %v5445_v50 = vsel %vm2394_vm2, %v11645_v60, 0.0  ;;  %v5279_v39 = vpop.xlane.xlu1 %5278 }
0x10aa   :  { %v11650_v15 = vpop.eup %9008  ;;  %v5378_v19 = vmul.f32 1.442695, %v5322_v11  ;;  %5446 = vadd.xlane.f32.xlu1 %v5445_v50  ;;  %v5323_v31 = vsub.f32 %v11505_v23, %v5279_v39 }
0x10ab   :  { %v5264_v34 = vpop.xlane.xlu0 %5263  ;;  %v5430_v17 = vsel %vm2394_vm2, %v11650_v15, 0.0 }
0x10ac   :  { %v11655_v18 = vpop.eup %9010  ;;  %9016 = vpow2.f32 %v5378_v19  ;;  %v5318_v12 = vsub.f32 %v11503_v26, %v5264_v34  ;;  %5431 = vadd.xlane.f32.xlu0 %v5430_v17  ;;  %v5376_v26 = vmul.f32 1.442695, %v5321_v62  ;;  %v5380_v7 = vmul.f32 1.442695, %v5323_v31 }
0x10ad   :  { %v5433_v55 = vsel %vm2394_vm2, %v11655_v18, 0.0  ;;  %v5267_v0 = vpop.xlane.xlu1 %5266 }
0x10ae   :  { %v11660_v53 = vpop.eup %9012  ;;  %v5370_v56 = vmul.f32 1.442695, %v5318_v12  ;;  %5434 = vadd.xlane.f32.xlu1 %v5433_v55  ;;  %v5319_v5 = vsub.f32 %v11511_v51, %v5267_v0 }
0x10af   :  { %v5472_v10 = vsel %vm2394_vm2, %v11660_v53, 0.0 }
0x10b0   :  { %9018 = vpow2.f32 %v5370_v56  ;;  %5473 = vadd.xlane.f32.xlu0 %v5472_v10  ;;  %v5372_v36 = vmul.f32 1.442695, %v5319_v5 }
0x10b1   :  { %9020 = vpow2.f32 %v5384_v52 }
0x10b2   :  { %v11665_v63 = vpop.eup %9014  ;;  %9022 = vpow2.f32 %v5376_v26 }
0x10b3   :  { %v5460_v57 = vsel %vm2394_vm2, %v11665_v63, 0.0  ;;  %9024 = vpow2.f32 %v5380_v7 }
0x10b4   :  { %5461 = vadd.xlane.f32.xlu1 %v5460_v57  ;;  %9026 = vpow2.f32 %v5372_v36 }
0x10b6   :  { %v11670_v3 = vpop.eup %9016 }
0x10b7   :  { %v5466_v11 = vsel %vm2394_vm2, %v11670_v3, 0.0 }
0x10b8   :  { %5467 = vadd.xlane.f32.xlu0 %v5466_v11 }
0x10ba   :  { %v11675_v50 = vpop.eup %9018 }
0x10bb   :  { %v5454_v23 = vsel %vm2394_vm2, %v11675_v50, 0.0  ;;  %v11679_v19 = vpop.eup %9020 }
0x10bc   :  { %5455 = vadd.xlane.f32.xlu1 %v5454_v23  ;;  %v5475_v34 = vsel %vm2394_vm2, %v11679_v19, 0.0  ;;  %v11683_v17 = vpop.eup %9022 }
0x10bd   :  { %v5463_v51 = vsel %vm2394_vm2, %v11683_v17, 0.0  ;;  %v11687_v12 = vpop.eup %9024 }
0x10be   :  { %v5469_v39 = vsel %vm2394_vm2, %v11687_v12, 0.0  ;;  %v11691_v55 = vpop.eup %9026 }
0x10bf   :  { %v5457_v52 = vsel %vm2394_vm2, %v11691_v55, 0.0 }
0x10c0   :  { %5476 = vadd.xlane.f32.xlu1 %v5475_v34 }
0x10c4   :  { %5464 = vadd.xlane.f32.xlu1 %v5463_v51 }
0x10c8   :  { %5470 = vadd.xlane.f32.xlu1 %v5469_v39 }
0x10cc   :  { %5458 = vadd.xlane.f32.xlu1 %v5457_v52 }
0x10d1   :  { %v5402_v62 = vpop.xlane.xlu0 %5401 }
0x10d2   :  { %9028 = vrcp.f32 %v5402_v62 }
0x10d5   :  { %v5396_v56 = vpop.xlane.xlu0 %5395 }
0x10d9   :  { %v5405_v10 = vpop.xlane.xlu1 %5404  ;;  %v5294_v26 = vpop.xlane.xlu0 %5293 }
0x10da   :  { %v5328_v31 = vsub.f32 %v11527_v59, %v5294_v26  ;;  %9030 = vrcp.f32 %v5405_v10 }
0x10db   :  { %9032 = vrcp.f32 %v5396_v56 }
0x10dc   :  { %v5390_v0 = vmul.f32 1.442695, %v5328_v31  ;;  %v9029_v51 = vpop.eup %9028 }
0x10dd   :  { %v5399_v57 = vpop.xlane.xlu1 %5398  ;;  %v5288_v7 = vpop.xlane.xlu0 %5287 }
0x10de   :  { %9034 = vpow2.f32 %v5390_v0  ;;  %v5326_v5 = vsub.f32 %v11529_v58, %v5288_v7 }
0x10df   :  { %9036 = vrcp.f32 %v5399_v57  ;;  %v5524_v57 = vmul.f32 %v9029_v51, %v11547_v46 }
0x10e0   :  { %v5386_v11 = vmul.f32 1.442695, %v5326_v5 }
0x10e1   :  { %v5297_v36 = vpop.xlane.xlu1 %5296 }
0x10e2   :  { %9038 = vpow2.f32 %v5386_v11  ;;  %v5329_v23 = vsub.f32 %v11531_v42, %v5297_v36 }
0x10e4   :  { %v5392_v34 = vmul.f32 1.442695, %v5329_v23  ;;  %v9031_v52 = vpop.eup %9030 }
0x10e5   :  { %v5291_v39 = vpop.xlane.xlu1 %5290  ;;  %v9033_v62 = vpop.eup %9032  ;;  %v5525_v58 = vmul.f32 %v9031_v52, %v11555_v37 }
0x10e6   :  { %9040 = vpow2.f32 %v5392_v34  ;;  %v5327_v59 = vsub.f32 %v11533_v61, %v5291_v39  ;;  %v5522_v42 = vmul.f32 %v9033_v62, %v11551_v27 }
0x10e7   :  { %v5555_v5 = vpack.c.bf16 %v5525_v58, %v5524_v57 }
0x10e8   :  { %v11699_v56 = vpop.eup %9034  ;;  %v5388_v10 = vmul.f32 1.442695, %v5327_v59 }
0x10e9   :  { %v9037_v26 = vpop.eup %9036  ;;  %v5484_v31 = vsel %vm2394_vm2, %v11699_v56, 0.0  ;;  %v11731_v23 = vpop.permute.xlu1 %4664 }
0x10ea   :  { %9042 = vpow2.f32 %v5388_v10  ;;  %5485 = vadd.xlane.f32.xlu0 %v5484_v31  ;;  %v5523_v0 = vmul.f32 %v9037_v26, %v11561_v8 }
0x10ec   :  { %v11707_v7 = vpop.eup %9038  ;;  %v5554_v61 = vpack.c.bf16 %v5523_v0, %v5522_v42 }
0x10ed   :  { %v5478_v11 = vsel %vm2394_vm2, %v11707_v7, 0.0 }
0x10ee   :  { %8349 = vmatprep.mubr.msk.bf16.mxu0 %vm2394_vm2, %v5554_v61  ;;  %5479 = vadd.xlane.f32.xlu0 %v5478_v11 }
0x10ef   :  { %8350 = vmatmul.mubr.msk.bf16.vlgmr.msra.gmra.mrb[124].mxu0 %vm2394_vm2, %v5555_v5 }
0x10f0   :  { %v11713_v37 = vpop.eup %9040  ;;  %8362 = vmatpush3.bf16.msra.mxu0 %v11397_v47  ;;  %v11729_v47 = vpop.permute.xlu0 %4662 }
0x10f1   :  { %8363 = vmatprep.subr.bf16.mxu0 %v11403_v43  ;;  %v5487_v46 = vsel %vm2394_vm2, %v11713_v37, 0.0 }
0x10f2   :  { %5488 = vadd.xlane.f32.xlu0 %v5487_v46 }
0x10f4   :  { %v11719_v27 = vpop.eup %9042  ;;  %8364 = vmatpush3.bf16.msra.mxu0 %v11403_v43 }
0x10f5   :  { %8377 = vmatprep.subr.bf16.mxu0 %v11525_v9  ;;  %v5481_v8 = vsel %vm2394_vm2, %v11719_v27, 0.0 }
0x10f6   :  { %5482 = vadd.xlane.f32.xlu1 %v5481_v8 }
0x1107   :  { %4676 = vrot.lane.b32.xlu1 %v11271_v2, %s9223_s1 }
0x1108   :  { %4674 = vrot.lane.b32.xlu0 %v11261_v25, %s9223_s1 }
0x1112   :  { %v5414_v36 = vpop.xlane.xlu0 %5413 }
0x1116   :  { %v5408_v34 = vpop.xlane.xlu0 %5407 }
0x111a   :  { %v5417_v51 = vpop.xlane.xlu1 %5416  ;;  %v5426_v43 = vpop.xlane.xlu0 %5425 }
0x111b   :  { %9044 = vrcp.f32 %v5417_v51 }
0x111c   :  { %9046 = vrcp.f32 %v5408_v34 }
0x111d   :  { %9048 = vrcp.f32 %v5414_v36 }
0x111e   :  { %v5411_v39 = vpop.xlane.xlu1 %5410  ;;  %v5420_v52 = vpop.xlane.xlu0 %5419 }
0x111f   :  { %9050 = vrcp.f32 %v5411_v39 }
0x1122   :  { %v5429_v59 = vpop.xlane.xlu1 %5428 }
0x1123   :  { %9052 = vrcp.f32 %v5429_v59 }
0x1124   :  { %9054 = vrcp.f32 %v5420_v52 }
0x1125   :  { %v9045_v2 = vpop.eup %9044  ;;  %9056 = vrcp.f32 %v5426_v43 }
0x1126   :  { %v5423_v25 = vpop.xlane.xlu1 %5422  ;;  %v9047_v62 = vpop.eup %9046  ;;  %v5529_v58 = vmul.f32 %v9045_v2, %v11589_v22 }
0x1127   :  { %9058 = vrcp.f32 %v5423_v25  ;;  %v9049_v10 = vpop.eup %9048  ;;  %v5526_v31 = vmul.f32 %v9047_v62, %v11587_v24 }
0x1128   :  { %v5528_v0 = vmul.f32 %v9049_v10, %v11582_v44 }
0x1129   :  { %v9051_v26 = vpop.eup %9050 }
0x112a   :  { %v5527_v42 = vmul.f32 %v9051_v26, %v11595_v14  ;;  %v5557_v61 = vpack.c.bf16 %v5529_v58, %v5528_v0 }
0x112c   :  { %v5556_v57 = vpack.c.bf16 %v5527_v42, %v5526_v31 }
0x112d   :  { %v9053_v5 = vpop.eup %9052  ;;  %v5450_v11 = vpop.xlane.xlu0 %5449 }
0x112e   :  { %8357 = vmatprep.mubr.msk.bf16.mxu1 %vm2394_vm2, %v5556_v57  ;;  %v9055_v46 = vpop.eup %9054  ;;  %v5533_v24 = vmul.f32 %v9053_v5, %v11607_v35 }
0x112f   :  { %8358 = vmatmul.mubr.msk.bf16.vlgmr.msra.gmra.mrb[140].mxu1 %vm2394_vm2, %v5557_v61  ;;  %v9057_v8 = vpop.eup %9056  ;;  %v5453_v36 = vpop.xlane.xlu1 %5452  ;;  %v5530_v44 = vmul.f32 %v9055_v46, %v11601_v40 }
0x1130   :  { %8370 = vmatpush3.bf16.msra.mxu1 %v11409_v45  ;;  %v5532_v51 = vmul.f32 %v9057_v8, %v11593_v41  ;;  %9060 = vrcp.f32 %v5453_v36 }
0x1131   :  { %v9059_v22 = vpop.eup %9058  ;;  %8371 = vmatprep.subr.bf16.mxu1 %v11539_v32  ;;  %v5438_v34 = vpop.xlane.xlu0 %5437 }
0x1132   :  { %v5531_v14 = vmul.f32 %v9059_v22, %v11613_v33  ;;  %v5559_v45 = vpack.c.bf16 %v5533_v24, %v5532_v51 }
0x1133   :  { %v5441_v39 = vpop.xlane.xlu1 %5440 }
0x1134   :  { %8372 = vmatpush3.bf16.msra.mxu1 %v11539_v32  ;;  %v5558_v43 = vpack.c.bf16 %v5531_v14, %v5530_v44 }
0x1135   :  { %8385 = vmatprep.subr.bf16.mxu1 %v11729_v47  ;;  %v5444_v35 = vpop.xlane.xlu0 %5443 }
0x1136   :  { %8365 = vmatprep.mubr.msk.bf16.mxu0 %vm2394_vm2, %v5558_v43  ;;  %9062 = vrcp.f32 %v5444_v35 }
0x1137   :  { %8366 = vmatmul.mubr.msk.bf16.vlgmr.msra.gmra.mrb[128].mxu0 %vm2394_vm2, %v5559_v45  ;;  %9064 = vrcp.f32 %v5450_v11  ;;  %v5447_v40 = vpop.xlane.xlu1 %5446 }
0x1138   :  { %8378 = vmatpush3.bf16.msra.mxu0 %v11525_v9  ;;  %9066 = vrcp.f32 %v5447_v40 }
0x1139   :  { %8379 = vmatprep.subr.bf16.mxu0 %v11535_v28  ;;  %9068 = vrcp.f32 %v5441_v39  ;;  %v5432_v32 = vpop.xlane.xlu0 %5431 }
0x113a   :  { %9070 = vrcp.f32 %v5432_v32  ;;  %v9061_v33 = vpop.eup %9060 }
0x113b   :  { %9072 = vrcp.f32 %v5438_v34  ;;  %v5435_v41 = vpop.xlane.xlu1 %5434  ;;  %v5541_v9 = vmul.f32 %v9061_v33, %v11627_v30 }
0x113c   :  { %8380 = vmatpush3.bf16.msra.mxu0 %v11535_v28  ;;  %9074 = vrcp.f32 %v5435_v41 }
0x113d   :  { %8393 = vmatprep.subr.bf16.mxu0 %v11537_v1 }
0x1140   :  { %v9063_v52 = vpop.eup %9062 }
0x1141   :  { %v9065_v59 = vpop.eup %9064  ;;  %v5538_v62 = vmul.f32 %v9063_v52, %v11641_v20  ;;  %v5462_v28 = vpop.xlane.xlu1 %5461 }
0x1142   :  { %v9067_v2 = vpop.eup %9066  ;;  %v5540_v58 = vmul.f32 %v9065_v59, %v11622_v6 }
0x1143   :  { %v9069_v25 = vpop.eup %9068  ;;  %v5539_v10 = vmul.f32 %v9067_v2, %v11645_v60 }
0x1144   :  { %v9071_v26 = vpop.eup %9070  ;;  %v5537_v57 = vmul.f32 %v9069_v25, %v11636_v38  ;;  %v5563_v61 = vpack.c.bf16 %v5541_v9, %v5540_v58  ;;  %v5474_v38 = vpop.xlane.xlu0 %5473 }
0x1145   :  { %v9073_v31 = vpop.eup %9072  ;;  %v5562_v42 = vpack.c.bf16 %v5539_v10, %v5538_v62  ;;  %v5534_v5 = vmul.f32 %v9071_v26, %v11650_v15 }
0x1146   :  { %v9075_v0 = vpop.eup %9074  ;;  %v5536_v20 = vmul.f32 %v9073_v31, %v11632_v54 }
0x1147   :  { %8381 = vmatprep.mubr.msk.bf16.mxu0 %vm2394_vm2, %v5562_v42  ;;  %v5535_v30 = vmul.f32 %v9075_v0, %v11655_v18 }
0x1148   :  { %8382 = vmatmul.mubr.msk.bf16.vlgmr.msra.gmra.mrb[132].mxu0 %vm2394_vm2, %v5563_v61  ;;  %v5561_v11 = vpack.c.bf16 %v5537_v57, %v5536_v20  ;;  %v5468_v54 = vpop.xlane.xlu0 %5467 }
0x1149   :  { %8394 = vmatpush3.bf16.msra.mxu0 %v11537_v1  ;;  %v5456_v6 = vpop.xlane.xlu1 %5455  ;;  %v5560_v60 = vpack.c.bf16 %v5535_v30, %v5534_v5 }
0x114a   :  { %8395 = vmatprep.subr.bf16.mxu0 %v11541_v13 }
0x114b   :  { %8373 = vmatprep.mubr.msk.bf16.mxu1 %vm2394_vm2, %v5560_v60 }
0x114c   :  { %8374 = vmatmul.mubr.msk.bf16.vlgmr.msra.gmra.mrb[144].mxu1 %vm2394_vm2, %v5561_v11 }
0x114d   :  { %8386 = vmatpush3.bf16.msra.mxu1 %v11729_v47  ;;  %8396 = vmatpush3.bf16.msra.mxu0 %v11541_v13  ;;  %v5477_v15 = vpop.xlane.xlu1 %5476 }
0x114e   :  { %8387 = vmatprep.subr.bf16.mxu1 %v11731_v23  ;;  %9076 = vrcp.f32 %v5477_v15 }
0x114f   :  { %9078 = vrcp.f32 %v5468_v54  ;;  %v8700_v54 = vld [vmem:[%s12486_s7 + $0x20] sm:$0xff]  }
0x1150   :  { %9080 = vrcp.f32 %v5474_v38  ;;  %8409 = vmatprep.subr.bf16.mxu0 %v8700_v54 }
0x1151   :  { %8388 = vmatpush3.bf16.msra.mxu1 %v11731_v23  ;;  %v5465_v1 = vpop.xlane.xlu1 %5464 }
0x1155   :  { %v5471_v18 = vpop.xlane.xlu1 %5470 }
0x1156   :  { %9082 = vrcp.f32 %v5471_v18  ;;  %v8702_v18 = vld [vmem:[%s12486_s7 + $0x30] sm:$0xff]  }
0x1157   :  { %9084 = vrcp.f32 %v5465_v1  ;;  %v8701_v1 = vld [vmem:[%s12486_s7 + $0x28] sm:$0xff]  }
0x1158   :  { %9086 = vrcp.f32 %v5456_v6  ;;  %v9077_v47 = vpop.eup %9076 }
0x1159   :  { %9088 = vrcp.f32 %v5462_v28  ;;  %v5459_v46 = vpop.xlane.xlu1 %5458  ;;  %v9079_v8 = vpop.eup %9078  ;;  %v5549_v22 = vmul.f32 %v9077_v47, %v11679_v19 }
0x115a   :  { %9090 = vrcp.f32 %v5459_v46  ;;  %v9081_v13 = vpop.eup %9080  ;;  %v5546_v23 = vmul.f32 %v9079_v8, %v11670_v3  ;;  %v8703_v8 = vld [vmem:[%s12486_s7 + $0x38] sm:$0xff]   ;;  %s12530_s7 = smov 48  }
0x115b   :  { %v5548_v34 = vmul.f32 %v9081_v13, %v11660_v53 }
0x115d   :  { %v5567_v35 = vpack.c.bf16 %v5549_v22, %v5548_v34 }
0x1160   :  { %v9083_v36 = vpop.eup %9082 }
0x1161   :  { %v9085_v24 = vpop.eup %9084  ;;  %v5547_v44 = vmul.f32 %v9083_v36, %v11687_v12 }
0x1162   :  { %v9087_v14 = vpop.eup %9086  ;;  %v5545_v45 = vmul.f32 %v9085_v24, %v11683_v17 }
0x1163   :  { %v9089_v51 = vpop.eup %9088  ;;  %v5566_v43 = vpack.c.bf16 %v5547_v44, %v5546_v23  ;;  %v5542_v40 = vmul.f32 %v9087_v14, %v11675_v50 }
0x1164   :  { %v9091_v39 = vpop.eup %9090  ;;  %v5544_v32 = vmul.f32 %v9089_v51, %v11665_v63 }
0x1165   :  { %8397 = vmatprep.mubr.msk.bf16.mxu0 %vm2394_vm2, %v5566_v43  ;;  %v5543_v19 = vmul.f32 %v9091_v39, %v11691_v55 }
0x1166   :  { %8398 = vmatmul.mubr.msk.bf16.vlgmr.msra.gmra.mrb[136].mxu0 %vm2394_vm2, %v5567_v35  ;;  %v5565_v12 = vpack.c.bf16 %v5545_v45, %v5544_v32 }
0x1167   :  { %v5564_v3 = vpack.c.bf16 %v5543_v19, %v5542_v40  ;;  %8410 = vmatpush3.bf16.msra.mxu0 %v8700_v54 }
0x1168   :  { %8411 = vmatprep.subr.bf16.mxu0 %v8701_v1 }
0x1169   :  { %8389 = vmatprep.mubr.msk.bf16.mxu1 %vm2394_vm2, %v5564_v3 }
0x116a   :  { %8390 = vmatmul.mubr.msk.bf16.vlgmr.msra.gmra.mrb[148].mxu1 %vm2394_vm2, %v5565_v12 }
0x116b   :  { %8412 = vmatpush3.bf16.msra.mxu0 %v8701_v1 }
0x116c   :  { %8413 = vmatprep.subr.bf16.mxu0 %v8702_v18 }
0x116f   :  { %8414 = vmatpush3.bf16.msra.mxu0 %v8702_v18 }
0x1170   :  { %8415 = vmatprep.subr.bf16.mxu0 %v8703_v8 }
0x1173   :  { %8416 = vmatpush3.bf16.msra.mxu0 %v8703_v8 }
0x1177   :  { %v5486_v53 = vpop.xlane.xlu0 %5485 }
0x117b   :  { %v5480_v41 = vpop.xlane.xlu0 %5479 }
0x117f   :  { %v5489_v17 = vpop.xlane.xlu0 %5488 }
0x1180   :  { %9092 = vrcp.f32 %v5489_v17 }
0x1181   :  { %9094 = vrcp.f32 %v5480_v41 }
0x1182   :  { %9096 = vrcp.f32 %v5486_v53 }
0x1183   :  { %v5483_v33 = vpop.xlane.xlu1 %5482  ;;  %v4675_v50 = vpop.permute.xlu0 %4674 }
0x1184   :  { %9098 = vrcp.f32 %v5483_v33  ;;  %8401 = vmatprep.subr.bf16.mxu1 %v4675_v50 }
0x1185   :  { %8402 = vmatpush3.bf16.msra.mxu1 %v4675_v50 }
0x1187   :  { %v4677_v63 = vpop.permute.xlu1 %4676 }
0x1188   :  { %8403 = vmatprep.subr.bf16.mxu1 %v4677_v63 }
0x1189   :  { %8404 = vmatpush3.bf16.msra.mxu1 %v4677_v63 }
0x118a   :  { %v9093_v55 = vpop.eup %9092 }
0x118b   :  { %v9095_v52 = vpop.eup %9094  ;;  %v5553_v9 = vmul.f32 %v9093_v55, %v11713_v37 }
0x118c   :  { %v9097_v59 = vpop.eup %9096  ;;  %v5550_v25 = vmul.f32 %v9095_v52, %v11707_v7 }
0x118d   :  { %v5552_v10 = vmul.f32 %v9097_v59, %v11699_v56 }
0x118e   :  { %v9099_v2 = vpop.eup %9098 }
0x118f   :  { %v5551_v62 = vmul.f32 %v9099_v2, %v11719_v27  ;;  %v5569_v58 = vpack.c.bf16 %v5553_v9, %v5552_v10 }
0x1191   :  { %v5568_v26 = vpack.c.bf16 %v5551_v62, %v5550_v25 }
0x1193   :  { %8405 = vmatprep.mubr.msk.bf16.mxu1 %vm2394_vm2, %v5568_v26 }
0x1194   :  { %8406 = vmatmul.mubr.msk.bf16.vlgmr.msra.gmra.mrb[152].mxu1 %vm2394_vm2, %v5569_v58 }
0x1195   :  { %6458 = vmatprep.mubr.bf16.mxu1 %v12522_v48 }
0x11c2   :  { %v11790_v31 = vpop.f32.mrb[124].mxu0 }
0x11c3   :  { %v11792_v28 = vpop.f32.mrb[125].mxu0 }
0x11c4   :  { %v11794_v42 = vpop.f32.mrb[126].mxu0 }
0x11c5   :  { %v6011_v7 = vpack.c.bf16 %v11794_v42, %v11790_v31  ;;  %v11798_v37 = vpop.f32.mrb[127].mxu0 }
0x11c6   :  { %v6010_v56 = vpack.c.bf16 %v11798_v37, %v11792_v28 }
0x1202   :  { %v11802_v27 = vpop.f32.mrb[140].mxu1 }
0x1203   :  { %v11804_v0 = vpop.f32.mrb[141].mxu1 }
0x1204   :  { %v11806_v57 = vpop.f32.mrb[142].mxu1 }
0x1205   :  { %v6013_v61 = vpack.c.bf16 %v11806_v57, %v11802_v27  ;;  %v11810_v5 = vpop.f32.mrb[143].mxu1 }
0x1206   :  { %v6012_v30 = vpack.c.bf16 %v11810_v5, %v11804_v0  ;;  %v7587_v0 = vld [vmem:[%s12487_s8 + $0x1] ss:$0 sm:$0xff] }
0x120a   :  { %v8367_v20 = vpop.f32.mrb[128].mxu0 }
0x120b   :  { %v5720_v6 = vpop.f32.mrb[129].mxu0 }
0x120c   :  { %v8368_v60 = vpop.f32.mrb[130].mxu0 }
0x120d   :  { %v6015_v11 = vpack.c.bf16 %v8368_v60, %v8367_v20  ;;  %v5723_v38 = vpop.f32.mrb[131].mxu0 }
0x120e   :  { %v6014_v15 = vpack.c.bf16 %v5723_v38, %v5720_v6 }
0x120f   :  { %6032 = vrot.lane.b32.xlu1 %v6015_v11, %s9225_s21 }
0x1210   :  { %6030 = vrot.lane.b32.xlu0 %v6014_v15, %s9225_s21 }
0x121b   :  { %v8383_v46 = vpop.f32.mrb[132].mxu0 }
0x121c   :  { %v5830_v47 = vpop.f32.mrb[133].mxu0 }
0x121d   :  { %v8384_v13 = vpop.f32.mrb[134].mxu0 }
0x121e   :  { %v6019_v36 = vpack.c.bf16 %v8384_v13, %v8383_v46  ;;  %v5833_v22 = vpop.f32.mrb[135].mxu0 }
0x121f   :  { %v6018_v24 = vpack.c.bf16 %v5833_v22, %v5830_v47  ;;  %v8375_v23 = vpop.f32.mrb[144].mxu1 }
0x1220   :  { %6044 = vrot.lane.b32.xlu1 %v6019_v36, %s9226_s30  ;;  %v5775_v44 = vpop.f32.mrb[145].mxu1 }
0x1221   :  { %6042 = vrot.lane.b32.xlu0 %v6018_v24, %s9226_s30  ;;  %v8376_v14 = vpop.f32.mrb[146].mxu1 }
0x1222   :  { %v6017_v34 = vpack.c.bf16 %v8376_v14, %v8375_v23  ;;  %v5778_v51 = vpop.f32.mrb[147].mxu1 }
0x1223   :  { %v6016_v43 = vpack.c.bf16 %v5778_v51, %v5775_v44 }
0x1239   :  { %v8399_v39 = vpop.f32.mrb[136].mxu0 }
0x123a   :  { %v5940_v45 = vpop.f32.mrb[137].mxu0 }
0x123b   :  { %v8400_v35 = vpop.f32.mrb[138].mxu0 }
0x123c   :  { %v6023_v40 = vpack.c.bf16 %v8400_v35, %v8399_v39  ;;  %v5943_v19 = vpop.f32.mrb[139].mxu0 }
0x123d   :  { %v6022_v32 = vpack.c.bf16 %v5943_v19, %v5940_v45  ;;  %v8391_v3 = vpop.f32.mrb[148].mxu1 }
0x123e   :  { %v5885_v12 = vpop.f32.mrb[149].mxu1  ;;  %6056 = vrot.lane.b32.xlu1 %v6023_v40, %s12530_s7 }
0x123f   :  { %v8392_v53 = vpop.f32.mrb[150].mxu1  ;;  %6054 = vrot.lane.b32.xlu0 %v6022_v32, %s12530_s7 }
0x1240   :  { %v6021_v41 = vpack.c.bf16 %v8392_v53, %v8391_v3  ;;  %v5888_v17 = vpop.f32.mrb[151].mxu1  ;;  %v12531_v3 = vld [vmem:[#allocation6_spill] sm:$0xff]  ;;  %v12532_v53 = vld [vmem:[#allocation5_spill] sm:$0xff] }
0x1241   :  { %v6020_v33 = vpack.c.bf16 %v5888_v17, %v5885_v12 }
0x1242   :  { %6036 = vrot.lane.b32.xlu1 %v6017_v34, %s9225_s21 }
0x1243   :  { %6034 = vrot.lane.b32.xlu0 %v6016_v43, %s9225_s21 }
0x1246   :  { %6048 = vrot.lane.b32.xlu1 %v6021_v41, %s9226_s30 }
0x1247   :  { %6046 = vrot.lane.b32.xlu0 %v6020_v33, %s9226_s30  ;;  %v12533_v33 = vld [vmem:[#allocation9_spill] sm:$0xff] }
0x1267   :  { %v8407_v50 = vpop.f32.mrb[152].mxu1 }
0x1268   :  { %v5995_v63 = vpop.f32.mrb[153].mxu1 }
0x1269   :  { %v8408_v55 = vpop.f32.mrb[154].mxu1 }
0x126a   :  { %v6025_v52 = vpack.c.bf16 %v8408_v55, %v8407_v50  ;;  %v5998_v59 = vpop.f32.mrb[155].mxu1 }
0x126b   :  { %v6024_v2 = vpack.c.bf16 %v5998_v59, %v5995_v63 }
0x126c   :  { %6060 = vrot.lane.b32.xlu1 %v6025_v52, %s12530_s7 }
0x126d   :  { %6058 = vrot.lane.b32.xlu0 %v6024_v2, %s12530_s7 }
0x1281   :  { %v6033_v9 = vpop.permute.xlu1 %6032 }
0x1282   :  { %v6031_v25 = vpop.permute.xlu0 %6030  ;;  %v6067_v20 = vsel %vm1877_vm1, %v6011_v7, %v6033_v9 }
0x1283   :  { %v6064_v26 = vsel %vm1877_vm1, %v6010_v56, %v6031_v25 }
0x1292   :  { %v6045_v62 = vpop.permute.xlu1 %6044 }
0x1293   :  { %v6043_v10 = vpop.permute.xlu0 %6042  ;;  %v6077_v11 = vsel %vm2394_vm2, %v6067_v20, %v6045_v62 }
0x1294   :  { %v6075_v6 = vsel %vm2394_vm2, %v6064_v26, %v6043_v10 }
0x12b0   :  { %v6057_v58 = vpop.permute.xlu1 %6056 }
0x12b1   :  { %v6055_v60 = vpop.permute.xlu0 %6054  ;;  %v6085_v15 = vsel %vm3275_vm3, %v6077_v11, %v6057_v58 }
0x12b2   :  { %v6083_v38 = vsel %vm3275_vm3, %v6075_v6, %v6055_v60 }
0x12b3   :  { %8417 = vmatprep.mubr.msk.bf16.mxu0 %vm1514_vm0, %v6083_v38 }
0x12b4   :  { %8418 = vmatmul.mubr.msk.bf16.vlgmr.msra.gmra.mrb[140].mxu0 %vm1514_vm0, %v6085_v15  ;;  %v6037_v28 = vpop.permute.xlu1 %6036 }
0x12b5   :  { %v6035_v37 = vpop.permute.xlu0 %6034  ;;  %v6073_v7 = vsel %vm1877_vm1, %v6013_v61, %v6037_v28 }
0x12b6   :  { %v6070_v31 = vsel %vm1877_vm1, %v6012_v30, %v6035_v37 }
0x12b8   :  { %v6049_v56 = vpop.permute.xlu1 %6048 }
0x12b9   :  { %v6047_v54 = vpop.permute.xlu0 %6046  ;;  %v6081_v46 = vsel %vm2394_vm2, %v6073_v7, %v6049_v56  ;;  %v8704_v7 = vld [vmem:[%s12490_s11 + $0x40] ss:$8 sps:$4 sm:$0xff]  }
0x12ba   :  { %v6079_v1 = vsel %vm2394_vm2, %v6070_v31, %v6047_v54 }
0x12de   :  { %v6061_v42 = vpop.permute.xlu1 %6060 }
0x12df   :  { %v6059_v18 = vpop.permute.xlu0 %6058  ;;  %v6089_v8 = vsel %vm3275_vm3, %v6081_v46, %v6061_v42  ;;  %v8706_v42 = vld [vmem:[%s12490_s11 + $0x44] ss:$8 sps:$4 sm:$0xff]  }
0x12e0   :  { %v6087_v47 = vsel %vm3275_vm3, %v6079_v1, %v6059_v18  ;;  %6426 = vmatprep.subr.bf16.mxu1 %v8706_v42  ;;  %v8709_v1 = vld [vmem:[%s12490_s11 + $0x54] ss:$8 sps:$4 sm:$0xff]   ;;  %v8707_v18 = vld [vmem:[%s12490_s11 + $0x50] ss:$8 sps:$4 sm:$0xff]  }
0x12e1   :  { %8421 = vmatprep.mubr.msk.bf16.mxu0 %vm1514_vm0, %v6087_v47  ;;  %6427 = vmatpush1.bf16.msra.mxu1 %v8704_v7  ;;  %v8710_v47 = vld [vmem:[%s12490_s11 + $0x60] ss:$8 sps:$4 sm:$0xff]  }
0x12e2   :  { %8422 = vmatmul.mubr.msk.bf16.gmra.mrb[144].mxu0 %vm1514_vm0, %v6089_v8  ;;  %6428 = vmatprep.subr.bf16.mxu1 %v8709_v1  ;;  %v8712_v8 = vld [vmem:[%s12490_s11 + $0x64] ss:$8 sps:$4 sm:$0xff]  }
0x12e5   :  { %6429 = vmatpush1.bf16.msra.mxu1 %v8707_v18 }
0x12e6   :  { %6430 = vmatprep.subr.bf16.mxu1 %v8712_v8 }
0x12e9   :  { %6431 = vmatpush1.bf16.msra.mxu1 %v8710_v47 }
0x1387   :  { %v8419_v27 = vpop.f32.mrb[140].mxu0 }
0x1388   :  { %v6173_v57 = vpop.f32.mrb[141].mxu0  ;;  %v6182_v61 = vadd.f32 %v8419_v27, %v7587_v0  ;;  %v8715_v27 = vld [vmem:[%s12490_s11 + $0x74] ss:$8 sps:$4 sm:$0xff]  }
0x1389   :  { %v6174_v5 = vadd.f32 %v7587_v0, %v6173_v57  ;;  %v8420_v30 = vpop.f32.mrb[142].mxu0  ;;  %6432 = vmatprep.subr.bf16.mxu1 %v8715_v27 }
0x138a   :  { %v6176_v13 = vpop.f32.mrb[143].mxu0  ;;  %v11873_v24 = vadd.f32 %v6182_v61, %v11124_v49  ;;  %v6185_v23 = vadd.f32 %v8420_v30, %v7587_v0 }
0x138b   :  { %v11870_v36 = vadd.f32 %v6174_v5, %v11114_v16  ;;  %v6177_v22 = vadd.f32 %v7587_v0, %v6176_v13  ;;  %v8713_v13 = vld [vmem:[%s12490_s11 + $0x70] ss:$8 sps:$4 sm:$0xff]  }
0x138c   :  { %v11883_v51 = vadd.f32 %v6185_v23, %v11127_v21  ;;  %v6222_v16 = vsel %vm1514_vm0, %v11873_v24, 0.0  ;;  %6433 = vmatpush1.bf16.msra.mxu1 %v8713_v13 }
0x138d   :  { %v11876_v44 = vadd.f32 %v6177_v22, %v11117_v4  ;;  %v6216_v14 = vsel %vm1514_vm0, %v11870_v36, 0.0 }
0x138e   :  { %6217 = vadd.xlane.f32.xlu0 %v6216_v14  ;;  %v6225_v49 = vsel %vm1514_vm0, %v11883_v51, 0.0 }
0x138f   :  { %v6219_v34 = vsel %vm1514_vm0, %v11876_v44, 0.0 }
0x1390   :  { %6220 = vadd.xlane.f32.xlu1 %v6219_v34 }
0x1392   :  { %6223 = vadd.xlane.f32.xlu0 %v6222_v16 }
0x1396   :  { %6226 = vadd.xlane.f32.xlu0 %v6225_v49 }
0x13b5   :  { %v8423_v4 = vpop.f32.mrb[144].mxu0 }
0x13b6   :  { %v6189_v43 = vpop.f32.mrb[145].mxu0  ;;  %v6198_v39 = vadd.f32 %v8423_v4, %v7587_v0 }
0x13b7   :  { %v6190_v45 = vadd.f32 %v7587_v0, %v6189_v43  ;;  %v8424_v35 = vpop.f32.mrb[146].mxu0 }
0x13b8   :  { %v6192_v40 = vpop.f32.mrb[147].mxu0  ;;  %v6201_v32 = vadd.f32 %v8424_v35, %v7587_v0  ;;  %v11893_v12 = vadd.f32 %v6198_v39, %v12531_v3 }
0x13b9   :  { %v11890_v19 = vadd.f32 %v6190_v45, %v11134_v29  ;;  %v6193_v21 = vadd.f32 %v7587_v0, %v6192_v40 }
0x13ba   :  { %v11901_v50 = vadd.f32 %v6201_v32, %v12533_v33  ;;  %v6234_v29 = vsel %vm1514_vm0, %v11893_v12, 0.0 }
0x13bb   :  { %v11896_v41 = vadd.f32 %v6193_v21, %v12532_v53  ;;  %v6228_v17 = vsel %vm1514_vm0, %v11890_v19, 0.0 }
0x13bc   :  { %6229 = vadd.xlane.f32.xlu0 %v6228_v17  ;;  %v6237_v55 = vsel %vm1514_vm0, %v11901_v50, 0.0 }
0x13bd   :  { %v6231_v63 = vsel %vm1514_vm0, %v11896_v41, 0.0 }
0x13be   :  { %6232 = vadd.xlane.f32.xlu1 %v6231_v63 }
0x13c0   :  { %6235 = vadd.xlane.f32.xlu0 %v6234_v29 }
0x13c2   :  { %6238 = vadd.xlane.f32.xlu1 %v6237_v55 }
0x141b   :  { %v6218_v52 = vpop.xlane.xlu0 %6217 }
0x141c   :  { %v6240_v59 = vmul.f32 0.015625, %v6218_v52 }
0x141d   :  { %v6221_v2 = vpop.xlane.xlu1 %6220 }
0x141e   :  { %v11910_v9 = vsub.f32 %v11870_v36, %v6240_v59  ;;  %v6241_v25 = vmul.f32 0.015625, %v6221_v2 }
0x141f   :  { %v6224_v62 = vpop.xlane.xlu0 %6223 }
0x1420   :  { %v11913_v10 = vsub.f32 %v11876_v44, %v6241_v25  ;;  %v6242_v26 = vmul.f32 0.015625, %v6224_v62  ;;  %v6256_v58 = vmul.f32 %v11910_v9, %v11910_v9 }
0x1422   :  { %v11918_v20 = vsub.f32 %v11873_v24, %v6242_v26  ;;  %v6264_v6 = vsel %vm1514_vm0, %v6256_v58, 0.0  ;;  %v6257_v60 = vmul.f32 %v11913_v10, %v11913_v10  ;;  %v7598_v58 = vld [vmem:[%s12488_s9 + $0x1] ss:$0 sm:$0xff] }
0x1423   :  { %6265 = vadd.xlane.f32.xlu0 %v6264_v6  ;;  %v6227_v11 = vpop.xlane.xlu0 %6226 }
0x1424   :  { %v6243_v38 = vmul.f32 0.015625, %v6227_v11  ;;  %v6267_v15 = vsel %vm1514_vm0, %v6257_v60, 0.0  ;;  %v6258_v28 = vmul.f32 %v11918_v20, %v11918_v20 }
0x1425   :  { %6268 = vadd.xlane.f32.xlu1 %v6267_v15 }
0x1426   :  { %v11927_v37 = vsub.f32 %v11883_v51, %v6243_v38  ;;  %v6270_v56 = vsel %vm1514_vm0, %v6258_v28, 0.0  ;;  %v7599_v28 = vld [vmem:[%s12489_s10 + $0x1] ss:$0 sm:$0xff] }
0x1427   :  { %6271 = vadd.xlane.f32.xlu0 %v6270_v56 }
0x1428   :  { %v6259_v54 = vmul.f32 %v11927_v37, %v11927_v37 }
0x142a   :  { %v6273_v31 = vsel %vm1514_vm0, %v6259_v54, 0.0 }
0x142b   :  { %6274 = vadd.xlane.f32.xlu1 %v6273_v31 }
0x1449   :  { %v6230_v46 = vpop.xlane.xlu0 %6229 }
0x144a   :  { %v6244_v0 = vmul.f32 0.015625, %v6230_v46 }
0x144b   :  { %v6233_v57 = vpop.xlane.xlu1 %6232 }
0x144c   :  { %v11955_v61 = vsub.f32 %v11890_v19, %v6244_v0  ;;  %v6245_v5 = vmul.f32 0.015625, %v6233_v57 }
0x144d   :  { %v6236_v30 = vpop.xlane.xlu0 %6235 }
0x144e   :  { %v11961_v22 = vsub.f32 %v11896_v41, %v6245_v5  ;;  %v6246_v23 = vmul.f32 0.015625, %v6236_v30  ;;  %v6260_v14 = vmul.f32 %v11955_v61, %v11955_v61 }
0x144f   :  { %v6239_v34 = vpop.xlane.xlu1 %6238 }
0x1450   :  { %v11966_v16 = vsub.f32 %v11893_v12, %v6246_v23  ;;  %v6247_v49 = vmul.f32 0.015625, %v6239_v34  ;;  %v6276_v4 = vsel %vm1514_vm0, %v6260_v14, 0.0  ;;  %v6261_v43 = vmul.f32 %v11961_v22, %v11961_v22 }
0x1451   :  { %6277 = vadd.xlane.f32.xlu0 %v6276_v4 }
0x1452   :  { %v11972_v39 = vsub.f32 %v11901_v50, %v6247_v49  ;;  %v6279_v45 = vsel %vm1514_vm0, %v6261_v43, 0.0  ;;  %v6262_v35 = vmul.f32 %v11966_v16, %v11966_v16 }
0x1453   :  { %6280 = vadd.xlane.f32.xlu1 %v6279_v45 }
0x1454   :  { %v6282_v40 = vsel %vm1514_vm0, %v6262_v35, 0.0  ;;  %v6263_v32 = vmul.f32 %v11972_v39, %v11972_v39 }
0x1455   :  { %6283 = vadd.xlane.f32.xlu0 %v6282_v40 }
0x1456   :  { %v6285_v21 = vsel %vm1514_vm0, %v6263_v32, 0.0 }
0x1457   :  { %6286 = vadd.xlane.f32.xlu1 %v6285_v21 }
0x14b0   :  { %v6266_v3 = vpop.xlane.xlu0 %6265 }
0x14b1   :  { %v6288_v53 = vmul.f32 0.015625, %v6266_v3 }
0x14b2   :  { %v6269_v17 = vpop.xlane.xlu1 %6268 }
0x14b3   :  { %v6296_v33 = vadd.f32 1e-06, %v6288_v53  ;;  %v6289_v63 = vmul.f32 0.015625, %v6269_v17 }
0x14b4   :  { %v6272_v29 = vpop.xlane.xlu0 %6271 }
0x14b5   :  { %9100 = vrsqrt.f32 %v6296_v33  ;;  %v6297_v55 = vadd.f32 1e-06, %v6289_v63  ;;  %v6290_v52 = vmul.f32 0.015625, %v6272_v29 }
0x14b7   :  { %9102 = vrsqrt.f32 %v6297_v55  ;;  %v6298_v59 = vadd.f32 1e-06, %v6290_v52 }
0x14b8   :  { %v6275_v2 = vpop.xlane.xlu1 %6274 }
0x14b9   :  { %9104 = vrsqrt.f32 %v6298_v59  ;;  %v6291_v25 = vmul.f32 0.015625, %v6275_v2  ;;  %v8718_v2 = vld [vmem:[%s12492_s13 + $0xc8] sm:$0xff]  }
0x14bb   :  { %v6299_v62 = vadd.f32 1e-06, %v6291_v25  ;;  %v8720_v25 = vld [vmem:[%s12492_s13 + $0xd0] sm:$0xff]  }
0x14bd   :  { %9106 = vrsqrt.f32 %v6299_v62  ;;  %v8721_v62 = vld [vmem:[%s12492_s13 + $0x90] sm:$0xff]  }
0x14bf   :  { %v9101_v26 = vpop.eup %9100 }
0x14c0   :  { %v6312_v6 = vmul.f32 %v9101_v26, %v11910_v9  ;;  %v8722_v26 = vld [vmem:[%s12492_s13 + $0xd8] sm:$0xff]  }
0x14c1   :  { %v9103_v60 = vpop.eup %9102 }
0x14c2   :  { %v6326_v11 = vmul.f32 %v7598_v58, %v6312_v6  ;;  %v6313_v38 = vmul.f32 %v9103_v60, %v11913_v10  ;;  %v8724_v6 = vld [vmem:[%s12492_s13 + $0xe0] sm:$0xff]  }
0x14c3   :  { %v9105_v15 = vpop.eup %9104  ;;  %v8725_v60 = vld [vmem:[%s12492_s13 + $0xa0] sm:$0xff]  }
0x14c4   :  { %v6327_v56 = vmul.f32 %v7598_v58, %v6313_v38  ;;  %v6314_v54 = vmul.f32 %v9105_v15, %v11918_v20  ;;  %v6340_v31 = vadd.f32 %v7599_v28, %v6326_v11  ;;  %v8726_v11 = vld [vmem:[%s12492_s13 + $0xe8] sm:$0xff]   ;;  %v8728_v15 = vld [vmem:[%s12492_s13 + $0xf0] sm:$0xff]  }
0x14c5   :  { %v8727_v38 = vld [vmem:[%s12492_s13 + $0xa8] sm:$0xff]  }
0x14c6   :  { %v6341_v42 = vadd.f32 %v7599_v28, %v6327_v56  ;;  %v6328_v9 = vmul.f32 %v7598_v58, %v6314_v54  ;;  %v8730_v56 = vld [vmem:[%s12492_s13 + $0xf8] sm:$0xff]  }
0x14c7   :  { %v9107_v7 = vpop.eup %9106  ;;  %v8731_v54 = vld [vmem:[%s12492_s13 + $0xb8] sm:$0xff]  }
0x14c8   :  { %v6315_v1 = vmul.f32 %v9107_v7, %v11927_v37  ;;  %v6348_v18 = vpack.c.bf16 %v6341_v42, %v6340_v31  ;;  %v6342_v47 = vadd.f32 %v7599_v28, %v6328_v9  ;;  %v7608_v31 = vld [vmem:[%s12491_s12 + $0x2] sm:$0x3]  ;;  %v12534_v42 = vld [vmem:[#allocation7_spill] sm:$0xff] }
0x14c9   :  { %v12054_v7 = vrot.slane %v7608_v31, %v12534_v42 }
0x14ca   :  { %7617 = vmatmul.mubr.msk.bf16.vlgmr.msra.gmra.mrb[156].mxu1 %vm1514_vm0, %v6348_v18  ;;  %v6329_v46 = vmul.f32 %v7598_v58, %v6315_v1  ;;  %v12535_v1 = vld [vmem:[#allocation8_spill] sm:$0xff] }
0x14cb   :  { %6468 = vmatprep.mubr.bf16.mxu1 %v12522_v48  ;;  %v12057_v18 = vrot.slane %v7608_v31, %v12535_v1 }
0x14cc   :  { %v6343_v10 = vadd.f32 %v7599_v28, %v6329_v46 }
0x14ce   :  { %v6349_v8 = vpack.c.bf16 %v6343_v10, %v6342_v47 }
0x14d2   :  { %7618 = vmatmul.mubr.msk.bf16.gmra.mrb[160].mxu1 %vm1514_vm0, %v6349_v8 }
0x14d3   :  { %6478 = vmatprep.mubr.bf16.mxu1 %v12522_v48 }
0x14de   :  { %v6278_v20 = vpop.xlane.xlu0 %6277 }
0x14df   :  { %v6292_v0 = vmul.f32 0.015625, %v6278_v20 }
0x14e0   :  { %v6281_v27 = vpop.xlane.xlu1 %6280 }
0x14e1   :  { %v6300_v57 = vadd.f32 1e-06, %v6292_v0  ;;  %v6293_v5 = vmul.f32 0.015625, %v6281_v27 }
0x14e2   :  { %v6284_v37 = vpop.xlane.xlu0 %6283 }
0x14e3   :  { %9108 = vrsqrt.f32 %v6300_v57  ;;  %v6301_v30 = vadd.f32 1e-06, %v6293_v5  ;;  %v6294_v13 = vmul.f32 0.015625, %v6284_v37 }
0x14e4   :  { %v6287_v23 = vpop.xlane.xlu1 %6286 }
0x14e5   :  { %9110 = vrsqrt.f32 %v6301_v30  ;;  %v6302_v14 = vadd.f32 1e-06, %v6294_v13  ;;  %v6295_v34 = vmul.f32 0.015625, %v6287_v23 }
0x14e7   :  { %9112 = vrsqrt.f32 %v6302_v14  ;;  %v6303_v49 = vadd.f32 1e-06, %v6295_v34 }
0x14e9   :  { %9114 = vrsqrt.f32 %v6303_v49 }
0x14ed   :  { %v9109_v4 = vpop.eup %9108 }
0x14ee   :  { %v6316_v43 = vmul.f32 %v9109_v4, %v11955_v61 }
0x14ef   :  { %v9111_v45 = vpop.eup %9110 }
0x14f0   :  { %v6317_v35 = vmul.f32 %v9111_v45, %v11961_v22  ;;  %v6330_v40 = vmul.f32 %v7598_v58, %v6316_v43 }
0x14f1   :  { %v9113_v32 = vpop.eup %9112 }
0x14f2   :  { %v6331_v21 = vmul.f32 %v7598_v58, %v6317_v35  ;;  %v6318_v53 = vmul.f32 %v9113_v32, %v11966_v16  ;;  %v6344_v33 = vadd.f32 %v7599_v28, %v6330_v40  ;;  %v8716_v16 = vld [vmem:[%s12492_s13 + $0xc0] sm:$0xff]  }
0x14f3   :  { %v9115_v3 = vpop.eup %9114  ;;  %8097 = vmatprep.subr.bf16.mxu0 %v8716_v16 }
0x14f4   :  { %v6319_v17 = vmul.f32 %v9115_v3, %v11972_v39  ;;  %v6345_v63 = vadd.f32 %v7599_v28, %v6331_v21  ;;  %v6332_v52 = vmul.f32 %v7598_v58, %v6318_v53  ;;  %v8717_v39 = vld [vmem:[%s12492_s13 + $0x80] sm:$0xff]  }
0x14f5   :  { %8098 = vmatpush3.bf16.msra.mxu0 %v8717_v39 }
0x14f6   :  { %v6350_v29 = vpack.c.bf16 %v6345_v63, %v6344_v33  ;;  %v6333_v55 = vmul.f32 %v7598_v58, %v6319_v17  ;;  %v6346_v59 = vadd.f32 %v7599_v28, %v6332_v52  ;;  %8099 = vmatprep.subr.bf16.mxu0 %v8718_v2  ;;  %v8723_v58 = vld [vmem:[%s12492_s13 + $0x98] sm:$0xff]  }
0x14f8   :  { %7619 = vmatmul.mubr.msk.bf16.gmra.mrb[164].mxu1 %vm1514_vm0, %v6350_v29  ;;  %v6347_v61 = vadd.f32 %v7599_v28, %v6333_v55  ;;  %v8729_v28 = vld [vmem:[%s12492_s13 + $0xb0] sm:$0xff]  }
0x14f9   :  { %6488 = vmatprep.mubr.bf16.mxu1 %v12522_v48  ;;  %v8719_v48 = vld [vmem:[%s12492_s13 + $0x88] sm:$0xff]  }
0x14fa   :  { %v6351_v22 = vpack.c.bf16 %v6347_v61, %v6346_v59  ;;  %8100 = vmatpush3.bf16.msra.mxu0 %v8719_v48 }
0x14fb   :  { %8101 = vmatprep.subr.bf16.mxu0 %v8720_v25 }
0x14fe   :  { %8102 = vmatpush3.bf16.msra.mxu0 %v8721_v62 }
0x14ff   :  { %8103 = vmatprep.subr.bf16.mxu0 %v8722_v26 }
0x1500   :  { %7620 = vmatmul.mubr.msk.bf16.gmra.mrb[168].mxu1 %vm1514_vm0, %v6351_v22 }
0x1502   :  { %8104 = vmatpush3.bf16.msra.mxu0 %v8723_v58 }
0x1503   :  { %8105 = vmatprep.subr.bf16.mxu0 %v8724_v6 }
0x1506   :  { %8106 = vmatpush3.bf16.msra.mxu0 %v8725_v60 }
0x1507   :  { %8107 = vmatprep.subr.bf16.mxu0 %v8726_v11 }
0x150a   :  { %8108 = vmatpush3.bf16.msra.mxu0 %v8727_v38 }
0x150b   :  { %8109 = vmatprep.subr.bf16.mxu0 %v8728_v15 }
0x150e   :  { %8110 = vmatpush3.bf16.msra.mxu0 %v8729_v28 }
0x150f   :  { %8111 = vmatprep.subr.bf16.mxu0 %v8730_v56 }
0x1512   :  { %8112 = vmatpush3.bf16.msra.mxu0 %v8731_v54 }
0x159d   :  { %v6460_v9 = vpop.f32.mrb[156].mxu1 }
0x159e   :  { %v12060_v46 = vadd.f32 %v6460_v9, %v12054_v7  ;;  %v6462_v10 = vpop.f32.mrb[157].mxu1 }
0x159f   :  { %v12063_v47 = vadd.f32 %v6462_v10, %v12057_v18  ;;  %v6464_v8 = vpop.f32.mrb[158].mxu1 }
0x15a0   :  { %v12066_v20 = vmul.f32 0.70710677, %v12060_v46  ;;  %v12069_v0 = vadd.f32 %v6464_v8, %v12054_v7  ;;  %v6466_v27 = vpop.f32.mrb[159].mxu1 }
0x15a1   :  { %v12072_v57 = vmul.f32 0.70710677, %v12063_v47  ;;  %v12075_v5 = vadd.f32 %v6466_v27, %v12057_v18 }
0x15a2   :  { %v6515_v37 = vand.u32 2147483647, %v12066_v20  ;;  %v12079_v30 = vmul.f32 0.70710677, %v12069_v0  ;;  %vm6819_vm1 = vcmp.ge.f32.partialorder %v12066_v20, 0.0 }
0x15a3   :  { %v6516_v13 = vand.u32 2147483647, %v12072_v57  ;;  %v12083_v23 = vmul.f32 0.70710677, %v12075_v5  ;;  %vm6820_vm3 = vcmp.ge.f32.partialorder %v12072_v57, 0.0 }
0x15a4   :  { %v6531_v14 = vmul.f32 0.3275911, %v6515_v37  ;;  %v6517_v34 = vand.u32 2147483647, %v12079_v30  ;;  %v6723_v59 = vsub.f32 0.0, %v6515_v37  ;;  %vm6821_vm2 = vcmp.ge.f32.partialorder %v12079_v30, 0.0 }
0x15a5   :  { %v6532_v49 = vmul.f32 0.3275911, %v6516_v13  ;;  %v6518_v4 = vand.u32 2147483647, %v12083_v23  ;;  %v6470_v35 = vpop.f32.mrb[160].mxu1  ;;  %v6724_v48 = vsub.f32 0.0, %v6516_v13 }
0x15a6   :  { %v6547_v43 = vadd.f32 1.0, %v6531_v14  ;;  %v6533_v45 = vmul.f32 0.3275911, %v6517_v34  ;;  %v6472_v21 = vpop.f32.mrb[161].mxu1  ;;  %v12088_v63 = vadd.f32 %v6470_v35, %v12054_v7  ;;  %v6739_v58 = vmul.f32 %v6723_v59, %v6515_v37 }
0x15a7   :  { %v6548_v40 = vadd.f32 1.0, %v6532_v49  ;;  %v6534_v32 = vmul.f32 0.3275911, %v6518_v4  ;;  %v6474_v53 = vpop.f32.mrb[162].mxu1  ;;  %v12091_v29 = vadd.f32 %v6472_v21, %v12057_v18  ;;  %v6725_v38 = vsub.f32 0.0, %v6517_v34 }
0x15a8   :  { %9116 = vrcp.f32 %v6547_v43  ;;  %v6549_v3 = vadd.f32 1.0, %v6533_v45  ;;  %v6476_v17 = vpop.f32.mrb[163].mxu1  ;;  %v12094_v55 = vadd.f32 %v6474_v53, %v12054_v7  ;;  %v12097_v52 = vmul.f32 0.70710677, %v12088_v63 }
0x15a9   :  { %9118 = vrcp.f32 %v6548_v40  ;;  %v6550_v33 = vadd.f32 1.0, %v6534_v32  ;;  %v12100_v61 = vmul.f32 0.70710677, %v12091_v29  ;;  %v12106_v16 = vadd.f32 %v6476_v17, %v12057_v18 }
0x15aa   :  { %9120 = vrcp.f32 %v6549_v3  ;;  %v12103_v22 = vmul.f32 0.70710677, %v12094_v55  ;;  %v6519_v39 = vand.u32 2147483647, %v12097_v52  ;;  %v6740_v31 = vmul.f32 %v6724_v48, %v6516_v13 }
0x15ab   :  { %9122 = vrcp.f32 %v6550_v33  ;;  %v6520_v2 = vand.u32 2147483647, %v12100_v61  ;;  %v12115_v60 = vmul.f32 0.70710677, %v12106_v16  ;;  %v6726_v9 = vsub.f32 0.0, %v6518_v4 }
0x15ac   :  { %v12111_v25 = vand.u32 2147483647, %v12103_v22  ;;  %v6535_v62 = vmul.f32 0.3275911, %v6519_v39  ;;  %v6755_v27 = vmul.f32 1.442695, %v6739_v58  ;;  %v6741_v43 = vmul.f32 %v6725_v38, %v6517_v34 }
0x15ad   :  { %v6536_v26 = vmul.f32 0.3275911, %v6520_v2  ;;  %v12123_v42 = vand.u32 2147483647, %v12115_v60  ;;  %v6757_v13 = vmul.f32 1.442695, %v6740_v31  ;;  %v6742_v3 = vmul.f32 %v6726_v9, %v6518_v4 }
0x15ae   :  { %v6537_v6 = vmul.f32 0.3275911, %v12111_v25  ;;  %v6551_v15 = vadd.f32 1.0, %v6535_v62  ;;  %v6727_v53 = vsub.f32 0.0, %v6519_v39  ;;  %v6759_v34 = vmul.f32 1.442695, %v6741_v43 }
0x15af   :  { %v6552_v28 = vadd.f32 1.0, %v6536_v26  ;;  %v6538_v37 = vmul.f32 0.3275911, %v12123_v42  ;;  %v6728_v62 = vsub.f32 0.0, %v6520_v2  ;;  %v12138_v38 = vmul.f32 0.5, %v12060_v46 }
0x15b0   :  { %9124 = vrcp.f32 %v6551_v15  ;;  %v6553_v10 = vadd.f32 1.0, %v6537_v6  ;;  %v6743_v15 = vmul.f32 %v6727_v53, %v6519_v39  ;;  %v6869_v30 = vmul.f32 0.5, %v12069_v0 }
0x15b1   :  { %9126 = vrcp.f32 %v6552_v28  ;;  %v6554_v40 = vadd.f32 1.0, %v6538_v37  ;;  %v6729_v28 = vsub.f32 0.0, %v12111_v25  ;;  %vm6822_vm8 = vcmp.ge.f32.partialorder %v12083_v23, 0.0 }
0x15b2   :  { %v12117_v11 = vpop.eup %9116  ;;  %9128 = vrcp.f32 %v6553_v10  ;;  %vm6823_vm9 = vcmp.ge.f32.partialorder %v12097_v52, 0.0  ;;  %vm6824_vm10 = vcmp.ge.f32.partialorder %v12100_v61, 0.0  ;;  %vm6825_vm11 = vcmp.ge.f32.partialorder %v12103_v22, 0.0 }
0x15b3   :  { %v12119_v56 = vpop.eup %9118  ;;  %v6579_v54 = vmul.f32 1.0614054, %v12117_v11  ;;  %9130 = vpow2.f32 %v6755_v27  ;;  %v6744_v27 = vmul.f32 %v6728_v62, %v6520_v2  ;;  %vm6826_vm12 = vcmp.ge.f32.partialorder %v12115_v60, 0.0 }
0x15b4   :  { %v6580_v1 = vmul.f32 1.0614054, %v12119_v56  ;;  %v12127_v14 = vpop.eup %9120  ;;  %9132 = vrcp.f32 %v6554_v40  ;;  %v6745_v40 = vmul.f32 %v6729_v28, %v12111_v25 }
0x15b5   :  { %v6595_v8 = vadd.f32 -1.4531521, %v6579_v54  ;;  %v6581_v35 = vmul.f32 1.0614054, %v12127_v14  ;;  %v12131_v32 = vpop.eup %9122  ;;  %9134 = vpow2.f32 %v6757_v13  ;;  %v6763_v13 = vmul.f32 1.442695, %v6743_v15 }
0x15b6   :  { %v6596_v49 = vadd.f32 -1.4531521, %v6580_v1  ;;  %v6582_v59 = vmul.f32 1.0614054, %v12131_v32  ;;  %9136 = vpow2.f32 %v6759_v34 }
0x15b7   :  { %v6611_v45 = vmul.f32 %v12117_v11, %v6595_v8  ;;  %v6597_v33 = vadd.f32 -1.4531521, %v6581_v35  ;;  %v6761_v8 = vmul.f32 1.442695, %v6742_v3 }
0x15b8   :  { %v6612_v21 = vmul.f32 %v12119_v56, %v6596_v49  ;;  %v6598_v6 = vadd.f32 -1.4531521, %v6582_v59  ;;  %v6765_v59 = vmul.f32 1.442695, %v6744_v27 }
0x15b9   :  { %v6627_v17 = vadd.f32 1.4214138, %v6611_v45  ;;  %v6613_v58 = vmul.f32 %v12127_v14, %v6597_v33  ;;  %9138 = vpow2.f32 %v6761_v8 }
0x15ba   :  { %v6628_v48 = vadd.f32 1.4214138, %v6612_v21  ;;  %v6614_v1 = vmul.f32 %v12131_v32, %v6598_v6  ;;  %v12143_v9 = vpop.eup %9124  ;;  %9140 = vpow2.f32 %v6763_v13 }
0x15bb   :  { %v6643_v26 = vmul.f32 %v12117_v11, %v6627_v17  ;;  %v6629_v31 = vadd.f32 1.4214138, %v6613_v58  ;;  %v12145_v37 = vpop.eup %9126  ;;  %v6583_v43 = vmul.f32 1.0614054, %v12143_v9  ;;  %9142 = vpow2.f32 %v6765_v59 }
0x15bc   :  { %v6644_v4 = vmul.f32 %v12119_v56, %v6628_v48  ;;  %v6630_v39 = vadd.f32 1.4214138, %v6614_v1  ;;  %v6584_v35 = vmul.f32 1.0614054, %v12145_v37  ;;  %v12154_v17 = vpop.eup %9128  ;;  %v6730_v48 = vsub.f32 0.0, %v12123_v42 }
0x15bd   :  { %v6659_v54 = vadd.f32 -0.28449672, %v6643_v26  ;;  %v6645_v49 = vmul.f32 %v12127_v14, %v6629_v31  ;;  %v6599_v3 = vadd.f32 -1.4531521, %v6583_v43  ;;  %v9131_v34 = vpop.eup %9130  ;;  %v6585_v28 = vmul.f32 1.0614054, %v12154_v17 }
0x15be   :  { %v6660_v10 = vadd.f32 -0.28449672, %v6644_v4  ;;  %v6646_v2 = vmul.f32 %v12131_v32, %v6630_v39  ;;  %v6600_v33 = vadd.f32 -1.4531521, %v6584_v35  ;;  %v12161_v6 = vpop.eup %9132  ;;  %v6746_v35 = vmul.f32 %v6730_v48, %v12123_v42 }
0x15bf   :  { %v6675_v46 = vmul.f32 %v12117_v11, %v6659_v54  ;;  %v6661_v53 = vadd.f32 -0.28449672, %v6645_v49  ;;  %v6615_v58 = vmul.f32 %v12143_v9, %v6599_v3  ;;  %v6767_v54 = vmul.f32 1.442695, %v6745_v40  ;;  %v9135_v49 = vpop.eup %9134 }
0x15c0   :  { %v6676_v45 = vmul.f32 %v12119_v56, %v6660_v10  ;;  %v6662_v25 = vadd.f32 -0.28449672, %v6646_v2  ;;  %v6616_v15 = vmul.f32 %v12145_v37, %v6600_v33  ;;  %v6601_v27 = vadd.f32 -1.4531521, %v6585_v28 }
0x15c1   :  { %v6691_v21 = vadd.f32 0.2548296, %v6675_v46  ;;  %v6677_v26 = vmul.f32 %v12127_v14, %v6661_v53  ;;  %v6631_v8 = vadd.f32 1.4214138, %v6615_v58  ;;  %v6586_v46 = vmul.f32 1.0614054, %v12161_v6 }
0x15c2   :  { %v6692_v4 = vadd.f32 0.2548296, %v6676_v45  ;;  %v6678_v10 = vmul.f32 %v12131_v32, %v6662_v25  ;;  %v6617_v2 = vmul.f32 %v12154_v17, %v6601_v27  ;;  %9144 = vpow2.f32 %v6767_v54 }
0x15c3   :  { %v6707_v62 = vmul.f32 %v12117_v11, %v6691_v21  ;;  %v6693_v1 = vadd.f32 0.2548296, %v6677_v26  ;;  %v6632_v11 = vadd.f32 1.4214138, %v6616_v15  ;;  %v6647_v45 = vmul.f32 %v12143_v9, %v6631_v8  ;;  %v9137_v21 = vpop.eup %9136 }
0x15c4   :  { %v6708_v40 = vmul.f32 %v12119_v56, %v6692_v4  ;;  %v6602_v13 = vadd.f32 -1.4531521, %v6586_v46  ;;  %v6633_v25 = vadd.f32 1.4214138, %v6617_v2  ;;  %v6769_v4 = vmul.f32 1.442695, %v6746_v35  ;;  %v9139_v28 = vpop.eup %9138 }
0x15c5   :  { %v6787_v31 = vmul.f32 %v9131_v34, %v6707_v62  ;;  %v6709_v43 = vmul.f32 %v12127_v14, %v6693_v1  ;;  %v6648_v53 = vmul.f32 %v12145_v37, %v6632_v11  ;;  %v6694_v34 = vadd.f32 0.2548296, %v6678_v10 }
0x15c6   :  { %v6663_v62 = vadd.f32 -0.28449672, %v6647_v45  ;;  %v6618_v14 = vmul.f32 %v12161_v6, %v6602_v13  ;;  %v6649_v59 = vmul.f32 %v12154_v17, %v6633_v25  ;;  %9146 = vpow2.f32 %v6769_v4 }
0x15c7   :  { %v6803_v39 = vsub.f32 1.0, %v6787_v31  ;;  %v6789_v33 = vmul.f32 %v9137_v21, %v6709_v43  ;;  %v6664_v26 = vadd.f32 -0.28449672, %v6648_v53  ;;  %v6788_v31 = vmul.f32 %v9135_v49, %v6708_v40  ;;  %v9141_v21 = vpop.eup %9140 }
0x15c8   :  { %v6679_v56 = vmul.f32 %v12143_v9, %v6663_v62  ;;  %v6710_v20 = vmul.f32 %v12131_v32, %v6694_v34  ;;  %v6665_v43 = vadd.f32 -0.28449672, %v6649_v59  ;;  %v6634_v45 = vadd.f32 1.4214138, %v6618_v14 }
0x15c9   :  { %v6835_v3 = vsub.f32 0.0, %v6803_v39  ;;  %v6805_v48 = vsub.f32 1.0, %v6789_v33  ;;  %v6680_v1 = vmul.f32 %v12145_v37, %v6664_v26  ;;  %v6804_v40 = vsub.f32 1.0, %v6788_v31 }
0x15ca   :  { %v6695_v27 = vadd.f32 0.2548296, %v6679_v56  ;;  %v6681_v2 = vmul.f32 %v12154_v17, %v6665_v43  ;;  %v6650_v32 = vmul.f32 %v12161_v6, %v6634_v45  ;;  %v6790_v13 = vmul.f32 %v9139_v28, %v6710_v20 }
0x15cb   :  { %v6480_v58 = vpop.f32.mrb[164].mxu1  ;;  %v6851_v42 = vsel %vm6819_vm1, %v6803_v39, %v6835_v3  ;;  %v6837_v11 = vsub.f32 0.0, %v6805_v48  ;;  %v6696_v39 = vadd.f32 0.2548296, %v6680_v1  ;;  %v6868_v31 = vmul.f32 0.5, %v12063_v47 }
0x15cc   :  { %v6482_v15 = vpop.f32.mrb[165].mxu1  ;;  %v6883_v8 = vadd.f32 1.0, %v6851_v42  ;;  %v6711_v35 = vmul.f32 %v12143_v9, %v6695_v27  ;;  %v12191_v33 = vadd.f32 %v6480_v58, %v12054_v7  ;;  %v6697_v26 = vadd.f32 0.2548296, %v6681_v2  ;;  %v9143_v42 = vpop.eup %9142 }
0x15cd   :  { %v12180_v10 = vpop.f32.mrb[166].mxu1  ;;  %v6853_v49 = vsel %vm6821_vm2, %v6805_v48, %v6837_v11  ;;  %v6712_v3 = vmul.f32 %v12145_v37, %v6696_v39  ;;  %v12199_v9 = vadd.f32 %v6482_v15, %v12057_v18  ;;  %v6666_v25 = vadd.f32 -0.28449672, %v6650_v32  ;;  %v9145_v39 = vpop.eup %9144 }
0x15ce   :  { %v12183_v46 = vpop.f32.mrb[167].mxu1  ;;  %v6885_v53 = vadd.f32 1.0, %v6853_v49  ;;  %v12194_v54 = vmul.f32 %v6883_v8, %v12138_v38  ;;  %v6791_v62 = vmul.f32 %v9141_v21, %v6711_v35  ;;  %v12202_v14 = vmul.f32 0.70710677, %v12191_v33 }
0x15cf   :  { %v6836_v37 = vsub.f32 0.0, %v6804_v40  ;;  %v6806_v38 = vsub.f32 1.0, %v6790_v13  ;;  %v6792_v56 = vmul.f32 %v9143_v42, %v6712_v3  ;;  %v6682_v4 = vmul.f32 %v12161_v6, %v6666_v25 }
0x15d0   :  { %v12196_v0 = vmul.f32 %v6885_v53, %v6869_v30  ;;  %v12210_v15 = vand.u32 2147483647, %v12202_v14  ;;  %v12217_v1 = vmul.f32 0.70710677, %v12199_v9  ;;  %v6807_v8 = vsub.f32 1.0, %v6791_v62  ;;  %v9147_v47 = vpop.eup %9146 }
0x15d1   :  { %v6713_v11 = vmul.f32 %v12154_v17, %v6697_v26  ;;  %v6698_v20 = vadd.f32 0.2548296, %v6682_v4  ;;  %v6852_v43 = vsel %vm6820_vm3, %v6804_v40, %v6836_v37  ;;  %v6870_v45 = vmul.f32 0.5, %v12075_v5 }
0x15d2   :  { %v6915_v58 = vpack.c.bf16 %v12196_v0, %v12194_v54  ;;  %v6539_v27 = vmul.f32 0.3275911, %v12210_v15  ;;  %v6524_v57 = vand.u32 2147483647, %v12217_v1  ;;  %v6838_v49 = vsub.f32 0.0, %v6806_v38 }
0x15d3   :  { %v6490_v34 = vpop.f32.mrb[168].mxu1  ;;  %v6808_v30 = vsub.f32 1.0, %v6792_v56  ;;  %v6714_v35 = vmul.f32 %v12161_v6, %v6698_v20  ;;  %v6871_v53 = vmul.f32 0.5, %v12088_v63  ;;  %v6872_v17 = vmul.f32 0.5, %v12091_v29 }
0x15d4   :  { %v12206_v48 = vpop.f32.mrb[169].mxu1  ;;  %v6555_v21 = vadd.f32 1.0, %v6539_v27  ;;  %v12230_v2 = vmul.f32 0.5, %v12094_v55  ;;  %v6540_v40 = vmul.f32 0.3275911, %v6524_v57  ;;  %v6839_v32 = vsub.f32 0.0, %v6807_v8 }
0x15d5   :  { %v12212_v28 = vpop.f32.mrb[170].mxu1  ;;  %v6793_v13 = vmul.f32 %v9145_v39, %v6713_v11  ;;  %v6794_v3 = vmul.f32 %v9147_v47, %v6714_v35  ;;  %v6884_v5 = vadd.f32 1.0, %v6852_v43  ;;  %v6854_v6 = vsel %vm6822_vm8, %v6806_v38, %v6838_v49 }
0x15d6   :  { %v12219_v59 = vpop.f32.mrb[171].mxu1  ;;  %9148 = vrcp.f32 %v6555_v21  ;;  %v6556_v62 = vadd.f32 1.0, %v6540_v40  ;;  %v6840_v63 = vsub.f32 0.0, %v6808_v30  ;;  %v12238_v29 = vadd.f32 %v12180_v10, %v12054_v7 }
0x15d7   :  { %v6810_v26 = vsub.f32 1.0, %v6794_v3  ;;  %v6874_v55 = vmul.f32 0.5, %v12106_v16  ;;  %v12244_v52 = vadd.f32 %v12183_v46, %v12057_v18  ;;  %v12247_v25 = vadd.f32 %v6490_v34, %v12054_v7 }
0x15d8   :  { %9150 = vrcp.f32 %v6556_v62  ;;  %v6855_v23 = vsel %vm6823_vm9, %v6807_v8, %v6839_v32  ;;  %v6809_v42 = vsub.f32 1.0, %v6793_v13  ;;  %v12251_v37 = vmul.f32 0.70710677, %v12238_v29 }
0x15d9   :  { %v12253_v10 = vmul.f32 %v6884_v5, %v6868_v31  ;;  %v6886_v38 = vadd.f32 1.0, %v6854_v6  ;;  %v12256_v16 = vmul.f32 0.70710677, %v12244_v52  ;;  %v12259_v56 = vmul.f32 0.70710677, %v12247_v25 }
0x15da   :  { %v6856_v46 = vsel %vm6824_vm10, %v6808_v30, %v6840_v63  ;;  %v6842_v34 = vsub.f32 0.0, %v6810_v26  ;;  %v6731_v4 = vsub.f32 0.0, %v12210_v15  ;;  %v6525_v8 = vand.u32 2147483647, %v12251_v37 }
0x15db   :  { %v6887_v11 = vadd.f32 1.0, %v6855_v23  ;;  %v6732_v20 = vsub.f32 0.0, %v6524_v57  ;;  %v6526_v31 = vand.u32 2147483647, %v12256_v16  ;;  %v6527_v27 = vand.u32 2147483647, %v12259_v56 }
0x15dc   :  { %v6841_v39 = vsub.f32 0.0, %v6809_v42  ;;  %v12268_v43 = vmul.f32 0.5, %v12191_v33  ;;  %v6541_v47 = vmul.f32 0.3275911, %v6525_v8  ;;  %v12272_v61 = vadd.f32 %v12206_v48, %v12057_v18 }
0x15dd   :  { %v6902_v49 = vmul.f32 %v6886_v38, %v6870_v45  ;;  %v6888_v30 = vadd.f32 1.0, %v6856_v46  ;;  %v6542_v35 = vmul.f32 0.3275911, %v6526_v31  ;;  %v6543_v21 = vmul.f32 0.3275911, %v6527_v27 }
0x15de   :  { %v6858_v32 = vsel %vm6826_vm12, %v6810_v26, %v6842_v34  ;;  %v6747_v13 = vmul.f32 %v6731_v4, %v12210_v15  ;;  %v6557_v3 = vadd.f32 1.0, %v6541_v47  ;;  %v12280_v33 = vmul.f32 0.70710677, %v12272_v61 }
0x15df   :  { %v12282_v5 = vmul.f32 %v6887_v11, %v6871_v53  ;;  %v6748_v62 = vmul.f32 %v6732_v20, %v6524_v57  ;;  %v6558_v45 = vadd.f32 1.0, %v6542_v35  ;;  %v6857_v6 = vsel %vm6825_vm11, %v6809_v42, %v6841_v39 }
0x15e0   :  { %v12274_v40 = vpop.eup %9148  ;;  %9152 = vrcp.f32 %v6557_v3  ;;  %v6559_v63 = vadd.f32 1.0, %v6543_v21  ;;  %v12288_v60 = vand.u32 2147483647, %v12280_v33  ;;  %v6890_v15 = vadd.f32 1.0, %v6858_v32 }
0x15e1   :  { %v6587_v48 = vmul.f32 1.0614054, %v12274_v40  ;;  %v6733_v38 = vsub.f32 0.0, %v6525_v8  ;;  %9154 = vrcp.f32 %v6558_v45  ;;  %v6904_v53 = vmul.f32 %v6888_v30, %v6872_v17 }
0x15e2   :  { %v12290_v26 = vpop.eup %9150  ;;  %v6771_v46 = vmul.f32 1.442695, %v6747_v13  ;;  %v6544_v57 = vmul.f32 0.3275911, %v12288_v60  ;;  %v6889_v4 = vadd.f32 1.0, %v6857_v6  ;;  %v6734_v11 = vsub.f32 0.0, %v6526_v31 }
0x15e3   :  { %v6603_v23 = vadd.f32 -1.4531521, %v6587_v48  ;;  %v6588_v34 = vmul.f32 1.0614054, %v12290_v26  ;;  %v6773_v42 = vmul.f32 1.442695, %v6748_v62  ;;  %9156 = vrcp.f32 %v6559_v63 }
0x15e4   :  { %v6560_v39 = vadd.f32 1.0, %v6544_v57  ;;  %v12297_v47 = vadd.f32 %v12212_v28, %v12054_v7  ;;  %v6906_v35 = vmul.f32 %v6890_v15, %v6874_v55  ;;  %v6749_v17 = vmul.f32 %v6733_v38, %v6525_v8 }
0x15e5   :  { %v6619_v22 = vmul.f32 %v12274_v40, %v6603_v23  ;;  %v6604_v20 = vadd.f32 -1.4531521, %v6588_v34  ;;  %v12301_v30 = vadd.f32 %v12219_v59, %v12057_v18  ;;  %v6735_v13 = vsub.f32 0.0, %v6527_v27 }
0x15e6   :  { %9158 = vrcp.f32 %v6560_v39  ;;  %v12305_v3 = vmul.f32 0.70710677, %v12297_v47  ;;  %v6750_v62 = vmul.f32 %v6734_v11, %v6526_v31  ;;  %v6905_v28 = vmul.f32 %v6889_v4, %v12230_v2 }
0x15e7   :  { %v6635_v21 = vadd.f32 1.4214138, %v6619_v22  ;;  %v6620_v32 = vmul.f32 %v12290_v26, %v6604_v20  ;;  %9160 = vpow2.f32 %v6771_v46  ;;  %v12309_v7 = vmul.f32 0.70710677, %v12301_v30 }
0x15e8   :  { %v6529_v18 = vand.u32 2147483647, %v12305_v3  ;;  %v6916_v59 = vpack.c.bf16 %v6902_v49, %v12253_v10  ;;  %9162 = vpow2.f32 %v6773_v42  ;;  %v6775_v45 = vmul.f32 1.442695, %v6749_v17 }
0x15e9   :  { %v6651_v48 = vmul.f32 %v12274_v40, %v6635_v21  ;;  %v6636_v55 = vadd.f32 1.4214138, %v6620_v32  ;;  %v12315_v6 = vand.u32 2147483647, %v12309_v7  ;;  %v6751_v15 = vmul.f32 %v6735_v13, %v6527_v27 }
0x15ea   :  { %v12317_v63 = vpop.eup %9152  ;;  %v6545_v23 = vmul.f32 0.3275911, %v6529_v18  ;;  %7092 = vmatprep.mubr.bf16.mxu0 %v6916_v59  ;;  %v6918_v38 = vpack.c.bf16 %v6906_v35, %v6904_v53  ;;  %v6777_v49 = vmul.f32 1.442695, %v6750_v62  ;;  %v6736_v27 = vsub.f32 0.0, %v12288_v60 }
0x15eb   :  { %v6667_v8 = vadd.f32 -0.28449672, %v6651_v48  ;;  %v6652_v31 = vmul.f32 %v12290_v26, %v6636_v55  ;;  %v12320_v2 = vpop.eup %9154  ;;  %v6589_v10 = vmul.f32 1.0614054, %v12317_v63  ;;  %v6546_v34 = vmul.f32 0.3275911, %v12315_v6  ;;  %7093 = vmatmul.mubr.bf16.vlgmr.msra.gmra.mrb[148].mxu0 %v6915_v58 }
0x15ec   :  { %v6590_v4 = vmul.f32 1.0614054, %v12320_v2  ;;  %v6561_v22 = vadd.f32 1.0, %v6545_v23  ;;  %7100 = vmatprep.mubr.bf16.mxu0 %v6918_v38  ;;  %9164 = vpow2.f32 %v6775_v45  ;;  %v6779_v21 = vmul.f32 1.442695, %v6751_v15 }
0x15ed   :  { %v6683_v46 = vmul.f32 %v12274_v40, %v6667_v8  ;;  %v6668_v57 = vadd.f32 -0.28449672, %v6652_v31  ;;  %v6605_v42 = vadd.f32 -1.4531521, %v6589_v10  ;;  %v6562_v11 = vadd.f32 1.0, %v6546_v34  ;;  %v12330_v20 = vpop.eup %9156 }
0x15ee   :  { %v6606_v35 = vadd.f32 -1.4531521, %v6590_v4  ;;  %9166 = vrcp.f32 %v6561_v22  ;;  %v6591_v58 = vmul.f32 1.0614054, %v12330_v20  ;;  %v6752_v48 = vmul.f32 %v6736_v27, %v12288_v60 }
0x15ef   :  { %v6699_v53 = vadd.f32 0.2548296, %v6683_v46  ;;  %v6684_v39 = vmul.f32 %v12290_v26, %v6668_v57  ;;  %v6621_v0 = vmul.f32 %v12317_v63, %v6605_v42  ;;  %9168 = vrcp.f32 %v6562_v11 }
0x15f0   :  { %v12336_v17 = vpop.eup %9158  ;;  %v6622_v13 = vmul.f32 %v12320_v2, %v6606_v35  ;;  %v6737_v62 = vsub.f32 0.0, %v6529_v18  ;;  %9170 = vpow2.f32 %v6777_v49  ;;  %v6607_v8 = vadd.f32 -1.4531521, %v6591_v58 }
0x15f1   :  { %v6715_v54 = vmul.f32 %v12274_v40, %v6699_v53  ;;  %v6700_v32 = vadd.f32 0.2548296, %v6684_v39  ;;  %v9161_v55 = vpop.eup %9160  ;;  %v6637_v59 = vadd.f32 1.4214138, %v6621_v0  ;;  %v6592_v45 = vmul.f32 1.0614054, %v12336_v17 }
0x15f2   :  { %v6638_v15 = vadd.f32 1.4214138, %v6622_v13  ;;  %v6917_v23 = vpack.c.bf16 %v6905_v28, %v12282_v5  ;;  %v9163_v38 = vpop.eup %9162  ;;  %v6623_v10 = vmul.f32 %v12330_v20, %v6607_v8  ;;  %v6738_v60 = vsub.f32 0.0, %v12315_v6 }
0x15f3   :  { %v6795_v40 = vmul.f32 %v9161_v55, %v6715_v54  ;;  %v6716_v31 = vmul.f32 %v12290_v26, %v6700_v32  ;;  %v6653_v46 = vmul.f32 %v12317_v63, %v6637_v59  ;;  %v6608_v34 = vadd.f32 -1.4531521, %v6592_v45 }
0x15f4   :  { %v6654_v49 = vmul.f32 %v12320_v2, %v6638_v15  ;;  %v6781_v4 = vmul.f32 1.442695, %v6752_v48  ;;  %v6753_v27 = vmul.f32 %v6737_v62, %v6529_v18  ;;  %7101 = vmatmul.mubr.bf16.gmra.mrb[152].mxu0 %v6917_v23  ;;  %vm6827_vm13 = vcmp.ge.f32.partialorder %v12202_v14, 0.0 }
0x15f5   :  { %v6796_v57 = vmul.f32 %v9163_v38, %v6716_v31  ;;  %v6669_v26 = vadd.f32 -0.28449672, %v6653_v46  ;;  %v6639_v22 = vadd.f32 1.4214138, %v6623_v10  ;;  %v6624_v5 = vmul.f32 %v12336_v17, %v6608_v34 }
0x15f6   :  { %v6811_v28 = vsub.f32 1.0, %v6795_v40  ;;  %v12350_v53 = vmul.f32 0.5, %v12199_v9  ;;  %v6670_v42 = vadd.f32 -0.28449672, %v6654_v49  ;;  %9172 = vpow2.f32 %v6779_v21  ;;  %v9165_v11 = vpop.eup %9164 }
0x15f7   :  { %vm6828_vm14 = vcmp.ge.f32.partialorder %v12217_v1, 0.0  ;;  %v6685_v39 = vmul.f32 %v12317_v63, %v6669_v26  ;;  %v6655_v18 = vmul.f32 %v12330_v20, %v6639_v22  ;;  %v6640_v35 = vadd.f32 1.4214138, %v6624_v5 }
0x15f8   :  { %v6754_v54 = vmul.f32 %v6738_v60, %v12315_v6  ;;  %v12356_v0 = vpop.eup %9166  ;;  %v6812_v58 = vsub.f32 1.0, %v6796_v57  ;;  %v6686_v32 = vmul.f32 %v12320_v2, %v6670_v42  ;;  %9174 = vpow2.f32 %v6781_v4 }
0x15f9   :  { %v6783_v9 = vmul.f32 1.442695, %v6753_v27  ;;  %v12359_v13 = vpop.eup %9168  ;;  %v6701_v21 = vadd.f32 0.2548296, %v6685_v39  ;;  %v6671_v48 = vadd.f32 -0.28449672, %v6655_v18  ;;  %v6656_v62 = vmul.f32 %v12336_v17, %v6640_v35 }
0x15fa   :  { %v6593_v55 = vmul.f32 1.0614054, %v12356_v0  ;;  %v6843_v59 = vsub.f32 0.0, %v6811_v28  ;;  %v6877_v8 = vmul.f32 0.5, %v12238_v29  ;;  %v6702_v45 = vadd.f32 0.2548296, %v6686_v32  ;;  %v9171_v40 = vpop.eup %9170 }
0x15fb   :  { %v6594_v6 = vmul.f32 1.0614054, %v12359_v13  ;;  %v6717_v31 = vmul.f32 %v12317_v63, %v6701_v21  ;;  %v6687_v15 = vmul.f32 %v12330_v20, %v6671_v48  ;;  %v6672_v23 = vadd.f32 -0.28449672, %v6656_v62 }
0x15fc   :  { %v6785_v38 = vmul.f32 1.442695, %v6754_v54  ;;  %v6844_v46 = vsub.f32 0.0, %v6812_v58  ;;  %v6718_v10 = vmul.f32 %v12320_v2, %v6702_v45  ;;  %v6609_v34 = vadd.f32 -1.4531521, %v6593_v55 }
0x15fd   :  { %v6610_v60 = vadd.f32 -1.4531521, %v6594_v6  ;;  %v6797_v57 = vmul.f32 %v9165_v11, %v6717_v31  ;;  %v6703_v49 = vadd.f32 0.2548296, %v6687_v15  ;;  %v6688_v4 = vmul.f32 %v12336_v17, %v6672_v23 }
0x15fe   :  { %9176 = vpow2.f32 %v6783_v9  ;;  %v6859_v29 = vsel %vm6827_vm13, %v6811_v28, %v6843_v59  ;;  %v6798_v27 = vmul.f32 %v9171_v40, %v6718_v10  ;;  %v6625_v63 = vmul.f32 %v12356_v0, %v6609_v34 }
0x15ff   :  { %v6626_v26 = vmul.f32 %v12359_v13, %v6610_v60  ;;  %v6813_v22 = vsub.f32 1.0, %v6797_v57  ;;  %v6719_v5 = vmul.f32 %v12330_v20, %v6703_v49  ;;  %v6704_v42 = vadd.f32 0.2548296, %v6688_v4 }
0x1600   :  { %9178 = vpow2.f32 %v6785_v38  ;;  %v9173_v2 = vpop.eup %9172  ;;  %v6860_v11 = vsel %vm6828_vm14, %v6812_v58, %v6844_v46  ;;  %v6814_v39 = vsub.f32 1.0, %v6798_v27  ;;  %v6641_v18 = vadd.f32 1.4214138, %v6625_v63 }
0x1601   :  { %v6642_v35 = vadd.f32 1.4214138, %v6626_v26  ;;  %v6891_v54 = vadd.f32 1.0, %v6859_v29  ;;  %v6845_v14 = vsub.f32 0.0, %v6813_v22  ;;  %v6799_v28 = vmul.f32 %v9173_v2, %v6719_v5 }
0x1602   :  { %v6720_v32 = vmul.f32 %v12336_v17, %v6704_v42  ;;  %v9175_v9 = vpop.eup %9174  ;;  %vm6829_vm15 = vcmp.ge.f32.partialorder %v12251_v37, 0.0  ;;  %v6846_v21 = vsub.f32 0.0, %v6814_v39  ;;  %v6657_v20 = vmul.f32 %v12356_v0, %v6641_v18 }
0x1603   :  { %v6658_v48 = vmul.f32 %v12359_v13, %v6642_v35  ;;  %v6892_v62 = vadd.f32 1.0, %v6860_v11  ;;  %v6861_v55 = vsel %vm6829_vm15, %v6813_v22, %v6845_v14  ;;  %vm6830_vm4 = vcmp.ge.f32.partialorder %v12256_v16, 0.0 }
0x1604   :  { %v6800_v1 = vmul.f32 %v9175_v9, %v6720_v32  ;;  %v6893_v58 = vadd.f32 1.0, %v6861_v55  ;;  %v6862_v59 = vsel %vm6830_vm4, %v6814_v39, %v6846_v21  ;;  %v6673_v45 = vadd.f32 -0.28449672, %v6657_v20 }
0x1605   :  { %v6674_v6 = vadd.f32 -0.28449672, %v6658_v48  ;;  %v6907_v40 = vmul.f32 %v6891_v54, %v12268_v43  ;;  %v6878_v17 = vmul.f32 0.5, %v12244_v52  ;;  %v6894_v31 = vadd.f32 1.0, %v6862_v59 }
0x1606   :  { %v6815_v37 = vsub.f32 1.0, %v6799_v28  ;;  %v6909_v15 = vmul.f32 %v6893_v58, %v6877_v8  ;;  %v6816_v23 = vsub.f32 1.0, %v6800_v1  ;;  %v6689_v38 = vmul.f32 %v12356_v0, %v6673_v45 }
0x1607   :  { %v6690_v46 = vmul.f32 %v12359_v13, %v6674_v6  ;;  %v6908_v16 = vmul.f32 %v6892_v62, %v12350_v53  ;;  %v6910_v34 = vmul.f32 %v6894_v31, %v6878_v17  ;;  %vm6831_vm5 = vcmp.ge.f32.partialorder %v12259_v56, 0.0 }
0x1608   :  { %v9177_v10 = vpop.eup %9176  ;;  %v6705_v60 = vadd.f32 0.2548296, %v6689_v38  ;;  %v6919_v49 = vpack.c.bf16 %v6909_v15, %v6907_v40  ;;  %v6847_v43 = vsub.f32 0.0, %v6815_v37  ;;  %v6848_v27 = vsub.f32 0.0, %v6816_v23 }
0x1609   :  { %v6706_v57 = vadd.f32 0.2548296, %v6690_v46  ;;  %v6920_v29 = vpack.c.bf16 %v6910_v34, %v6908_v16  ;;  %vm6832_vm6 = vcmp.ge.f32.partialorder %v12280_v33, 0.0  ;;  %vm6833_vm7 = vcmp.ge.f32.partialorder %v12305_v3, 0.0 }
0x160a   :  { %v9179_v4 = vpop.eup %9178  ;;  %v6721_v52 = vmul.f32 %v12356_v0, %v6705_v60  ;;  %v6863_v53 = vsel %vm6831_vm5, %v6815_v37, %v6847_v43  ;;  %v6864_v22 = vsel %vm6832_vm6, %v6816_v23, %v6848_v27  ;;  %vm6834_vm1 = vcmp.ge.f32.partialorder %v12309_v7, 0.0 }
0x160b   :  { %v6722_v8 = vmul.f32 %v12359_v13, %v6706_v57  ;;  %7108 = vmatprep.mubr.bf16.mxu0 %v6920_v29  ;;  %v6895_v39 = vadd.f32 1.0, %v6863_v53  ;;  %v6896_v18 = vadd.f32 1.0, %v6864_v22  ;;  %v6879_v0 = vmul.f32 0.5, %v12247_v25  ;;  %v7654_v25 = vld [vmem:[%s12493_s14 + $0x1] ss:$0 sm:$0xff] }
0x160c   :  { %v6801_v63 = vmul.f32 %v9177_v10, %v6721_v52  ;;  %7109 = vmatmul.mubr.bf16.gmra.mrb[156].mxu0 %v6919_v49  ;;  %v6880_v13 = vmul.f32 0.5, %v12272_v61  ;;  %v6881_v33 = vmul.f32 0.5, %v12297_v47  ;;  %v6882_v14 = vmul.f32 0.5, %v12301_v30 }
0x160d   :  { %v6802_v26 = vmul.f32 %v9179_v4, %v6722_v8  ;;  %v6911_v32 = vmul.f32 %v6895_v39, %v6879_v0 }
0x160e   :  { %v6817_v5 = vsub.f32 1.0, %v6801_v63  ;;  %v6912_v9 = vmul.f32 %v6896_v18, %v6880_v13 }
0x160f   :  { %v6818_v42 = vsub.f32 1.0, %v6802_v26 }
0x1610   :  { %v6849_v2 = vsub.f32 0.0, %v6817_v5 }
0x1611   :  { %v6850_v11 = vsub.f32 0.0, %v6818_v42 }
0x1612   :  { %v6865_v35 = vsel %vm6833_vm7, %v6817_v5, %v6849_v2 }
0x1613   :  { %v6866_v56 = vsel %vm6834_vm1, %v6818_v42, %v6850_v11  ;;  %v6897_v54 = vadd.f32 1.0, %v6865_v35 }
0x1614   :  { %v6898_v28 = vadd.f32 1.0, %v6866_v56 }
0x1615   :  { %v6913_v21 = vmul.f32 %v6897_v54, %v6881_v33 }
0x1616   :  { %v6914_v20 = vmul.f32 %v6898_v28, %v6882_v14 }
0x1617   :  { %v6921_v3 = vpack.c.bf16 %v6913_v21, %v6911_v32 }
0x1618   :  { %v6922_v48 = vpack.c.bf16 %v6914_v20, %v6912_v9 }
0x161a   :  { %7116 = vmatprep.mubr.bf16.mxu0 %v6922_v48 }
0x161b   :  { %7117 = vmatmul.mubr.bf16.gmra.mrb[160].mxu0 %v6921_v3 }
0x16be   :  { %v8113_v7 = vpop.f32.mrb[148].mxu0 }
0x16bf   :  { %v8114_v61 = vpop.f32.mrb[149].mxu0 }
0x16c0   :  { %v8115_v62 = vadd.f32 %v8114_v61, %v8113_v7  ;;  %v8116_v47 = vpop.f32.mrb[150].mxu0 }
0x16c1   :  { %v8117_v55 = vpop.f32.mrb[151].mxu0 }
0x16c2   :  { %v7095_v1 = vadd.f32 %v8115_v62, %v7654_v25  ;;  %v8118_v30 = vadd.f32 %v8117_v55, %v8116_v47 }
0x16c4   :  { %v7098_v58 = vadd.f32 %v8118_v30, %v7654_v25  ;;  %v7125_v59 = vadd.f32 %v7095_v1, %v11870_v36 }
0x16c6   :  { %v7135_v45 = vsel %vm1514_vm0, %v7125_v59, 0.0  ;;  %v7126_v6 = vadd.f32 %v7098_v58, %v11876_v44 }
0x16c7   :  { %v8119_v40 = vpop.f32.mrb[152].mxu0  ;;  %7136 = vadd.xlane.f32.xlu0 %v7135_v45 }
0x16c8   :  { %v8120_v17 = vpop.f32.mrb[153].mxu0  ;;  %v7138_v31 = vsel %vm1514_vm0, %v7126_v6, 0.0 }
0x16c9   :  { %v8121_v37 = vadd.f32 %v8120_v17, %v8119_v40  ;;  %v8122_v15 = vpop.f32.mrb[154].mxu0  ;;  %7139 = vadd.xlane.f32.xlu1 %v7138_v31 }
0x16ca   :  { %v8123_v23 = vpop.f32.mrb[155].mxu0 }
0x16cb   :  { %v7103_v38 = vadd.f32 %v8121_v37, %v7654_v25  ;;  %v8124_v46 = vadd.f32 %v8123_v23, %v8122_v15 }
0x16cd   :  { %v7106_v10 = vadd.f32 %v8124_v46, %v7654_v25  ;;  %v7127_v16 = vadd.f32 %v7103_v38, %v11873_v24 }
0x16cf   :  { %v7141_v36 = vsel %vm1514_vm0, %v7127_v16, 0.0  ;;  %v7128_v34 = vadd.f32 %v7106_v10, %v11883_v51 }
0x16d0   :  { %7142 = vadd.xlane.f32.xlu0 %v7141_v36 }
0x16d1   :  { %v7144_v44 = vsel %vm1514_vm0, %v7128_v34, 0.0 }
0x16d2   :  { %7145 = vadd.xlane.f32.xlu1 %v7144_v44 }
0x16df   :  { %v8125_v60 = vpop.f32.mrb[156].mxu0 }
0x16e0   :  { %v8126_v57 = vpop.f32.mrb[157].mxu0 }
0x16e1   :  { %v8127_v49 = vadd.f32 %v8126_v57, %v8125_v60  ;;  %v8128_v4 = vpop.f32.mrb[158].mxu0 }
0x16e2   :  { %v8129_v29 = vpop.f32.mrb[159].mxu0 }
0x16e3   :  { %v7111_v43 = vadd.f32 %v8127_v49, %v7654_v25  ;;  %v8130_v27 = vadd.f32 %v8129_v29, %v8128_v4 }
0x16e5   :  { %v7114_v52 = vadd.f32 %v8130_v27, %v7654_v25  ;;  %v7129_v8 = vadd.f32 %v7111_v43, %v11890_v19 }
0x16e7   :  { %v7147_v24 = vsel %vm1514_vm0, %v7129_v8, 0.0  ;;  %v7130_v63 = vadd.f32 %v7114_v52, %v11896_v41 }
0x16e8   :  { %7148 = vadd.xlane.f32.xlu0 %v7147_v24 }
0x16e9   :  { %v7150_v51 = vsel %vm1514_vm0, %v7130_v63, 0.0 }
0x16ea   :  { %7151 = vadd.xlane.f32.xlu1 %v7150_v51 }
0x16ee   :  { %v8131_v26 = vpop.f32.mrb[160].mxu0 }
0x16ef   :  { %v8132_v53 = vpop.f32.mrb[161].mxu0 }
0x16f0   :  { %v8133_v22 = vadd.f32 %v8132_v53, %v8131_v26  ;;  %v8134_v5 = vpop.f32.mrb[162].mxu0  ;;  %v7671_v53 = vld [vmem:[%s12494_s15] ss:$0 sm:$0xff]  ;;  %s9228_s15 = smov [#allocation2]  }
0x16f1   :  { %v8135_v42 = vpop.f32.mrb[163].mxu0 }
0x16f2   :  { %v7119_v2 = vadd.f32 %v8133_v22, %v7654_v25  ;;  %v8136_v11 = vadd.f32 %v8135_v42, %v8134_v5  ;;  %v7672_v42 = vld [vmem:[%s12495_s16] ss:$0 sm:$0xff]  ;;  %s7280_s16 = sshll.u32 %s9228_s15, 4  ;;  %s7281_s16 = int_to_ptr.vmem [resolvable:$true] %s7280_s16 }
0x16f3   :  { %s9196_s28 = scalar_lea.vmem %s7281_s16, 1024  ;;  %p9201_p1 = scmp.lt.s32.totalorder %s7281_s16, %s7281_s16 }
0x16f4   :  { %v7122_v39 = vadd.f32 %v8136_v11, %v7654_v25  ;;  %v7131_v18 = vadd.f32 %v7119_v2, %v11893_v12  ;;  %p9197_p0 = scmp.ne.s32.totalorder %s7281_s16, %s9196_s28  ;;  %p9202_p2 = scmp.lt.s32.totalorder %s9196_s28, %s9196_s28 }
0x16f6   :  { %v7153_v19 = vsel %vm1514_vm0, %v7131_v18, 0.0  ;;  %v7132_v0 = vadd.f32 %v7122_v39, %v11901_v50  ;;  %p9203_p3 = por %p9202_p2, %p9201_p1 }
0x16f7   :  { %7154 = vadd.xlane.f32.xlu0 %v7153_v19 }
0x16f8   :  { %v7156_v41 = vsel %vm1514_vm0, %v7132_v0, 0.0  ;;  %p9204_p4 = pnand %p9203_p3, %p9197_p0 }
0x16f9   :  { %7157 = vadd.xlane.f32.xlu1 %v7156_v41 }
0x1754   :  { %v7137_v13 = vpop.xlane.xlu0 %7136 }
0x1755   :  { %v7159_v35 = vmul.f32 0.015625, %v7137_v13 }
0x1756   :  { %v7140_v56 = vpop.xlane.xlu1 %7139 }
0x1757   :  { %v7167_v33 = vsub.f32 %v7125_v59, %v7159_v35  ;;  %v7160_v54 = vmul.f32 0.015625, %v7140_v56 }
0x1759   :  { %v12415_v14 = vsub.f32 %v7126_v6, %v7160_v54  ;;  %v7175_v28 = vmul.f32 %v7167_v33, %v7167_v33 }
0x175b   :  { %v7183_v32 = vsel %vm1514_vm0, %v7175_v28, 0.0  ;;  %v7176_v12 = vmul.f32 %v12415_v14, %v12415_v14 }
0x175c   :  { %7184 = vadd.xlane.f32.xlu0 %v7183_v32 }
0x175d   :  { %v7143_v9 = vpop.xlane.xlu0 %7142  ;;  %v7186_v50 = vsel %vm1514_vm0, %v7176_v12, 0.0 }
0x175e   :  { %v7161_v21 = vmul.f32 0.015625, %v7143_v9  ;;  %7187 = vadd.xlane.f32.xlu1 %v7186_v50 }
0x175f   :  { %v7146_v20 = vpop.xlane.xlu1 %7145 }
0x1760   :  { %v7169_v48 = vsub.f32 %v7127_v16, %v7161_v21  ;;  %v7162_v3 = vmul.f32 0.015625, %v7146_v20 }
0x1762   :  { %v12421_v7 = vsub.f32 %v7128_v34, %v7162_v3  ;;  %v7177_v25 = vmul.f32 %v7169_v48, %v7169_v48 }
0x1764   :  { %v7189_v61 = vsel %vm1514_vm0, %v7177_v25, 0.0  ;;  %v7178_v62 = vmul.f32 %v12421_v7, %v12421_v7 }
0x1765   :  { %7190 = vadd.xlane.f32.xlu0 %v7189_v61 }
0x1766   :  { %v7192_v47 = vsel %vm1514_vm0, %v7178_v62, 0.0 }
0x1767   :  { %7193 = vadd.xlane.f32.xlu1 %v7192_v47 }
0x1775   :  { %v7149_v55 = vpop.xlane.xlu0 %7148 }
0x1776   :  { %v7163_v1 = vmul.f32 0.015625, %v7149_v55 }
0x1777   :  { %v7152_v30 = vpop.xlane.xlu1 %7151 }
0x1778   :  { %v12427_v58 = vsub.f32 %v7129_v8, %v7163_v1  ;;  %v7164_v59 = vmul.f32 0.015625, %v7152_v30 }
0x177a   :  { %v12429_v45 = vsub.f32 %v7130_v63, %v7164_v59  ;;  %v7179_v6 = vmul.f32 %v12427_v58, %v12427_v58 }
0x177c   :  { %v7195_v40 = vsel %vm1514_vm0, %v7179_v6, 0.0  ;;  %v7180_v17 = vmul.f32 %v12429_v45, %v12429_v45 }
0x177d   :  { %7196 = vadd.xlane.f32.xlu0 %v7195_v40 }
0x177e   :  { %v7198_v31 = vsel %vm1514_vm0, %v7180_v17, 0.0 }
0x177f   :  { %7199 = vadd.xlane.f32.xlu1 %v7198_v31 }
0x1784   :  { %v7155_v37 = vpop.xlane.xlu0 %7154 }
0x1785   :  { %v7165_v15 = vmul.f32 0.015625, %v7155_v37 }
0x1786   :  { %v7158_v23 = vpop.xlane.xlu1 %7157 }
0x1787   :  { %v12437_v38 = vsub.f32 %v7131_v18, %v7165_v15  ;;  %v7166_v46 = vmul.f32 0.015625, %v7158_v23 }
0x1789   :  { %v12439_v10 = vsub.f32 %v7132_v0, %v7166_v46  ;;  %v7181_v16 = vmul.f32 %v12437_v38, %v12437_v38 }
0x178b   :  { %v7201_v36 = vsel %vm1514_vm0, %v7181_v16, 0.0  ;;  %v7182_v34 = vmul.f32 %v12439_v10, %v12439_v10 }
0x178c   :  { %7202 = vadd.xlane.f32.xlu0 %v7201_v36 }
0x178d   :  { %v7204_v44 = vsel %vm1514_vm0, %v7182_v34, 0.0 }
0x178e   :  { %7205 = vadd.xlane.f32.xlu1 %v7204_v44 }
0x17e9   :  { %v7185_v60 = vpop.xlane.xlu0 %7184 }
0x17ea   :  { %v7207_v57 = vmul.f32 0.015625, %v7185_v60 }
0x17eb   :  { %v7188_v49 = vpop.xlane.xlu1 %7187 }
0x17ec   :  { %v7215_v4 = vadd.f32 1e-06, %v7207_v57  ;;  %v7208_v29 = vmul.f32 0.015625, %v7188_v49 }
0x17ee   :  { %9180 = vrsqrt.f32 %v7215_v4  ;;  %v7216_v43 = vadd.f32 1e-06, %v7208_v29 }
0x17f0   :  { %9182 = vrsqrt.f32 %v7216_v43 }
0x17f2   :  { %v7191_v27 = vpop.xlane.xlu0 %7190 }
0x17f3   :  { %v7209_v52 = vmul.f32 0.015625, %v7191_v27 }
0x17f4   :  { %v7194_v8 = vpop.xlane.xlu1 %7193 }
0x17f5   :  { %v7217_v24 = vadd.f32 1e-06, %v7209_v52  ;;  %v7210_v63 = vmul.f32 0.015625, %v7194_v8 }
0x17f7   :  { %9184 = vrsqrt.f32 %v7217_v24  ;;  %v7218_v51 = vadd.f32 1e-06, %v7210_v63 }
0x17f8   :  { %v9181_v26 = vpop.eup %9180 }
0x17f9   :  { %v7231_v22 = vmul.f32 %v9181_v26, %v7167_v33  ;;  %9186 = vrsqrt.f32 %v7218_v51 }
0x17fa   :  { %v9183_v5 = vpop.eup %9182 }
0x17fb   :  { %v7245_v2 = vmul.f32 %v7671_v53, %v7231_v22  ;;  %v7232_v11 = vmul.f32 %v9183_v5, %v12415_v14 }
0x17fd   :  { %v7259_v39 = vadd.f32 %v7672_v42, %v7245_v2  ;;  %v7246_v18 = vmul.f32 %v7671_v53, %v7232_v11 }
0x17ff   :  { %7267 = vst.msk [vmem:[#allocation2] sm:$0xff] %vm1514_vm0, %v7259_v39  ;;  %v7260_v19 = vadd.f32 %v7672_v42, %v7246_v18 }
0x1801   :  { %v9185_v0 = vpop.eup %9184  ;;  %7268 = vst.msk [vmem:[#allocation2 + $0x8] sm:$0xff] %vm1514_vm0, %v7260_v19 }
0x1802   :  { %v7233_v41 = vmul.f32 %v9185_v0, %v7169_v48 }
0x1803   :  { %v9187_v13 = vpop.eup %9186 }
0x1804   :  { %v7247_v35 = vmul.f32 %v7671_v53, %v7233_v41  ;;  %v7234_v56 = vmul.f32 %v9187_v13, %v12421_v7 }
0x1806   :  { %v7261_v33 = vadd.f32 %v7672_v42, %v7247_v35  ;;  %v7248_v54 = vmul.f32 %v7671_v53, %v7234_v56 }
0x1808   :  { %7269 = vst.msk [vmem:[#allocation2 + $0x10] sm:$0xff] %vm1514_vm0, %v7261_v33  ;;  %v7262_v28 = vadd.f32 %v7672_v42, %v7248_v54 }
0x180a   :  { %7270 = vst.msk [vmem:[#allocation2 + $0x18] sm:$0xff] %vm1514_vm0, %v7262_v28  ;;  %v7197_v14 = vpop.xlane.xlu0 %7196 }
0x180b   :  { %v7211_v32 = vmul.f32 0.015625, %v7197_v14 }
0x180c   :  { %v7200_v12 = vpop.xlane.xlu1 %7199 }
0x180d   :  { %v7219_v9 = vadd.f32 1e-06, %v7211_v32  ;;  %v7212_v50 = vmul.f32 0.015625, %v7200_v12 }
0x180f   :  { %9188 = vrsqrt.f32 %v7219_v9  ;;  %v7220_v21 = vadd.f32 1e-06, %v7212_v50 }
0x1811   :  { %9190 = vrsqrt.f32 %v7220_v21 }
0x1819   :  { %v7203_v20 = vpop.xlane.xlu0 %7202  ;;  %v9189_v48 = vpop.eup %9188 }
0x181a   :  { %v7213_v3 = vmul.f32 0.015625, %v7203_v20  ;;  %v7235_v7 = vmul.f32 %v9189_v48, %v12427_v58 }
0x181b   :  { %v7206_v25 = vpop.xlane.xlu1 %7205  ;;  %v9191_v61 = vpop.eup %9190 }
0x181c   :  { %v7221_v62 = vadd.f32 1e-06, %v7213_v3  ;;  %v7214_v47 = vmul.f32 0.015625, %v7206_v25  ;;  %v7249_v55 = vmul.f32 %v7671_v53, %v7235_v7  ;;  %v7236_v1 = vmul.f32 %v9191_v61, %v12429_v45 }
0x181e   :  { %9192 = vrsqrt.f32 %v7221_v62  ;;  %v7222_v30 = vadd.f32 1e-06, %v7214_v47  ;;  %v7263_v59 = vadd.f32 %v7672_v42, %v7249_v55  ;;  %v7250_v6 = vmul.f32 %v7671_v53, %v7236_v1 }
0x1820   :  { %9194 = vrsqrt.f32 %v7222_v30  ;;  %7271 = vst.msk [vmem:[#allocation2 + $0x20] sm:$0xff] %vm1514_vm0, %v7263_v59  ;;  %v7264_v40 = vadd.f32 %v7672_v42, %v7250_v6 }
0x1822   :  { %7272 = vst.msk [vmem:[#allocation2 + $0x28] sm:$0xff] %vm1514_vm0, %v7264_v40 }
0x1828   :  { %v9193_v17 = vpop.eup %9192 }
0x1829   :  { %v7237_v58 = vmul.f32 %v9193_v17, %v12437_v38 }
0x182a   :  { %v9195_v31 = vpop.eup %9194 }
0x182b   :  { %v7251_v37 = vmul.f32 %v7671_v53, %v7237_v58  ;;  %v7238_v15 = vmul.f32 %v9195_v31, %v12439_v10 }
0x182d   :  { %v7265_v45 = vadd.f32 %v7672_v42, %v7251_v37  ;;  %v7252_v23 = vmul.f32 %v7671_v53, %v7238_v15 }
0x182f   :  { %7273 = vst.msk [vmem:[#allocation2 + $0x30] sm:$0xff] %vm1514_vm0, %v7265_v45  ;;  %v7266_v46 = vadd.f32 %v7672_v42, %v7252_v23 }
0x1831   :  { %7274 = vst.msk [vmem:[#allocation2 + $0x38] sm:$0xff] %vm1514_vm0, %v7266_v46 }
0x1832   :  { %9207 = shalt.err (!%p9204_p4)
}
0x1833   :  { %s9208_s4 = scalar_lea.hbm %s12496_s17, 1024 }
0x1834   :  { %p9209_p5 = scmp.ne.s32.totalorder %s12496_s17, %s9208_s4  ;;  %p9212_p6 = scmp.lt.u32.totalorder %s9208_s4, %s12496_s17 }
0x1836   :  { %p9214_p7 = pnand %p9212_p6, %p9209_p5 }
0x1838   :  { %9217 = shalt.err (!%p9214_p7)
}
0x1839   :  { %s9229_s20 = smov 128   ;;  %s9230_s11 = smov 8  }
0x183a   :  { %7286 = dma.vmem_to_hbm [thread:$0]  %s7281_s16, 1024, %s12496_s17, [#allocation3], %s9229_s20, %s9229_s20, %s9230_s11  }
0x183b   :  { %9218 = dma.done.wait [#allocation3], 1024  }
0x183c   :  { %9219 = vsyncadd [#allocation3], 4294966272 }
0x183d   :  { %7290 = vsyncpa [#allocation3], 1 }

</bundles_post_ra>
